<compile_context>
chip_gen: v5e
topology: v5e:2x2
jax: 0.10.0
libtpu: 0.0.40
codegen_flags: <defaults>
</compile_context>

<pallas_src>
import functools

import jax
import jax.numpy as jnp
import numpy as np
from jax.experimental import pallas as pl
from jax.experimental.pallas import tpu as pltpu

LEAKY_SLOPE = 0.2
BN_EPS = 1e-5
WEIGHT_RESIDENT_MAX = 4 * 1024 * 1024   # bytes of bf16 weights kept resident


# ---------------------------------------------------------------------------
# Device-dependent configuration
# ---------------------------------------------------------------------------
@functools.lru_cache(maxsize=None)
def _device_cfg():
    """(vmem_capacity_bytes, tm_cap, tk_cap) — conservative fallback if the
    hardware query is unavailable (assume a 64 MiB-per-core chip, i.e. v7x)."""
    try:
        cap = int(pltpu.get_tpu_info().vmem_capacity_bytes)
    except Exception:
        cap = 64 * 1024 * 1024
    if cap <= 80 * 1024 * 1024:          # v7x-class: 64 MiB per TensorCore
        tm_cap, tk_cap = 512, 1024
    else:                                # v5e / v6e: 128 MiB
        tm_cap, tk_cap = 1024, 2048
    return cap, tm_cap, tk_cap


def _vmem_limit(est_bytes, vmem_cap):
    """Explicit scoped-VMEM limit computed from the chosen tiles (+ slack)."""
    limit = max(int(est_bytes) + (4 << 20), 32 << 20)
    return min(limit, int(vmem_cap * 0.9), 96 << 20)


def _round_up(x, m):
    return ((x + m - 1) // m) * m


def _choose_tile(dim, cap, align):
    """Largest divisor of `dim` that is <= cap and a multiple of `align`.
    DCGAN shapes (powers of two) always hit the aligned-divisor path; the
    full-dim fallback can only trigger for pathological dims, and the explicit
    vmem_limit below then makes compilation fail loudly instead of silently."""
    if dim <= cap:
        return dim
    t = (cap // align) * align
    while t >= align:
        if dim % t == 0:
            return t
        t -= align
    return dim


# ---------------------------------------------------------------------------
# Kernel A: conv (+bias) + activation   (conv1, and conv5 if not fused)
# ---------------------------------------------------------------------------
def _conv_act_kernel(p_ref, w_ref, b_ref, o_ref, acc_ref, *, act, tk,
                     w_resident):
    ki = pl.program_id(1)

    @pl.when(ki == 0)
    def _():
        acc_ref[...] = jnp.zeros_like(acc_ref)

    if w_resident:
        w = w_ref[pl.ds(pl.multiple_of(ki * tk, tk), tk), :]
    else:
        w = w_ref[...]
    acc_ref[...] += jnp.dot(p_ref[...], w, preferred_element_type=jnp.float32)

    @pl.when(ki == pl.num_programs(1) - 1)
    def _():
        y = acc_ref[...] + b_ref[...]
        if act == "leaky":
            y = jnp.where(y > 0, y, LEAKY_SLOPE * y)
        elif act == "sigmoid":
            y = pl.reciprocal(1.0 + jnp.exp(-y), approx=True)   # EUP slot
        o_ref[...] = y.astype(o_ref.dtype)


def conv_act(p, w2d, brow, act, out_dtype, cfg):
    vmem_cap, tm_cap, tk_cap = cfg
    M, K = p.shape
    _, Cp = w2d.shape
    tm = _choose_tile(M, tm_cap, 16)      # 16-row align: bf16 sublane packing
    tk = _choose_tile(K, tk_cap, 128)
    n_m, n_k = M // tm, K // tk

    w_resident = (K * Cp * 2) <= WEIGHT_RESIDENT_MAX
    if w_resident:
        w_spec = pl.BlockSpec((K, Cp), lambda mi, ki: (0, 0))
        w_blk = K * Cp * 2
    else:
        w_spec = pl.BlockSpec((tk, Cp), lambda mi, ki: (ki, 0))
        w_blk = tk * Cp * 2

    out_b = jnp.dtype(out_dtype).itemsize
    est = (2 * tm * tk * 2 + 2 * w_blk + 2 * Cp * 4
           + 2 * tm * Cp * out_b + tm * Cp * 4)

    kern = functools.partial(_conv_act_kernel, act=act, tk=tk,
                             w_resident=w_resident)
    return pl.pallas_call(
        kern,
        out_shape=jax.ShapeDtypeStruct((M, Cp), out_dtype),
        grid=(n_m, n_k),
        in_specs=[pl.BlockSpec((tm, tk), lambda mi, ki: (mi, ki)),
                  w_spec,
                  pl.BlockSpec((1, Cp), lambda mi, ki: (0, 0))],
        out_specs=pl.BlockSpec((tm, Cp), lambda mi, ki: (mi, 0)),
        scratch_shapes=[pltpu.VMEM((tm, Cp), jnp.float32)],
        compiler_params=pltpu.CompilerParams(
            dimension_semantics=("parallel", "arbitrary"),
            vmem_limit_bytes=_vmem_limit(est, vmem_cap)),
    )(p, w2d, brow)


# ---------------------------------------------------------------------------
# Kernel B: conv (+bias) + training-mode BatchNorm + leaky-ReLU
#           (optionally fused with the tiny conv5 + sigmoid tail)
# ---------------------------------------------------------------------------
def _conv_bn_act_kernel(*refs, tm, tk, m_total, n_k, w_resident, fuse_tail):
    if fuse_tail:
        (p_ref, w_ref, b_ref, g_ref, be_ref, w5_ref, b5_ref,
         o_ref, o5_ref,
         acc_ref, pre_ref, sum_ref, sq_ref, sc_ref, sh_ref) = refs
    else:
        (p_ref, w_ref, b_ref, g_ref, be_ref,
         o_ref,
         acc_ref, pre_ref, sum_ref, sq_ref, sc_ref, sh_ref) = refs
        w5_ref = b5_ref = o5_ref = None

    ph = pl.program_id(0)
    mi = pl.program_id(1)
    ki = pl.program_id(2)

    # ---------------- phase 0: matmul + bias + stats ----------------
    is_mm = ph == 0

    @pl.when(is_mm & (mi == 0) & (ki == 0))
    def _():
        sum_ref[...] = jnp.zeros_like(sum_ref)
        sq_ref[...] = jnp.zeros_like(sq_ref)

    @pl.when(is_mm & (ki == 0))
    def _():
        acc_ref[...] = jnp.zeros_like(acc_ref)

    @pl.when(is_mm)
    def _():
        if w_resident:
            w = w_ref[pl.ds(pl.multiple_of(ki * tk, tk), tk), :]
        else:
            w = w_ref[...]
        acc_ref[...] += jnp.dot(p_ref[...], w,
                                preferred_element_type=jnp.float32)

    @pl.when(is_mm & (ki == n_k - 1))
    def _():
        y = acc_ref[...] + b_ref[...]
        row = pl.multiple_of(mi * tm, tm)
        pre_ref[pl.ds(row, tm), :] = y.astype(pre_ref.dtype)
        sum_ref[...] += jnp.sum(y, axis=0, keepdims=True)
        sq_ref[...] += jnp.sum(y * y, axis=0, keepdims=True)

    # ---------------- phase 1: pipelined normalize ----------------
    is_norm = ph == 1

    @pl.when(is_norm & (mi == 0) & (ki == 0))
    def _():
        inv_m = 1.0 / float(m_total)
        mean = sum_ref[...] * inv_m
        # E[x^2] - E[x]^2 in f32; fine at these sizes/magnitudes.
        var = jnp.maximum(sq_ref[...] * inv_m - mean * mean, 0.0)
        scale = g_ref[...] * jax.lax.rsqrt(var + BN_EPS)
        sc_ref[...] = scale
        sh_ref[...] = be_ref[...] - mean * scale

    @pl.when(is_norm & (ki == 0))
    def _():
        row = pl.multiple_of(mi * tm, tm)
        y = (pre_ref[pl.ds(row, tm), :].astype(jnp.float32) * sc_ref[...]
             + sh_ref[...])
        y = jnp.where(y > 0, y, LEAKY_SLOPE * y)
        o_ref[...] = y.astype(o_ref.dtype)
        if fuse_tail:
            # conv5: 4x4/stride1/pad0 over a 4x4 map == per-image weighted
            # reduce of 16 rows x Cp channels, then bias + sigmoid.
            n_img = tm // 16
            w5 = w5_ref[...]                                     # (16, Cp) f32
            prod = y.reshape(n_img, 16, y.shape[-1]) * w5[None, :, :]
            s = jnp.sum(prod, axis=2)                            # (n_img, 16)
            s = jnp.sum(s, axis=1, keepdims=True)                # (n_img, 1)
            z = s + b5_ref[...]
            o5_ref[...] = pl.reciprocal(1.0 + jnp.exp(-z),
                                        approx=True).astype(o5_ref.dtype)


def conv_bn_act(p, w2d, brow, grow, berow, out_dtype, cfg, tail=None):
    vmem_cap, tm_cap, tk_cap = cfg
    M, K = p.shape
    _, Cp = w2d.shape
    tm = _choose_tile(M, tm_cap, 16)
    tk = _choose_tile(K, tk_cap, 128)
    n_m, n_k = M // tm, K // tk
    last_m, last_k = n_m - 1, n_k - 1

    # conv5 fusion preconditions (also require a lane-legal o5 block).
    fuse_tail = (tail is not None and M % 16 == 0 and tm % 16 == 0
                 and (tm == M or (tm // 16) % 8 == 0))

    # Phase 1 pins inputs to the last visited block -> no redundant DMA.
    p_spec = pl.BlockSpec(
        (tm, tk),
        lambda ph, mi, ki: ((1 - ph) * mi + ph * last_m,
                            (1 - ph) * ki + ph * last_k))
    w_resident = (K * Cp * 2) <= WEIGHT_RESIDENT_MAX
    if w_resident:
        w_spec = pl.BlockSpec((K, Cp), lambda ph, mi, ki: (0, 0))
        w_blk = K * Cp * 2
    else:
        w_spec = pl.BlockSpec(
            (tk, Cp), lambda ph, mi, ki: ((1 - ph) * ki + ph * last_k, 0))
        w_blk = tk * Cp * 2
    vec_spec = pl.BlockSpec((1, Cp), lambda ph, mi, ki: (0, 0))

    in_specs = [p_spec, w_spec, vec_spec, vec_spec, vec_spec]
    inputs = [p, w2d, brow, grow, berow]

    out_b = jnp.dtype(out_dtype).itemsize
    out_shapes = [jax.ShapeDtypeStruct((M, Cp), out_dtype)]
    # Output blocks only start moving in phase 1 -> writeback overlaps compute.
    out_specs = [pl.BlockSpec((tm, Cp), lambda ph, mi, ki: (ph * mi, 0))]

    if fuse_tail:
        w5row, b5s = tail
        in_specs += [pl.BlockSpec((16, Cp), lambda ph, mi, ki: (0, 0)),
                     pl.BlockSpec((1, 1), lambda ph, mi, ki: (0, 0))]
        inputs += [w5row, b5s]
        n_img = M // 16
        out_shapes.append(jax.ShapeDtypeStruct((n_img, 1), jnp.float32))
        out_specs.append(
            pl.BlockSpec((tm // 16, 1), lambda ph, mi, ki: (ph * mi, 0)))

    scratch = [pltpu.VMEM((tm, Cp), jnp.float32),     # matmul accumulator
               pltpu.VMEM((M, Cp), jnp.bfloat16),     # resident pre-BN acts
               pltpu.VMEM((1, Cp), jnp.float32),      # per-channel sum
               pltpu.VMEM((1, Cp), jnp.float32),      # per-channel sum of sq
               pltpu.VMEM((1, Cp), jnp.float32),      # BN scale
               pltpu.VMEM((1, Cp), jnp.float32)]      # BN shift

    est = (2 * tm * tk * 2 + 2 * w_blk + 3 * 2 * Cp * 4
           + 2 * tm * Cp * out_b + M * Cp * 2 + tm * Cp * 4 + 4 * Cp * 4
           + (2 * 16 * Cp * 4 + 64 if fuse_tail else 0))

    kern = functools.partial(_conv_bn_act_kernel, tm=tm, tk=tk, m_total=M,
                             n_k=n_k, w_resident=w_resident,
                             fuse_tail=fuse_tail)
    outs = pl.pallas_call(
        kern,
        out_shape=tuple(out_shapes),
        grid=(2, n_m, n_k),
        in_specs=in_specs,
        out_specs=tuple(out_specs),
        scratch_shapes=scratch,
        # Resident output / accumulated stats => strictly sequential grid.
        compiler_params=pltpu.CompilerParams(
            dimension_semantics=("arbitrary", "arbitrary", "arbitrary"),
            vmem_limit_bytes=_vmem_limit(est, vmem_cap)),
    )(*inputs)
    y = outs[0]
    y5 = outs[1] if fuse_tail else None
    return y, y5


# ---------------------------------------------------------------------------
# Glue: im2col + layer composition (plain JAX reshapes / slicing)
# ---------------------------------------------------------------------------
def im2col(x, kh, kw, stride, pad):
    """x: NHWC -> (N*OH*OW, kh*kw*Cin) patch matrix, column order ((i*kw+j)*Cin+c)."""
    N, H, W, C = x.shape
    xp = jnp.pad(x, ((0, 0), (pad, pad), (pad, pad), (0, 0)))
    OH = (H + 2 * pad - kh) // stride + 1
    OW = (W + 2 * pad - kw) // stride + 1
    pieces = []
    for i in range(kh):
        for j in range(kw):
            pieces.append(xp[:, i:i + stride * OH:stride,
                             j:j + stride * OW:stride, :])
    p = jnp.concatenate(pieces, axis=-1)          # (N, OH, OW, kh*kw*C)
    return p.reshape(N * OH * OW, kh * kw * C), OH, OW


def _pad_cols(a, cp):
    return jnp.pad(a, ((0, 0), (0, cp - a.shape[1])))


def conv_block(x, w_hwio, b, bn, act, cfg, stride=2, pad=1, out_f32=False,
               tail=None):
    N, H, W, Cin = x.shape
    kh, kw, _, Cout = w_hwio.shape
    # TODO(synk): build patches in-kernel (halo DMA from the padded NHWC input
    # in HBM) to avoid materializing the duplicated im2col matrix in HBM.
    p, oh, ow = im2col(x.astype(jnp.bfloat16), kh, kw, stride, pad)
    Cp = _round_up(Cout, 128)                               # lane-dense output
    w2d = _pad_cols(w_hwio.reshape(kh * kw * Cin, Cout),
                    Cp).astype(jnp.bfloat16)
    brow = _pad_cols(b.reshape(1, Cout).astype(jnp.float32), Cp)
    out_dtype = jnp.float32 if out_f32 else jnp.bfloat16

    y5 = None
    if bn is None:
        y = conv_act(p, w2d, brow, act, out_dtype, cfg)
    else:
        gamma, beta = bn
        grow = _pad_cols(gamma.reshape(1, Cout).astype(jnp.float32), Cp)
        berow = _pad_cols(beta.reshape(1, Cout).astype(jnp.float32), Cp)
        tail_padded = None
        if tail is not None:
            w5, b5 = tail
            if (oh, ow) == (4, 4) and tuple(w5.shape[:3]) == (4, 4, Cout):
                w5row = _pad_cols(w5.reshape(16, Cout).astype(jnp.float32), Cp)
                b5s = b5.reshape(1, 1).astype(jnp.float32)
                tail_padded = (w5row, b5s)
        y, y5 = conv_bn_act(p, w2d, brow, grow, berow, out_dtype, cfg,
                            tail=tail_padded)
    x_out = y[:, :Cout].reshape(N, oh, ow, Cout)
    return x_out, y5


def discriminator_forward(x_nchw, params):
    cfg = _device_cfg()
    x = jnp.transpose(x_nchw, (0, 2, 3, 1)).astype(jnp.float32)   # NCHW->NHWC
    x, _ = conv_block(x, params["w1"], params["b1"], None, "leaky", cfg)
    x, _ = conv_block(x, params["w2"], params["b2"],
                      (params["g2"], params["be2"]), "leaky", cfg)
    x, _ = conv_block(x, params["w3"], params["b3"],
                      (params["g3"], params["be3"]), "leaky", cfg)
    x, y5 = conv_block(x, params["w4"], params["b4"],
                       (params["g4"], params["be4"]), "leaky", cfg,
                       tail=(params["w5"], params["b5"]))
    if y5 is not None:                      # conv5 fused into conv4's finalize
        return y5.reshape(y5.shape[0], 1, 1, 1)
    # Fallback: standalone conv5 kernel (fusion preconditions not met).
    x, _ = conv_block(x, params["w5"], params["b5"], None, "sigmoid", cfg,
                      stride=1, pad=0, out_f32=True)
    return jnp.transpose(x, (0, 3, 1, 2))


# ---------------------------------------------------------------------------
# Pure-JAX reference (for correctness check)
# ---------------------------------------------------------------------------
def ref_forward(x_nchw, params):
    x = jnp.transpose(x_nchw, (0, 2, 3, 1)).astype(jnp.float32)

    def conv(x, w, b, stride, pad):
        y = jax.lax.conv_general_dilated(
            x, w, (stride, stride), [(pad, pad), (pad, pad)],
            dimension_numbers=("NHWC", "HWIO", "NHWC"),
            precision=jax.lax.Precision.HIGHEST)
        return y + b

    def bn(y, g, be):
        mean = jnp.mean(y, axis=(0, 1, 2), keepdims=True)
        var = jnp.mean((y - mean) ** 2, axis=(0, 1, 2), keepdims=True)
        return (y - mean) / jnp.sqrt(var + BN_EPS) * g + be

    lrelu = lambda y: jnp.where(y > 0, y, LEAKY_SLOPE * y)
    y = lrelu(conv(x, params["w1"], params["b1"], 2, 1))
    y = lrelu(bn(conv(y, params["w2"], params["b2"], 2, 1), params["g2"], params["be2"]))
    y = lrelu(bn(conv(y, params["w3"], params["b3"], 2, 1), params["g3"], params["be3"]))
    y = lrelu(bn(conv(y, params["w4"], params["b4"], 2, 1), params["g4"], params["be4"]))
    y = jax.nn.sigmoid(conv(y, params["w5"], params["b5"], 1, 0))
    return jnp.transpose(y, (0, 3, 1, 2))


# ---------------------------------------------------------------------------
# Deterministic parameter init (shapes from Discriminator.__init__, d scaled)
# ---------------------------------------------------------------------------
def init_params(key, d=16):
    ks = jax.random.split(key, 32)
    params = {}
    specs = [(1, d), (d, 2 * d), (2 * d, 4 * d), (4 * d, 8 * d), (8 * d, 1)]
    for n, (cin, cout) in enumerate(specs, start=1):
        params[f"w{n}"] = 0.05 * jax.random.normal(ks[2 * n], (4, 4, cin, cout), jnp.float32)
        params[f"b{n}"] = 0.01 * jax.random.normal(ks[2 * n + 1], (cout,), jnp.float32)
    for n, cout in [(2, 2 * d), (3, 4 * d), (4, 8 * d)]:
        params[f"g{n}"] = 1.0 + 0.1 * jax.random.normal(ks[12 + n], (cout,), jnp.float32)
        params[f"be{n}"] = 0.1 * jax.random.normal(ks[20 + n], (cout,), jnp.float32)
    return params


if __name__ == "__main__":
    key = jax.random.PRNGKey(0)
    pkey, xkey = jax.random.split(key)
    d = 16                       # scaled-down width (original d=128)
    params = init_params(pkey, d=d)
    # DCGAN discriminator expects 64x64 single-channel images (conv5 -> 1x1).
    x = jax.random.normal(xkey, (2, 1, 64, 64), jnp.float32)

    fwd = jax.jit(discriminator_forward)
    out = jax.block_until_ready(fwd(x, params))
    assert out.shape == (2, 1, 1, 1), out.shape

    ref = jax.block_until_ready(jax.jit(ref_forward)(x, params))
    # bf16 MXU inputs + bf16 intermediate activations => looser tolerance than
    # a pure-f32 pipeline (BN stats / accumulation remain f32).
    np.testing.assert_allclose(np.asarray(out), np.asarray(ref),
                               rtol=4e-2, atol=4e-2)

    print("KERNEL_OK")
</pallas_src>

<mosaic_0001>
module attributes {stable_mosaic.version = 11 : i64} {
  func.func @_conv_act_kernel(%arg0: i32, %arg1: i32, %arg2: memref<512x16xbf16, #tpu.memory_space<vmem>>, %arg3: memref<16x128xbf16, #tpu.memory_space<vmem>>, %arg4: memref<1x128xf32, #tpu.memory_space<vmem>>, %arg5: memref<512x128xbf16, #tpu.memory_space<vmem>>, %arg6: memref<512x128xf32, #tpu.memory_space<vmem>>) attributes {dimension_semantics = [#tpu.dimension_semantics<parallel>, #tpu.dimension_semantics<arbitrary>], iteration_bounds = array<i64: 4, 1>, scalar_prefetch = 0 : i64, scratch_operands = 1 : i64, tpu.core_type = #tpu.core_type<tc>, window_params = [{transform_indices = @transform_0, window_bounds = array<i64: 512, 16>}, {pipeline_mode = #tpu.pipeline_mode<synchronous>, transform_indices = @transform_1, window_bounds = array<i64: 16, 128>}, {pipeline_mode = #tpu.pipeline_mode<synchronous>, transform_indices = @transform_2, window_bounds = array<i64: 1, 128>}, {transform_indices = @transform_3, window_bounds = array<i64: 512, 128>}]} {
    %c0_i32 = arith.constant 0 : i32
    %0 = arith.cmpi eq, %arg1, %c0_i32 : i32
    %1 = arith.extui %0 : i1 to i32
    %c0_i32_0 = arith.constant 0 : i32
    %2 = arith.cmpi ne, %1, %c0_i32_0 : i32
    scf.if %2 {
      %cst_9 = arith.constant 0.000000e+00 : f32
      %15 = vector.broadcast %cst_9 : f32 to vector<512x128xf32>
      %c0_10 = arith.constant 0 : index
      %c0_11 = arith.constant 0 : index
      %16 = vector.load %arg6[%c0_10, %c0_11] : memref<512x128xf32, #tpu.memory_space<vmem>>, vector<512x128xf32>
      tpu.vector_store %arg6[%c0_10, %c0_11], %15 {strides = array<i32>} : memref<512x128xf32, #tpu.memory_space<vmem>>, vector<512x128xf32>,
    } else {
    }
    %c16_i32 = arith.constant 16 : i32
    %3 = arith.muli %arg1, %c16_i32 : i32
    %4 = tpu.assume_multiple %3, 16 : i32
    %5 = arith.index_cast %4 : i32 to index
    %c0 = arith.constant 0 : index
    %6 = vector.load %arg3[%5, %c0] : memref<16x128xbf16, #tpu.memory_space<vmem>>, vector<16x128xbf16>
    %c0_1 = arith.constant 0 : index
    %c0_2 = arith.constant 0 : index
    %7 = vector.load %arg6[%c0_1, %c0_2] : memref<512x128xf32, #tpu.memory_space<vmem>>, vector<512x128xf32>
    %c0_3 = arith.constant 0 : index
    %c0_4 = arith.constant 0 : index
    %8 = vector.load %arg2[%c0_3, %c0_4] : memref<512x16xbf16, #tpu.memory_space<vmem>>, vector<512x16xbf16>
    %cst = arith.constant dense<0.000000e+00> : vector<512x128xf32>
    %9 = tpu.matmul %8, %6, %cst {dimension_numbers = #tpu.dot_dimension_numbers<[1], [0], [0], [1], [0, 0, 1, 1], [], []>} : vector<512x16xbf16>, vector<16x128xbf16>, vector<512x128xf32> -> vector<512x128xf32>
    %10 = arith.addf %7, %9 : vector<512x128xf32>
    %c0_5 = arith.constant 0 : index
    %c0_6 = arith.constant 0 : index
    %11 = vector.load %arg6[%c0_5, %c0_6] : memref<512x128xf32, #tpu.memory_space<vmem>>, vector<512x128xf32>
    tpu.vector_store %arg6[%c0_5, %c0_6], %10 {strides = array<i32>} : memref<512x128xf32, #tpu.memory_space<vmem>>, vector<512x128xf32>,
    %c0_i32_7 = arith.constant 0 : i32
    %12 = arith.cmpi eq, %arg1, %c0_i32_7 : i32
    %13 = arith.extui %12 : i1 to i32
    %c0_i32_8 = arith.constant 0 : i32
    %14 = arith.cmpi ne, %13, %c0_i32_8 : i32
    scf.if %14 {
      %c0_9 = arith.constant 0 : index
      %c0_10 = arith.constant 0 : index
      %15 = vector.load %arg6[%c0_9, %c0_10] : memref<512x128xf32, #tpu.memory_space<vmem>>, vector<512x128xf32>
      %c0_11 = arith.constant 0 : index
      %c0_12 = arith.constant 0 : index
      %16 = vector.load %arg4[%c0_11, %c0_12] : memref<1x128xf32, #tpu.memory_space<vmem>>, vector<1x128xf32>
      %17 = vector.broadcast %16 : vector<1x128xf32> to vector<512x128xf32>
      %18 = arith.addf %15, %17 : vector<512x128xf32>
      %cst_13 = arith.constant 0.000000e+00 : f32
      %19 = vector.broadcast %cst_13 : f32 to vector<512x128xf32>
      %20 = arith.cmpf ogt, %18, %19 : vector<512x128xf32>
      %cst_14 = arith.constant 2.000000e-01 : f32
      %21 = vector.broadcast %cst_14 : f32 to vector<512x128xf32>
      %22 = arith.mulf %21, %18 : vector<512x128xf32>
      %23 = arith.select %20, %18, %22 : vector<512x128xi1>, vector<512x128xf32>
      %24 = arith.truncf %23 : vector<512x128xf32> to vector<512x128xbf16>
      %c0_15 = arith.constant 0 : index
      %c0_16 = arith.constant 0 : index
      %25 = vector.load %arg5[%c0_15, %c0_16] : memref<512x128xbf16, #tpu.memory_space<vmem>>, vector<512x128xbf16>
      tpu.vector_store %arg5[%c0_15, %c0_16], %24 {strides = array<i32>} : memref<512x128xbf16, #tpu.memory_space<vmem>>, vector<512x128xbf16>,
    } else {
    }
    return
  }
  func.func @transform_0(%arg0: i32, %arg1: i32) -> (i32, i32) {
    %c0_i32 = arith.constant 0 : i32
    return %arg0, %arg1 : i32, i32
  }
  func.func @transform_1(%arg0: i32, %arg1: i32) -> (i32, i32) {
    %c0_i32 = arith.constant 0 : i32
    %c0_i32_0 = arith.constant 0 : i32
    %c0_i32_1 = arith.constant 0 : i32
    return %c0_i32, %c0_i32_0 : i32, i32
  }
  func.func @transform_2(%arg0: i32, %arg1: i32) -> (i32, i32) {
    %c0_i32 = arith.constant 0 : i32
    %c0_i32_0 = arith.constant 0 : i32
    %c0_i32_1 = arith.constant 0 : i32
    return %c0_i32, %c0_i32_0 : i32, i32
  }
  func.func @transform_3(%arg0: i32, %arg1: i32) -> (i32, i32) {
    %c0_i32 = arith.constant 0 : i32
    %c0_i32_0 = arith.constant 0 : i32
    return %arg0, %c0_i32 : i32, i32
  }
}

module attributes {stable_mosaic.version = 11 : i64} {
  func.func @_conv_bn_act_kernel(%arg0: i32, %arg1: i32, %arg2: i32, %arg3: memref<512x256xbf16, #tpu.memory_space<vmem>>, %arg4: memref<256x128xbf16, #tpu.memory_space<vmem>>, %arg5: memref<1x128xf32, #tpu.memory_space<vmem>>, %arg6: memref<1x128xf32, #tpu.memory_space<vmem>>, %arg7: memref<1x128xf32, #tpu.memory_space<vmem>>, %arg8: memref<512x128xbf16, #tpu.memory_space<vmem>>, %arg9: memref<512x128xf32, #tpu.memory_space<vmem>>, %arg10: memref<512x128xbf16, #tpu.memory_space<vmem>>, %arg11: memref<1x128xf32, #tpu.memory_space<vmem>>, %arg12: memref<1x128xf32, #tpu.memory_space<vmem>>, %arg13: memref<1x128xf32, #tpu.memory_space<vmem>>, %arg14: memref<1x128xf32, #tpu.memory_space<vmem>>) attributes {dimension_semantics = [#tpu.dimension_semantics<arbitrary>, #tpu.dimension_semantics<arbitrary>, #tpu.dimension_semantics<arbitrary>], iteration_bounds = array<i64: 2, 1, 1>, scalar_prefetch = 0 : i64, scratch_operands = 6 : i64, tpu.core_type = #tpu.core_type<tc>, window_params = [{transform_indices = @transform_0, window_bounds = array<i64: 512, 256>}, {pipeline_mode = #tpu.pipeline_mode<synchronous>, transform_indices = @transform_1, window_bounds = array<i64: 256, 128>}, {pipeline_mode = #tpu.pipeline_mode<synchronous>, transform_indices = @transform_2, window_bounds = array<i64: 1, 128>}, {pipeline_mode = #tpu.pipeline_mode<synchronous>, transform_indices = @transform_3, window_bounds = array<i64: 1, 128>}, {pipeline_mode = #tpu.pipeline_mode<synchronous>, transform_indices = @transform_4, window_bounds = array<i64: 1, 128>}, {transform_indices = @transform_5, window_bounds = array<i64: 512, 128>}]} {
    %c0_i32 = arith.constant 0 : i32
    %0 = arith.cmpi eq, %arg0, %c0_i32 : i32
    %c0_i32_0 = arith.constant 0 : i32
    %1 = arith.cmpi eq, %arg1, %c0_i32_0 : i32
    %2 = arith.andi %0, %1 : i1
    %c0_i32_1 = arith.constant 0 : i32
    %3 = arith.cmpi eq, %arg2, %c0_i32_1 : i32
    %4 = arith.andi %2, %3 : i1
    %5 = arith.extui %4 : i1 to i32
    %c0_i32_2 = arith.constant 0 : i32
    %6 = arith.cmpi ne, %5, %c0_i32_2 : i32
    scf.if %6 {
      %cst = arith.constant 0.000000e+00 : f32
      %28 = vector.broadcast %cst : f32 to vector<1x128xf32>
      %c0 = arith.constant 0 : index
      %c0_13 = arith.constant 0 : index
      %29 = vector.load %arg11[%c0, %c0_13] : memref<1x128xf32, #tpu.memory_space<vmem>>, vector<1x128xf32>
      tpu.vector_store %arg11[%c0, %c0_13], %28 {strides = array<i32>} : memref<1x128xf32, #tpu.memory_space<vmem>>, vector<1x128xf32>,
      %cst_14 = arith.constant 0.000000e+00 : f32
      %30 = vector.broadcast %cst_14 : f32 to vector<1x128xf32>
      %c0_15 = arith.constant 0 : index
      %c0_16 = arith.constant 0 : index
      %31 = vector.load %arg12[%c0_15, %c0_16] : memref<1x128xf32, #tpu.memory_space<vmem>>, vector<1x128xf32>
      tpu.vector_store %arg12[%c0_15, %c0_16], %30 {strides = array<i32>} : memref<1x128xf32, #tpu.memory_space<vmem>>, vector<1x128xf32>,
    } else {
    }
    %c0_i32_3 = arith.constant 0 : i32
    %7 = arith.cmpi eq, %arg2, %c0_i32_3 : i32
    %8 = arith.andi %0, %7 : i1
    %9 = arith.extui %8 : i1 to i32
    %c0_i32_4 = arith.constant 0 : i32
    %10 = arith.cmpi ne, %9, %c0_i32_4 : i32
    scf.if %10 {
      %cst = arith.constant 0.000000e+00 : f32
      %28 = vector.broadcast %cst : f32 to vector<512x128xf32>
      %c0 = arith.constant 0 : index
      %c0_13 = arith.constant 0 : index
      %29 = vector.load %arg9[%c0, %c0_13] : memref<512x128xf32, #tpu.memory_space<vmem>>, vector<512x128xf32>
      tpu.vector_store %arg9[%c0, %c0_13], %28 {strides = array<i32>} : memref<512x128xf32, #tpu.memory_space<vmem>>, vector<512x128xf32>,
    } else {
    }
    %11 = arith.extui %0 : i1 to i32
    %c0_i32_5 = arith.constant 0 : i32
    %12 = arith.cmpi ne, %11, %c0_i32_5 : i32
    scf.if %12 {
      %c256_i32 = arith.constant 256 : i32
      %28 = arith.muli %arg2, %c256_i32 : i32
      %29 = tpu.assume_multiple %28, 256 : i32
      %30 = arith.index_cast %29 : i32 to index
      %c0 = arith.constant 0 : index
      %31 = vector.load %arg4[%30, %c0] : memref<256x128xbf16, #tpu.memory_space<vmem>>, vector<256x128xbf16>
      %c0_13 = arith.constant 0 : index
      %c0_14 = arith.constant 0 : index
      %32 = vector.load %arg9[%c0_13, %c0_14] : memref<512x128xf32, #tpu.memory_space<vmem>>, vector<512x128xf32>
      %c0_15 = arith.constant 0 : index
      %c0_16 = arith.constant 0 : index
      %33 = vector.load %arg3[%c0_15, %c0_16] : memref<512x256xbf16, #tpu.memory_space<vmem>>, vector<512x256xbf16>
      %cst = arith.constant dense<0.000000e+00> : vector<512x128xf32>
      %34 = tpu.matmul %33, %31, %cst {dimension_numbers = #tpu.dot_dimension_numbers<[1], [0], [0], [1], [0, 0, 1, 1], [], []>} : vector<512x256xbf16>, vector<256x128xbf16>, vector<512x128xf32> -> vector<512x128xf32>
      %35 = arith.addf %32, %34 : vector<512x128xf32>
      %c0_17 = arith.constant 0 : index
      %c0_18 = arith.constant 0 : index
      %36 = vector.load %arg9[%c0_17, %c0_18] : memref<512x128xf32, #tpu.memory_space<vmem>>, vector<512x128xf32>
      tpu.vector_store %arg9[%c0_17, %c0_18], %35 {strides = array<i32>} : memref<512x128xf32, #tpu.memory_space<vmem>>, vector<512x128xf32>,
    } else {
    }
    %c0_i32_6 = arith.constant 0 : i32
    %13 = arith.cmpi eq, %arg2, %c0_i32_6 : i32
    %14 = arith.andi %0, %13 : i1
    %15 = arith.extui %14 : i1 to i32
    %c0_i32_7 = arith.constant 0 : i32
    %16 = arith.cmpi ne, %15, %c0_i32_7 : i32
    scf.if %16 {
      %c0 = arith.constant 0 : index
      %c0_13 = arith.constant 0 : index
      %28 = vector.load %arg9[%c0, %c0_13] : memref<512x128xf32, #tpu.memory_space<vmem>>, vector<512x128xf32>
      %c0_14 = arith.constant 0 : index
      %c0_15 = arith.constant 0 : index
      %29 = vector.load %arg5[%c0_14, %c0_15] : memref<1x128xf32, #tpu.memory_space<vmem>>, vector<1x128xf32>
      %30 = vector.broadcast %29 : vector<1x128xf32> to vector<512x128xf32>
      %31 = arith.addf %28, %30 : vector<512x128xf32>
      %c512_i32 = arith.constant 512 : i32
      %32 = arith.muli %arg1, %c512_i32 : i32
      %33 = tpu.assume_multiple %32, 512 : i32
      %34 = arith.truncf %31 : vector<512x128xf32> to vector<512x128xbf16>
      %35 = arith.index_cast %33 : i32 to index
      %c0_16 = arith.constant 0 : index
      %36 = vector.load %arg10[%35, %c0_16] : memref<512x128xbf16, #tpu.memory_space<vmem>>, vector<512x128xbf16>
      tpu.vector_store %arg10[%35, %c0_16], %34 {strides = array<i32>} : memref<512x128xbf16, #tpu.memory_space<vmem>>, vector<512x128xbf16>,
      %c0_17 = arith.constant 0 : index
      %c0_18 = arith.constant 0 : index
      %37 = vector.load %arg11[%c0_17, %c0_18] : memref<1x128xf32, #tpu.memory_space<vmem>>, vector<1x128xf32>
      %cst = arith.constant dense<0.000000e+00> : vector<128xf32>
      %38 = vector.multi_reduction <add>, %31, %cst [0] : vector<512x128xf32> to vector<128xf32>
      %39 = vector.shape_cast %38 : vector<128xf32> to vector<1x128xf32>
      %40 = arith.addf %37, %39 : vector<1x128xf32>
      %c0_19 = arith.constant 0 : index
      %c0_20 = arith.constant 0 : index
      %41 = vector.load %arg11[%c0_19, %c0_20] : memref<1x128xf32, #tpu.memory_space<vmem>>, vector<1x128xf32>
      tpu.vector_store %arg11[%c0_19, %c0_20], %40 {strides = array<i32>} : memref<1x128xf32, #tpu.memory_space<vmem>>, vector<1x128xf32>,
      %c0_21 = arith.constant 0 : index
      %c0_22 = arith.constant 0 : index
      %42 = vector.load %arg12[%c0_21, %c0_22] : memref<1x128xf32, #tpu.memory_space<vmem>>, vector<1x128xf32>
      %43 = arith.mulf %31, %31 : vector<512x128xf32>
      %cst_23 = arith.constant dense<0.000000e+00> : vector<128xf32>
      %44 = vector.multi_reduction <add>, %43, %cst_23 [0] : vector<512x128xf32> to vector<128xf32>
      %45 = vector.shape_cast %44 : vector<128xf32> to vector<1x128xf32>
      %46 = arith.addf %42, %45 : vector<1x128xf32>
      %c0_24 = arith.constant 0 : index
      %c0_25 = arith.constant 0 : index
      %47 = vector.load %arg12[%c0_24, %c0_25] : memref<1x128xf32, #tpu.memory_space<vmem>>, vector<1x128xf32>
      tpu.vector_store %arg12[%c0_24, %c0_25], %46 {strides = array<i32>} : memref<1x128xf32, #tpu.memory_space<vmem>>, vector<1x128xf32>,
    } else {
    }
    %c1_i32 = arith.constant 1 : i32
    %17 = arith.cmpi eq, %arg0, %c1_i32 : i32
    %c0_i32_8 = arith.constant 0 : i32
    %18 = arith.cmpi eq, %arg1, %c0_i32_8 : i32
    %19 = arith.andi %17, %18 : i1
    %c0_i32_9 = arith.constant 0 : i32
    %20 = arith.cmpi eq, %arg2, %c0_i32_9 : i32
    %21 = arith.andi %19, %20 : i1
    %22 = arith.extui %21 : i1 to i32
    %c0_i32_10 = arith.constant 0 : i32
    %23 = arith.cmpi ne, %22, %c0_i32_10 : i32
    scf.if %23 {
      %c0 = arith.constant 0 : index
      %c0_13 = arith.constant 0 : index
      %28 = vector.load %arg11[%c0, %c0_13] : memref<1x128xf32, #tpu.memory_space<vmem>>, vector<1x128xf32>
      %cst = arith.constant 0.001953125 : f32
      %29 = vector.broadcast %cst : f32 to vector<1x128xf32>
      %30 = arith.mulf %28, %29 : vector<1x128xf32>
      %c0_14 = arith.constant 0 : index
      %c0_15 = arith.constant 0 : index
      %31 = vector.load %arg12[%c0_14, %c0_15] : memref<1x128xf32, #tpu.memory_space<vmem>>, vector<1x128xf32>
      %cst_16 = arith.constant 0.001953125 : f32
      %32 = vector.broadcast %cst_16 : f32 to vector<1x128xf32>
      %33 = arith.mulf %31, %32 : vector<1x128xf32>
      %34 = arith.mulf %30, %30 : vector<1x128xf32>
      %35 = arith.subf %33, %34 : vector<1x128xf32>
      %cst_17 = arith.constant 0.000000e+00 : f32
      %36 = vector.broadcast %cst_17 : f32 to vector<1x128xf32>
      %37 = arith.maximumf %35, %36 : vector<1x128xf32>
      %c0_18 = arith.constant 0 : index
      %c0_19 = arith.constant 0 : index
      %38 = vector.load %arg6[%c0_18, %c0_19] : memref<1x128xf32, #tpu.memory_space<vmem>>, vector<1x128xf32>
      %cst_20 = arith.constant 9.99999974E-6 : f32
      %39 = vector.broadcast %cst_20 : f32 to vector<1x128xf32>
      %40 = arith.addf %37, %39 : vector<1x128xf32>
      %41 = math.rsqrt %40 : vector<1x128xf32>
      %42 = arith.mulf %38, %41 : vector<1x128xf32>
      %c0_21 = arith.constant 0 : index
      %c0_22 = arith.constant 0 : index
      %43 = vector.load %arg13[%c0_21, %c0_22] : memref<1x128xf32, #tpu.memory_space<vmem>>, vector<1x128xf32>
      tpu.vector_store %arg13[%c0_21, %c0_22], %42 {strides = array<i32>} : memref<1x128xf32, #tpu.memory_space<vmem>>, vector<1x128xf32>,
      %c0_23 = arith.constant 0 : index
      %c0_24 = arith.constant 0 : index
      %44 = vector.load %arg7[%c0_23, %c0_24] : memref<1x128xf32, #tpu.memory_space<vmem>>, vector<1x128xf32>
      %45 = arith.mulf %30, %42 : vector<1x128xf32>
      %46 = arith.subf %44, %45 : vector<1x128xf32>
      %c0_25 = arith.constant 0 : index
      %c0_26 = arith.constant 0 : index
      %47 = vector.load %arg14[%c0_25, %c0_26] : memref<1x128xf32, #tpu.memory_space<vmem>>, vector<1x128xf32>
      tpu.vector_store %arg14[%c0_25, %c0_26], %46 {strides = array<i32>} : memref<1x128xf32, #tpu.memory_space<vmem>>, vector<1x128xf32>,
    } else {
    }
    %c0_i32_11 = arith.constant 0 : i32
    %24 = arith.cmpi eq, %arg2, %c0_i32_11 : i32
    %25 = arith.andi %17, %24 : i1
    %26 = arith.extui %25 : i1 to i32
    %c0_i32_12 = arith.constant 0 : i32
    %27 = arith.cmpi ne, %26, %c0_i32_12 : i32
    scf.if %27 {
      %c512_i32 = arith.constant 512 : i32
      %28 = arith.muli %arg1, %c512_i32 : i32
      %29 = tpu.assume_multiple %28, 512 : i32
      %30 = arith.index_cast %29 : i32 to index
      %c0 = arith.constant 0 : index
      %31 = vector.load %arg10[%30, %c0] : memref<512x128xbf16, #tpu.memory_space<vmem>>, vector<512x128xbf16>
      %32 = arith.extf %31 : vector<512x128xbf16> to vector<512x128xf32>
      %c0_13 = arith.constant 0 : index
      %c0_14 = arith.constant 0 : index
      %33 = vector.load %arg13[%c0_13, %c0_14] : memref<1x128xf32, #tpu.memory_space<vmem>>, vector<1x128xf32>
      %34 = vector.broadcast %33 : vector<1x128xf32> to vector<512x128xf32>
      %35 = arith.mulf %32, %34 : vector<512x128xf32>
      %c0_15 = arith.constant 0 : index
      %c0_16 = arith.constant 0 : index
      %36 = vector.load %arg14[%c0_15, %c0_16] : memref<1x128xf32, #tpu.memory_space<vmem>>, vector<1x128xf32>
      %37 = vector.broadcast %36 : vector<1x128xf32> to vector<512x128xf32>
      %38 = arith.addf %35, %37 : vector<512x128xf32>
      %cst = arith.constant 0.000000e+00 : f32
      %39 = vector.broadcast %cst : f32 to vector<512x128xf32>
      %40 = arith.cmpf ogt, %38, %39 : vector<512x128xf32>
      %cst_17 = arith.constant 2.000000e-01 : f32
      %41 = vector.broadcast %cst_17 : f32 to vector<512x128xf32>
      %42 = arith.mulf %41, %38 : vector<512x128xf32>
      %43 = arith.select %40, %38, %42 : vector<512x128xi1>, vector<512x128xf32>
      %44 = arith.truncf %43 : vector<512x128xf32> to vector<512x128xbf16>
      %c0_18 = arith.constant 0 : index
      %c0_19 = arith.constant 0 : index
      %45 = vector.load %arg8[%c0_18, %c0_19] : memref<512x128xbf16, #tpu.memory_space<vmem>>, vector<512x128xbf16>
      tpu.vector_store %arg8[%c0_18, %c0_19], %44 {strides = array<i32>} : memref<512x128xbf16, #tpu.memory_space<vmem>>, vector<512x128xbf16>,
    } else {
    }
    return
  }
  func.func @transform_0(%arg0: i32, %arg1: i32, %arg2: i32) -> (i32, i32) {
    %c1_i32 = arith.constant 1 : i32
    %0 = arith.subi %c1_i32, %arg0 : i32
    %1 = arith.muli %0, %arg1 : i32
    %c0_i32 = arith.constant 0 : i32
    %2 = arith.muli %arg0, %c0_i32 : i32
    %3 = arith.addi %1, %2 : i32
    %c1_i32_0 = arith.constant 1 : i32
    %4 = arith.subi %c1_i32_0, %arg0 : i32
    %5 = arith.muli %4, %arg2 : i32
    %c0_i32_1 = arith.constant 0 : i32
    %6 = arith.muli %arg0, %c0_i32_1 : i32
    %7 = arith.addi %5, %6 : i32
    %c0_i32_2 = arith.constant 0 : i32
    return %3, %7 : i32, i32
  }
  func.func @transform_1(%arg0: i32, %arg1: i32, %arg2: i32) -> (i32, i32) {
    %c0_i32 = arith.constant 0 : i32
    %c0_i32_0 = arith.constant 0 : i32
    %c0_i32_1 = arith.constant 0 : i32
    return %c0_i32, %c0_i32_0 : i32, i32
  }
  func.func @transform_2(%arg0: i32, %arg1: i32, %arg2: i32) -> (i32, i32) {
    %c0_i32 = arith.constant 0 : i32
    %c0_i32_0 = arith.constant 0 : i32
    %c0_i32_1 = arith.constant 0 : i32
    return %c0_i32, %c0_i32_0 : i32, i32
  }
  func.func @transform_3(%arg0: i32, %arg1: i32, %arg2: i32) -> (i32, i32) {
    %c0_i32 = arith.constant 0 : i32
    %c0_i32_0 = arith.constant 0 : i32
    %c0_i32_1 = arith.constant 0 : i32
    return %c0_i32, %c0_i32_0 : i32, i32
  }
  func.func @transform_4(%arg0: i32, %arg1: i32, %arg2: i32) -> (i32, i32) {
    %c0_i32 = arith.constant 0 : i32
    %c0_i32_0 = arith.constant 0 : i32
    %c0_i32_1 = arith.constant 0 : i32
    return %c0_i32, %c0_i32_0 : i32, i32
  }
  func.func @transform_5(%arg0: i32, %arg1: i32, %arg2: i32) -> (i32, i32) {
    %0 = arith.muli %arg0, %arg1 : i32
    %c0_i32 = arith.constant 0 : i32
    %c0_i32_0 = arith.constant 0 : i32
    return %0, %c0_i32 : i32, i32
  }
}

module attributes {stable_mosaic.version = 11 : i64} {
  func.func @_conv_bn_act_kernel(%arg0: i32, %arg1: i32, %arg2: i32, %arg3: memref<128x512xbf16, #tpu.memory_space<vmem>>, %arg4: memref<512x128xbf16, #tpu.memory_space<vmem>>, %arg5: memref<1x128xf32, #tpu.memory_space<vmem>>, %arg6: memref<1x128xf32, #tpu.memory_space<vmem>>, %arg7: memref<1x128xf32, #tpu.memory_space<vmem>>, %arg8: memref<128x128xbf16, #tpu.memory_space<vmem>>, %arg9: memref<128x128xf32, #tpu.memory_space<vmem>>, %arg10: memref<128x128xbf16, #tpu.memory_space<vmem>>, %arg11: memref<1x128xf32, #tpu.memory_space<vmem>>, %arg12: memref<1x128xf32, #tpu.memory_space<vmem>>, %arg13: memref<1x128xf32, #tpu.memory_space<vmem>>, %arg14: memref<1x128xf32, #tpu.memory_space<vmem>>) attributes {dimension_semantics = [#tpu.dimension_semantics<arbitrary>, #tpu.dimension_semantics<arbitrary>, #tpu.dimension_semantics<arbitrary>], iteration_bounds = array<i64: 2, 1, 1>, scalar_prefetch = 0 : i64, scratch_operands = 6 : i64, tpu.core_type = #tpu.core_type<tc>, window_params = [{transform_indices = @transform_0, window_bounds = array<i64: 128, 512>}, {pipeline_mode = #tpu.pipeline_mode<synchronous>, transform_indices = @transform_1, window_bounds = array<i64: 512, 128>}, {pipeline_mode = #tpu.pipeline_mode<synchronous>, transform_indices = @transform_2, window_bounds = array<i64: 1, 128>}, {pipeline_mode = #tpu.pipeline_mode<synchronous>, transform_indices = @transform_3, window_bounds = array<i64: 1, 128>}, {pipeline_mode = #tpu.pipeline_mode<synchronous>, transform_indices = @transform_4, window_bounds = array<i64: 1, 128>}, {transform_indices = @transform_5, window_bounds = array<i64: 128, 128>}]} {
    %c0_i32 = arith.constant 0 : i32
    %0 = arith.cmpi eq, %arg0, %c0_i32 : i32
    %c0_i32_0 = arith.constant 0 : i32
    %1 = arith.cmpi eq, %arg1, %c0_i32_0 : i32
    %2 = arith.andi %0, %1 : i1
    %c0_i32_1 = arith.constant 0 : i32
    %3 = arith.cmpi eq, %arg2, %c0_i32_1 : i32
    %4 = arith.andi %2, %3 : i1
    %5 = arith.extui %4 : i1 to i32
    %c0_i32_2 = arith.constant 0 : i32
    %6 = arith.cmpi ne, %5, %c0_i32_2 : i32
    scf.if %6 {
      %cst = arith.constant 0.000000e+00 : f32
      %28 = vector.broadcast %cst : f32 to vector<1x128xf32>
      %c0 = arith.constant 0 : index
      %c0_13 = arith.constant 0 : index
      %29 = vector.load %arg11[%c0, %c0_13] : memref<1x128xf32, #tpu.memory_space<vmem>>, vector<1x128xf32>
      tpu.vector_store %arg11[%c0, %c0_13], %28 {strides = array<i32>} : memref<1x128xf32, #tpu.memory_space<vmem>>, vector<1x128xf32>,
      %cst_14 = arith.constant 0.000000e+00 : f32
      %30 = vector.broadcast %cst_14 : f32 to vector<1x128xf32>
      %c0_15 = arith.constant 0 : index
      %c0_16 = arith.constant 0 : index
      %31 = vector.load %arg12[%c0_15, %c0_16] : memref<1x128xf32, #tpu.memory_space<vmem>>, vector<1x128xf32>
      tpu.vector_store %arg12[%c0_15, %c0_16], %30 {strides = array<i32>} : memref<1x128xf32, #tpu.memory_space<vmem>>, vector<1x128xf32>,
    } else {
    }
    %c0_i32_3 = arith.constant 0 : i32
    %7 = arith.cmpi eq, %arg2, %c0_i32_3 : i32
    %8 = arith.andi %0, %7 : i1
    %9 = arith.extui %8 : i1 to i32
    %c0_i32_4 = arith.constant 0 : i32
    %10 = arith.cmpi ne, %9, %c0_i32_4 : i32
    scf.if %10 {
      %cst = arith.constant 0.000000e+00 : f32
      %28 = vector.broadcast %cst : f32 to vector<128x128xf32>
      %c0 = arith.constant 0 : index
      %c0_13 = arith.constant 0 : index
      %29 = vector.load %arg9[%c0, %c0_13] : memref<128x128xf32, #tpu.memory_space<vmem>>, vector<128x128xf32>
      tpu.vector_store %arg9[%c0, %c0_13], %28 {strides = array<i32>} : memref<128x128xf32, #tpu.memory_space<vmem>>, vector<128x128xf32>,
    } else {
    }
    %11 = arith.extui %0 : i1 to i32
    %c0_i32_5 = arith.constant 0 : i32
    %12 = arith.cmpi ne, %11, %c0_i32_5 : i32
    scf.if %12 {
      %c512_i32 = arith.constant 512 : i32
      %28 = arith.muli %arg2, %c512_i32 : i32
      %29 = tpu.assume_multiple %28, 512 : i32
      %30 = arith.index_cast %29 : i32 to index
      %c0 = arith.constant 0 : index
      %31 = vector.load %arg4[%30, %c0] : memref<512x128xbf16, #tpu.memory_space<vmem>>, vector<512x128xbf16>
      %c0_13 = arith.constant 0 : index
      %c0_14 = arith.constant 0 : index
      %32 = vector.load %arg9[%c0_13, %c0_14] : memref<128x128xf32, #tpu.memory_space<vmem>>, vector<128x128xf32>
      %c0_15 = arith.constant 0 : index
      %c0_16 = arith.constant 0 : index
      %33 = vector.load %arg3[%c0_15, %c0_16] : memref<128x512xbf16, #tpu.memory_space<vmem>>, vector<128x512xbf16>
      %cst = arith.constant dense<0.000000e+00> : vector<128x128xf32>
      %34 = tpu.matmul %33, %31, %cst {dimension_numbers = #tpu.dot_dimension_numbers<[1], [0], [0], [1], [0, 0, 1, 1], [], []>} : vector<128x512xbf16>, vector<512x128xbf16>, vector<128x128xf32> -> vector<128x128xf32>
      %35 = arith.addf %32, %34 : vector<128x128xf32>
      %c0_17 = arith.constant 0 : index
      %c0_18 = arith.constant 0 : index
      %36 = vector.load %arg9[%c0_17, %c0_18] : memref<128x128xf32, #tpu.memory_space<vmem>>, vector<128x128xf32>
      tpu.vector_store %arg9[%c0_17, %c0_18], %35 {strides = array<i32>} : memref<128x128xf32, #tpu.memory_space<vmem>>, vector<128x128xf32>,
    } else {
    }
    %c0_i32_6 = arith.constant 0 : i32
    %13 = arith.cmpi eq, %arg2, %c0_i32_6 : i32
    %14 = arith.andi %0, %13 : i1
    %15 = arith.extui %14 : i1 to i32
    %c0_i32_7 = arith.constant 0 : i32
    %16 = arith.cmpi ne, %15, %c0_i32_7 : i32
    scf.if %16 {
      %c0 = arith.constant 0 : index
      %c0_13 = arith.constant 0 : index
      %28 = vector.load %arg9[%c0, %c0_13] : memref<128x128xf32, #tpu.memory_space<vmem>>, vector<128x128xf32>
      %c0_14 = arith.constant 0 : index
      %c0_15 = arith.constant 0 : index
      %29 = vector.load %arg5[%c0_14, %c0_15] : memref<1x128xf32, #tpu.memory_space<vmem>>, vector<1x128xf32>
      %30 = vector.broadcast %29 : vector<1x128xf32> to vector<128x128xf32>
      %31 = arith.addf %28, %30 : vector<128x128xf32>
      %c128_i32 = arith.constant 128 : i32
      %32 = arith.muli %arg1, %c128_i32 : i32
      %33 = tpu.assume_multiple %32, 128 : i32
      %34 = arith.truncf %31 : vector<128x128xf32> to vector<128x128xbf16>
      %35 = arith.index_cast %33 : i32 to index
      %c0_16 = arith.constant 0 : index
      %36 = vector.load %arg10[%35, %c0_16] : memref<128x128xbf16, #tpu.memory_space<vmem>>, vector<128x128xbf16>
      tpu.vector_store %arg10[%35, %c0_16], %34 {strides = array<i32>} : memref<128x128xbf16, #tpu.memory_space<vmem>>, vector<128x128xbf16>,
      %c0_17 = arith.constant 0 : index
      %c0_18 = arith.constant 0 : index
      %37 = vector.load %arg11[%c0_17, %c0_18] : memref<1x128xf32, #tpu.memory_space<vmem>>, vector<1x128xf32>
      %cst = arith.constant dense<0.000000e+00> : vector<128xf32>
      %38 = vector.multi_reduction <add>, %31, %cst [0] : vector<128x128xf32> to vector<128xf32>
      %39 = vector.shape_cast %38 : vector<128xf32> to vector<1x128xf32>
      %40 = arith.addf %37, %39 : vector<1x128xf32>
      %c0_19 = arith.constant 0 : index
      %c0_20 = arith.constant 0 : index
      %41 = vector.load %arg11[%c0_19, %c0_20] : memref<1x128xf32, #tpu.memory_space<vmem>>, vector<1x128xf32>
      tpu.vector_store %arg11[%c0_19, %c0_20], %40 {strides = array<i32>} : memref<1x128xf32, #tpu.memory_space<vmem>>, vector<1x128xf32>,
      %c0_21 = arith.constant 0 : index
      %c0_22 = arith.constant 0 : index
      %42 = vector.load %arg12[%c0_21, %c0_22] : memref<1x128xf32, #tpu.memory_space<vmem>>, vector<1x128xf32>
      %43 = arith.mulf %31, %31 : vector<128x128xf32>
      %cst_23 = arith.constant dense<0.000000e+00> : vector<128xf32>
      %44 = vector.multi_reduction <add>, %43, %cst_23 [0] : vector<128x128xf32> to vector<128xf32>
      %45 = vector.shape_cast %44 : vector<128xf32> to vector<1x128xf32>
      %46 = arith.addf %42, %45 : vector<1x128xf32>
      %c0_24 = arith.constant 0 : index
      %c0_25 = arith.constant 0 : index
      %47 = vector.load %arg12[%c0_24, %c0_25] : memref<1x128xf32, #tpu.memory_space<vmem>>, vector<1x128xf32>
      tpu.vector_store %arg12[%c0_24, %c0_25], %46 {strides = array<i32>} : memref<1x128xf32, #tpu.memory_space<vmem>>, vector<1x128xf32>,
    } else {
    }
    %c1_i32 = arith.constant 1 : i32
    %17 = arith.cmpi eq, %arg0, %c1_i32 : i32
    %c0_i32_8 = arith.constant 0 : i32
    %18 = arith.cmpi eq, %arg1, %c0_i32_8 : i32
    %19 = arith.andi %17, %18 : i1
    %c0_i32_9 = arith.constant 0 : i32
    %20 = arith.cmpi eq, %arg2, %c0_i32_9 : i32
    %21 = arith.andi %19, %20 : i1
    %22 = arith.extui %21 : i1 to i32
    %c0_i32_10 = arith.constant 0 : i32
    %23 = arith.cmpi ne, %22, %c0_i32_10 : i32
    scf.if %23 {
      %c0 = arith.constant 0 : index
      %c0_13 = arith.constant 0 : index
      %28 = vector.load %arg11[%c0, %c0_13] : memref<1x128xf32, #tpu.memory_space<vmem>>, vector<1x128xf32>
      %cst = arith.constant 7.812500e-03 : f32
      %29 = vector.broadcast %cst : f32 to vector<1x128xf32>
      %30 = arith.mulf %28, %29 : vector<1x128xf32>
      %c0_14 = arith.constant 0 : index
      %c0_15 = arith.constant 0 : index
      %31 = vector.load %arg12[%c0_14, %c0_15] : memref<1x128xf32, #tpu.memory_space<vmem>>, vector<1x128xf32>
      %cst_16 = arith.constant 7.812500e-03 : f32
      %32 = vector.broadcast %cst_16 : f32 to vector<1x128xf32>
      %33 = arith.mulf %31, %32 : vector<1x128xf32>
      %34 = arith.mulf %30, %30 : vector<1x128xf32>
      %35 = arith.subf %33, %34 : vector<1x128xf32>
      %cst_17 = arith.constant 0.000000e+00 : f32
      %36 = vector.broadcast %cst_17 : f32 to vector<1x128xf32>
      %37 = arith.maximumf %35, %36 : vector<1x128xf32>
      %c0_18 = arith.constant 0 : index
      %c0_19 = arith.constant 0 : index
      %38 = vector.load %arg6[%c0_18, %c0_19] : memref<1x128xf32, #tpu.memory_space<vmem>>, vector<1x128xf32>
      %cst_20 = arith.constant 9.99999974E-6 : f32
      %39 = vector.broadcast %cst_20 : f32 to vector<1x128xf32>
      %40 = arith.addf %37, %39 : vector<1x128xf32>
      %41 = math.rsqrt %40 : vector<1x128xf32>
      %42 = arith.mulf %38, %41 : vector<1x128xf32>
      %c0_21 = arith.constant 0 : index
      %c0_22 = arith.constant 0 : index
      %43 = vector.load %arg13[%c0_21, %c0_22] : memref<1x128xf32, #tpu.memory_space<vmem>>, vector<1x128xf32>
      tpu.vector_store %arg13[%c0_21, %c0_22], %42 {strides = array<i32>} : memref<1x128xf32, #tpu.memory_space<vmem>>, vector<1x128xf32>,
      %c0_23 = arith.constant 0 : index
      %c0_24 = arith.constant 0 : index
      %44 = vector.load %arg7[%c0_23, %c0_24] : memref<1x128xf32, #tpu.memory_space<vmem>>, vector<1x128xf32>
      %45 = arith.mulf %30, %42 : vector<1x128xf32>
      %46 = arith.subf %44, %45 : vector<1x128xf32>
      %c0_25 = arith.constant 0 : index
      %c0_26 = arith.constant 0 : index
      %47 = vector.load %arg14[%c0_25, %c0_26] : memref<1x128xf32, #tpu.memory_space<vmem>>, vector<1x128xf32>
      tpu.vector_store %arg14[%c0_25, %c0_26], %46 {strides = array<i32>} : memref<1x128xf32, #tpu.memory_space<vmem>>, vector<1x128xf32>,
    } else {
    }
    %c0_i32_11 = arith.constant 0 : i32
    %24 = arith.cmpi eq, %arg2, %c0_i32_11 : i32
    %25 = arith.andi %17, %24 : i1
    %26 = arith.extui %25 : i1 to i32
    %c0_i32_12 = arith.constant 0 : i32
    %27 = arith.cmpi ne, %26, %c0_i32_12 : i32
    scf.if %27 {
      %c128_i32 = arith.constant 128 : i32
      %28 = arith.muli %arg1, %c128_i32 : i32
      %29 = tpu.assume_multiple %28, 128 : i32
      %30 = arith.index_cast %29 : i32 to index
      %c0 = arith.constant 0 : index
      %31 = vector.load %arg10[%30, %c0] : memref<128x128xbf16, #tpu.memory_space<vmem>>, vector<128x128xbf16>
      %32 = arith.extf %31 : vector<128x128xbf16> to vector<128x128xf32>
      %c0_13 = arith.constant 0 : index
      %c0_14 = arith.constant 0 : index
      %33 = vector.load %arg13[%c0_13, %c0_14] : memref<1x128xf32, #tpu.memory_space<vmem>>, vector<1x128xf32>
      %34 = vector.broadcast %33 : vector<1x128xf32> to vector<128x128xf32>
      %35 = arith.mulf %32, %34 : vector<128x128xf32>
      %c0_15 = arith.constant 0 : index
      %c0_16 = arith.constant 0 : index
      %36 = vector.load %arg14[%c0_15, %c0_16] : memref<1x128xf32, #tpu.memory_space<vmem>>, vector<1x128xf32>
      %37 = vector.broadcast %36 : vector<1x128xf32> to vector<128x128xf32>
      %38 = arith.addf %35, %37 : vector<128x128xf32>
      %cst = arith.constant 0.000000e+00 : f32
      %39 = vector.broadcast %cst : f32 to vector<128x128xf32>
      %40 = arith.cmpf ogt, %38, %39 : vector<128x128xf32>
      %cst_17 = arith.constant 2.000000e-01 : f32
      %41 = vector.broadcast %cst_17 : f32 to vector<128x128xf32>
      %42 = arith.mulf %41, %38 : vector<128x128xf32>
      %43 = arith.select %40, %38, %42 : vector<128x128xi1>, vector<128x128xf32>
      %44 = arith.truncf %43 : vector<128x128xf32> to vector<128x128xbf16>
      %c0_18 = arith.constant 0 : index
      %c0_19 = arith.constant 0 : index
      %45 = vector.load %arg8[%c0_18, %c0_19] : memref<128x128xbf16, #tpu.memory_space<vmem>>, vector<128x128xbf16>
      tpu.vector_store %arg8[%c0_18, %c0_19], %44 {strides = array<i32>} : memref<128x128xbf16, #tpu.memory_space<vmem>>, vector<128x128xbf16>,
    } else {
    }
    return
  }
  func.func @transform_0(%arg0: i32, %arg1: i32, %arg2: i32) -> (i32, i32) {
    %c1_i32 = arith.constant 1 : i32
    %0 = arith.subi %c1_i32, %arg0 : i32
    %1 = arith.muli %0, %arg1 : i32
    %c0_i32 = arith.constant 0 : i32
    %2 = arith.muli %arg0, %c0_i32 : i32
    %3 = arith.addi %1, %2 : i32
    %c1_i32_0 = arith.constant 1 : i32
    %4 = arith.subi %c1_i32_0, %arg0 : i32
    %5 = arith.muli %4, %arg2 : i32
    %c0_i32_1 = arith.constant 0 : i32
    %6 = arith.muli %arg0, %c0_i32_1 : i32
    %7 = arith.addi %5, %6 : i32
    %c0_i32_2 = arith.constant 0 : i32
    return %3, %7 : i32, i32
  }
  func.func @transform_1(%arg0: i32, %arg1: i32, %arg2: i32) -> (i32, i32) {
    %c0_i32 = arith.constant 0 : i32
    %c0_i32_0 = arith.constant 0 : i32
    %c0_i32_1 = arith.constant 0 : i32
    return %c0_i32, %c0_i32_0 : i32, i32
  }
  func.func @transform_2(%arg0: i32, %arg1: i32, %arg2: i32) -> (i32, i32) {
    %c0_i32 = arith.constant 0 : i32
    %c0_i32_0 = arith.constant 0 : i32
    %c0_i32_1 = arith.constant 0 : i32
    return %c0_i32, %c0_i32_0 : i32, i32
  }
  func.func @transform_3(%arg0: i32, %arg1: i32, %arg2: i32) -> (i32, i32) {
    %c0_i32 = arith.constant 0 : i32
    %c0_i32_0 = arith.constant 0 : i32
    %c0_i32_1 = arith.constant 0 : i32
    return %c0_i32, %c0_i32_0 : i32, i32
  }
  func.func @transform_4(%arg0: i32, %arg1: i32, %arg2: i32) -> (i32, i32) {
    %c0_i32 = arith.constant 0 : i32
    %c0_i32_0 = arith.constant 0 : i32
    %c0_i32_1 = arith.constant 0 : i32
    return %c0_i32, %c0_i32_0 : i32, i32
  }
  func.func @transform_5(%arg0: i32, %arg1: i32, %arg2: i32) -> (i32, i32) {
    %0 = arith.muli %arg0, %arg1 : i32
    %c0_i32 = arith.constant 0 : i32
    %c0_i32_0 = arith.constant 0 : i32
    return %0, %c0_i32 : i32, i32
  }
}

module attributes {stable_mosaic.version = 11 : i64} {
  func.func @_conv_bn_act_kernel(%arg0: i32, %arg1: i32, %arg2: i32, %arg3: memref<32x1024xbf16, #tpu.memory_space<vmem>>, %arg4: memref<1024x128xbf16, #tpu.memory_space<vmem>>, %arg5: memref<1x128xf32, #tpu.memory_space<vmem>>, %arg6: memref<1x128xf32, #tpu.memory_space<vmem>>, %arg7: memref<1x128xf32, #tpu.memory_space<vmem>>, %arg8: memref<16x128xf32, #tpu.memory_space<vmem>>, %arg9: memref<1x1xf32, #tpu.memory_space<vmem>>, %arg10: memref<32x128xbf16, #tpu.memory_space<vmem>>, %arg11: memref<2x1xf32, #tpu.memory_space<vmem>>, %arg12: memref<32x128xf32, #tpu.memory_space<vmem>>, %arg13: memref<32x128xbf16, #tpu.memory_space<vmem>>, %arg14: memref<1x128xf32, #tpu.memory_space<vmem>>, %arg15: memref<1x128xf32, #tpu.memory_space<vmem>>, %arg16: memref<1x128xf32, #tpu.memory_space<vmem>>, %arg17: memref<1x128xf32, #tpu.memory_space<vmem>>) attributes {dimension_semantics = [#tpu.dimension_semantics<arbitrary>, #tpu.dimension_semantics<arbitrary>, #tpu.dimension_semantics<arbitrary>], iteration_bounds = array<i64: 2, 1, 1>, scalar_prefetch = 0 : i64, scratch_operands = 6 : i64, tpu.core_type = #tpu.core_type<tc>, window_params = [{transform_indices = @transform_0, window_bounds = array<i64: 32, 1024>}, {pipeline_mode = #tpu.pipeline_mode<synchronous>, transform_indices = @transform_1, window_bounds = array<i64: 1024, 128>}, {pipeline_mode = #tpu.pipeline_mode<synchronous>, transform_indices = @transform_2, window_bounds = array<i64: 1, 128>}, {pipeline_mode = #tpu.pipeline_mode<synchronous>, transform_indices = @transform_3, window_bounds = array<i64: 1, 128>}, {pipeline_mode = #tpu.pipeline_mode<synchronous>, transform_indices = @transform_4, window_bounds = array<i64: 1, 128>}, {pipeline_mode = #tpu.pipeline_mode<synchronous>, transform_indices = @transform_5, window_bounds = array<i64: 16, 128>}, {pipeline_mode = #tpu.pipeline_mode<synchronous>, transform_indices = @transform_6, window_bounds = array<i64: 1, 1>}, {transform_indices = @transform_7, window_bounds = array<i64: 32, 128>}, {transform_indices = @transform_8, window_bounds = array<i64: 2, 1>}]} {
    %c0_i32 = arith.constant 0 : i32
    %0 = arith.cmpi eq, %arg0, %c0_i32 : i32
    %c0_i32_0 = arith.constant 0 : i32
    %1 = arith.cmpi eq, %arg1, %c0_i32_0 : i32
    %2 = arith.andi %0, %1 : i1
    %c0_i32_1 = arith.constant 0 : i32
    %3 = arith.cmpi eq, %arg2, %c0_i32_1 : i32
    %4 = arith.andi %2, %3 : i1
    %5 = arith.extui %4 : i1 to i32
    %c0_i32_2 = arith.constant 0 : i32
    %6 = arith.cmpi ne, %5, %c0_i32_2 : i32
    scf.if %6 {
      %cst = arith.constant 0.000000e+00 : f32
      %28 = vector.broadcast %cst : f32 to vector<1x128xf32>
      %c0 = arith.constant 0 : index
      %c0_13 = arith.constant 0 : index
      %29 = vector.load %arg14[%c0, %c0_13] : memref<1x128xf32, #tpu.memory_space<vmem>>, vector<1x128xf32>
      tpu.vector_store %arg14[%c0, %c0_13], %28 {strides = array<i32>} : memref<1x128xf32, #tpu.memory_space<vmem>>, vector<1x128xf32>,
      %cst_14 = arith.constant 0.000000e+00 : f32
      %30 = vector.broadcast %cst_14 : f32 to vector<1x128xf32>
      %c0_15 = arith.constant 0 : index
      %c0_16 = arith.constant 0 : index
      %31 = vector.load %arg15[%c0_15, %c0_16] : memref<1x128xf32, #tpu.memory_space<vmem>>, vector<1x128xf32>
      tpu.vector_store %arg15[%c0_15, %c0_16], %30 {strides = array<i32>} : memref<1x128xf32, #tpu.memory_space<vmem>>, vector<1x128xf32>,
    } else {
    }
    %c0_i32_3 = arith.constant 0 : i32
    %7 = arith.cmpi eq, %arg2, %c0_i32_3 : i32
    %8 = arith.andi %0, %7 : i1
    %9 = arith.extui %8 : i1 to i32
    %c0_i32_4 = arith.constant 0 : i32
    %10 = arith.cmpi ne, %9, %c0_i32_4 : i32
    scf.if %10 {
      %cst = arith.constant 0.000000e+00 : f32
      %28 = vector.broadcast %cst : f32 to vector<32x128xf32>
      %c0 = arith.constant 0 : index
      %c0_13 = arith.constant 0 : index
      %29 = vector.load %arg12[%c0, %c0_13] : memref<32x128xf32, #tpu.memory_space<vmem>>, vector<32x128xf32>
      tpu.vector_store %arg12[%c0, %c0_13], %28 {strides = array<i32>} : memref<32x128xf32, #tpu.memory_space<vmem>>, vector<32x128xf32>,
    } else {
    }
    %11 = arith.extui %0 : i1 to i32
    %c0_i32_5 = arith.constant 0 : i32
    %12 = arith.cmpi ne, %11, %c0_i32_5 : i32
    scf.if %12 {
      %c1024_i32 = arith.constant 1024 : i32
      %28 = arith.muli %arg2, %c1024_i32 : i32
      %29 = tpu.assume_multiple %28, 1024 : i32
      %30 = arith.index_cast %29 : i32 to index
      %c0 = arith.constant 0 : index
      %31 = vector.load %arg4[%30, %c0] : memref<1024x128xbf16, #tpu.memory_space<vmem>>, vector<1024x128xbf16>
      %c0_13 = arith.constant 0 : index
      %c0_14 = arith.constant 0 : index
      %32 = vector.load %arg12[%c0_13, %c0_14] : memref<32x128xf32, #tpu.memory_space<vmem>>, vector<32x128xf32>
      %c0_15 = arith.constant 0 : index
      %c0_16 = arith.constant 0 : index
      %33 = vector.load %arg3[%c0_15, %c0_16] : memref<32x1024xbf16, #tpu.memory_space<vmem>>, vector<32x1024xbf16>
      %cst = arith.constant dense<0.000000e+00> : vector<32x128xf32>
      %34 = tpu.matmul %33, %31, %cst {dimension_numbers = #tpu.dot_dimension_numbers<[1], [0], [0], [1], [0, 0, 1, 1], [], []>} : vector<32x1024xbf16>, vector<1024x128xbf16>, vector<32x128xf32> -> vector<32x128xf32>
      %35 = arith.addf %32, %34 : vector<32x128xf32>
      %c0_17 = arith.constant 0 : index
      %c0_18 = arith.constant 0 : index
      %36 = vector.load %arg12[%c0_17, %c0_18] : memref<32x128xf32, #tpu.memory_space<vmem>>, vector<32x128xf32>
      tpu.vector_store %arg12[%c0_17, %c0_18], %35 {strides = array<i32>} : memref<32x128xf32, #tpu.memory_space<vmem>>, vector<32x128xf32>,
    } else {
    }
    %c0_i32_6 = arith.constant 0 : i32
    %13 = arith.cmpi eq, %arg2, %c0_i32_6 : i32
    %14 = arith.andi %0, %13 : i1
    %15 = arith.extui %14 : i1 to i32
    %c0_i32_7 = arith.constant 0 : i32
    %16 = arith.cmpi ne, %15, %c0_i32_7 : i32
    scf.if %16 {
      %c0 = arith.constant 0 : index
      %c0_13 = arith.constant 0 : index
      %28 = vector.load %arg12[%c0, %c0_13] : memref<32x128xf32, #tpu.memory_space<vmem>>, vector<32x128xf32>
      %c0_14 = arith.constant 0 : index
      %c0_15 = arith.constant 0 : index
      %29 = vector.load %arg5[%c0_14, %c0_15] : memref<1x128xf32, #tpu.memory_space<vmem>>, vector<1x128xf32>
      %30 = vector.broadcast %29 : vector<1x128xf32> to vector<32x128xf32>
      %31 = arith.addf %28, %30 : vector<32x128xf32>
      %c32_i32 = arith.constant 32 : i32
      %32 = arith.muli %arg1, %c32_i32 : i32
      %33 = tpu.assume_multiple %32, 32 : i32
      %34 = arith.truncf %31 : vector<32x128xf32> to vector<32x128xbf16>
      %35 = arith.index_cast %33 : i32 to index
      %c0_16 = arith.constant 0 : index
      %36 = vector.load %arg13[%35, %c0_16] : memref<32x128xbf16, #tpu.memory_space<vmem>>, vector<32x128xbf16>
      tpu.vector_store %arg13[%35, %c0_16], %34 {strides = array<i32>} : memref<32x128xbf16, #tpu.memory_space<vmem>>, vector<32x128xbf16>,
      %c0_17 = arith.constant 0 : index
      %c0_18 = arith.constant 0 : index
      %37 = vector.load %arg14[%c0_17, %c0_18] : memref<1x128xf32, #tpu.memory_space<vmem>>, vector<1x128xf32>
      %cst = arith.constant dense<0.000000e+00> : vector<128xf32>
      %38 = vector.multi_reduction <add>, %31, %cst [0] : vector<32x128xf32> to vector<128xf32>
      %39 = vector.shape_cast %38 : vector<128xf32> to vector<1x128xf32>
      %40 = arith.addf %37, %39 : vector<1x128xf32>
      %c0_19 = arith.constant 0 : index
      %c0_20 = arith.constant 0 : index
      %41 = vector.load %arg14[%c0_19, %c0_20] : memref<1x128xf32, #tpu.memory_space<vmem>>, vector<1x128xf32>
      tpu.vector_store %arg14[%c0_19, %c0_20], %40 {strides = array<i32>} : memref<1x128xf32, #tpu.memory_space<vmem>>, vector<1x128xf32>,
      %c0_21 = arith.constant 0 : index
      %c0_22 = arith.constant 0 : index
      %42 = vector.load %arg15[%c0_21, %c0_22] : memref<1x128xf32, #tpu.memory_space<vmem>>, vector<1x128xf32>
      %43 = arith.mulf %31, %31 : vector<32x128xf32>
      %cst_23 = arith.constant dense<0.000000e+00> : vector<128xf32>
      %44 = vector.multi_reduction <add>, %43, %cst_23 [0] : vector<32x128xf32> to vector<128xf32>
      %45 = vector.shape_cast %44 : vector<128xf32> to vector<1x128xf32>
      %46 = arith.addf %42, %45 : vector<1x128xf32>
      %c0_24 = arith.constant 0 : index
      %c0_25 = arith.constant 0 : index
      %47 = vector.load %arg15[%c0_24, %c0_25] : memref<1x128xf32, #tpu.memory_space<vmem>>, vector<1x128xf32>
      tpu.vector_store %arg15[%c0_24, %c0_25], %46 {strides = array<i32>} : memref<1x128xf32, #tpu.memory_space<vmem>>, vector<1x128xf32>,
    } else {
    }
    %c1_i32 = arith.constant 1 : i32
    %17 = arith.cmpi eq, %arg0, %c1_i32 : i32
    %c0_i32_8 = arith.constant 0 : i32
    %18 = arith.cmpi eq, %arg1, %c0_i32_8 : i32
    %19 = arith.andi %17, %18 : i1
    %c0_i32_9 = arith.constant 0 : i32
    %20 = arith.cmpi eq, %arg2, %c0_i32_9 : i32
    %21 = arith.andi %19, %20 : i1
    %22 = arith.extui %21 : i1 to i32
    %c0_i32_10 = arith.constant 0 : i32
    %23 = arith.cmpi ne, %22, %c0_i32_10 : i32
    scf.if %23 {
      %c0 = arith.constant 0 : index
      %c0_13 = arith.constant 0 : index
      %28 = vector.load %arg14[%c0, %c0_13] : memref<1x128xf32, #tpu.memory_space<vmem>>, vector<1x128xf32>
      %cst = arith.constant 3.125000e-02 : f32
      %29 = vector.broadcast %cst : f32 to vector<1x128xf32>
      %30 = arith.mulf %28, %29 : vector<1x128xf32>
      %c0_14 = arith.constant 0 : index
      %c0_15 = arith.constant 0 : index
      %31 = vector.load %arg15[%c0_14, %c0_15] : memref<1x128xf32, #tpu.memory_space<vmem>>, vector<1x128xf32>
      %cst_16 = arith.constant 3.125000e-02 : f32
      %32 = vector.broadcast %cst_16 : f32 to vector<1x128xf32>
      %33 = arith.mulf %31, %32 : vector<1x128xf32>
      %34 = arith.mulf %30, %30 : vector<1x128xf32>
      %35 = arith.subf %33, %34 : vector<1x128xf32>
      %cst_17 = arith.constant 0.000000e+00 : f32
      %36 = vector.broadcast %cst_17 : f32 to vector<1x128xf32>
      %37 = arith.maximumf %35, %36 : vector<1x128xf32>
      %c0_18 = arith.constant 0 : index
      %c0_19 = arith.constant 0 : index
      %38 = vector.load %arg6[%c0_18, %c0_19] : memref<1x128xf32, #tpu.memory_space<vmem>>, vector<1x128xf32>
      %cst_20 = arith.constant 9.99999974E-6 : f32
      %39 = vector.broadcast %cst_20 : f32 to vector<1x128xf32>
      %40 = arith.addf %37, %39 : vector<1x128xf32>
      %41 = math.rsqrt %40 : vector<1x128xf32>
      %42 = arith.mulf %38, %41 : vector<1x128xf32>
      %c0_21 = arith.constant 0 : index
      %c0_22 = arith.constant 0 : index
      %43 = vector.load %arg16[%c0_21, %c0_22] : memref<1x128xf32, #tpu.memory_space<vmem>>, vector<1x128xf32>
      tpu.vector_store %arg16[%c0_21, %c0_22], %42 {strides = array<i32>} : memref<1x128xf32, #tpu.memory_space<vmem>>, vector<1x128xf32>,
      %c0_23 = arith.constant 0 : index
      %c0_24 = arith.constant 0 : index
      %44 = vector.load %arg7[%c0_23, %c0_24] : memref<1x128xf32, #tpu.memory_space<vmem>>, vector<1x128xf32>
      %45 = arith.mulf %30, %42 : vector<1x128xf32>
      %46 = arith.subf %44, %45 : vector<1x128xf32>
      %c0_25 = arith.constant 0 : index
      %c0_26 = arith.constant 0 : index
      %47 = vector.load %arg17[%c0_25, %c0_26] : memref<1x128xf32, #tpu.memory_space<vmem>>, vector<1x128xf32>
      tpu.vector_store %arg17[%c0_25, %c0_26], %46 {strides = array<i32>} : memref<1x128xf32, #tpu.memory_space<vmem>>, vector<1x128xf32>,
    } else {
    }
    %c0_i32_11 = arith.constant 0 : i32
    %24 = arith.cmpi eq, %arg2, %c0_i32_11 : i32
    %25 = arith.andi %17, %24 : i1
    %26 = arith.extui %25 : i1 to i32
    %c0_i32_12 = arith.constant 0 : i32
    %27 = arith.cmpi ne, %26, %c0_i32_12 : i32
    scf.if %27 {
      %c32_i32 = arith.constant 32 : i32
      %28 = arith.muli %arg1, %c32_i32 : i32
      %29 = tpu.assume_multiple %28, 32 : i32
      %30 = arith.index_cast %29 : i32 to index
      %c0 = arith.constant 0 : index
      %31 = vector.load %arg13[%30, %c0] : memref<32x128xbf16, #tpu.memory_space<vmem>>, vector<32x128xbf16>
      %32 = arith.extf %31 : vector<32x128xbf16> to vector<32x128xf32>
      %c0_13 = arith.constant 0 : index
      %c0_14 = arith.constant 0 : index
      %33 = vector.load %arg16[%c0_13, %c0_14] : memref<1x128xf32, #tpu.memory_space<vmem>>, vector<1x128xf32>
      %34 = vector.broadcast %33 : vector<1x128xf32> to vector<32x128xf32>
      %35 = arith.mulf %32, %34 : vector<32x128xf32>
      %c0_15 = arith.constant 0 : index
      %c0_16 = arith.constant 0 : index
      %36 = vector.load %arg17[%c0_15, %c0_16] : memref<1x128xf32, #tpu.memory_space<vmem>>, vector<1x128xf32>
      %37 = vector.broadcast %36 : vector<1x128xf32> to vector<32x128xf32>
      %38 = arith.addf %35, %37 : vector<32x128xf32>
      %cst = arith.constant 0.000000e+00 : f32
      %39 = vector.broadcast %cst : f32 to vector<32x128xf32>
      %40 = arith.cmpf ogt, %38, %39 : vector<32x128xf32>
      %cst_17 = arith.constant 2.000000e-01 : f32
      %41 = vector.broadcast %cst_17 : f32 to vector<32x128xf32>
      %42 = arith.mulf %41, %38 : vector<32x128xf32>
      %43 = arith.select %40, %38, %42 : vector<32x128xi1>, vector<32x128xf32>
      %44 = arith.truncf %43 : vector<32x128xf32> to vector<32x128xbf16>
      %c0_18 = arith.constant 0 : index
      %c0_19 = arith.constant 0 : index
      %45 = vector.load %arg10[%c0_18, %c0_19] : memref<32x128xbf16, #tpu.memory_space<vmem>>, vector<32x128xbf16>
      tpu.vector_store %arg10[%c0_18, %c0_19], %44 {strides = array<i32>} : memref<32x128xbf16, #tpu.memory_space<vmem>>, vector<32x128xbf16>,
      %c0_20 = arith.constant 0 : index
      %c0_21 = arith.constant 0 : index
      %46 = vector.load %arg8[%c0_20, %c0_21] : memref<16x128xf32, #tpu.memory_space<vmem>>, vector<16x128xf32>
      %47 = vector.shape_cast %43 : vector<32x128xf32> to vector<2x16x128xf32>
      %48 = vector.shape_cast %46 : vector<16x128xf32> to vector<1x16x128xf32>
      %49 = vector.broadcast %48 : vector<1x16x128xf32> to vector<2x16x128xf32>
      %50 = arith.mulf %47, %49 : vector<2x16x128xf32>
      %cst_22 = arith.constant dense<0.000000e+00> : vector<2x16xf32>
      %51 = vector.multi_reduction <add>, %50, %cst_22 [2] : vector<2x16x128xf32> to vector<2x16xf32>
      %cst_23 = arith.constant dense<0.000000e+00> : vector<2xf32>
      %52 = vector.multi_reduction <add>, %51, %cst_23 [1] : vector<2x16xf32> to vector<2xf32>
      %53 = vector.shape_cast %52 : vector<2xf32> to vector<2x1xf32>
      %c0_24 = arith.constant 0 : index
      %c0_25 = arith.constant 0 : index
      %54 = vector.load %arg9[%c0_24, %c0_25] : memref<1x1xf32, #tpu.memory_space<vmem>>, vector<1x1xf32>
      %55 = vector.broadcast %54 : vector<1x1xf32> to vector<2x1xf32>
      %56 = arith.addf %53, %55 : vector<2x1xf32>
      %cst_26 = arith.constant 0.000000e+00 : f32
      %57 = vector.broadcast %cst_26 : f32 to vector<2x1xf32>
      %58 = arith.subf %57, %56 : vector<2x1xf32>
      %59 = math.exp %58 : vector<2x1xf32>
      %cst_27 = arith.constant 1.000000e+00 : f32
      %60 = vector.broadcast %cst_27 : f32 to vector<2x1xf32>
      %61 = arith.addf %60, %59 : vector<2x1xf32>
      %62 = tpu.reciprocal %61 {approx = true} : vector<2x1xf32> -> vector<2x1xf32>
      %c0_28 = arith.constant 0 : index
      %c0_29 = arith.constant 0 : index
      %63 = vector.load %arg11[%c0_28, %c0_29] : memref<2x1xf32, #tpu.memory_space<vmem>>, vector<2x1xf32>
      tpu.vector_store %arg11[%c0_28, %c0_29], %62 {strides = array<i32>} : memref<2x1xf32, #tpu.memory_space<vmem>>, vector<2x1xf32>,
    } else {
    }
    return
  }
  func.func @transform_0(%arg0: i32, %arg1: i32, %arg2: i32) -> (i32, i32) {
    %c1_i32 = arith.constant 1 : i32
    %0 = arith.subi %c1_i32, %arg0 : i32
    %1 = arith.muli %0, %arg1 : i32
    %c0_i32 = arith.constant 0 : i32
    %2 = arith.muli %arg0, %c0_i32 : i32
    %3 = arith.addi %1, %2 : i32
    %c1_i32_0 = arith.constant 1 : i32
    %4 = arith.subi %c1_i32_0, %arg0 : i32
    %5 = arith.muli %4, %arg2 : i32
    %c0_i32_1 = arith.constant 0 : i32
    %6 = arith.muli %arg0, %c0_i32_1 : i32
    %7 = arith.addi %5, %6 : i32
    %c0_i32_2 = arith.constant 0 : i32
    return %3, %7 : i32, i32
  }
  func.func @transform_1(%arg0: i32, %arg1: i32, %arg2: i32) -> (i32, i32) {
    %c0_i32 = arith.constant 0 : i32
    %c0_i32_0 = arith.constant 0 : i32
    %c0_i32_1 = arith.constant 0 : i32
    return %c0_i32, %c0_i32_0 : i32, i32
  }
  func.func @transform_2(%arg0: i32, %arg1: i32, %arg2: i32) -> (i32, i32) {
    %c0_i32 = arith.constant 0 : i32
    %c0_i32_0 = arith.constant 0 : i32
    %c0_i32_1 = arith.constant 0 : i32
    return %c0_i32, %c0_i32_0 : i32, i32
  }
  func.func @transform_3(%arg0: i32, %arg1: i32, %arg2: i32) -> (i32, i32) {
    %c0_i32 = arith.constant 0 : i32
    %c0_i32_0 = arith.constant 0 : i32
    %c0_i32_1 = arith.constant 0 : i32
    return %c0_i32, %c0_i32_0 : i32, i32
  }
  func.func @transform_4(%arg0: i32, %arg1: i32, %arg2: i32) -> (i32, i32) {
    %c0_i32 = arith.constant 0 : i32
    %c0_i32_0 = arith.constant 0 : i32
    %c0_i32_1 = arith.constant 0 : i32
    return %c0_i32, %c0_i32_0 : i32, i32
  }
  func.func @transform_5(%arg0: i32, %arg1: i32, %arg2: i32) -> (i32, i32) {
    %c0_i32 = arith.constant 0 : i32
    %c0_i32_0 = arith.constant 0 : i32
    %c0_i32_1 = arith.constant 0 : i32
    return %c0_i32, %c0_i32_0 : i32, i32
  }
  func.func @transform_6(%arg0: i32, %arg1: i32, %arg2: i32) -> (i32, i32) {
    %c0_i32 = arith.constant 0 : i32
    %c0_i32_0 = arith.constant 0 : i32
    %c0_i32_1 = arith.constant 0 : i32
    return %c0_i32, %c0_i32_0 : i32, i32
  }
  func.func @transform_7(%arg0: i32, %arg1: i32, %arg2: i32) -> (i32, i32) {
    %0 = arith.muli %arg0, %arg1 : i32
    %c0_i32 = arith.constant 0 : i32
    %c0_i32_0 = arith.constant 0 : i32
    return %0, %c0_i32 : i32, i32
  }
  func.func @transform_8(%arg0: i32, %arg1: i32, %arg2: i32) -> (i32, i32) {
    %0 = arith.muli %arg0, %arg1 : i32
    %c0_i32 = arith.constant 0 : i32
    %c0_i32_0 = arith.constant 0 : i32
    return %0, %c0_i32 : i32, i32
  }
}

</mosaic_0001>

<bundles_post_ra>
// kernel: discriminator_forward.4
= control target key start
LH: loop header
LB: loop body
LE: loop exit
PB: predicated region body
PF: predicated region fallthrough
CT: control target
= control target key end

     0   :  { %s1957_s12 = smov 0   ;;  %s1959_s13 = smov 0   ;;  %s2169_s0 = inlined_call_operand.vmem [shape: bf16[2048,16], index: 0, kind: input, shape index: {}]   ;;  %s2170_s1 = inlined_call_operand.vmem [shape: bf16[16,128], index: 1, kind: input, shape index: {}]   ;;  %s2171_s2 = inlined_call_operand.vmem [shape: f32[1,128], index: 2, kind: input, shape index: {}]   ;;  %s2172_s3 = inlined_call_operand.vmem [shape: bf16[2048,128], index: 3, kind: output, shape index: {}]  }
   0x1   :  { %s1961_s14 = smov 0  }
   0x2 LB: > { %s25_s15 = sadd.s32 1, %s1931_s13  ;;  %p1490_p0 = scmp.ge.s32.totalorder %s1935_s14, 1  ;;  %s1935_s14 = sphi %s1961_s14, %s13_s14   ;;  %s1931_s13 = sphi %s1959_s13, %s2174_s13   ;;  %s1927_s12 = sphi %s1957_s12, %s2173_s12  }
   0x3   : > { %p27_p1 = scmp.ge.s32.totalorder %s25_s15, 4  ;;  %p155_p2 = scmp.lt.s32.totalorder %s1935_s14, 5 }
   0x5   : > { %s2176_s15 = smov (%p27_p1, %s25_s15), 0  ;;  %p156_p3 = pnand %p1490_p0, %p155_p2 }
   0x6   : > { %s1491_s18 = sshll.u32 (!%p156_p3), %s1927_s12, 6 }
   0x7   : > { %159 = sbr.rel (%p156_p3) target bundleno = 279 (0x117), region = 32  ;;  %p183_p4 = scmp.lt.s32.totalorder (!%p156_p3), %s1491_s18, 255 }
   0xc   : > { %v1661_v0 = vld [vmem:[%s2170_s1] sm:$0xff]  ;;  %s2178_s18 = smov (!%p183_p4, %s1491_s18), 255  ;;  %vm567_vm0 = vcmask 130048  }
   0xd   : > { %671 = vmatpush.bf16.msra.mxu0 %v1661_v0  ;;  %1885 = vmatpush.bf16.msra.mxu1 %v1661_v0  ;;  %s1492_s19 = sshll.u32 %s2178_s18, 2  ;;  %v2055_v35 = vld [vmem:[%s2171_s2] ss:$0 sm:$0xff] }
   0xe   : > { %1886 = vmatpush.bf16.msra.mxu2 %v1661_v0  ;;  %1887 = vmatpush.bf16.msra.mxu3 %v1661_v0  ;;  %s1986_s22 = scalar_lea.vmem %s2169_s0, %s1492_s19  ;;  %s2068_s27 = scalar_lea.vmem %s2172_s3, %s1492_s19 }
   0xf   : > { %v1662_v1 = vld [vmem:[%s1986_s22] sm:$0xff]  ;;  %v1663_v5 = vld [vmem:[%s1986_s22 + $0x8] sm:$0xff]  ;;  %v1664_v9 = vld [vmem:[%s1986_s22 + $0x10] sm:$0xff] }
  0x10   : > { %v1670_v2 = vld [vmem:[%s1986_s22 + $0x40] sm:$0xff]  ;;  %1627 = vmatmul.msk.bf16.vlgmr.msra.gmra.mxu0 %vm567_vm0, %v1662_v1  ;;  %v1671_v6 = vld [vmem:[%s1986_s22 + $0x48] sm:$0xff]  ;;  %v1672_v10 = vld [vmem:[%s1986_s22 + $0x50] sm:$0xff] }
  0x11   : > { %v1678_v3 = vld [vmem:[%s1986_s22 + $0x80] sm:$0xff]  ;;  %1635 = vmatmul.msk.bf16.vlgmr.msra.gmra.mxu1 %vm567_vm0, %v1670_v2  ;;  %v1679_v7 = vld [vmem:[%s1986_s22 + $0x88] sm:$0xff]  ;;  %v1680_v11 = vld [vmem:[%s1986_s22 + $0x90] sm:$0xff] }
  0x12   : > { %v1686_v4 = vld [vmem:[%s1986_s22 + $0xc0] sm:$0xff]  ;;  %1643 = vmatmul.msk.bf16.vlgmr.msra.gmra.mxu2 %vm567_vm0, %v1678_v3  ;;  %v1687_v8 = vld [vmem:[%s1986_s22 + $0xc8] sm:$0xff]  ;;  %v1688_v12 = vld [vmem:[%s1986_s22 + $0xd0] sm:$0xff] }
  0x13   : > { %1651 = vmatmul.msk.bf16.vlgmr.msra.gmra.mxu3 %vm567_vm0, %v1686_v4  ;;  %v1665_v13 = vld [vmem:[%s1986_s22 + $0x18] sm:$0xff]  ;;  %v1666_v17 = vld [vmem:[%s1986_s22 + $0x20] sm:$0xff]  ;;  %v1667_v21 = vld [vmem:[%s1986_s22 + $0x28] sm:$0xff] }
  0x14   : > { %v1673_v14 = vld [vmem:[%s1986_s22 + $0x58] sm:$0xff]  ;;  %v1674_v18 = vld [vmem:[%s1986_s22 + $0x60] sm:$0xff]  ;;  %v1675_v22 = vld [vmem:[%s1986_s22 + $0x68] sm:$0xff] }
  0x15   : > { %v1681_v15 = vld [vmem:[%s1986_s22 + $0x98] sm:$0xff]  ;;  %v1682_v19 = vld [vmem:[%s1986_s22 + $0xa0] sm:$0xff]  ;;  %v1683_v23 = vld [vmem:[%s1986_s22 + $0xa8] sm:$0xff] }
  0x16   : > { %v1689_v16 = vld [vmem:[%s1986_s22 + $0xd8] sm:$0xff]  ;;  %v1690_v20 = vld [vmem:[%s1986_s22 + $0xe0] sm:$0xff]  ;;  %v1691_v24 = vld [vmem:[%s1986_s22 + $0xe8] sm:$0xff] }
  0x17   : > { %v1668_v25 = vld [vmem:[%s1986_s22 + $0x30] sm:$0xff]  ;;  %v1669_v29 = vld [vmem:[%s1986_s22 + $0x38] sm:$0xff] }
  0x18   : > { %v1676_v26 = vld [vmem:[%s1986_s22 + $0x70] sm:$0xff]  ;;  %v1677_v30 = vld [vmem:[%s1986_s22 + $0x78] sm:$0xff] }
  0x19   : > { %v1684_v27 = vld [vmem:[%s1986_s22 + $0xb0] sm:$0xff]  ;;  %v1685_v31 = vld [vmem:[%s1986_s22 + $0xb8] sm:$0xff] }
  0x1a   : > { %v1692_v28 = vld [vmem:[%s1986_s22 + $0xf0] sm:$0xff]  ;;  %v1693_v32 = vld [vmem:[%s1986_s22 + $0xf8] sm:$0xff] }
  0x20   : > { %1628 = vmatmul.msk.bf16.gmra.mxu0 %vm567_vm0, %v1663_v5 }
  0x21   : > { %1636 = vmatmul.msk.bf16.gmra.mxu1 %vm567_vm0, %v1671_v6 }
  0x22   : > { %1644 = vmatmul.msk.bf16.gmra.mxu2 %vm567_vm0, %v1679_v7 }
  0x23   : > { %1652 = vmatmul.msk.bf16.gmra.mxu3 %vm567_vm0, %v1687_v8 }
  0x30   : > { %1629 = vmatmul.msk.bf16.gmra.mxu0 %vm567_vm0, %v1664_v9 }
  0x31   : > { %1637 = vmatmul.msk.bf16.gmra.mxu1 %vm567_vm0, %v1672_v10 }
  0x32   : > { %1645 = vmatmul.msk.bf16.gmra.mxu2 %vm567_vm0, %v1680_v11 }
  0x33   : > { %1653 = vmatmul.msk.bf16.gmra.mxu3 %vm567_vm0, %v1688_v12 }
  0x40   : > { %1630 = vmatmul.msk.bf16.gmra.mxu0 %vm567_vm0, %v1665_v13 }
  0x41   : > { %1638 = vmatmul.msk.bf16.gmra.mxu1 %vm567_vm0, %v1673_v14 }
  0x42   : > { %1646 = vmatmul.msk.bf16.gmra.mxu2 %vm567_vm0, %v1681_v15 }
  0x43   : > { %1654 = vmatmul.msk.bf16.gmra.mxu3 %vm567_vm0, %v1689_v16 }
  0x50   : > { %1631 = vmatmul.msk.bf16.gmra.mxu0 %vm567_vm0, %v1666_v17 }
  0x51   : > { %1639 = vmatmul.msk.bf16.gmra.mxu1 %vm567_vm0, %v1674_v18 }
  0x52   : > { %1647 = vmatmul.msk.bf16.gmra.mxu2 %vm567_vm0, %v1682_v19 }
  0x53   : > { %1655 = vmatmul.msk.bf16.gmra.mxu3 %vm567_vm0, %v1690_v20 }
  0x60   : > { %1632 = vmatmul.msk.bf16.gmra.mxu0 %vm567_vm0, %v1667_v21 }
  0x61   : > { %1640 = vmatmul.msk.bf16.gmra.mxu1 %vm567_vm0, %v1675_v22 }
  0x62   : > { %1648 = vmatmul.msk.bf16.gmra.mxu2 %vm567_vm0, %v1683_v23 }
  0x63   : > { %1656 = vmatmul.msk.bf16.gmra.mxu3 %vm567_vm0, %v1691_v24 }
  0x70   : > { %1633 = vmatmul.msk.bf16.gmra.mxu0 %vm567_vm0, %v1668_v25 }
  0x71   : > { %1641 = vmatmul.msk.bf16.gmra.mxu1 %vm567_vm0, %v1676_v26 }
  0x72   : > { %1649 = vmatmul.msk.bf16.gmra.mxu2 %vm567_vm0, %v1684_v27 }
  0x73   : > { %1657 = vmatmul.msk.bf16.gmra.mxu3 %vm567_vm0, %v1692_v28 }
  0x80   : > { %1634 = vmatmul.msk.bf16.gmra.mxu0 %vm567_vm0, %v1669_v29 }
  0x81   : > { %1642 = vmatmul.msk.bf16.gmra.mxu1 %vm567_vm0, %v1677_v30 }
  0x82   : > { %1650 = vmatmul.msk.bf16.gmra.mxu2 %vm567_vm0, %v1685_v31 }
  0x83   : > { %1658 = vmatmul.msk.bf16.gmra.mxu3 %vm567_vm0, %v1693_v32 }
  0x8d   : > { %v673_v33 = vpop.f32.mrf.mxu0 }
  0x8e   : > { %v713_v34 = vpop.f32.mrf.mxu1  ;;  %v1032_v36 = vadd.f32 %v2055_v35, %v673_v33 }
  0x8f   : > { %v1048_v37 = vadd.f32 %v2055_v35, %v713_v34 }
  0x90   : > { %v1160_v42 = vmul.f32 0.2, %v1032_v36  ;;  %vm1096_vm1 = vcmp.gt.f32.partialorder %v1032_v36, 0.0 }
  0x91   : > { %v1176_v43 = vmul.f32 0.2, %v1048_v37  ;;  %vm1112_vm2 = vcmp.gt.f32.partialorder %v1048_v37, 0.0 }
  0x92   : > { %v1224_v50 = vsel %vm1096_vm1, %v1032_v36, %v1160_v42 }
  0x93   : > { %v1240_v51 = vsel %vm1112_vm2, %v1048_v37, %v1176_v43 }
  0x95   : > { %v753_v38 = vpop.f32.mrf.mxu2  ;;  %v675_v40 = vpop.f32.mrf.mxu0 }
  0x96   : > { %v793_v39 = vpop.f32.mrf.mxu3  ;;  %v715_v41 = vpop.f32.mrf.mxu1  ;;  %v1033_v44 = vadd.f32 %v2055_v35, %v675_v40  ;;  %v1064_v48 = vadd.f32 %v2055_v35, %v753_v38 }
  0x97   : > { %v1049_v45 = vadd.f32 %v2055_v35, %v715_v41  ;;  %v1080_v49 = vadd.f32 %v2055_v35, %v793_v39 }
  0x98   : > { %vm1097_vm3 = vcmp.gt.f32.partialorder %v1033_v44, 0.0  ;;  %v1161_v46 = vmul.f32 0.2, %v1033_v44  ;;  %v1192_v58 = vmul.f32 0.2, %v1064_v48  ;;  %vm1128_vm5 = vcmp.gt.f32.partialorder %v1064_v48, 0.0 }
  0x99   : > { %vm1113_vm4 = vcmp.gt.f32.partialorder %v1049_v45, 0.0  ;;  %v1177_v47 = vmul.f32 0.2, %v1049_v45  ;;  %v1208_v59 = vmul.f32 0.2, %v1080_v49  ;;  %vm1144_vm6 = vcmp.gt.f32.partialorder %v1080_v49, 0.0 }
  0x9a   : > { %v1225_v52 = vsel %vm1097_vm3, %v1033_v44, %v1161_v46  ;;  %v1256_v2 = vsel %vm1128_vm5, %v1064_v48, %v1192_v58 }
  0x9b   : > { %v1241_v53 = vsel %vm1113_vm4, %v1049_v45, %v1177_v47  ;;  %v1697_v54 = vpack.c.bf16 %v1225_v52, %v1224_v50  ;;  %v1272_v3 = vsel %vm1144_vm6, %v1080_v49, %v1208_v59 }
  0x9c   : > { %v1737_v55 = vpack.c.bf16 %v1241_v53, %v1240_v51 }
  0x9d   : > { %v755_v56 = vpop.f32.mrf.mxu2  ;;  %1698 = vst [vmem:[%s2068_s27] sm:$0xff] %v1697_v54   ;;  %v678_v62 = vpop.f32.mrf.mxu0 }
  0x9e   : > { %v795_v57 = vpop.f32.mrf.mxu3  ;;  %v1065_v60 = vadd.f32 %v2055_v35, %v755_v56  ;;  %v718_v63 = vpop.f32.mrf.mxu1  ;;  %1861 = vst [vmem:[%s2068_s27 + $0x40] sm:$0xff] %v1737_v55   ;;  %v1034_v8 = vadd.f32 %v2055_v35, %v678_v62 }
  0x9f   : > { %v1081_v61 = vadd.f32 %v2055_v35, %v795_v57  ;;  %v1050_v9 = vadd.f32 %v2055_v35, %v718_v63 }
  0xa0   : > { %vm1129_vm7 = vcmp.gt.f32.partialorder %v1065_v60, 0.0  ;;  %v1193_v0 = vmul.f32 0.2, %v1065_v60  ;;  %v1162_v14 = vmul.f32 0.2, %v1034_v8  ;;  %vm1098_vm9 = vcmp.gt.f32.partialorder %v1034_v8, 0.0 }
  0xa1   : > { %vm1145_vm8 = vcmp.gt.f32.partialorder %v1081_v61, 0.0  ;;  %v1209_v1 = vmul.f32 0.2, %v1081_v61  ;;  %v1178_v15 = vmul.f32 0.2, %v1050_v9  ;;  %vm1114_vm10 = vcmp.gt.f32.partialorder %v1050_v9, 0.0 }
  0xa2   : > { %v1257_v4 = vsel %vm1129_vm7, %v1065_v60, %v1193_v0  ;;  %v1226_v22 = vsel %vm1098_vm9, %v1034_v8, %v1162_v14 }
  0xa3   : > { %v1273_v5 = vsel %vm1145_vm8, %v1081_v61, %v1209_v1  ;;  %v1777_v6 = vpack.c.bf16 %v1257_v4, %v1256_v2  ;;  %v1242_v23 = vsel %vm1114_vm10, %v1050_v9, %v1178_v15 }
  0xa4   : > { %v1817_v7 = vpack.c.bf16 %v1273_v5, %v1272_v3 }
  0xa5   : > { %1869 = vst [vmem:[%s2068_s27 + $0x80] sm:$0xff] %v1777_v6   ;;  %v758_v10 = vpop.f32.mrf.mxu2  ;;  %v680_v12 = vpop.f32.mrf.mxu0 }
  0xa6   : > { %v798_v11 = vpop.f32.mrf.mxu3  ;;  %1877 = vst [vmem:[%s2068_s27 + $0xc0] sm:$0xff] %v1817_v7   ;;  %v720_v13 = vpop.f32.mrf.mxu1  ;;  %v1035_v16 = vadd.f32 %v2055_v35, %v680_v12  ;;  %v1066_v20 = vadd.f32 %v2055_v35, %v758_v10 }
  0xa7   : > { %v1051_v17 = vadd.f32 %v2055_v35, %v720_v13  ;;  %v1082_v21 = vadd.f32 %v2055_v35, %v798_v11 }
  0xa8   : > { %vm1099_vm11 = vcmp.gt.f32.partialorder %v1035_v16, 0.0  ;;  %v1163_v18 = vmul.f32 0.2, %v1035_v16  ;;  %v1194_v30 = vmul.f32 0.2, %v1066_v20  ;;  %vm1130_vm13 = vcmp.gt.f32.partialorder %v1066_v20, 0.0 }
  0xa9   : > { %vm1115_vm12 = vcmp.gt.f32.partialorder %v1051_v17, 0.0  ;;  %v1179_v19 = vmul.f32 0.2, %v1051_v17  ;;  %v1210_v31 = vmul.f32 0.2, %v1082_v21  ;;  %vm1146_vm14 = vcmp.gt.f32.partialorder %v1082_v21, 0.0 }
  0xaa   : > { %v1227_v24 = vsel %vm1099_vm11, %v1035_v16, %v1163_v18  ;;  %v1258_v39 = vsel %vm1130_vm13, %v1066_v20, %v1194_v30 }
  0xab   : > { %v1243_v25 = vsel %vm1115_vm12, %v1051_v17, %v1179_v19  ;;  %v1702_v26 = vpack.c.bf16 %v1227_v24, %v1226_v22  ;;  %v1274_v40 = vsel %vm1146_vm14, %v1082_v21, %v1210_v31 }
  0xac   : > { %v1742_v27 = vpack.c.bf16 %v1243_v25, %v1242_v23 }
  0xad   : > { %v760_v28 = vpop.f32.mrf.mxu2  ;;  %1854 = vst [vmem:[%s2068_s27 + $0x8] sm:$0xff] %v1702_v26   ;;  %v683_v34 = vpop.f32.mrf.mxu0 }
  0xae   : > { %v800_v29 = vpop.f32.mrf.mxu3  ;;  %v1067_v32 = vadd.f32 %v2055_v35, %v760_v28  ;;  %v723_v36 = vpop.f32.mrf.mxu1  ;;  %1862 = vst [vmem:[%s2068_s27 + $0x48] sm:$0xff] %v1742_v27   ;;  %v1036_v45 = vadd.f32 %v2055_v35, %v683_v34 }
  0xaf   : > { %v1083_v33 = vadd.f32 %v2055_v35, %v800_v29  ;;  %v1052_v46 = vadd.f32 %v2055_v35, %v723_v36 }
  0xb0   : > { %vm1131_vm15 = vcmp.gt.f32.partialorder %v1067_v32, 0.0  ;;  %v1195_v37 = vmul.f32 0.2, %v1067_v32  ;;  %v1164_v51 = vmul.f32 0.2, %v1036_v45  ;;  %vm1100_vm1 = vcmp.gt.f32.partialorder %v1036_v45, 0.0 }
  0xb1   : > { %vm1147_vm0 = vcmp.gt.f32.partialorder %v1083_v33, 0.0  ;;  %v1211_v38 = vmul.f32 0.2, %v1083_v33  ;;  %v1180_v52 = vmul.f32 0.2, %v1052_v46  ;;  %vm1116_vm2 = vcmp.gt.f32.partialorder %v1052_v46, 0.0 }
  0xb2   : > { %v1259_v41 = vsel %vm1131_vm15, %v1067_v32, %v1195_v37  ;;  %v1228_v59 = vsel %vm1100_vm1, %v1036_v45, %v1164_v51 }
  0xb3   : > { %v1275_v42 = vsel %vm1147_vm0, %v1083_v33, %v1211_v38  ;;  %v1782_v43 = vpack.c.bf16 %v1259_v41, %v1258_v39  ;;  %v1244_v60 = vsel %vm1116_vm2, %v1052_v46, %v1180_v52 }
  0xb4   : > { %v1822_v44 = vpack.c.bf16 %v1275_v42, %v1274_v40 }
  0xb5   : > { %1870 = vst [vmem:[%s2068_s27 + $0x88] sm:$0xff] %v1782_v43   ;;  %v763_v47 = vpop.f32.mrf.mxu2  ;;  %v685_v49 = vpop.f32.mrf.mxu0 }
  0xb6   : > { %v803_v48 = vpop.f32.mrf.mxu3  ;;  %1878 = vst [vmem:[%s2068_s27 + $0xc8] sm:$0xff] %v1822_v44   ;;  %v725_v50 = vpop.f32.mrf.mxu1  ;;  %v1037_v53 = vadd.f32 %v2055_v35, %v685_v49  ;;  %v1068_v57 = vadd.f32 %v2055_v35, %v763_v47 }
  0xb7   : > { %v1053_v54 = vadd.f32 %v2055_v35, %v725_v50  ;;  %v1084_v58 = vadd.f32 %v2055_v35, %v803_v48 }
  0xb8   : > { %vm1101_vm3 = vcmp.gt.f32.partialorder %v1037_v53, 0.0  ;;  %v1165_v55 = vmul.f32 0.2, %v1037_v53  ;;  %v1196_v3 = vmul.f32 0.2, %v1068_v57  ;;  %vm1132_vm5 = vcmp.gt.f32.partialorder %v1068_v57, 0.0 }
  0xb9   : > { %vm1117_vm4 = vcmp.gt.f32.partialorder %v1053_v54, 0.0  ;;  %v1181_v56 = vmul.f32 0.2, %v1053_v54  ;;  %v1212_v4 = vmul.f32 0.2, %v1084_v58  ;;  %vm1148_vm6 = vcmp.gt.f32.partialorder %v1084_v58, 0.0 }
  0xba   : > { %v1229_v61 = vsel %vm1101_vm3, %v1037_v53, %v1165_v55  ;;  %v1260_v11 = vsel %vm1132_vm5, %v1068_v57, %v1196_v3 }
  0xbb   : > { %v1245_v62 = vsel %vm1117_vm4, %v1053_v54, %v1181_v56  ;;  %v1707_v63 = vpack.c.bf16 %v1229_v61, %v1228_v59  ;;  %v1276_v12 = vsel %vm1148_vm6, %v1084_v58, %v1212_v4 }
  0xbc   : > { %v1747_v0 = vpack.c.bf16 %v1245_v62, %v1244_v60 }
  0xbd   : > { %v765_v1 = vpop.f32.mrf.mxu2  ;;  %1855 = vst [vmem:[%s2068_s27 + $0x10] sm:$0xff] %v1707_v63   ;;  %v688_v7 = vpop.f32.mrf.mxu0 }
  0xbe   : > { %v805_v2 = vpop.f32.mrf.mxu3  ;;  %v1069_v5 = vadd.f32 %v2055_v35, %v765_v1  ;;  %v728_v8 = vpop.f32.mrf.mxu1  ;;  %1863 = vst [vmem:[%s2068_s27 + $0x50] sm:$0xff] %v1747_v0   ;;  %v1038_v17 = vadd.f32 %v2055_v35, %v688_v7 }
  0xbf   : > { %v1085_v6 = vadd.f32 %v2055_v35, %v805_v2  ;;  %v1054_v18 = vadd.f32 %v2055_v35, %v728_v8 }
  0xc0   : > { %vm1133_vm7 = vcmp.gt.f32.partialorder %v1069_v5, 0.0  ;;  %v1197_v9 = vmul.f32 0.2, %v1069_v5  ;;  %v1166_v23 = vmul.f32 0.2, %v1038_v17  ;;  %vm1102_vm9 = vcmp.gt.f32.partialorder %v1038_v17, 0.0 }
  0xc1   : > { %vm1149_vm8 = vcmp.gt.f32.partialorder %v1085_v6, 0.0  ;;  %v1213_v10 = vmul.f32 0.2, %v1085_v6  ;;  %v1182_v24 = vmul.f32 0.2, %v1054_v18  ;;  %vm1118_vm10 = vcmp.gt.f32.partialorder %v1054_v18, 0.0 }
  0xc2   : > { %v1261_v13 = vsel %vm1133_vm7, %v1069_v5, %v1197_v9  ;;  %v1230_v31 = vsel %vm1102_vm9, %v1038_v17, %v1166_v23 }
  0xc3   : > { %v1277_v14 = vsel %vm1149_vm8, %v1085_v6, %v1213_v10  ;;  %v1787_v15 = vpack.c.bf16 %v1261_v13, %v1260_v11  ;;  %v1246_v32 = vsel %vm1118_vm10, %v1054_v18, %v1182_v24 }
  0xc4   : > { %v1827_v16 = vpack.c.bf16 %v1277_v14, %v1276_v12 }
  0xc5   : > { %1871 = vst [vmem:[%s2068_s27 + $0x90] sm:$0xff] %v1787_v15   ;;  %v768_v19 = vpop.f32.mrf.mxu2  ;;  %v690_v21 = vpop.f32.mrf.mxu0 }
  0xc6   : > { %v808_v20 = vpop.f32.mrf.mxu3  ;;  %1879 = vst [vmem:[%s2068_s27 + $0xd0] sm:$0xff] %v1827_v16   ;;  %v730_v22 = vpop.f32.mrf.mxu1  ;;  %v1039_v25 = vadd.f32 %v2055_v35, %v690_v21  ;;  %v1070_v29 = vadd.f32 %v2055_v35, %v768_v19 }
  0xc7   : > { %v1055_v26 = vadd.f32 %v2055_v35, %v730_v22  ;;  %v1086_v30 = vadd.f32 %v2055_v35, %v808_v20 }
  0xc8   : > { %vm1103_vm11 = vcmp.gt.f32.partialorder %v1039_v25, 0.0  ;;  %v1167_v27 = vmul.f32 0.2, %v1039_v25  ;;  %v1198_v40 = vmul.f32 0.2, %v1070_v29  ;;  %vm1134_vm13 = vcmp.gt.f32.partialorder %v1070_v29, 0.0 }
  0xc9   : > { %vm1119_vm12 = vcmp.gt.f32.partialorder %v1055_v26, 0.0  ;;  %v1183_v28 = vmul.f32 0.2, %v1055_v26  ;;  %v1214_v41 = vmul.f32 0.2, %v1086_v30  ;;  %vm1150_vm14 = vcmp.gt.f32.partialorder %v1086_v30, 0.0 }
  0xca   : > { %v1231_v33 = vsel %vm1103_vm11, %v1039_v25, %v1167_v27  ;;  %v1262_v48 = vsel %vm1134_vm13, %v1070_v29, %v1198_v40 }
  0xcb   : > { %v1247_v34 = vsel %vm1119_vm12, %v1055_v26, %v1183_v28  ;;  %v1712_v36 = vpack.c.bf16 %v1231_v33, %v1230_v31  ;;  %v1278_v49 = vsel %vm1150_vm14, %v1086_v30, %v1214_v41 }
  0xcc   : > { %v1752_v37 = vpack.c.bf16 %v1247_v34, %v1246_v32 }
  0xcd   : > { %v770_v38 = vpop.f32.mrf.mxu2  ;;  %1856 = vst [vmem:[%s2068_s27 + $0x18] sm:$0xff] %v1712_v36   ;;  %v693_v44 = vpop.f32.mrf.mxu0 }
  0xce   : > { %v810_v39 = vpop.f32.mrf.mxu3  ;;  %v1071_v42 = vadd.f32 %v2055_v35, %v770_v38  ;;  %v733_v45 = vpop.f32.mrf.mxu1  ;;  %1864 = vst [vmem:[%s2068_s27 + $0x58] sm:$0xff] %v1752_v37   ;;  %v1040_v54 = vadd.f32 %v2055_v35, %v693_v44 }
  0xcf   : > { %v1087_v43 = vadd.f32 %v2055_v35, %v810_v39  ;;  %v1056_v55 = vadd.f32 %v2055_v35, %v733_v45 }
  0xd0   : > { %vm1135_vm15 = vcmp.gt.f32.partialorder %v1071_v42, 0.0  ;;  %v1199_v46 = vmul.f32 0.2, %v1071_v42  ;;  %v1168_v60 = vmul.f32 0.2, %v1040_v54  ;;  %vm1104_vm1 = vcmp.gt.f32.partialorder %v1040_v54, 0.0 }
  0xd1   : > { %vm1151_vm0 = vcmp.gt.f32.partialorder %v1087_v43, 0.0  ;;  %v1215_v47 = vmul.f32 0.2, %v1087_v43  ;;  %v1184_v61 = vmul.f32 0.2, %v1056_v55  ;;  %vm1120_vm2 = vcmp.gt.f32.partialorder %v1056_v55, 0.0 }
  0xd2   : > { %v1263_v50 = vsel %vm1135_vm15, %v1071_v42, %v1199_v46  ;;  %v1232_v4 = vsel %vm1104_vm1, %v1040_v54, %v1168_v60 }
  0xd3   : > { %v1279_v51 = vsel %vm1151_vm0, %v1087_v43, %v1215_v47  ;;  %v1792_v52 = vpack.c.bf16 %v1263_v50, %v1262_v48  ;;  %v1248_v5 = vsel %vm1120_vm2, %v1056_v55, %v1184_v61 }
  0xd4   : > { %v1832_v53 = vpack.c.bf16 %v1279_v51, %v1278_v49 }
  0xd5   : > { %1872 = vst [vmem:[%s2068_s27 + $0x98] sm:$0xff] %v1792_v52   ;;  %v773_v56 = vpop.f32.mrf.mxu2  ;;  %v695_v58 = vpop.f32.mrf.mxu0 }
  0xd6   : > { %v813_v57 = vpop.f32.mrf.mxu3  ;;  %1880 = vst [vmem:[%s2068_s27 + $0xd8] sm:$0xff] %v1832_v53   ;;  %v735_v59 = vpop.f32.mrf.mxu1  ;;  %v1041_v62 = vadd.f32 %v2055_v35, %v695_v58  ;;  %v1072_v2 = vadd.f32 %v2055_v35, %v773_v56 }
  0xd7   : > { %v1057_v63 = vadd.f32 %v2055_v35, %v735_v59  ;;  %v1088_v3 = vadd.f32 %v2055_v35, %v813_v57 }
  0xd8   : > { %vm1105_vm3 = vcmp.gt.f32.partialorder %v1041_v62, 0.0  ;;  %v1169_v0 = vmul.f32 0.2, %v1041_v62  ;;  %v1200_v12 = vmul.f32 0.2, %v1072_v2  ;;  %vm1136_vm5 = vcmp.gt.f32.partialorder %v1072_v2, 0.0 }
  0xd9   : > { %vm1121_vm4 = vcmp.gt.f32.partialorder %v1057_v63, 0.0  ;;  %v1185_v1 = vmul.f32 0.2, %v1057_v63  ;;  %v1216_v13 = vmul.f32 0.2, %v1088_v3  ;;  %vm1152_vm6 = vcmp.gt.f32.partialorder %v1088_v3, 0.0 }
  0xda   : > { %v1233_v6 = vsel %vm1105_vm3, %v1041_v62, %v1169_v0  ;;  %v1264_v20 = vsel %vm1136_vm5, %v1072_v2, %v1200_v12 }
  0xdb   : > { %v1249_v7 = vsel %vm1121_vm4, %v1057_v63, %v1185_v1  ;;  %v1717_v8 = vpack.c.bf16 %v1233_v6, %v1232_v4  ;;  %v1280_v21 = vsel %vm1152_vm6, %v1088_v3, %v1216_v13 }
  0xdc   : > { %v1757_v9 = vpack.c.bf16 %v1249_v7, %v1248_v5 }
  0xdd   : > { %v775_v10 = vpop.f32.mrf.mxu2  ;;  %1857 = vst [vmem:[%s2068_s27 + $0x20] sm:$0xff] %v1717_v8   ;;  %v698_v16 = vpop.f32.mrf.mxu0 }
  0xde   : > { %v815_v11 = vpop.f32.mrf.mxu3  ;;  %v1073_v14 = vadd.f32 %v2055_v35, %v775_v10  ;;  %v738_v17 = vpop.f32.mrf.mxu1  ;;  %1865 = vst [vmem:[%s2068_s27 + $0x60] sm:$0xff] %v1757_v9   ;;  %v1042_v26 = vadd.f32 %v2055_v35, %v698_v16 }
  0xdf   : > { %v1089_v15 = vadd.f32 %v2055_v35, %v815_v11  ;;  %v1058_v27 = vadd.f32 %v2055_v35, %v738_v17 }
  0xe0   : > { %vm1137_vm7 = vcmp.gt.f32.partialorder %v1073_v14, 0.0  ;;  %v1201_v18 = vmul.f32 0.2, %v1073_v14  ;;  %v1170_v32 = vmul.f32 0.2, %v1042_v26  ;;  %vm1106_vm9 = vcmp.gt.f32.partialorder %v1042_v26, 0.0 }
  0xe1   : > { %vm1153_vm8 = vcmp.gt.f32.partialorder %v1089_v15, 0.0  ;;  %v1217_v19 = vmul.f32 0.2, %v1089_v15  ;;  %v1186_v33 = vmul.f32 0.2, %v1058_v27  ;;  %vm1122_vm10 = vcmp.gt.f32.partialorder %v1058_v27, 0.0 }
  0xe2   : > { %v1265_v22 = vsel %vm1137_vm7, %v1073_v14, %v1201_v18  ;;  %v1234_v41 = vsel %vm1106_vm9, %v1042_v26, %v1170_v32 }
  0xe3   : > { %v1281_v23 = vsel %vm1153_vm8, %v1089_v15, %v1217_v19  ;;  %v1797_v24 = vpack.c.bf16 %v1265_v22, %v1264_v20  ;;  %v1250_v42 = vsel %vm1122_vm10, %v1058_v27, %v1186_v33 }
  0xe4   : > { %v1837_v25 = vpack.c.bf16 %v1281_v23, %v1280_v21 }
  0xe5   : > { %1873 = vst [vmem:[%s2068_s27 + $0xa0] sm:$0xff] %v1797_v24   ;;  %v778_v28 = vpop.f32.mrf.mxu2  ;;  %v700_v30 = vpop.f32.mrf.mxu0 }
  0xe6   : > { %v818_v29 = vpop.f32.mrf.mxu3  ;;  %1881 = vst [vmem:[%s2068_s27 + $0xe0] sm:$0xff] %v1837_v25   ;;  %v740_v31 = vpop.f32.mrf.mxu1  ;;  %v1043_v34 = vadd.f32 %v2055_v35, %v700_v30  ;;  %v1074_v39 = vadd.f32 %v2055_v35, %v778_v28 }
  0xe7   : > { %v1059_v36 = vadd.f32 %v2055_v35, %v740_v31  ;;  %v1090_v40 = vadd.f32 %v2055_v35, %v818_v29 }
  0xe8   : > { %vm1107_vm11 = vcmp.gt.f32.partialorder %v1043_v34, 0.0  ;;  %v1171_v37 = vmul.f32 0.2, %v1043_v34  ;;  %v1202_v49 = vmul.f32 0.2, %v1074_v39  ;;  %vm1138_vm13 = vcmp.gt.f32.partialorder %v1074_v39, 0.0 }
  0xe9   : > { %vm1123_vm12 = vcmp.gt.f32.partialorder %v1059_v36, 0.0  ;;  %v1187_v38 = vmul.f32 0.2, %v1059_v36  ;;  %v1218_v50 = vmul.f32 0.2, %v1090_v40  ;;  %vm1154_vm14 = vcmp.gt.f32.partialorder %v1090_v40, 0.0 }
  0xea   : > { %v1235_v43 = vsel %vm1107_vm11, %v1043_v34, %v1171_v37  ;;  %v1266_v57 = vsel %vm1138_vm13, %v1074_v39, %v1202_v49 }
  0xeb   : > { %v1251_v44 = vsel %vm1123_vm12, %v1059_v36, %v1187_v38  ;;  %v1722_v45 = vpack.c.bf16 %v1235_v43, %v1234_v41  ;;  %v1282_v58 = vsel %vm1154_vm14, %v1090_v40, %v1218_v50 }
  0xec   : > { %v1762_v46 = vpack.c.bf16 %v1251_v44, %v1250_v42 }
  0xed   : > { %v780_v47 = vpop.f32.mrf.mxu2  ;;  %1858 = vst [vmem:[%s2068_s27 + $0x28] sm:$0xff] %v1722_v45   ;;  %v703_v53 = vpop.f32.mrf.mxu0 }
  0xee   : > { %v820_v48 = vpop.f32.mrf.mxu3  ;;  %v1075_v51 = vadd.f32 %v2055_v35, %v780_v47  ;;  %v743_v54 = vpop.f32.mrf.mxu1  ;;  %1866 = vst [vmem:[%s2068_s27 + $0x68] sm:$0xff] %v1762_v46   ;;  %v1044_v63 = vadd.f32 %v2055_v35, %v703_v53 }
  0xef   : > { %v1091_v52 = vadd.f32 %v2055_v35, %v820_v48  ;;  %v1060_v0 = vadd.f32 %v2055_v35, %v743_v54 }
  0xf0   : > { %vm1139_vm15 = vcmp.gt.f32.partialorder %v1075_v51, 0.0  ;;  %v1203_v55 = vmul.f32 0.2, %v1075_v51  ;;  %v1172_v5 = vmul.f32 0.2, %v1044_v63  ;;  %vm1108_vm1 = vcmp.gt.f32.partialorder %v1044_v63, 0.0 }
  0xf1   : > { %vm1155_vm0 = vcmp.gt.f32.partialorder %v1091_v52, 0.0  ;;  %v1219_v56 = vmul.f32 0.2, %v1091_v52  ;;  %v1188_v6 = vmul.f32 0.2, %v1060_v0  ;;  %vm1124_vm2 = vcmp.gt.f32.partialorder %v1060_v0, 0.0 }
  0xf2   : > { %v1267_v59 = vsel %vm1139_vm15, %v1075_v51, %v1203_v55  ;;  %v1236_v13 = vsel %vm1108_vm1, %v1044_v63, %v1172_v5 }
  0xf3   : > { %v1283_v60 = vsel %vm1155_vm0, %v1091_v52, %v1219_v56  ;;  %v1802_v61 = vpack.c.bf16 %v1267_v59, %v1266_v57  ;;  %v1252_v14 = vsel %vm1124_vm2, %v1060_v0, %v1188_v6 }
  0xf4   : > { %v1842_v62 = vpack.c.bf16 %v1283_v60, %v1282_v58 }
  0xf5   : > { %1874 = vst [vmem:[%s2068_s27 + $0xa8] sm:$0xff] %v1802_v61   ;;  %v783_v1 = vpop.f32.mrf.mxu2  ;;  %v705_v3 = vpop.f32.mrf.mxu0 }
  0xf6   : > { %v823_v2 = vpop.f32.mrf.mxu3  ;;  %1882 = vst [vmem:[%s2068_s27 + $0xe8] sm:$0xff] %v1842_v62   ;;  %v745_v4 = vpop.f32.mrf.mxu1  ;;  %v1045_v7 = vadd.f32 %v2055_v35, %v705_v3  ;;  %v1076_v11 = vadd.f32 %v2055_v35, %v783_v1 }
  0xf7   : > { %v1061_v8 = vadd.f32 %v2055_v35, %v745_v4  ;;  %v1092_v12 = vadd.f32 %v2055_v35, %v823_v2 }
  0xf8   : > { %vm1109_vm3 = vcmp.gt.f32.partialorder %v1045_v7, 0.0  ;;  %v1173_v9 = vmul.f32 0.2, %v1045_v7  ;;  %v1204_v21 = vmul.f32 0.2, %v1076_v11  ;;  %vm1140_vm5 = vcmp.gt.f32.partialorder %v1076_v11, 0.0 }
  0xf9   : > { %vm1125_vm4 = vcmp.gt.f32.partialorder %v1061_v8, 0.0  ;;  %v1189_v10 = vmul.f32 0.2, %v1061_v8  ;;  %v1220_v22 = vmul.f32 0.2, %v1092_v12  ;;  %vm1156_vm6 = vcmp.gt.f32.partialorder %v1092_v12, 0.0 }
  0xfa   : > { %v1237_v15 = vsel %vm1109_vm3, %v1045_v7, %v1173_v9  ;;  %v1268_v29 = vsel %vm1140_vm5, %v1076_v11, %v1204_v21 }
  0xfb   : > { %v1253_v16 = vsel %vm1125_vm4, %v1061_v8, %v1189_v10  ;;  %v1727_v17 = vpack.c.bf16 %v1237_v15, %v1236_v13  ;;  %v1284_v30 = vsel %vm1156_vm6, %v1092_v12, %v1220_v22 }
  0xfc   : > { %v1767_v18 = vpack.c.bf16 %v1253_v16, %v1252_v14 }
  0xfd   : > { %v785_v19 = vpop.f32.mrf.mxu2  ;;  %1859 = vst [vmem:[%s2068_s27 + $0x30] sm:$0xff] %v1727_v17   ;;  %v708_v25 = vpop.f32.mrf.mxu0 }
  0xfe   : > { %v825_v20 = vpop.f32.mrf.mxu3  ;;  %v1077_v23 = vadd.f32 %v2055_v35, %v785_v19  ;;  %v748_v26 = vpop.f32.mrf.mxu1  ;;  %1867 = vst [vmem:[%s2068_s27 + $0x70] sm:$0xff] %v1767_v18   ;;  %v1046_v36 = vadd.f32 %v2055_v35, %v708_v25 }
  0xff   : > { %v1093_v24 = vadd.f32 %v2055_v35, %v825_v20  ;;  %v1062_v37 = vadd.f32 %v2055_v35, %v748_v26 }
 0x100   : > { %vm1141_vm7 = vcmp.gt.f32.partialorder %v1077_v23, 0.0  ;;  %v1205_v27 = vmul.f32 0.2, %v1077_v23  ;;  %v1174_v42 = vmul.f32 0.2, %v1046_v36  ;;  %vm1110_vm9 = vcmp.gt.f32.partialorder %v1046_v36, 0.0 }
 0x101   : > { %vm1157_vm8 = vcmp.gt.f32.partialorder %v1093_v24, 0.0  ;;  %v1221_v28 = vmul.f32 0.2, %v1093_v24  ;;  %v1190_v43 = vmul.f32 0.2, %v1062_v37  ;;  %vm1126_vm10 = vcmp.gt.f32.partialorder %v1062_v37, 0.0 }
 0x102   : > { %v1269_v31 = vsel %vm1141_vm7, %v1077_v23, %v1205_v27  ;;  %v1238_v50 = vsel %vm1110_vm9, %v1046_v36, %v1174_v42 }
 0x103   : > { %v1285_v32 = vsel %vm1157_vm8, %v1093_v24, %v1221_v28  ;;  %v1807_v33 = vpack.c.bf16 %v1269_v31, %v1268_v29  ;;  %v1254_v51 = vsel %vm1126_vm10, %v1062_v37, %v1190_v43 }
 0x104   : > { %v1847_v34 = vpack.c.bf16 %v1285_v32, %v1284_v30 }
 0x105   : > { %1875 = vst [vmem:[%s2068_s27 + $0xb0] sm:$0xff] %v1807_v33   ;;  %v788_v38 = vpop.f32.mrf.mxu2  ;;  %v710_v40 = vpop.f32.mrf.mxu0 }
 0x106   : > { %v828_v39 = vpop.f32.mrf.mxu3  ;;  %1883 = vst [vmem:[%s2068_s27 + $0xf0] sm:$0xff] %v1847_v34   ;;  %v750_v41 = vpop.f32.mrf.mxu1  ;;  %v1047_v44 = vadd.f32 %v2055_v35, %v710_v40  ;;  %v1078_v48 = vadd.f32 %v2055_v35, %v788_v38 }
 0x107   : > { %v1063_v45 = vadd.f32 %v2055_v35, %v750_v41  ;;  %v1094_v49 = vadd.f32 %v2055_v35, %v828_v39 }
 0x108   : > { %vm1111_vm11 = vcmp.gt.f32.partialorder %v1047_v44, 0.0  ;;  %v1175_v46 = vmul.f32 0.2, %v1047_v44  ;;  %v1206_v58 = vmul.f32 0.2, %v1078_v48  ;;  %vm1142_vm13 = vcmp.gt.f32.partialorder %v1078_v48, 0.0 }
 0x109   : > { %vm1127_vm12 = vcmp.gt.f32.partialorder %v1063_v45, 0.0  ;;  %v1191_v47 = vmul.f32 0.2, %v1063_v45  ;;  %v1222_v59 = vmul.f32 0.2, %v1094_v49  ;;  %vm1158_vm14 = vcmp.gt.f32.partialorder %v1094_v49, 0.0 }
 0x10a   : > { %v1239_v52 = vsel %vm1111_vm11, %v1047_v44, %v1175_v46  ;;  %v1270_v0 = vsel %vm1142_vm13, %v1078_v48, %v1206_v58 }
 0x10b   : > { %v1255_v53 = vsel %vm1127_vm12, %v1063_v45, %v1191_v47  ;;  %v1732_v54 = vpack.c.bf16 %v1239_v52, %v1238_v50  ;;  %v1286_v1 = vsel %vm1158_vm14, %v1094_v49, %v1222_v59 }
 0x10c   : > { %v1772_v55 = vpack.c.bf16 %v1255_v53, %v1254_v51 }
 0x10d   : > { %v790_v56 = vpop.f32.mrf.mxu2  ;;  %1860 = vst [vmem:[%s2068_s27 + $0x38] sm:$0xff] %v1732_v54  }
 0x10e   : > { %v830_v57 = vpop.f32.mrf.mxu3  ;;  %v1079_v60 = vadd.f32 %v2055_v35, %v790_v56  ;;  %1868 = vst [vmem:[%s2068_s27 + $0x78] sm:$0xff] %v1772_v55  }
 0x10f   : > { %v1095_v61 = vadd.f32 %v2055_v35, %v830_v57 }
 0x110   : > { %vm1143_vm15 = vcmp.gt.f32.partialorder %v1079_v60, 0.0  ;;  %v1207_v62 = vmul.f32 0.2, %v1079_v60 }
 0x111   : > { %vm1159_vm0 = vcmp.gt.f32.partialorder %v1095_v61, 0.0  ;;  %v1223_v63 = vmul.f32 0.2, %v1095_v61 }
 0x112   : > { %v1271_v2 = vsel %vm1143_vm15, %v1079_v60, %v1207_v62 }
 0x113   : > { %v1287_v3 = vsel %vm1159_vm0, %v1095_v61, %v1223_v63  ;;  %v1812_v4 = vpack.c.bf16 %v1271_v2, %v1270_v0 }
 0x114   : > { %v1852_v5 = vpack.c.bf16 %v1287_v3, %v1286_v1 }
 0x115   : > { %1876 = vst [vmem:[%s2068_s27 + $0xb8] sm:$0xff] %v1812_v4  }
 0x116   : > { %1884 = vst [vmem:[%s2068_s27 + $0xf8] sm:$0xff] %v1852_v5  }
 0x117 PF: > { %s13_s14 = sadd.s32 1, %s1935_s14   ;;  %s2173_s12 = smov %s1931_s13 }
 0x118   : > { %p10_p5 = scmp.ge.s32.totalorder %s13_s14, 6   ;;  %s2174_s13 = smov %s2176_s15 }
 0x11a   :  { %12 = sbr.rel (!%p10_p5) target bundleno = 2 (0x2), region = 71 }

// kernel: discriminator_forward.5
= control target key start
LH: loop header
LB: loop body
LE: loop exit
PB: predicated region body
PF: predicated region fallthrough
CT: control target
= control target key end

     0   :  { %s3671_s18 = smov 0   ;;  %s3673_s19 = smov 0   ;;  %s4806_s0 = inlined_call_operand.vmem [shape: bf16[512,256], index: 0, kind: input, shape index: {}]   ;;  %s4807_s1 = inlined_call_operand.vmem [shape: bf16[256,128], index: 1, kind: input, shape index: {}]   ;;  %s4808_s2 = inlined_call_operand.vmem [shape: f32[1,128], index: 2, kind: input, shape index: {}]   ;;  %s4809_s3 = inlined_call_operand.vmem [shape: f32[1,128], index: 3, kind: input, shape index: {}]   ;;  %s4810_s4 = inlined_call_operand.vmem [shape: f32[1,128], index: 4, kind: input, shape index: {}]   ;;  %s4811_s5 = inlined_call_operand.vmem [shape: bf16[512,128], index: 5, kind: output, shape index: {}]  }
   0x1   :  { %s3675_s20 = smov 0  }
   0x2 LB: > { %s34_s21 = sadd.s32 1, %s3633_s19  ;;  %p2609_p0 = scmp.ge.s32.totalorder %s3637_s20, 1  ;;  %s3637_s20 = sphi %s3675_s20, %s15_s20   ;;  %s3633_s19 = sphi %s3673_s19, %s4813_s19   ;;  %s3629_s18 = sphi %s3671_s18, %s4812_s18  }
   0x3   : > { %p36_p1 = scmp.ge.s32.totalorder %s34_s21, 2  ;;  %p229_p2 = scmp.lt.s32.totalorder %s3637_s20, 3 }
   0x5   : > { %s4815_s21 = smov (%p36_p1, %s34_s21), 0  ;;  %p230_p3 = pnand %p2609_p0, %p229_p2 }
   0x6   : > { %p292_p4 = scmp.eq.s32.totalorder (!%p230_p3), %s3629_s18, 0 }
   0x7   : > { %233 = sbr.rel (%p230_p3) target bundleno = 806 (0x326), region = 40 }
   0xc   : > { %300 = sbr.rel (!%p292_p4) target bundleno = 17 (0x11), region = 44  ;;  %v3639_v0 = vmov (%p292_p4), 0.0  }
   0xd   : > { %301 = vst [vmem:[#allocation4] sm:$0x1] (%p292_p4), %v3639_v0 }
   0xe   : > { %302 = vst [vmem:[#allocation5] sm:$0x1] (%p292_p4), %v3639_v0 }
  0x11 PF: > { %306 = sbr.rel (!%p292_p4) target bundleno = 82 (0x52), region = 48  ;;  %v3640_v1 = vmov (%p292_p4), 0.0  }
  0x12   : > { %307 = vst [vmem:[#allocation2 + $0xb0] sm:$0xff] (%p292_p4), %v3640_v1 }
  0x13   : > { %308 = vst [vmem:[#allocation2 + $0x1b0] sm:$0xff] (%p292_p4), %v3640_v1 }
  0x14   : > { %309 = vst [vmem:[#allocation2 + $0xd8] sm:$0xff] (%p292_p4), %v3640_v1 }
  0x15   : > { %310 = vst [vmem:[#allocation2 + $0x18] sm:$0xff] (%p292_p4), %v3640_v1 }
  0x16   : > { %311 = vst [vmem:[#allocation2 + $0x50] sm:$0xff] %v3640_v1 }
  0x17   : > { %312 = vst [vmem:[#allocation2 + $0x168] sm:$0xff] %v3640_v1 }
  0x18   : > { %313 = vst [vmem:[#allocation2 + $0x130] sm:$0xff] %v3640_v1 }
  0x19   : > { %314 = vst [vmem:[#allocation2 + $0x48] sm:$0xff] %v3640_v1 }
  0x1a   : > { %315 = vst [vmem:[#allocation2 + $0x180] sm:$0xff] %v3640_v1 }
  0x1b   : > { %316 = vst [vmem:[#allocation2 + $0x110] sm:$0xff] %v3640_v1 }
  0x1c   : > { %317 = vst [vmem:[#allocation2 + $0x118] sm:$0xff] %v3640_v1 }
  0x1d   : > { %318 = vst [vmem:[#allocation2 + $0x98] sm:$0xff] %v3640_v1 }
  0x1e   : > { %319 = vst [vmem:[#allocation2 + $0x120] sm:$0xff] %v3640_v1 }
  0x1f   : > { %320 = vst [vmem:[#allocation2 + $0x150] sm:$0xff] %v3640_v1 }
  0x20   : > { %321 = vst [vmem:[#allocation2 + $0x108] sm:$0xff] %v3640_v1 }
  0x21   : > { %322 = vst [vmem:[#allocation2 + $0x60] sm:$0xff] %v3640_v1 }
  0x22   : > { %323 = vst [vmem:[#allocation2 + $0xe0] sm:$0xff] %v3640_v1 }
  0x23   : > { %324 = vst [vmem:[#allocation2 + $0x188] sm:$0xff] %v3640_v1 }
  0x24   : > { %325 = vst [vmem:[#allocation2 + $0x138] sm:$0xff] %v3640_v1 }
  0x25   : > { %326 = vst [vmem:[#allocation2 + $0x140] sm:$0xff] %v3640_v1 }
  0x26   : > { %327 = vst [vmem:[#allocation2 + $0x80] sm:$0xff] %v3640_v1 }
  0x27   : > { %328 = vst [vmem:[#allocation2 + $0x1a8] sm:$0xff] %v3640_v1 }
  0x28   : > { %329 = vst [vmem:[#allocation2 + $0x1b8] sm:$0xff] %v3640_v1 }
  0x29   : > { %330 = vst [vmem:[#allocation2 + $0x28] sm:$0xff] %v3640_v1 }
  0x2a   : > { %331 = vst [vmem:[#allocation2 + $0x1e8] sm:$0xff] %v3640_v1 }
  0x2b   : > { %332 = vst [vmem:[#allocation2 + $0xf8] sm:$0xff] %v3640_v1 }
  0x2c   : > { %333 = vst [vmem:[#allocation2 + $0x160] sm:$0xff] %v3640_v1 }
  0x2d   : > { %334 = vst [vmem:[#allocation2 + $0x30] sm:$0xff] %v3640_v1 }
  0x2e   : > { %335 = vst [vmem:[#allocation2 + $0x1e0] sm:$0xff] %v3640_v1 }
  0x2f   : > { %336 = vst [vmem:[#allocation2] sm:$0xff] %v3640_v1 }
  0x30   : > { %337 = vst [vmem:[#allocation2 + $0xf0] sm:$0xff] %v3640_v1 }
  0x31   : > { %338 = vst [vmem:[#allocation2 + $0x8] sm:$0xff] %v3640_v1 }
  0x32   : > { %339 = vst [vmem:[#allocation2 + $0x148] sm:$0xff] %v3640_v1 }
  0x33   : > { %340 = vst [vmem:[#allocation2 + $0x1d0] sm:$0xff] %v3640_v1 }
  0x34   : > { %341 = vst [vmem:[#allocation2 + $0x100] sm:$0xff] %v3640_v1 }
  0x35   : > { %342 = vst [vmem:[#allocation2 + $0xc8] sm:$0xff] %v3640_v1 }
  0x36   : > { %343 = vst [vmem:[#allocation2 + $0x40] sm:$0xff] %v3640_v1 }
  0x37   : > { %344 = vst [vmem:[#allocation2 + $0x1f8] sm:$0xff] %v3640_v1 }
  0x38   : > { %345 = vst [vmem:[#allocation2 + $0x20] sm:$0xff] %v3640_v1 }
  0x39   : > { %346 = vst [vmem:[#allocation2 + $0x128] sm:$0xff] %v3640_v1 }
  0x3a   : > { %347 = vst [vmem:[#allocation2 + $0x1a0] sm:$0xff] %v3640_v1 }
  0x3b   : > { %348 = vst [vmem:[#allocation2 + $0x1f0] sm:$0xff] %v3640_v1 }
  0x3c   : > { %349 = vst [vmem:[#allocation2 + $0xe8] sm:$0xff] %v3640_v1 }
  0x3d   : > { %350 = vst [vmem:[#allocation2 + $0x78] sm:$0xff] %v3640_v1 }
  0x3e   : > { %351 = vst [vmem:[#allocation2 + $0x70] sm:$0xff] %v3640_v1 }
  0x3f   : > { %352 = vst [vmem:[#allocation2 + $0x90] sm:$0xff] %v3640_v1 }
  0x40   : > { %353 = vst [vmem:[#allocation2 + $0x1d8] sm:$0xff] %v3640_v1 }
  0x41   : > { %354 = vst [vmem:[#allocation2 + $0xd0] sm:$0xff] %v3640_v1 }
  0x42   : > { %355 = vst [vmem:[#allocation2 + $0xb8] sm:$0xff] %v3640_v1 }
  0x43   : > { %356 = vst [vmem:[#allocation2 + $0x88] sm:$0xff] %v3640_v1 }
  0x44   : > { %357 = vst [vmem:[#allocation2 + $0xa8] sm:$0xff] %v3640_v1 }
  0x45   : > { %358 = vst [vmem:[#allocation2 + $0x1c8] sm:$0xff] %v3640_v1 }
  0x46   : > { %359 = vst [vmem:[#allocation2 + $0x170] sm:$0xff] %v3640_v1 }
  0x47   : > { %360 = vst [vmem:[#allocation2 + $0x178] sm:$0xff] %v3640_v1 }
  0x48   : > { %361 = vst [vmem:[#allocation2 + $0x68] sm:$0xff] %v3640_v1 }
  0x49   : > { %362 = vst [vmem:[#allocation2 + $0x190] sm:$0xff] %v3640_v1 }
  0x4a   : > { %363 = vst [vmem:[#allocation2 + $0x198] sm:$0xff] %v3640_v1 }
  0x4b   : > { %364 = vst [vmem:[#allocation2 + $0x38] sm:$0xff] %v3640_v1 }
  0x4c   : > { %365 = vst [vmem:[#allocation2 + $0xc0] sm:$0xff] %v3640_v1 }
  0x4d   : > { %366 = vst [vmem:[#allocation2 + $0x1c0] sm:$0xff] %v3640_v1 }
  0x4e   : > { %367 = vst [vmem:[#allocation2 + $0x158] sm:$0xff] %v3640_v1 }
  0x4f   : > { %368 = vst [vmem:[#allocation2 + $0x10] sm:$0xff] %v3640_v1 }
  0x50   : > { %369 = vst [vmem:[#allocation2 + $0x58] sm:$0xff] %v3640_v1 }
  0x51   : > { %370 = vst [vmem:[#allocation2 + $0xa0] sm:$0xff] %v3640_v1 }
  0x52 PF: > { %p2613_p5 = scmp.ne.s32.totalorder %s3629_s18, 0 }
  0x54   : > { %373 = sbr.rel (%p2613_p5) target bundleno = 507 (0x1fb), region = 52 }
  0x59   : > { %v2951_v2 = vld [vmem:[%s4807_s1 + $0x38] sm:$0xff]  ;;  %v2950_v4 = vld [vmem:[%s4807_s1 + $0x30] sm:$0xff]  ;;  %v2949_v6 = vld [vmem:[%s4807_s1 + $0x28] sm:$0xff] }
  0x5a   : > { %v2959_v3 = vld [vmem:[%s4807_s1 + $0x78] sm:$0xff]  ;;  %955 = vmatpush.bf16.msra.mxu0 %v2951_v2  ;;  %3568 = vmatpush.bf16.msra.mxu2 %v2951_v2  ;;  %v2958_v5 = vld [vmem:[%s4807_s1 + $0x70] sm:$0xff]  ;;  %v2957_v7 = vld [vmem:[%s4807_s1 + $0x68] sm:$0xff] }
  0x5b   : > { %1124 = vmatpush.bf16.msra.mxu1 %v2959_v3  ;;  %3576 = vmatpush.bf16.msra.mxu3 %v2959_v3  ;;  %v2948_v8 = vld [vmem:[%s4807_s1 + $0x20] sm:$0xff]  ;;  %v2947_v10 = vld [vmem:[%s4807_s1 + $0x18] sm:$0xff]  ;;  %v2946_v12 = vld [vmem:[%s4807_s1 + $0x10] sm:$0xff] }
  0x5c   : > { %v2956_v9 = vld [vmem:[%s4807_s1 + $0x60] sm:$0xff]  ;;  %v2955_v11 = vld [vmem:[%s4807_s1 + $0x58] sm:$0xff]  ;;  %v2954_v13 = vld [vmem:[%s4807_s1 + $0x50] sm:$0xff] }
  0x5d   : > { %v2945_v14 = vld [vmem:[%s4807_s1 + $0x8] sm:$0xff]  ;;  %v2944_v16 = vld [vmem:[%s4807_s1] sm:$0xff]  ;;  %v2624_v30 = vld [vmem:[%s4806_s0 + $0x10] sm:$0xf] }
  0x5e   : > { %956 = vmatpush.bf16.msra.mxu0 %v2950_v4  ;;  %3569 = vmatpush.bf16.msra.mxu2 %v2950_v4  ;;  %v2953_v15 = vld [vmem:[%s4807_s1 + $0x48] sm:$0xff]  ;;  %v2952_v17 = vld [vmem:[%s4807_s1 + $0x40] sm:$0xff]  ;;  %v2963_v31 = vld [vmem:[%s4806_s0 + $0x14] sm:$0xf0] }
  0x5f   : > { %1125 = vmatpush.bf16.msra.mxu1 %v2958_v5  ;;  %3577 = vmatpush.bf16.msra.mxu3 %v2958_v5  ;;  %v2616_v18 = vld [vmem:[%s4806_s0] sm:$0xf]  ;;  %v2961_v19 = vld [vmem:[%s4806_s0 + $0x4] sm:$0xf0]  ;;  %v2960_v22 = vld [vmem:[%s4806_s0 + $0x4] sm:$0xf]  ;;  %v2625_v38 = vor.u32 %v2963_v31, %v2624_v30 }
  0x60   : > { %v2744_v20 = vld [vmem:[%s4806_s0 + $0x100] sm:$0xf]  ;;  %v2993_v21 = vld [vmem:[%s4806_s0 + $0x104] sm:$0xf0]  ;;  %v2618_v23 = vld [vmem:[%s4806_s0 + $0x8] sm:$0xf0]  ;;  %v2617_v26 = vor.u32 %v2961_v19, %v2616_v18 }
  0x61   : > { %v2992_v24 = vld [vmem:[%s4806_s0 + $0x104] sm:$0xf]  ;;  %v2746_v25 = vld [vmem:[%s4806_s0 + $0x108] sm:$0xf0]  ;;  %v2745_v27 = vor.u32 %v2993_v21, %v2744_v20  ;;  %v2621_v28 = vor.u32 %v2960_v22, %v2618_v23  ;;  %v2752_v32 = vld [vmem:[%s4806_s0 + $0x110] sm:$0xf] }
  0x62   : > { %957 = vmatpush.bf16.msra.mxu0 %v2949_v6  ;;  %3570 = vmatpush.bf16.msra.mxu2 %v2949_v6  ;;  %v2749_v29 = vor.u32 %v2992_v24, %v2746_v25  ;;  %v2995_v33 = vld [vmem:[%s4806_s0 + $0x114] sm:$0xf0]  ;;  %v2962_v34 = vld [vmem:[%s4806_s0 + $0x14] sm:$0xf]  ;;  %v2626_v35 = vld [vmem:[%s4806_s0 + $0x18] sm:$0xf0] }
  0x63   : > { %1126 = vmatpush.bf16.msra.mxu1 %v2957_v7  ;;  %3578 = vmatpush.bf16.msra.mxu3 %v2957_v7  ;;  %v2994_v36 = vld [vmem:[%s4806_s0 + $0x114] sm:$0xf]  ;;  %v2754_v37 = vld [vmem:[%s4806_s0 + $0x118] sm:$0xf0]  ;;  %v2753_v39 = vor.u32 %v2995_v33, %v2752_v32  ;;  %v2629_v40 = vor.u32 %v2962_v34, %v2626_v35  ;;  %v2632_v42 = vld [vmem:[%s4806_s0 + $0x20] sm:$0xf] }
  0x64   : > { %v2757_v41 = vor.u32 %v2994_v36, %v2754_v37  ;;  %v2965_v43 = vld [vmem:[%s4806_s0 + $0x24] sm:$0xf0]  ;;  %v2760_v44 = vld [vmem:[%s4806_s0 + $0x120] sm:$0xf]  ;;  %v2964_v46 = vld [vmem:[%s4806_s0 + $0x24] sm:$0xf] }
  0x65   : > { %v2997_v45 = vld [vmem:[%s4806_s0 + $0x124] sm:$0xf0]  ;;  %v2634_v47 = vld [vmem:[%s4806_s0 + $0x28] sm:$0xf0]  ;;  %v2996_v48 = vld [vmem:[%s4806_s0 + $0x124] sm:$0xf]  ;;  %v2633_v50 = vor.u32 %v2965_v43, %v2632_v42 }
  0x66   : > { %958 = vmatpush.bf16.msra.mxu0 %v2948_v8  ;;  %3571 = vmatpush.bf16.msra.mxu2 %v2948_v8  ;;  %v2762_v49 = vld [vmem:[%s4806_s0 + $0x128] sm:$0xf0]  ;;  %v2761_v51 = vor.u32 %v2997_v45, %v2760_v44  ;;  %v2637_v52 = vor.u32 %v2964_v46, %v2634_v47  ;;  %v2640_v54 = vld [vmem:[%s4806_s0 + $0x30] sm:$0xf]  ;;  %v2967_v55 = vld [vmem:[%s4806_s0 + $0x34] sm:$0xf0] }
  0x67   : > { %1127 = vmatpush.bf16.msra.mxu1 %v2956_v9  ;;  %3579 = vmatpush.bf16.msra.mxu3 %v2956_v9  ;;  %v2765_v53 = vor.u32 %v2996_v48, %v2762_v49  ;;  %v2768_v56 = vld [vmem:[%s4806_s0 + $0x130] sm:$0xf]  ;;  %v2999_v57 = vld [vmem:[%s4806_s0 + $0x134] sm:$0xf0]  ;;  %v2966_v58 = vld [vmem:[%s4806_s0 + $0x34] sm:$0xf]  ;;  %v2641_v62 = vor.u32 %v2967_v55, %v2640_v54 }
  0x68   : > { %v2642_v59 = vld [vmem:[%s4806_s0 + $0x38] sm:$0xf0]  ;;  %v2998_v60 = vld [vmem:[%s4806_s0 + $0x134] sm:$0xf]  ;;  %v2769_v63 = vor.u32 %v2999_v57, %v2768_v56  ;;  %v2648_v2 = vld [vmem:[%s4806_s0 + $0x40] sm:$0xf] }
  0x69   : > { %v2770_v61 = vld [vmem:[%s4806_s0 + $0x138] sm:$0xf0]  ;;  %v2645_v0 = vor.u32 %v2966_v58, %v2642_v59  ;;  %v2969_v3 = vld [vmem:[%s4806_s0 + $0x44] sm:$0xf0]  ;;  %v2776_v4 = vld [vmem:[%s4806_s0 + $0x140] sm:$0xf] }
  0x6a   : > { %959 = vmatpush.bf16.msra.mxu0 %v2947_v10  ;;  %3572 = vmatpush.bf16.msra.mxu2 %v2947_v10  ;;  %v2773_v1 = vor.u32 %v2998_v60, %v2770_v61  ;;  %v3001_v5 = vld [vmem:[%s4806_s0 + $0x144] sm:$0xf0]  ;;  %v2968_v6 = vld [vmem:[%s4806_s0 + $0x44] sm:$0xf]  ;;  %v2650_v7 = vld [vmem:[%s4806_s0 + $0x48] sm:$0xf0]  ;;  %v2649_v10 = vor.u32 %v2969_v3, %v2648_v2 }
  0x6b   : > { %1128 = vmatpush.bf16.msra.mxu1 %v2955_v11  ;;  %3580 = vmatpush.bf16.msra.mxu3 %v2955_v11  ;;  %v3000_v8 = vld [vmem:[%s4806_s0 + $0x144] sm:$0xf]  ;;  %v2778_v9 = vld [vmem:[%s4806_s0 + $0x148] sm:$0xf0]  ;;  %v2777_v11 = vor.u32 %v3001_v5, %v2776_v4  ;;  %v2970_v18 = vld [vmem:[%s4806_s0 + $0x54] sm:$0xf] }
  0x6c   : > { %v2658_v19 = vld [vmem:[%s4806_s0 + $0x58] sm:$0xf0]  ;;  %v3002_v20 = vld [vmem:[%s4806_s0 + $0x154] sm:$0xf]  ;;  %v2972_v30 = vld [vmem:[%s4806_s0 + $0x64] sm:$0xf] }
  0x6d   : > { %v2786_v21 = vld [vmem:[%s4806_s0 + $0x158] sm:$0xf0]  ;;  %v2661_v24 = vor.u32 %v2970_v18, %v2658_v19  ;;  %v2666_v31 = vld [vmem:[%s4806_s0 + $0x68] sm:$0xf0]  ;;  %v3004_v32 = vld [vmem:[%s4806_s0 + $0x164] sm:$0xf] }
  0x6e   : > { %960 = vmatpush.bf16.msra.mxu0 %v2946_v12  ;;  %3573 = vmatpush.bf16.msra.mxu2 %v2946_v12  ;;  %v2653_v12 = vor.u32 %v2968_v6, %v2650_v7  ;;  %v2789_v25 = vor.u32 %v3002_v20, %v2786_v21  ;;  %v2794_v33 = vld [vmem:[%s4806_s0 + $0x168] sm:$0xf0]  ;;  %v2669_v36 = vor.u32 %v2972_v30, %v2666_v31  ;;  %v2974_v42 = vld [vmem:[%s4806_s0 + $0x74] sm:$0xf]  ;;  %v2674_v43 = vld [vmem:[%s4806_s0 + $0x78] sm:$0xf0] }
  0x6f   : > { %1129 = vmatpush.bf16.msra.mxu1 %v2954_v13  ;;  %3581 = vmatpush.bf16.msra.mxu3 %v2954_v13  ;;  %v2781_v13 = vor.u32 %v3000_v8, %v2778_v9  ;;  %v2797_v37 = vor.u32 %v3004_v32, %v2794_v33  ;;  %v3006_v44 = vld [vmem:[%s4806_s0 + $0x174] sm:$0xf]  ;;  %v2802_v45 = vld [vmem:[%s4806_s0 + $0x178] sm:$0xf0]  ;;  %v2677_v48 = vor.u32 %v2974_v42, %v2674_v43  ;;  %v2976_v54 = vld [vmem:[%s4806_s0 + $0x84] sm:$0xf] }
  0x70   : > { %v2805_v49 = vor.u32 %v3006_v44, %v2802_v45  ;;  %v2682_v55 = vld [vmem:[%s4806_s0 + $0x88] sm:$0xf0]  ;;  %v3008_v56 = vld [vmem:[%s4806_s0 + $0x184] sm:$0xf]  ;;  %v412_v8 = vld [vmem:[#allocation2 + $0x1b0] sm:$0xff] }
  0x71   : > { %v2810_v57 = vld [vmem:[%s4806_s0 + $0x188] sm:$0xf0]  ;;  %v2685_v61 = vor.u32 %v2976_v54, %v2682_v55  ;;  %v2690_v18 = vld [vmem:[%s4806_s0 + $0x98] sm:$0xf0]  ;;  %v3010_v19 = vld [vmem:[%s4806_s0 + $0x194] sm:$0xf] }
  0x72   : > { %961 = vmatpush.bf16.msra.mxu0 %v2945_v14  ;;  %3574 = vmatpush.bf16.msra.mxu2 %v2945_v14  ;;  %v2656_v14 = vld [vmem:[%s4806_s0 + $0x50] sm:$0xf]  ;;  %v443_v4 = vld [vmem:[#allocation2 + $0x148] sm:$0xff]  ;;  %v2818_v20 = vld [vmem:[%s4806_s0 + $0x198] sm:$0xf0] }
  0x73   : > { %1130 = vmatpush.bf16.msra.mxu1 %v2953_v15  ;;  %3582 = vmatpush.bf16.msra.mxu3 %v2953_v15  ;;  %v2971_v15 = vld [vmem:[%s4806_s0 + $0x54] sm:$0xf0]  ;;  %v2696_v44 = vld [vmem:[%s4806_s0 + $0xa0] sm:$0xf]  ;;  %v2981_v45 = vld [vmem:[%s4806_s0 + $0xa4] sm:$0xf0] }
  0x74   : > { %v2657_v22 = vor.u32 %v2971_v15, %v2656_v14  ;;  %v2816_v14 = vld [vmem:[%s4806_s0 + $0x190] sm:$0xf]  ;;  %v413_v30 = vld [vmem:[#allocation2 + $0xd8] sm:$0xff]  ;;  %v446_v54 = vld [vmem:[#allocation2 + $0xc8] sm:$0xff] }
  0x76   : > { %962 = vmatpush.bf16.msra.mxu0 %v2944_v16  ;;  %3575 = vmatpush.bf16.msra.mxu2 %v2944_v16  ;;  %v2784_v16 = vld [vmem:[%s4806_s0 + $0x150] sm:$0xf] }
  0x77   : > { %1131 = vmatpush.bf16.msra.mxu1 %v2952_v17  ;;  %3583 = vmatpush.bf16.msra.mxu3 %v2952_v17  ;;  %v3003_v17 = vld [vmem:[%s4806_s0 + $0x154] sm:$0xf0] }
  0x78   : > { %v2785_v23 = vor.u32 %v3003_v17, %v2784_v16  ;;  %v3011_v16 = vld [vmem:[%s4806_s0 + $0x194] sm:$0xf0]  ;;  %v2978_v17 = vld [vmem:[%s4806_s0 + $0x94] sm:$0xf] }
  0x79   : > { %963 = vmatmul.bf16.vlgmr.msra.gmra.mxu0 %v2617_v26  ;;  %1043 = vmatmul.bf16.vlgmr.msra.gmra.mxu2 %v2745_v27  ;;  %v2664_v26 = vld [vmem:[%s4806_s0 + $0x60] sm:$0xf]  ;;  %v2973_v27 = vld [vmem:[%s4806_s0 + $0x64] sm:$0xf0] }
  0x7a   : > { %1132 = vmatmul.bf16.vlgmr.msra.gmra.mxu1 %v2621_v28  ;;  %1212 = vmatmul.bf16.vlgmr.msra.gmra.mxu3 %v2749_v29  ;;  %v2792_v28 = vld [vmem:[%s4806_s0 + $0x160] sm:$0xf]  ;;  %v3005_v29 = vld [vmem:[%s4806_s0 + $0x164] sm:$0xf0]  ;;  %v2665_v34 = vor.u32 %v2973_v27, %v2664_v26 }
  0x7b   : > { %v2793_v35 = vor.u32 %v3005_v29, %v2792_v28  ;;  %v2693_v28 = vor.u32 %v2978_v17, %v2690_v18  ;;  %v2821_v29 = vor.u32 %v3010_v19, %v2818_v20  ;;  %v2982_v17 = vld [vmem:[%s4806_s0 + $0xb4] sm:$0xf]  ;;  %v2706_v18 = vld [vmem:[%s4806_s0 + $0xb8] sm:$0xf0] }
  0x7c   : > { %v3014_v19 = vld [vmem:[%s4806_s0 + $0x1b4] sm:$0xf]  ;;  %v2834_v20 = vld [vmem:[%s4806_s0 + $0x1b8] sm:$0xf0] }
  0x89   : > { %968 = vmatmul.bf16.gmra.mxu0 %v2625_v38  ;;  %1048 = vmatmul.bf16.gmra.mxu2 %v2753_v39  ;;  %v2672_v38 = vld [vmem:[%s4806_s0 + $0x70] sm:$0xf]  ;;  %v2975_v39 = vld [vmem:[%s4806_s0 + $0x74] sm:$0xf0] }
  0x8a   : > { %1137 = vmatmul.bf16.gmra.mxu1 %v2629_v40  ;;  %1217 = vmatmul.bf16.gmra.mxu3 %v2757_v41  ;;  %v2800_v40 = vld [vmem:[%s4806_s0 + $0x170] sm:$0xf]  ;;  %v3007_v41 = vld [vmem:[%s4806_s0 + $0x174] sm:$0xf0]  ;;  %v2673_v46 = vor.u32 %v2975_v39, %v2672_v38 }
  0x8b   : > { %v2801_v47 = vor.u32 %v3007_v41, %v2800_v40  ;;  %v414_v40 = vld [vmem:[#allocation2 + $0x18] sm:$0xff] }
  0x99   : > { %973 = vmatmul.bf16.gmra.mxu0 %v2633_v50  ;;  %1053 = vmatmul.bf16.gmra.mxu2 %v2761_v51  ;;  %v2680_v50 = vld [vmem:[%s4806_s0 + $0x80] sm:$0xf]  ;;  %v2977_v51 = vld [vmem:[%s4806_s0 + $0x84] sm:$0xf0] }
  0x9a   : > { %1142 = vmatmul.bf16.gmra.mxu1 %v2637_v52  ;;  %1222 = vmatmul.bf16.gmra.mxu3 %v2765_v53  ;;  %v2808_v52 = vld [vmem:[%s4806_s0 + $0x180] sm:$0xf]  ;;  %v3009_v53 = vld [vmem:[%s4806_s0 + $0x184] sm:$0xf0]  ;;  %v2681_v58 = vor.u32 %v2977_v51, %v2680_v50  ;;  %v2698_v50 = vld [vmem:[%s4806_s0 + $0xa8] sm:$0xf0] }
  0x9b   : > { %v2809_v59 = vor.u32 %v3009_v53, %v2808_v52  ;;  %v3012_v51 = vld [vmem:[%s4806_s0 + $0x1a4] sm:$0xf]  ;;  %v2826_v52 = vld [vmem:[%s4806_s0 + $0x1a8] sm:$0xf0] }
  0xa9   : > { %978 = vmatmul.bf16.gmra.mxu0 %v2641_v62  ;;  %1058 = vmatmul.bf16.gmra.mxu2 %v2769_v63  ;;  %v2813_v62 = vor.u32 %v3008_v56, %v2810_v57  ;;  %v411_v63 = vld [vmem:[#allocation2 + $0xb0] sm:$0xff]  ;;  %v2697_v56 = vor.u32 %v2981_v45, %v2696_v44  ;;  %v2712_v44 = vld [vmem:[%s4806_s0 + $0xc0] sm:$0xf]  ;;  %v2985_v45 = vld [vmem:[%s4806_s0 + $0xc4] sm:$0xf0] }
  0xaa   : > { %1147 = vmatmul.bf16.gmra.mxu1 %v2645_v0  ;;  %1227 = vmatmul.bf16.gmra.mxu3 %v2773_v1 }
  0xb9   : > { %983 = vmatmul.bf16.gmra.mxu0 %v2649_v10  ;;  %1063 = vmatmul.bf16.gmra.mxu2 %v2777_v11 }
  0xba   : > { %1152 = vmatmul.bf16.gmra.mxu1 %v2653_v12  ;;  %1232 = vmatmul.bf16.gmra.mxu3 %v2781_v13  ;;  %v2688_v12 = vld [vmem:[%s4806_s0 + $0x90] sm:$0xf]  ;;  %v2979_v13 = vld [vmem:[%s4806_s0 + $0x94] sm:$0xf0] }
  0xc9   : > { %988 = vmatmul.bf16.gmra.mxu0 %v2657_v22  ;;  %1068 = vmatmul.bf16.gmra.mxu2 %v2785_v23  ;;  %v444_v22 = vld [vmem:[#allocation2 + $0x1d0] sm:$0xff] }
  0xca   : > { %1157 = vmatmul.bf16.gmra.mxu1 %v2661_v24  ;;  %1237 = vmatmul.bf16.gmra.mxu3 %v2789_v25  ;;  %v2689_v24 = vor.u32 %v2979_v13, %v2688_v12  ;;  %v2817_v25 = vor.u32 %v3011_v16, %v2816_v14  ;;  %v2704_v12 = vld [vmem:[%s4806_s0 + $0xb0] sm:$0xf]  ;;  %v2983_v13 = vld [vmem:[%s4806_s0 + $0xb4] sm:$0xf0] }
  0xcb   : > { %v2832_v14 = vld [vmem:[%s4806_s0 + $0x1b0] sm:$0xf]  ;;  %v3015_v16 = vld [vmem:[%s4806_s0 + $0x1b4] sm:$0xf0] }
  0xd9   : > { %993 = vmatmul.bf16.gmra.mxu0 %v2665_v34  ;;  %1073 = vmatmul.bf16.gmra.mxu2 %v2793_v35 }
  0xda   : > { %1162 = vmatmul.bf16.gmra.mxu1 %v2669_v36  ;;  %1242 = vmatmul.bf16.gmra.mxu3 %v2797_v37  ;;  %v445_v36 = vld [vmem:[#allocation2 + $0x100] sm:$0xff] }
  0xe9   : > { %998 = vmatmul.bf16.gmra.mxu0 %v2673_v46  ;;  %1078 = vmatmul.bf16.gmra.mxu2 %v2801_v47  ;;  %v2824_v46 = vld [vmem:[%s4806_s0 + $0x1a0] sm:$0xf] }
  0xea   : > { %1167 = vmatmul.bf16.gmra.mxu1 %v2677_v48  ;;  %1247 = vmatmul.bf16.gmra.mxu3 %v2805_v49  ;;  %v3013_v48 = vld [vmem:[%s4806_s0 + $0x1a4] sm:$0xf0]  ;;  %v2980_v49 = vld [vmem:[%s4806_s0 + $0xa4] sm:$0xf] }
  0xeb   : > { %v2825_v57 = vor.u32 %v3013_v48, %v2824_v46  ;;  %v2840_v46 = vld [vmem:[%s4806_s0 + $0x1c0] sm:$0xf]  ;;  %v3017_v48 = vld [vmem:[%s4806_s0 + $0x1c4] sm:$0xf0] }
  0xf6   : > { %v964_v60 = vpop.f32.mrf.mxu0 }
  0xf7   : > { %v1133_v0 = vpop.f32.mrf.mxu1 }
  0xf8   : > { %v1134_v1 = vadd.f32 %v1133_v0, %v964_v60  ;;  %v2701_v60 = vor.u32 %v2980_v49, %v2698_v50  ;;  %v2984_v49 = vld [vmem:[%s4806_s0 + $0xc4] sm:$0xf]  ;;  %v2714_v50 = vld [vmem:[%s4806_s0 + $0xc8] sm:$0xf0] }
  0xf9   : > { %1003 = vmatmul.bf16.gmra.mxu0 %v2681_v58  ;;  %1083 = vmatmul.bf16.gmra.mxu2 %v2809_v59 }
  0xfa   : > { %v1293_v2 = vadd.f32 %v1134_v1, %v411_v63  ;;  %1172 = vmatmul.bf16.gmra.mxu1 %v2685_v61  ;;  %1252 = vmatmul.bf16.gmra.mxu3 %v2813_v62  ;;  %v2829_v61 = vor.u32 %v3012_v51, %v2826_v52  ;;  %v415_v62 = vld [vmem:[#allocation2 + $0x50] sm:$0xff]  ;;  %v3016_v51 = vld [vmem:[%s4806_s0 + $0x1c4] sm:$0xf]  ;;  %v2842_v52 = vld [vmem:[%s4806_s0 + $0x1c8] sm:$0xf0] }
  0xfc   : > { %1357 = vst [vmem:[#allocation2 + $0xb0] sm:$0xff] %v1293_v2  ;;  %v1044_v3 = vpop.f32.mrf.mxu2 }
  0xfd   : > { %v1213_v5 = vpop.f32.mrf.mxu3 }
  0xfe   : > { %v1214_v6 = vadd.f32 %v1213_v5, %v1044_v3  ;;  %v966_v7 = vpop.f32.mrf.mxu0 }
  0xff   : > { %v1135_v9 = vpop.f32.mrf.mxu1 }
 0x100   : > { %v1325_v10 = vadd.f32 %v1214_v6, %v443_v4  ;;  %v1136_v11 = vadd.f32 %v1135_v9, %v966_v7  ;;  %v447_v4 = vld [vmem:[#allocation2 + $0x40] sm:$0xff] }
 0x102   : > { %1389 = vst [vmem:[#allocation2 + $0x148] sm:$0xff] %v1325_v10  ;;  %v1294_v15 = vadd.f32 %v1136_v11, %v412_v8  ;;  %v416_v8 = vld [vmem:[#allocation2 + $0x168] sm:$0xff] }
 0x104   : > { %1358 = vst [vmem:[#allocation2 + $0x1b0] sm:$0xff] %v1294_v15  ;;  %v1046_v21 = vpop.f32.mrf.mxu2 }
 0x105   : > { %v1215_v23 = vpop.f32.mrf.mxu3 }
 0x106   : > { %v1216_v26 = vadd.f32 %v1215_v23, %v1046_v21  ;;  %v969_v27 = vpop.f32.mrf.mxu0 }
 0x107   : > { %v1138_v31 = vpop.f32.mrf.mxu1 }
 0x108   : > { %v1326_v32 = vadd.f32 %v1216_v26, %v444_v22  ;;  %v1139_v33 = vadd.f32 %v1138_v31, %v969_v27  ;;  %v448_v22 = vld [vmem:[#allocation2 + $0x1f8] sm:$0xff] }
 0x109   : > { %1008 = vmatmul.bf16.gmra.mxu0 %v2689_v24  ;;  %1088 = vmatmul.bf16.gmra.mxu2 %v2817_v25  ;;  %v2705_v24 = vor.u32 %v2983_v13, %v2704_v12  ;;  %v2833_v25 = vor.u32 %v3015_v16, %v2832_v14  ;;  %v2720_v12 = vld [vmem:[%s4806_s0 + $0xd0] sm:$0xf]  ;;  %v2987_v13 = vld [vmem:[%s4806_s0 + $0xd4] sm:$0xf0] }
 0x10a   : > { %1390 = vst [vmem:[#allocation2 + $0x1d0] sm:$0xff] %v1326_v32  ;;  %v1295_v34 = vadd.f32 %v1139_v33, %v413_v30  ;;  %1177 = vmatmul.bf16.gmra.mxu1 %v2693_v28  ;;  %1257 = vmatmul.bf16.gmra.mxu3 %v2821_v29  ;;  %v2709_v28 = vor.u32 %v2982_v17, %v2706_v18  ;;  %v417_v30 = vld [vmem:[#allocation2 + $0x130] sm:$0xff]  ;;  %v3019_v16 = vld [vmem:[%s4806_s0 + $0x1d4] sm:$0xf0]  ;;  %v2722_v18 = vld [vmem:[%s4806_s0 + $0xd8] sm:$0xf0] }
 0x10b   : > { %v2837_v29 = vor.u32 %v3014_v19, %v2834_v20  ;;  %v2848_v14 = vld [vmem:[%s4806_s0 + $0x1d0] sm:$0xf]  ;;  %v2986_v17 = vld [vmem:[%s4806_s0 + $0xd4] sm:$0xf]  ;;  %v2850_v20 = vld [vmem:[%s4806_s0 + $0x1d8] sm:$0xf0] }
 0x10c   : > { %1359 = vst [vmem:[#allocation2 + $0xd8] sm:$0xff] %v1295_v34  ;;  %v1049_v35 = vpop.f32.mrf.mxu2  ;;  %v3018_v19 = vld [vmem:[%s4806_s0 + $0x1d4] sm:$0xf] }
 0x10d   : > { %v1218_v37 = vpop.f32.mrf.mxu3 }
 0x10e   : > { %v1219_v38 = vadd.f32 %v1218_v37, %v1049_v35  ;;  %v971_v39 = vpop.f32.mrf.mxu0 }
 0x10f   : > { %v1140_v41 = vpop.f32.mrf.mxu1 }
 0x110   : > { %v1327_v42 = vadd.f32 %v1219_v38, %v445_v36  ;;  %v1141_v43 = vadd.f32 %v1140_v41, %v971_v39  ;;  %v449_v36 = vld [vmem:[#allocation2 + $0x20] sm:$0xff] }
 0x112   : > { %1391 = vst [vmem:[#allocation2 + $0x100] sm:$0xff] %v1327_v42  ;;  %v1296_v47 = vadd.f32 %v1141_v43, %v414_v40  ;;  %v418_v40 = vld [vmem:[#allocation2 + $0x48] sm:$0xff] }
 0x114   : > { %1360 = vst [vmem:[#allocation2 + $0x18] sm:$0xff] %v1296_v47  ;;  %v1051_v53 = vpop.f32.mrf.mxu2 }
 0x115   : > { %v1220_v55 = vpop.f32.mrf.mxu3 }
 0x116   : > { %v1221_v58 = vadd.f32 %v1220_v55, %v1051_v53  ;;  %v974_v59 = vpop.f32.mrf.mxu0 }
 0x117   : > { %v1143_v63 = vpop.f32.mrf.mxu1 }
 0x118   : > { %v1328_v0 = vadd.f32 %v1221_v58, %v446_v54  ;;  %v1144_v1 = vadd.f32 %v1143_v63, %v974_v59  ;;  %v450_v54 = vld [vmem:[#allocation2 + $0x128] sm:$0xff] }
 0x119   : > { %1013 = vmatmul.bf16.gmra.mxu0 %v2697_v56  ;;  %1093 = vmatmul.bf16.gmra.mxu2 %v2825_v57  ;;  %v2713_v56 = vor.u32 %v2985_v45, %v2712_v44  ;;  %v2841_v57 = vor.u32 %v3017_v48, %v2840_v46  ;;  %v2728_v44 = vld [vmem:[%s4806_s0 + $0xe0] sm:$0xf]  ;;  %v2989_v45 = vld [vmem:[%s4806_s0 + $0xe4] sm:$0xf0] }
 0x11a   : > { %1392 = vst [vmem:[#allocation2 + $0xc8] sm:$0xff] %v1328_v0  ;;  %v1297_v2 = vadd.f32 %v1144_v1, %v415_v62  ;;  %1182 = vmatmul.bf16.gmra.mxu1 %v2701_v60  ;;  %1262 = vmatmul.bf16.gmra.mxu3 %v2829_v61  ;;  %v2717_v60 = vor.u32 %v2984_v49, %v2714_v50  ;;  %v419_v62 = vld [vmem:[#allocation2 + $0x180] sm:$0xff]  ;;  %v3021_v48 = vld [vmem:[%s4806_s0 + $0x1e4] sm:$0xf0]  ;;  %v2730_v50 = vld [vmem:[%s4806_s0 + $0xe8] sm:$0xf0] }
 0x11b   : > { %v2845_v61 = vor.u32 %v3016_v51, %v2842_v52  ;;  %v2856_v46 = vld [vmem:[%s4806_s0 + $0x1e0] sm:$0xf]  ;;  %v2988_v49 = vld [vmem:[%s4806_s0 + $0xe4] sm:$0xf]  ;;  %v2858_v52 = vld [vmem:[%s4806_s0 + $0x1e8] sm:$0xf0] }
 0x11c   : > { %1361 = vst [vmem:[#allocation2 + $0x50] sm:$0xff] %v1297_v2  ;;  %v1054_v3 = vpop.f32.mrf.mxu2  ;;  %v3020_v51 = vld [vmem:[%s4806_s0 + $0x1e4] sm:$0xf] }
 0x11d   : > { %v1223_v5 = vpop.f32.mrf.mxu3 }
 0x11e   : > { %v1224_v6 = vadd.f32 %v1223_v5, %v1054_v3  ;;  %v976_v7 = vpop.f32.mrf.mxu0 }
 0x11f   : > { %v1145_v9 = vpop.f32.mrf.mxu1 }
 0x120   : > { %v1329_v10 = vadd.f32 %v1224_v6, %v447_v4  ;;  %v1146_v11 = vadd.f32 %v1145_v9, %v976_v7  ;;  %v451_v4 = vld [vmem:[#allocation2 + $0x1a0] sm:$0xff] }
 0x122   : > { %1393 = vst [vmem:[#allocation2 + $0x40] sm:$0xff] %v1329_v10  ;;  %v1298_v15 = vadd.f32 %v1146_v11, %v416_v8  ;;  %v420_v8 = vld [vmem:[#allocation2 + $0x110] sm:$0xff] }
 0x124   : > { %1362 = vst [vmem:[#allocation2 + $0x168] sm:$0xff] %v1298_v15  ;;  %v1056_v21 = vpop.f32.mrf.mxu2 }
 0x125   : > { %v1225_v23 = vpop.f32.mrf.mxu3 }
 0x126   : > { %v1226_v26 = vadd.f32 %v1225_v23, %v1056_v21  ;;  %v979_v27 = vpop.f32.mrf.mxu0 }
 0x127   : > { %v1148_v31 = vpop.f32.mrf.mxu1 }
 0x128   : > { %v1330_v32 = vadd.f32 %v1226_v26, %v448_v22  ;;  %v1149_v33 = vadd.f32 %v1148_v31, %v979_v27  ;;  %v452_v22 = vld [vmem:[#allocation2 + $0x1f0] sm:$0xff] }
 0x129   : > { %1018 = vmatmul.bf16.gmra.mxu0 %v2705_v24  ;;  %1098 = vmatmul.bf16.gmra.mxu2 %v2833_v25  ;;  %v2721_v24 = vor.u32 %v2987_v13, %v2720_v12  ;;  %v2849_v25 = vor.u32 %v3019_v16, %v2848_v14  ;;  %v2736_v12 = vld [vmem:[%s4806_s0 + $0xf0] sm:$0xf]  ;;  %v2991_v13 = vld [vmem:[%s4806_s0 + $0xf4] sm:$0xf0] }
 0x12a   : > { %1394 = vst [vmem:[#allocation2 + $0x1f8] sm:$0xff] %v1330_v32  ;;  %v1299_v34 = vadd.f32 %v1149_v33, %v417_v30  ;;  %1187 = vmatmul.bf16.gmra.mxu1 %v2709_v28  ;;  %1267 = vmatmul.bf16.gmra.mxu3 %v2837_v29  ;;  %v2725_v28 = vor.u32 %v2986_v17, %v2722_v18  ;;  %v421_v30 = vld [vmem:[#allocation2 + $0x118] sm:$0xff]  ;;  %v2864_v14 = vld [vmem:[%s4806_s0 + $0x1f0] sm:$0xf]  ;;  %v2990_v17 = vld [vmem:[%s4806_s0 + $0xf4] sm:$0xf] }
 0x12b   : > { %v2853_v29 = vor.u32 %v3018_v19, %v2850_v20  ;;  %v3023_v16 = vld [vmem:[%s4806_s0 + $0x1f4] sm:$0xf0]  ;;  %v2738_v18 = vld [vmem:[%s4806_s0 + $0xf8] sm:$0xf0]  ;;  %v3022_v19 = vld [vmem:[%s4806_s0 + $0x1f4] sm:$0xf] }
 0x12c   : > { %1363 = vst [vmem:[#allocation2 + $0x130] sm:$0xff] %v1299_v34  ;;  %v1059_v35 = vpop.f32.mrf.mxu2  ;;  %v2866_v20 = vld [vmem:[%s4806_s0 + $0x1f8] sm:$0xf0] }
 0x12d   : > { %v1228_v37 = vpop.f32.mrf.mxu3 }
 0x12e   : > { %v1229_v38 = vadd.f32 %v1228_v37, %v1059_v35  ;;  %v981_v39 = vpop.f32.mrf.mxu0 }
 0x12f   : > { %v1150_v41 = vpop.f32.mrf.mxu1 }
 0x130   : > { %v1331_v42 = vadd.f32 %v1229_v38, %v449_v36  ;;  %v1151_v43 = vadd.f32 %v1150_v41, %v981_v39  ;;  %v453_v36 = vld [vmem:[#allocation2 + $0xe8] sm:$0xff] }
 0x132   : > { %1395 = vst [vmem:[#allocation2 + $0x20] sm:$0xff] %v1331_v42  ;;  %v1300_v47 = vadd.f32 %v1151_v43, %v418_v40  ;;  %v422_v40 = vld [vmem:[#allocation2 + $0x98] sm:$0xff] }
 0x134   : > { %1364 = vst [vmem:[#allocation2 + $0x48] sm:$0xff] %v1300_v47  ;;  %v1061_v53 = vpop.f32.mrf.mxu2 }
 0x135   : > { %v1230_v55 = vpop.f32.mrf.mxu3 }
 0x136   : > { %v1231_v58 = vadd.f32 %v1230_v55, %v1061_v53  ;;  %v984_v59 = vpop.f32.mrf.mxu0 }
 0x137   : > { %v1153_v63 = vpop.f32.mrf.mxu1 }
 0x138   : > { %v1332_v0 = vadd.f32 %v1231_v58, %v450_v54  ;;  %v1154_v1 = vadd.f32 %v1153_v63, %v984_v59  ;;  %v454_v54 = vld [vmem:[#allocation2 + $0x78] sm:$0xff] }
 0x139   : > { %1023 = vmatmul.bf16.gmra.mxu0 %v2713_v56  ;;  %1103 = vmatmul.bf16.gmra.mxu2 %v2841_v57  ;;  %v2729_v56 = vor.u32 %v2989_v45, %v2728_v44  ;;  %v2857_v57 = vor.u32 %v3021_v48, %v2856_v46  ;;  %v458_v46 = vld [vmem:[#allocation2 + $0xd0] sm:$0xff] }
 0x13a   : > { %1396 = vst [vmem:[#allocation2 + $0x128] sm:$0xff] %v1332_v0  ;;  %v1301_v2 = vadd.f32 %v1154_v1, %v419_v62  ;;  %1192 = vmatmul.bf16.gmra.mxu1 %v2717_v60  ;;  %1272 = vmatmul.bf16.gmra.mxu3 %v2845_v61  ;;  %v2733_v60 = vor.u32 %v2988_v49, %v2730_v50  ;;  %v423_v62 = vld [vmem:[#allocation2 + $0x120] sm:$0xff] }
 0x13b   : > { %v2861_v61 = vor.u32 %v3020_v51, %v2858_v52  ;;  %v427_v50 = vld [vmem:[#allocation2 + $0xe0] sm:$0xff] }
 0x13c   : > { %1365 = vst [vmem:[#allocation2 + $0x180] sm:$0xff] %v1301_v2  ;;  %v1064_v3 = vpop.f32.mrf.mxu2 }
 0x13d   : > { %v1233_v5 = vpop.f32.mrf.mxu3 }
 0x13e   : > { %v1234_v6 = vadd.f32 %v1233_v5, %v1064_v3  ;;  %v986_v7 = vpop.f32.mrf.mxu0 }
 0x13f   : > { %v1155_v9 = vpop.f32.mrf.mxu1 }
 0x140   : > { %v1333_v10 = vadd.f32 %v1234_v6, %v451_v4  ;;  %v1156_v11 = vadd.f32 %v1155_v9, %v986_v7  ;;  %v455_v4 = vld [vmem:[#allocation2 + $0x70] sm:$0xff] }
 0x142   : > { %1397 = vst [vmem:[#allocation2 + $0x1a0] sm:$0xff] %v1333_v10  ;;  %v1302_v15 = vadd.f32 %v1156_v11, %v420_v8  ;;  %v424_v8 = vld [vmem:[#allocation2 + $0x150] sm:$0xff] }
 0x144   : > { %1366 = vst [vmem:[#allocation2 + $0x110] sm:$0xff] %v1302_v15  ;;  %v1066_v21 = vpop.f32.mrf.mxu2 }
 0x145   : > { %v1235_v23 = vpop.f32.mrf.mxu3 }
 0x146   : > { %v1236_v26 = vadd.f32 %v1235_v23, %v1066_v21  ;;  %v989_v27 = vpop.f32.mrf.mxu0 }
 0x147   : > { %v1158_v31 = vpop.f32.mrf.mxu1 }
 0x148   : > { %v1334_v32 = vadd.f32 %v1236_v26, %v452_v22  ;;  %v1159_v33 = vadd.f32 %v1158_v31, %v989_v27  ;;  %v456_v22 = vld [vmem:[#allocation2 + $0x90] sm:$0xff] }
 0x149   : > { %1028 = vmatmul.bf16.gmra.mxu0 %v2721_v24  ;;  %1108 = vmatmul.bf16.gmra.mxu2 %v2849_v25  ;;  %v2737_v24 = vor.u32 %v2991_v13, %v2736_v12  ;;  %v2865_v25 = vor.u32 %v3023_v16, %v2864_v14  ;;  %v461_v12 = vld [vmem:[#allocation2 + $0xa8] sm:$0xff]  ;;  %v430_v16 = vld [vmem:[#allocation2 + $0x140] sm:$0xff] }
 0x14a   : > { %1398 = vst [vmem:[#allocation2 + $0x1f0] sm:$0xff] %v1334_v32  ;;  %v1303_v34 = vadd.f32 %v1159_v33, %v421_v30  ;;  %1197 = vmatmul.bf16.gmra.mxu1 %v2725_v28  ;;  %1277 = vmatmul.bf16.gmra.mxu3 %v2853_v29  ;;  %v2741_v28 = vor.u32 %v2990_v17, %v2738_v18  ;;  %v425_v30 = vld [vmem:[#allocation2 + $0x108] sm:$0xff] }
 0x14b   : > { %v2869_v29 = vor.u32 %v3022_v19, %v2866_v20 }
 0x14c   : > { %1367 = vst [vmem:[#allocation2 + $0x118] sm:$0xff] %v1303_v34  ;;  %v1069_v35 = vpop.f32.mrf.mxu2 }
 0x14d   : > { %v1238_v37 = vpop.f32.mrf.mxu3 }
 0x14e   : > { %v1239_v38 = vadd.f32 %v1238_v37, %v1069_v35  ;;  %v991_v39 = vpop.f32.mrf.mxu0 }
 0x14f   : > { %v1160_v41 = vpop.f32.mrf.mxu1 }
 0x150   : > { %v1335_v42 = vadd.f32 %v1239_v38, %v453_v36  ;;  %v1161_v43 = vadd.f32 %v1160_v41, %v991_v39  ;;  %v457_v36 = vld [vmem:[#allocation2 + $0x1d8] sm:$0xff] }
 0x152   : > { %1399 = vst [vmem:[#allocation2 + $0xe8] sm:$0xff] %v1335_v42  ;;  %v1304_v47 = vadd.f32 %v1161_v43, %v422_v40  ;;  %v426_v40 = vld [vmem:[#allocation2 + $0x60] sm:$0xff] }
 0x154   : > { %1368 = vst [vmem:[#allocation2 + $0x98] sm:$0xff] %v1304_v47  ;;  %v1071_v53 = vpop.f32.mrf.mxu2 }
 0x155   : > { %v1240_v55 = vpop.f32.mrf.mxu3 }
 0x156   : > { %v1241_v58 = vadd.f32 %v1240_v55, %v1071_v53  ;;  %v994_v59 = vpop.f32.mrf.mxu0 }
 0x157   : > { %v1163_v63 = vpop.f32.mrf.mxu1 }
 0x158   : > { %v1336_v0 = vadd.f32 %v1241_v58, %v454_v54  ;;  %v1164_v1 = vadd.f32 %v1163_v63, %v994_v59 }
 0x159   : > { %1033 = vmatmul.bf16.gmra.mxu0 %v2729_v56  ;;  %1113 = vmatmul.bf16.gmra.mxu2 %v2857_v57  ;;  %v459_v56 = vld [vmem:[#allocation2 + $0xb8] sm:$0xff] }
 0x15a   : > { %1400 = vst [vmem:[#allocation2 + $0x78] sm:$0xff] %v1336_v0  ;;  %v1305_v2 = vadd.f32 %v1164_v1, %v423_v62  ;;  %1202 = vmatmul.bf16.gmra.mxu1 %v2733_v60  ;;  %1282 = vmatmul.bf16.gmra.mxu3 %v2861_v61  ;;  %v428_v60 = vld [vmem:[#allocation2 + $0x188] sm:$0xff] }
 0x15c   : > { %1369 = vst [vmem:[#allocation2 + $0x120] sm:$0xff] %v1305_v2  ;;  %v1074_v3 = vpop.f32.mrf.mxu2  ;;  %v460_v2 = vld [vmem:[#allocation2 + $0x88] sm:$0xff] }
 0x15d   : > { %v1243_v5 = vpop.f32.mrf.mxu3 }
 0x15e   : > { %v1244_v6 = vadd.f32 %v1243_v5, %v1074_v3  ;;  %v996_v7 = vpop.f32.mrf.mxu0 }
 0x15f   : > { %v1165_v9 = vpop.f32.mrf.mxu1 }
 0x160   : > { %v1337_v10 = vadd.f32 %v1244_v6, %v455_v4  ;;  %v1166_v11 = vadd.f32 %v1165_v9, %v996_v7  ;;  %v429_v6 = vld [vmem:[#allocation2 + $0x138] sm:$0xff] }
 0x162   : > { %1401 = vst [vmem:[#allocation2 + $0x70] sm:$0xff] %v1337_v10  ;;  %v1306_v15 = vadd.f32 %v1166_v11, %v424_v8 }
 0x164   : > { %1370 = vst [vmem:[#allocation2 + $0x150] sm:$0xff] %v1306_v15  ;;  %v1076_v21 = vpop.f32.mrf.mxu2 }
 0x165   : > { %v1245_v23 = vpop.f32.mrf.mxu3 }
 0x166   : > { %v1246_v26 = vadd.f32 %v1245_v23, %v1076_v21  ;;  %v999_v27 = vpop.f32.mrf.mxu0 }
 0x167   : > { %v1168_v31 = vpop.f32.mrf.mxu1 }
 0x168   : > { %v1338_v32 = vadd.f32 %v1246_v26, %v456_v22  ;;  %v1169_v33 = vadd.f32 %v1168_v31, %v999_v27  ;;  %v462_v22 = vld [vmem:[#allocation2 + $0x1c8] sm:$0xff]  ;;  %v431_v26 = vld [vmem:[#allocation2 + $0x80] sm:$0xff] }
 0x169   : > { %1038 = vmatmul.bf16.gmra.mxu0 %v2737_v24  ;;  %1118 = vmatmul.bf16.gmra.mxu2 %v2865_v25 }
 0x16a   : > { %1402 = vst [vmem:[#allocation2 + $0x90] sm:$0xff] %v1338_v32  ;;  %v1307_v34 = vadd.f32 %v1169_v33, %v425_v30  ;;  %1207 = vmatmul.bf16.gmra.mxu1 %v2741_v28  ;;  %1287 = vmatmul.bf16.gmra.mxu3 %v2869_v29  ;;  %v463_v32 = vld [vmem:[#allocation2 + $0x170] sm:$0xff] }
 0x16c   : > { %1371 = vst [vmem:[#allocation2 + $0x108] sm:$0xff] %v1307_v34  ;;  %v1079_v35 = vpop.f32.mrf.mxu2 }
 0x16d   : > { %v1248_v37 = vpop.f32.mrf.mxu3 }
 0x16e   : > { %v1249_v38 = vadd.f32 %v1248_v37, %v1079_v35  ;;  %v1001_v39 = vpop.f32.mrf.mxu0 }
 0x16f   : > { %v1170_v41 = vpop.f32.mrf.mxu1 }
 0x170   : > { %v1339_v42 = vadd.f32 %v1249_v38, %v457_v36  ;;  %v1171_v43 = vadd.f32 %v1170_v41, %v1001_v39  ;;  %v432_v36 = vld [vmem:[#allocation2 + $0x1a8] sm:$0xff] }
 0x172   : > { %1403 = vst [vmem:[#allocation2 + $0x1d8] sm:$0xff] %v1339_v42  ;;  %v1308_v44 = vadd.f32 %v1171_v43, %v426_v40  ;;  %v464_v42 = vld [vmem:[#allocation2 + $0x178] sm:$0xff] }
 0x174   : > { %1372 = vst [vmem:[#allocation2 + $0x60] sm:$0xff] %v1308_v44  ;;  %v1081_v45 = vpop.f32.mrf.mxu2 }
 0x175   : > { %v1250_v47 = vpop.f32.mrf.mxu3 }
 0x176   : > { %v1251_v48 = vadd.f32 %v1250_v47, %v1081_v45  ;;  %v1004_v49 = vpop.f32.mrf.mxu0 }
 0x177   : > { %v1173_v51 = vpop.f32.mrf.mxu1 }
 0x178   : > { %v1340_v52 = vadd.f32 %v1251_v48, %v458_v46  ;;  %v1174_v53 = vadd.f32 %v1173_v51, %v1004_v49  ;;  %v433_v46 = vld [vmem:[#allocation2 + $0x1b8] sm:$0xff] }
 0x17a   : > { %1404 = vst [vmem:[#allocation2 + $0xd0] sm:$0xff] %v1340_v52  ;;  %v1309_v54 = vadd.f32 %v1174_v53, %v427_v50  ;;  %v465_v52 = vld [vmem:[#allocation2 + $0x68] sm:$0xff] }
 0x17c   : > { %1373 = vst [vmem:[#allocation2 + $0xe0] sm:$0xff] %v1309_v54  ;;  %v1084_v55 = vpop.f32.mrf.mxu2 }
 0x17d   : > { %v1253_v57 = vpop.f32.mrf.mxu3 }
 0x17e   : > { %v1254_v58 = vadd.f32 %v1253_v57, %v1084_v55  ;;  %v1006_v59 = vpop.f32.mrf.mxu0 }
 0x17f   : > { %v1175_v61 = vpop.f32.mrf.mxu1 }
 0x180   : > { %v1341_v62 = vadd.f32 %v1254_v58, %v459_v56  ;;  %v1176_v63 = vadd.f32 %v1175_v61, %v1006_v59  ;;  %v434_v56 = vld [vmem:[#allocation2 + $0x28] sm:$0xff] }
 0x182   : > { %1405 = vst [vmem:[#allocation2 + $0xb8] sm:$0xff] %v1341_v62  ;;  %v1310_v0 = vadd.f32 %v1176_v63, %v428_v60  ;;  %v466_v62 = vld [vmem:[#allocation2 + $0x190] sm:$0xff] }
 0x184   : > { %1374 = vst [vmem:[#allocation2 + $0x188] sm:$0xff] %v1310_v0  ;;  %v1086_v1 = vpop.f32.mrf.mxu2 }
 0x185   : > { %v1255_v3 = vpop.f32.mrf.mxu3 }
 0x186   : > { %v1256_v4 = vadd.f32 %v1255_v3, %v1086_v1  ;;  %v1009_v5 = vpop.f32.mrf.mxu0 }
 0x187   : > { %v1178_v7 = vpop.f32.mrf.mxu1 }
 0x188   : > { %v1342_v8 = vadd.f32 %v1256_v4, %v460_v2  ;;  %v1179_v9 = vadd.f32 %v1178_v7, %v1009_v5  ;;  %v435_v2 = vld [vmem:[#allocation2 + $0x1e8] sm:$0xff] }
 0x18a   : > { %1406 = vst [vmem:[#allocation2 + $0x88] sm:$0xff] %v1342_v8  ;;  %v1311_v10 = vadd.f32 %v1179_v9, %v429_v6  ;;  %v467_v8 = vld [vmem:[#allocation2 + $0x198] sm:$0xff] }
 0x18c   : > { %1375 = vst [vmem:[#allocation2 + $0x138] sm:$0xff] %v1311_v10  ;;  %v1089_v11 = vpop.f32.mrf.mxu2 }
 0x18d   : > { %v1258_v13 = vpop.f32.mrf.mxu3 }
 0x18e   : > { %v1259_v14 = vadd.f32 %v1258_v13, %v1089_v11  ;;  %v1011_v15 = vpop.f32.mrf.mxu0 }
 0x18f   : > { %v1180_v17 = vpop.f32.mrf.mxu1 }
 0x190   : > { %v1343_v18 = vadd.f32 %v1259_v14, %v461_v12  ;;  %v1181_v19 = vadd.f32 %v1180_v17, %v1011_v15  ;;  %v436_v12 = vld [vmem:[#allocation2 + $0xf8] sm:$0xff] }
 0x192   : > { %1407 = vst [vmem:[#allocation2 + $0xa8] sm:$0xff] %v1343_v18  ;;  %v1312_v20 = vadd.f32 %v1181_v19, %v430_v16  ;;  %v468_v18 = vld [vmem:[#allocation2 + $0x38] sm:$0xff] }
 0x194   : > { %1376 = vst [vmem:[#allocation2 + $0x140] sm:$0xff] %v1312_v20  ;;  %v1091_v21 = vpop.f32.mrf.mxu2 }
 0x195   : > { %v1260_v23 = vpop.f32.mrf.mxu3 }
 0x196   : > { %v1261_v24 = vadd.f32 %v1260_v23, %v1091_v21  ;;  %v1014_v25 = vpop.f32.mrf.mxu0 }
 0x197   : > { %v1183_v27 = vpop.f32.mrf.mxu1 }
 0x198   : > { %v1344_v28 = vadd.f32 %v1261_v24, %v462_v22  ;;  %v1184_v29 = vadd.f32 %v1183_v27, %v1014_v25  ;;  %v437_v22 = vld [vmem:[#allocation2 + $0x160] sm:$0xff] }
 0x19a   : > { %1408 = vst [vmem:[#allocation2 + $0x1c8] sm:$0xff] %v1344_v28  ;;  %v1313_v30 = vadd.f32 %v1184_v29, %v431_v26  ;;  %v469_v28 = vld [vmem:[#allocation2 + $0xc0] sm:$0xff] }
 0x19c   : > { %1377 = vst [vmem:[#allocation2 + $0x80] sm:$0xff] %v1313_v30  ;;  %v1094_v31 = vpop.f32.mrf.mxu2 }
 0x19d   : > { %v1263_v33 = vpop.f32.mrf.mxu3 }
 0x19e   : > { %v1264_v34 = vadd.f32 %v1263_v33, %v1094_v31  ;;  %v1016_v35 = vpop.f32.mrf.mxu0 }
 0x19f   : > { %v1185_v37 = vpop.f32.mrf.mxu1 }
 0x1a0   : > { %v1345_v38 = vadd.f32 %v1264_v34, %v463_v32  ;;  %v1186_v39 = vadd.f32 %v1185_v37, %v1016_v35  ;;  %v438_v32 = vld [vmem:[#allocation2 + $0x30] sm:$0xff] }
 0x1a2   : > { %1409 = vst [vmem:[#allocation2 + $0x170] sm:$0xff] %v1345_v38  ;;  %v1314_v40 = vadd.f32 %v1186_v39, %v432_v36  ;;  %v470_v38 = vld [vmem:[#allocation2 + $0x1c0] sm:$0xff] }
 0x1a4   : > { %1378 = vst [vmem:[#allocation2 + $0x1a8] sm:$0xff] %v1314_v40  ;;  %v1096_v41 = vpop.f32.mrf.mxu2 }
 0x1a5   : > { %v1265_v43 = vpop.f32.mrf.mxu3 }
 0x1a6   : > { %v1266_v44 = vadd.f32 %v1265_v43, %v1096_v41  ;;  %v1019_v45 = vpop.f32.mrf.mxu0 }
 0x1a7   : > { %v1188_v47 = vpop.f32.mrf.mxu1 }
 0x1a8   : > { %v1346_v48 = vadd.f32 %v1266_v44, %v464_v42  ;;  %v1189_v49 = vadd.f32 %v1188_v47, %v1019_v45  ;;  %v439_v42 = vld [vmem:[#allocation2 + $0x1e0] sm:$0xff] }
 0x1aa   : > { %1410 = vst [vmem:[#allocation2 + $0x178] sm:$0xff] %v1346_v48  ;;  %v1315_v50 = vadd.f32 %v1189_v49, %v433_v46  ;;  %v471_v48 = vld [vmem:[#allocation2 + $0x158] sm:$0xff] }
 0x1ac   : > { %1379 = vst [vmem:[#allocation2 + $0x1b8] sm:$0xff] %v1315_v50  ;;  %v1099_v51 = vpop.f32.mrf.mxu2 }
 0x1ad   : > { %v1268_v53 = vpop.f32.mrf.mxu3 }
 0x1ae   : > { %v1269_v54 = vadd.f32 %v1268_v53, %v1099_v51  ;;  %v1021_v55 = vpop.f32.mrf.mxu0 }
 0x1af   : > { %v1190_v57 = vpop.f32.mrf.mxu1 }
 0x1b0   : > { %v1347_v58 = vadd.f32 %v1269_v54, %v465_v52  ;;  %v1191_v59 = vadd.f32 %v1190_v57, %v1021_v55  ;;  %v440_v52 = vld [vmem:[#allocation2] sm:$0xff] }
 0x1b2   : > { %1411 = vst [vmem:[#allocation2 + $0x68] sm:$0xff] %v1347_v58  ;;  %v1316_v60 = vadd.f32 %v1191_v59, %v434_v56  ;;  %v472_v58 = vld [vmem:[#allocation2 + $0x10] sm:$0xff] }
 0x1b4   : > { %1380 = vst [vmem:[#allocation2 + $0x28] sm:$0xff] %v1316_v60  ;;  %v1101_v61 = vpop.f32.mrf.mxu2 }
 0x1b5   : > { %v1270_v63 = vpop.f32.mrf.mxu3 }
 0x1b6   : > { %v1271_v0 = vadd.f32 %v1270_v63, %v1101_v61  ;;  %v1024_v1 = vpop.f32.mrf.mxu0 }
 0x1b7   : > { %v1193_v3 = vpop.f32.mrf.mxu1 }
 0x1b8   : > { %v1348_v4 = vadd.f32 %v1271_v0, %v466_v62  ;;  %v1194_v5 = vadd.f32 %v1193_v3, %v1024_v1  ;;  %v441_v62 = vld [vmem:[#allocation2 + $0xf0] sm:$0xff] }
 0x1ba   : > { %1412 = vst [vmem:[#allocation2 + $0x190] sm:$0xff] %v1348_v4  ;;  %v1317_v6 = vadd.f32 %v1194_v5, %v435_v2  ;;  %v473_v4 = vld [vmem:[#allocation2 + $0x58] sm:$0xff] }
 0x1bc   : > { %1381 = vst [vmem:[#allocation2 + $0x1e8] sm:$0xff] %v1317_v6  ;;  %v1104_v7 = vpop.f32.mrf.mxu2 }
 0x1bd   : > { %v1273_v9 = vpop.f32.mrf.mxu3 }
 0x1be   : > { %v1274_v10 = vadd.f32 %v1273_v9, %v1104_v7  ;;  %v1026_v11 = vpop.f32.mrf.mxu0 }
 0x1bf   : > { %v1195_v13 = vpop.f32.mrf.mxu1 }
 0x1c0   : > { %v1349_v14 = vadd.f32 %v1274_v10, %v467_v8  ;;  %v1196_v15 = vadd.f32 %v1195_v13, %v1026_v11  ;;  %v442_v8 = vld [vmem:[#allocation2 + $0x8] sm:$0xff] }
 0x1c2   : > { %1413 = vst [vmem:[#allocation2 + $0x198] sm:$0xff] %v1349_v14  ;;  %v1318_v16 = vadd.f32 %v1196_v15, %v436_v12  ;;  %v474_v14 = vld [vmem:[#allocation2 + $0xa0] sm:$0xff] }
 0x1c4   : > { %1382 = vst [vmem:[#allocation2 + $0xf8] sm:$0xff] %v1318_v16  ;;  %v1106_v17 = vpop.f32.mrf.mxu2 }
 0x1c5   : > { %v1275_v19 = vpop.f32.mrf.mxu3 }
 0x1c6   : > { %v1276_v20 = vadd.f32 %v1275_v19, %v1106_v17  ;;  %v1029_v21 = vpop.f32.mrf.mxu0 }
 0x1c7   : > { %v1198_v23 = vpop.f32.mrf.mxu1 }
 0x1c8   : > { %v1350_v24 = vadd.f32 %v1276_v20, %v468_v18  ;;  %v1199_v25 = vadd.f32 %v1198_v23, %v1029_v21 }
 0x1ca   : > { %1414 = vst [vmem:[#allocation2 + $0x38] sm:$0xff] %v1350_v24  ;;  %v1319_v26 = vadd.f32 %v1199_v25, %v437_v22 }
 0x1cc   : > { %1383 = vst [vmem:[#allocation2 + $0x160] sm:$0xff] %v1319_v26  ;;  %v1109_v27 = vpop.f32.mrf.mxu2 }
 0x1cd   : > { %v1278_v29 = vpop.f32.mrf.mxu3 }
 0x1ce   : > { %v1279_v30 = vadd.f32 %v1278_v29, %v1109_v27  ;;  %v1031_v31 = vpop.f32.mrf.mxu0 }
 0x1cf   : > { %v1200_v33 = vpop.f32.mrf.mxu1 }
 0x1d0   : > { %v1351_v34 = vadd.f32 %v1279_v30, %v469_v28  ;;  %v1201_v35 = vadd.f32 %v1200_v33, %v1031_v31 }
 0x1d2   : > { %1415 = vst [vmem:[#allocation2 + $0xc0] sm:$0xff] %v1351_v34  ;;  %v1320_v36 = vadd.f32 %v1201_v35, %v438_v32 }
 0x1d4   : > { %1384 = vst [vmem:[#allocation2 + $0x30] sm:$0xff] %v1320_v36  ;;  %v1111_v37 = vpop.f32.mrf.mxu2 }
 0x1d5   : > { %v1280_v39 = vpop.f32.mrf.mxu3 }
 0x1d6   : > { %v1281_v40 = vadd.f32 %v1280_v39, %v1111_v37  ;;  %v1034_v41 = vpop.f32.mrf.mxu0 }
 0x1d7   : > { %v1203_v43 = vpop.f32.mrf.mxu1 }
 0x1d8   : > { %v1352_v44 = vadd.f32 %v1281_v40, %v470_v38  ;;  %v1204_v45 = vadd.f32 %v1203_v43, %v1034_v41 }
 0x1da   : > { %1416 = vst [vmem:[#allocation2 + $0x1c0] sm:$0xff] %v1352_v44  ;;  %v1321_v46 = vadd.f32 %v1204_v45, %v439_v42 }
 0x1dc   : > { %1385 = vst [vmem:[#allocation2 + $0x1e0] sm:$0xff] %v1321_v46  ;;  %v1114_v47 = vpop.f32.mrf.mxu2 }
 0x1dd   : > { %v1283_v49 = vpop.f32.mrf.mxu3 }
 0x1de   : > { %v1284_v50 = vadd.f32 %v1283_v49, %v1114_v47  ;;  %v1036_v51 = vpop.f32.mrf.mxu0 }
 0x1df   : > { %v1205_v53 = vpop.f32.mrf.mxu1 }
 0x1e0   : > { %v1353_v54 = vadd.f32 %v1284_v50, %v471_v48  ;;  %v1206_v55 = vadd.f32 %v1205_v53, %v1036_v51 }
 0x1e2   : > { %1417 = vst [vmem:[#allocation2 + $0x158] sm:$0xff] %v1353_v54  ;;  %v1322_v56 = vadd.f32 %v1206_v55, %v440_v52 }
 0x1e4   : > { %1386 = vst [vmem:[#allocation2] sm:$0xff] %v1322_v56  ;;  %v1116_v57 = vpop.f32.mrf.mxu2 }
 0x1e5   : > { %v1285_v59 = vpop.f32.mrf.mxu3 }
 0x1e6   : > { %v1286_v60 = vadd.f32 %v1285_v59, %v1116_v57  ;;  %v1039_v61 = vpop.f32.mrf.mxu0 }
 0x1e7   : > { %v1208_v63 = vpop.f32.mrf.mxu1 }
 0x1e8   : > { %v1354_v0 = vadd.f32 %v1286_v60, %v472_v58  ;;  %v1209_v1 = vadd.f32 %v1208_v63, %v1039_v61 }
 0x1ea   : > { %1418 = vst [vmem:[#allocation2 + $0x10] sm:$0xff] %v1354_v0  ;;  %v1323_v2 = vadd.f32 %v1209_v1, %v441_v62 }
 0x1ec   : > { %1387 = vst [vmem:[#allocation2 + $0xf0] sm:$0xff] %v1323_v2  ;;  %v1119_v3 = vpop.f32.mrf.mxu2 }
 0x1ed   : > { %v1288_v5 = vpop.f32.mrf.mxu3 }
 0x1ee   : > { %v1289_v6 = vadd.f32 %v1288_v5, %v1119_v3  ;;  %v1041_v7 = vpop.f32.mrf.mxu0 }
 0x1ef   : > { %v1210_v9 = vpop.f32.mrf.mxu1 }
 0x1f0   : > { %v1355_v10 = vadd.f32 %v1289_v6, %v473_v4  ;;  %v1211_v11 = vadd.f32 %v1210_v9, %v1041_v7 }
 0x1f2   : > { %1419 = vst [vmem:[#allocation2 + $0x58] sm:$0xff] %v1355_v10  ;;  %v1324_v12 = vadd.f32 %v1211_v11, %v442_v8 }
 0x1f4   : > { %1388 = vst [vmem:[#allocation2 + $0x8] sm:$0xff] %v1324_v12  ;;  %v1121_v13 = vpop.f32.mrf.mxu2 }
 0x1f5   : > { %v1290_v15 = vpop.f32.mrf.mxu3 }
 0x1f6   : > { %v1291_v16 = vadd.f32 %v1290_v15, %v1121_v13 }
 0x1f8   : > { %v1356_v17 = vadd.f32 %v1291_v16, %v474_v14 }
 0x1fa   : > { %1420 = vst [vmem:[#allocation2 + $0xa0] sm:$0xff] %v1356_v17 }
 0x1fb PF: > { %1422 = sbr.rel (!%p292_p4) target bundleno = 654 (0x28e), region = 56  ;;  %v1423_v18 = vld [vmem:[#allocation2 + $0xb0] sm:$0xff] (%p292_p4)  ;;  %v4198_v20 = vld [vmem:[%s4808_s2] ss:$0 sm:$0xff] (%p292_p4)  ;;  %v1425_v21 = vld [vmem:[#allocation2 + $0xd8] sm:$0xff] (%p292_p4) }
 0x1fc   : > { %v1424_v19 = vld [vmem:[#allocation2 + $0x1b0] sm:$0xff] (%p292_p4)  ;;  %v1426_v22 = vld [vmem:[#allocation2 + $0x18] sm:$0xff] (%p292_p4)  ;;  %v1428_v24 = vld [vmem:[#allocation2 + $0x168] sm:$0xff] (%p292_p4)  ;;  %v1491_v26 = vadd.f32 (%p292_p4), %v4198_v20, %v1423_v18  ;;  %v1493_v28 = vadd.f32 (%p292_p4), %v4198_v20, %v1425_v21 }
 0x1fd   : > { %v1427_v23 = vld [vmem:[#allocation2 + $0x50] sm:$0xff] (%p292_p4)  ;;  %v1492_v27 = vadd.f32 (%p292_p4), %v4198_v20, %v1424_v19  ;;  %v1494_v29 = vadd.f32 (%p292_p4), %v4198_v20, %v1426_v22  ;;  %v1430_v30 = vld [vmem:[#allocation2 + $0x48] sm:$0xff] (%p292_p4)  ;;  %v1496_v32 = vadd.f32 (%p292_p4), %v4198_v20, %v1428_v24  ;;  %v1431_v42 = vld [vmem:[#allocation2 + $0x180] sm:$0xff] (%p292_p4) }
 0x1fe   : > { %v1429_v25 = vld [vmem:[#allocation2 + $0x130] sm:$0xff] (%p292_p4)  ;;  %v1495_v31 = vadd.f32 (%p292_p4), %v4198_v20, %v1427_v23  ;;  %v1761_v36 = vmul.f32 (%p292_p4), %v1491_v26, %v1491_v26  ;;  %v1763_v39 = vmul.f32 (%p292_p4), %v1493_v28, %v1493_v28  ;;  %v1498_v41 = vadd.f32 (%p292_p4), %v4198_v20, %v1430_v30  ;;  %v1433_v44 = vld [vmem:[#allocation2 + $0x118] sm:$0xff] (%p292_p4)  ;;  %v1435_v49 = vld [vmem:[#allocation2 + $0x120] sm:$0xff] (%p292_p4) }
 0x1ff   : > { %v1497_v33 = vadd.f32 (%p292_p4), %v4198_v20, %v1429_v25  ;;  %v3030_v34 = vpack.c.bf16 (%p292_p4), %v1492_v27, %v1491_v26  ;;  %v1689_v35 = vadd.f32 (%p292_p4), %v1492_v27, %v1491_v26  ;;  %v1762_v37 = vmul.f32 (%p292_p4), %v1492_v27, %v1492_v27  ;;  %v1432_v43 = vld [vmem:[#allocation2 + $0x110] sm:$0xff] (%p292_p4)  ;;  %v1434_v48 = vld [vmem:[#allocation2 + $0x98] sm:$0xff] (%p292_p4)  ;;  %v1437_v61 = vld [vmem:[#allocation2 + $0x108] sm:$0xff] (%p292_p4) }
 0x200   : > { %v3035_v38 = vpack.c.bf16 %v1494_v29, %v1493_v28  ;;  %v3040_v40 = vpack.c.bf16 %v1496_v32, %v1495_v31  ;;  %v1764_v47 = vmul.f32 %v1494_v29, %v1494_v29  ;;  %v1436_v50 = vld [vmem:[#allocation2 + $0x150] sm:$0xff]  ;;  %v1765_v51 = vmul.f32 %v1495_v31, %v1495_v31  ;;  %v1438_v2 = vld [vmem:[#allocation2 + $0x60] sm:$0xff]  ;;  %v1440_v4 = vld [vmem:[#allocation2 + $0x188] sm:$0xff] }
 0x201   : > { %3031 = vst [vmem:[#allocation3 + $0x68] sm:$0xff] %v3030_v34   ;;  %v1825_v45 = vadd.f32 %v1762_v37, %v1761_v36  ;;  %v1690_v46 = vadd.f32 %v1689_v35, %v1493_v28  ;;  %v3045_v52 = vpack.c.bf16 %v1498_v41, %v1497_v33  ;;  %v1499_v55 = vadd.f32 %v4198_v20, %v1431_v42  ;;  %v1439_v3 = vld [vmem:[#allocation2 + $0xe0] sm:$0xff]  ;;  %v1441_v10 = vld [vmem:[#allocation2 + $0x138] sm:$0xff]  ;;  %v1444_v25 = vld [vmem:[#allocation2 + $0x1a8] sm:$0xff] }
 0x202   : > { %3475 = vst [vmem:[#allocation3 + $0x50] sm:$0xff] %v3035_v38   ;;  %v1500_v56 = vadd.f32 %v4198_v20, %v1432_v43  ;;  %v4211_v57 = vadd.f32 %v4198_v20, %v1433_v44  ;;  %v4214_v58 = vadd.f32 %v4198_v20, %v1434_v48  ;;  %v4217_v59 = vadd.f32 %v4198_v20, %v1435_v49  ;;  %v1442_v11 = vld [vmem:[#allocation2 + $0x140] sm:$0xff]  ;;  %v1446_v30 = vld [vmem:[#allocation2 + $0x28] sm:$0xff]  ;;  %v1448_v34 = vld [vmem:[#allocation2 + $0xf8] sm:$0xff] }
 0x203   : > { %v1691_v53 = vadd.f32 %v1690_v46, %v1494_v29  ;;  %v1826_v54 = vadd.f32 %v1825_v45, %v1763_v39  ;;  %3476 = vst [vmem:[#allocation3 + $0x70] sm:$0xff] %v3040_v40   ;;  %v4220_v60 = vadd.f32 %v4198_v20, %v1436_v50  ;;  %v1766_v0 = vmul.f32 %v1496_v32, %v1496_v32  ;;  %v1443_v24 = vld [vmem:[#allocation2 + $0x80] sm:$0xff]  ;;  %v1445_v29 = vld [vmem:[#allocation2 + $0x1b8] sm:$0xff]  ;;  %v1450_v50 = vld [vmem:[#allocation2 + $0x30] sm:$0xff] }
 0x204   : > { %3477 = vst [vmem:[#allocation3 + $0x60] sm:$0xff] %v3045_v52   ;;  %v3050_v1 = vpack.c.bf16 %v1500_v56, %v1499_v55  ;;  %v3055_v5 = vpack.c.bf16 %v4214_v58, %v4211_v57  ;;  %v1767_v9 = vmul.f32 %v1497_v33, %v1497_v33  ;;  %v4227_v12 = vadd.f32 %v4198_v20, %v1437_v61 }
 0x205   : > { %v1827_v62 = vadd.f32 %v1826_v54, %v1764_v47  ;;  %v1692_v63 = vadd.f32 %v1691_v53, %v1495_v31  ;;  %v3060_v6 = vpack.c.bf16 %v4220_v60, %v4217_v59  ;;  %v4230_v13 = vadd.f32 %v4198_v20, %v1438_v2  ;;  %v1447_v31 = vld [vmem:[#allocation2 + $0x1e8] sm:$0xff]  ;;  %v1449_v47 = vld [vmem:[#allocation2 + $0x160] sm:$0xff] }
 0x206   : > { %3478 = vst [vmem:[#allocation3 + $0xd0] sm:$0xff] %v3050_v1   ;;  %v4233_v14 = vadd.f32 %v4198_v20, %v1439_v3  ;;  %v4236_v15 = vadd.f32 %v4198_v20, %v1440_v4  ;;  %v1768_v18 = vmul.f32 %v1498_v41, %v1498_v41  ;;  %v4243_v22 = vadd.f32 %v4198_v20, %v1441_v10  ;;  %v1452_v1 = vld [vmem:[#allocation2] sm:$0xff]  ;;  %v1454_v10 = vld [vmem:[#allocation2 + $0x8] sm:$0xff] }
 0x207   : > { %v1693_v7 = vadd.f32 %v1692_v63, %v1496_v32  ;;  %v1828_v8 = vadd.f32 %v1827_v62, %v1765_v51  ;;  %3479 = vst [vmem:[#allocation3 + $0xd8] sm:$0xff] %v3055_v5   ;;  %v3065_v19 = vpack.c.bf16 %v4230_v13, %v4227_v12  ;;  %v4246_v23 = vadd.f32 %v4198_v20, %v1442_v11  ;;  %v1453_v5 = vld [vmem:[#allocation2 + $0xf0] sm:$0xff] }
 0x208   : > { %3480 = vst [vmem:[#allocation3 + $0xe0] sm:$0xff] %v3060_v6   ;;  %v3070_v21 = vpack.c.bf16 %v4236_v15, %v4233_v14  ;;  %v1769_v28 = vmul.f32 %v1499_v55, %v1499_v55  ;;  %v1770_v32 = vmul.f32 %v1500_v56, %v1500_v56  ;;  %v4251_v37 = vadd.f32 %v4198_v20, %v1443_v24 }
 0x209   : > { %v1829_v16 = vadd.f32 %v1828_v8, %v1766_v0  ;;  %v1694_v17 = vadd.f32 %v1693_v7, %v1497_v33  ;;  %3481 = vst [vmem:[#allocation3 + $0x30] sm:$0xff] %v3065_v19   ;;  %v3075_v33 = vpack.c.bf16 %v4246_v23, %v4243_v22  ;;  %v4254_v38 = vadd.f32 %v4198_v20, %v1444_v25 }
 0x20a   : > { %3482 = vst [vmem:[#allocation3 + $0x48] sm:$0xff] %v3070_v21   ;;  %v4257_v39 = vadd.f32 %v4198_v20, %v1445_v29  ;;  %v4260_v40 = vadd.f32 %v4198_v20, %v1446_v30  ;;  %v4266_v42 = vadd.f32 %v4198_v20, %v1448_v34  ;;  %v1771_v45 = vmul.f32 %v4211_v57, %v4211_v57  ;;  %v1457_v30 = vld [vmem:[#allocation2 + $0x100] sm:$0xff] }
 0x20b   : > { %v1695_v26 = vadd.f32 %v1694_v17, %v1498_v41  ;;  %v1830_v27 = vadd.f32 %v1829_v16, %v1767_v9  ;;  %3483 = vst [vmem:[#allocation3 + $0x8] sm:$0xff] %v3075_v33   ;;  %v4263_v41 = vadd.f32 %v4198_v20, %v1447_v31  ;;  %v3080_v46 = vpack.c.bf16 %v4254_v38, %v4251_v37 }
 0x20c   : > { %v3085_v48 = vpack.c.bf16 %v4260_v40, %v4257_v39  ;;  %v1772_v53 = vmul.f32 %v4214_v58, %v4214_v58  ;;  %v4280_v54 = vadd.f32 %v4198_v20, %v1449_v47  ;;  %v1773_v63 = vmul.f32 %v4217_v59, %v4217_v59 }
 0x20d   : > { %v1831_v35 = vadd.f32 %v1830_v27, %v1768_v18  ;;  %v1696_v36 = vadd.f32 %v1695_v26, %v1499_v55  ;;  %v3090_v49 = vpack.c.bf16 %v4266_v42, %v4263_v41  ;;  %3484 = vst [vmem:[#allocation3 + $0xf0] sm:$0xff] %v3080_v46   ;;  %v4283_v55 = vadd.f32 %v4198_v20, %v1450_v50  ;;  %v1455_v18 = vld [vmem:[#allocation2 + $0x148] sm:$0xff]  ;;  %v1456_v26 = vld [vmem:[#allocation2 + $0x1d0] sm:$0xff]  ;;  %v1460_v50 = vld [vmem:[#allocation2 + $0x1f8] sm:$0xff] }
 0x20e   : > { %3485 = vst [vmem:[#allocation3 + $0x88] sm:$0xff] %v3085_v48   ;;  %v1775_v8 = vmul.f32 %v4227_v12, %v4227_v12  ;;  %v4308_v17 = vadd.f32 %v4198_v20, %v1453_v5  ;;  %v1777_v24 = vmul.f32 %v4233_v14, %v4233_v14  ;;  %v4322_v29 = vadd.f32 %v4198_v20, %v1455_v18  ;;  %v1463_v5 = vld [vmem:[#allocation2 + $0x1a0] sm:$0xff]  ;;  %v1465_v18 = vld [vmem:[#allocation2 + $0xe8] sm:$0xff] }
 0x20f   : > { %v1697_v43 = vadd.f32 %v1696_v36, %v1500_v56  ;;  %v1832_v44 = vadd.f32 %v1831_v35, %v1769_v28  ;;  %v1451_v56 = vld [vmem:[#allocation2 + $0x1e0] sm:$0xff]  ;;  %3486 = vst [vmem:[#allocation3 + $0x78] sm:$0xff] %v3090_v49   ;;  %v3095_v0 = vpack.c.bf16 %v4283_v55, %v4280_v54  ;;  %v1779_v33 = vmul.f32 %v4243_v22, %v4243_v22  ;;  %v1458_v35 = vld [vmem:[#allocation2 + $0xc8] sm:$0xff] }
 0x210   : > { %v4294_v4 = vadd.f32 %v4198_v20, %v1451_v56  ;;  %v1781_v48 = vmul.f32 %v4251_v37, %v4251_v37  ;;  %v1461_v56 = vld [vmem:[#allocation2 + $0x20] sm:$0xff] }
 0x211   : > { %v1833_v51 = vadd.f32 %v1832_v44, %v1770_v32  ;;  %v1698_v52 = vadd.f32 %v1697_v43, %v4211_v57  ;;  %v1774_v57 = vmul.f32 %v4220_v60, %v4220_v60  ;;  %3487 = vst [vmem:[#allocation3 + $0x20] sm:$0xff] %v3095_v0   ;;  %v4336_v44 = vadd.f32 %v4198_v20, %v1457_v30  ;;  %v1462_v0 = vld [vmem:[#allocation2 + $0x128] sm:$0xff]  ;;  %v1467_v30 = vld [vmem:[#allocation2 + $0x70] sm:$0xff] }
 0x213   : > { %v1699_v61 = vadd.f32 %v1698_v52, %v4214_v58  ;;  %v1834_v62 = vadd.f32 %v1833_v51, %v1771_v45  ;;  %v4297_v58 = vadd.f32 %v4198_v20, %v1452_v1  ;;  %v1459_v45 = vld [vmem:[#allocation2 + $0x40] sm:$0xff] }
 0x215   : > { %v1835_v2 = vadd.f32 %v1834_v62, %v1772_v53  ;;  %v1700_v3 = vadd.f32 %v1699_v61, %v4217_v59  ;;  %v3100_v9 = vpack.c.bf16 %v4297_v58, %v4294_v4  ;;  %v1776_v59 = vmul.f32 %v4230_v13, %v4230_v13 }
 0x216   : > { %v4350_v53 = vadd.f32 %v4198_v20, %v1459_v45  ;;  %v1469_v45 = vld [vmem:[#allocation2 + $0x1d8] sm:$0xff] }
 0x217   : > { %v1701_v6 = vadd.f32 %v1700_v3, %v4220_v60  ;;  %v1836_v7 = vadd.f32 %v1835_v2, %v1773_v63  ;;  %3488 = vst [vmem:[#allocation3] sm:$0xff] %v3100_v9   ;;  %v4311_v60 = vadd.f32 %v4198_v20, %v1454_v10  ;;  %v1783_v63 = vmul.f32 %v4257_v39, %v4257_v39 }
 0x218   : > { %v4364_v3 = vadd.f32 %v4198_v20, %v1461_v56  ;;  %v1471_v56 = vld [vmem:[#allocation2 + $0xb8] sm:$0xff] }
 0x219   : > { %v1837_v11 = vadd.f32 %v1836_v7, %v1774_v57  ;;  %v1702_v16 = vadd.f32 %v1701_v6, %v4227_v12  ;;  %v3105_v25 = vpack.c.bf16 %v4311_v60, %v4308_v17  ;;  %v1778_v12 = vmul.f32 %v4236_v15, %v4236_v15 }
 0x21b   : > { %v1703_v19 = vadd.f32 %v1702_v16, %v4230_v13  ;;  %v1838_v21 = vadd.f32 %v1837_v11, %v1775_v8  ;;  %3489 = vst [vmem:[#allocation3 + $0x18] sm:$0xff] %v3105_v25   ;;  %v4325_v13 = vadd.f32 %v4198_v20, %v1456_v26  ;;  %v1785_v8 = vmul.f32 %v4263_v41, %v4263_v41 }
 0x21c   : > { %v4378_v16 = vadd.f32 %v4198_v20, %v1463_v5  ;;  %v1473_v5 = vld [vmem:[#allocation2 + $0xa8] sm:$0xff] }
 0x21d   : > { %v1839_v27 = vadd.f32 %v1838_v21, %v1776_v59  ;;  %v1704_v28 = vadd.f32 %v1703_v19, %v4233_v14  ;;  %v3110_v34 = vpack.c.bf16 %v4325_v13, %v4322_v29  ;;  %v1780_v14 = vmul.f32 %v4246_v23, %v4246_v23  ;;  %v1464_v59 = vld [vmem:[#allocation2 + $0x1f0] sm:$0xff] }
 0x21f   : > { %v1705_v31 = vadd.f32 %v1704_v28, %v4236_v15  ;;  %v1840_v32 = vadd.f32 %v1839_v27, %v1777_v24  ;;  %3490 = vst [vmem:[#allocation3 + $0x98] sm:$0xff] %v3110_v34   ;;  %v4339_v15 = vadd.f32 %v4198_v20, %v1458_v35  ;;  %v1787_v24 = vmul.f32 %v4280_v54, %v4280_v54 }
 0x220   : > { %v4392_v28 = vadd.f32 %v4198_v20, %v1465_v18  ;;  %v1475_v18 = vld [vmem:[#allocation2 + $0x170] sm:$0xff] }
 0x221   : > { %v1841_v36 = vadd.f32 %v1840_v32, %v1778_v12  ;;  %v1706_v43 = vadd.f32 %v1705_v31, %v4243_v22  ;;  %v3115_v49 = vpack.c.bf16 %v4339_v15, %v4336_v44  ;;  %v1782_v22 = vmul.f32 %v4254_v38, %v4254_v38  ;;  %v1466_v12 = vld [vmem:[#allocation2 + $0x78] sm:$0xff] }
 0x223   : > { %v1707_v46 = vadd.f32 %v1706_v43, %v4246_v23  ;;  %v1842_v47 = vadd.f32 %v1841_v36, %v1779_v33  ;;  %3491 = vst [vmem:[#allocation3 + $0xa0] sm:$0xff] %v3115_v49   ;;  %v4353_v23 = vadd.f32 %v4198_v20, %v1460_v50  ;;  %v1789_v33 = vmul.f32 %v4294_v4, %v4294_v4 }
 0x224   : > { %v4406_v43 = vadd.f32 %v4198_v20, %v1467_v30  ;;  %v1477_v30 = vld [vmem:[#allocation2 + $0x68] sm:$0xff] }
 0x225   : > { %v1843_v51 = vadd.f32 %v1842_v47, %v1780_v14  ;;  %v1708_v52 = vadd.f32 %v1707_v46, %v4251_v37  ;;  %v3120_v57 = vpack.c.bf16 %v4353_v23, %v4350_v53  ;;  %v1784_v37 = vmul.f32 %v4260_v40, %v4260_v40  ;;  %v1468_v14 = vld [vmem:[#allocation2 + $0x90] sm:$0xff] }
 0x227   : > { %v1709_v61 = vadd.f32 %v1708_v52, %v4254_v38  ;;  %v1844_v62 = vadd.f32 %v1843_v51, %v1781_v48  ;;  %3492 = vst [vmem:[#allocation3 + $0xf8] sm:$0xff] %v3120_v57   ;;  %v4367_v38 = vadd.f32 %v4198_v20, %v1462_v0  ;;  %v1791_v48 = vmul.f32 %v4308_v17, %v4308_v17 }
 0x228   : > { %v4420_v52 = vadd.f32 %v4198_v20, %v1469_v45  ;;  %v1479_v45 = vld [vmem:[#allocation2 + $0x198] sm:$0xff] }
 0x229   : > { %v1845_v1 = vadd.f32 %v1844_v62, %v1782_v22  ;;  %v1710_v2 = vadd.f32 %v1709_v61, %v4257_v39  ;;  %v3125_v9 = vpack.c.bf16 %v4367_v38, %v4364_v3  ;;  %v1786_v39 = vmul.f32 %v4266_v42, %v4266_v42  ;;  %v1470_v22 = vld [vmem:[#allocation2 + $0xd0] sm:$0xff] }
 0x22b   : > { %v1711_v6 = vadd.f32 %v1710_v2, %v4260_v40  ;;  %v1846_v7 = vadd.f32 %v1845_v1, %v1783_v63  ;;  %3493 = vst [vmem:[#allocation3 + $0x58] sm:$0xff] %v3125_v9   ;;  %v4381_v40 = vadd.f32 %v4198_v20, %v1464_v59  ;;  %v1793_v63 = vmul.f32 %v4322_v29, %v4322_v29 }
 0x22c   : > { %v4434_v2 = vadd.f32 %v4198_v20, %v1471_v56  ;;  %v1481_v56 = vld [vmem:[#allocation2 + $0xc0] sm:$0xff] }
 0x22d   : > { %v1847_v10 = vadd.f32 %v1846_v7, %v1784_v37  ;;  %v1712_v11 = vadd.f32 %v1711_v6, %v4263_v41  ;;  %v3130_v25 = vpack.c.bf16 %v4381_v40, %v4378_v16  ;;  %v1788_v41 = vmul.f32 %v4283_v55, %v4283_v55  ;;  %v1472_v37 = vld [vmem:[#allocation2 + $0x88] sm:$0xff] }
 0x22f   : > { %v1713_v19 = vadd.f32 %v1712_v11, %v4266_v42  ;;  %v1848_v21 = vadd.f32 %v1847_v10, %v1785_v8  ;;  %3494 = vst [vmem:[#allocation3 + $0xc0] sm:$0xff] %v3130_v25   ;;  %v4395_v42 = vadd.f32 %v4198_v20, %v1466_v12  ;;  %v1795_v8 = vmul.f32 %v4336_v44, %v4336_v44 }
 0x230   : > { %v4448_v11 = vadd.f32 %v4198_v20, %v1473_v5 }
 0x231   : > { %v1849_v26 = vadd.f32 %v1848_v21, %v1786_v39  ;;  %v1714_v27 = vadd.f32 %v1713_v19, %v4280_v54  ;;  %v3135_v34 = vpack.c.bf16 %v4395_v42, %v4392_v28  ;;  %v1790_v54 = vmul.f32 %v4297_v58, %v4297_v58  ;;  %v1474_v39 = vld [vmem:[#allocation2 + $0x1c8] sm:$0xff] }
 0x233   : > { %v1715_v31 = vadd.f32 %v1714_v27, %v4283_v55  ;;  %v1850_v32 = vadd.f32 %v1849_v26, %v1787_v24  ;;  %3495 = vst [vmem:[#allocation3 + $0x38] sm:$0xff] %v3135_v34   ;;  %v4409_v55 = vadd.f32 %v4198_v20, %v1468_v14  ;;  %v1797_v24 = vmul.f32 %v4350_v53, %v4350_v53 }
 0x234   : > { %v4462_v27 = vadd.f32 %v4198_v20, %v1475_v18 }
 0x235   : > { %v1851_v35 = vadd.f32 %v1850_v32, %v1788_v41  ;;  %v1716_v36 = vadd.f32 %v1715_v31, %v4294_v4  ;;  %v3140_v49 = vpack.c.bf16 %v4409_v55, %v4406_v43  ;;  %v1792_v4 = vmul.f32 %v4311_v60, %v4311_v60  ;;  %v1476_v41 = vld [vmem:[#allocation2 + $0x178] sm:$0xff] }
 0x237   : > { %v1717_v46 = vadd.f32 %v1716_v36, %v4297_v58  ;;  %v1852_v47 = vadd.f32 %v1851_v35, %v1789_v33  ;;  %3496 = vst [vmem:[#allocation3 + $0x28] sm:$0xff] %v3140_v49   ;;  %v4423_v58 = vadd.f32 %v4198_v20, %v1470_v22  ;;  %v1799_v33 = vmul.f32 %v4364_v3, %v4364_v3 }
 0x238   : > { %v4476_v36 = vadd.f32 %v4198_v20, %v1477_v30 }
 0x239   : > { %v1853_v50 = vadd.f32 %v1852_v47, %v1790_v54  ;;  %v1718_v51 = vadd.f32 %v1717_v46, %v4308_v17  ;;  %v3145_v57 = vpack.c.bf16 %v4423_v58, %v4420_v52  ;;  %v1794_v17 = vmul.f32 %v4325_v13, %v4325_v13  ;;  %v1478_v54 = vld [vmem:[#allocation2 + $0x190] sm:$0xff] }
 0x23b   : > { %v1719_v61 = vadd.f32 %v1718_v51, %v4311_v60  ;;  %v1854_v62 = vadd.f32 %v1853_v50, %v1791_v48  ;;  %3497 = vst [vmem:[#allocation3 + $0xa8] sm:$0xff] %v3145_v57   ;;  %v4437_v60 = vadd.f32 %v4198_v20, %v1472_v37  ;;  %v1801_v48 = vmul.f32 %v4378_v16, %v4378_v16 }
 0x23c   : > { %v4490_v51 = vadd.f32 %v4198_v20, %v1479_v45 }
 0x23d   : > { %v1855_v0 = vadd.f32 %v1854_v62, %v1792_v4  ;;  %v1720_v1 = vadd.f32 %v1719_v61, %v4322_v29  ;;  %v3150_v9 = vpack.c.bf16 %v4437_v60, %v4434_v2  ;;  %v1796_v29 = vmul.f32 %v4339_v15, %v4339_v15  ;;  %v1480_v4 = vld [vmem:[#allocation2 + $0x38] sm:$0xff] }
 0x23f   : > { %v1721_v6 = vadd.f32 %v1720_v1, %v4325_v13  ;;  %v1856_v7 = vadd.f32 %v1855_v0, %v1793_v63  ;;  %3498 = vst [vmem:[#allocation3 + $0xe8] sm:$0xff] %v3150_v9   ;;  %v4451_v13 = vadd.f32 %v4198_v20, %v1474_v39  ;;  %v1803_v63 = vmul.f32 %v4392_v28, %v4392_v28  ;;  %v1484_v39 = vld [vmem:[#allocation2 + $0x10] sm:$0xff] }
 0x240   : > { %v1549_v1 = vadd.f32 %v4198_v20, %v1481_v56  ;;  %v1552_v18 = vadd.f32 %v4198_v20, %v1484_v39 }
 0x241   : > { %v1857_v59 = vadd.f32 %v1856_v7, %v1794_v17  ;;  %v1722_v10 = vadd.f32 %v1721_v6, %v4336_v44  ;;  %v3155_v25 = vpack.c.bf16 %v4451_v13, %v4448_v11  ;;  %v1798_v44 = vmul.f32 %v4353_v23, %v4353_v23  ;;  %v1482_v17 = vld [vmem:[#allocation2 + $0x1c0] sm:$0xff] }
 0x242   : > { %v4505_v5 = vadd.f32 %v4198_v20, %v1482_v17  ;;  %v1812_v45 = vmul.f32 %v4451_v13, %v4451_v13  ;;  %v1819_v17 = vmul.f32 %v1549_v1, %v1549_v1 }
 0x243   : > { %v1723_v19 = vadd.f32 %v1722_v10, %v4339_v15  ;;  %v1858_v21 = vadd.f32 %v1857_v59, %v1795_v8  ;;  %3499 = vst [vmem:[#allocation3 + $0xb0] sm:$0xff] %v3155_v25   ;;  %v4465_v15 = vadd.f32 %v4198_v20, %v1476_v41  ;;  %v1805_v8 = vmul.f32 %v4406_v43, %v4406_v43  ;;  %v1486_v41 = vld [vmem:[#allocation2 + $0xa0] sm:$0xff] }
 0x244   : > { %v3175_v9 = vpack.c.bf16 %v4505_v5, %v1549_v1  ;;  %v1554_v30 = vadd.f32 %v4198_v20, %v1486_v41 }
 0x245   : > { %v1859_v12 = vadd.f32 %v1858_v21, %v1796_v29  ;;  %v1724_v26 = vadd.f32 %v1723_v19, %v4350_v53  ;;  %v3160_v34 = vpack.c.bf16 %v4465_v15, %v4462_v27  ;;  %v1800_v53 = vmul.f32 %v4367_v38, %v4367_v38  ;;  %v1485_v19 = vld [vmem:[#allocation2 + $0x58] sm:$0xff] }
 0x246   : > { %v1806_v29 = vmul.f32 %v4409_v55, %v4409_v55  ;;  %3503 = vst [vmem:[#allocation3 + $0x80] sm:$0xff] %v3175_v9   ;;  %v1822_v9 = vmul.f32 %v1552_v18, %v1552_v18 }
 0x247   : > { %v1725_v31 = vadd.f32 %v1724_v26, %v4353_v23  ;;  %v1860_v32 = vadd.f32 %v1859_v12, %v1797_v24  ;;  %3500 = vst [vmem:[#allocation3 + $0x90] sm:$0xff] %v3160_v34   ;;  %v4479_v23 = vadd.f32 %v4198_v20, %v1478_v54  ;;  %v1807_v24 = vmul.f32 %v4420_v52, %v4420_v52 }
 0x248   : > { %v1553_v26 = vadd.f32 %v4198_v20, %v1485_v19  ;;  %v1810_v54 = vmul.f32 %v4437_v60, %v4437_v60 }
 0x249   : > { %v1861_v14 = vadd.f32 %v1860_v32, %v1798_v44  ;;  %v1726_v35 = vadd.f32 %v1725_v31, %v4364_v3  ;;  %v3165_v49 = vpack.c.bf16 %v4479_v23, %v4476_v36  ;;  %v1802_v3 = vmul.f32 %v4381_v40, %v4381_v40 }
 0x24a   : > { %v1808_v44 = vmul.f32 %v4423_v58, %v4423_v58  ;;  %v1809_v32 = vmul.f32 %v4434_v2, %v4434_v2  ;;  %v1823_v39 = vmul.f32 %v1553_v26, %v1553_v26 }
 0x24b   : > { %v1727_v46 = vadd.f32 %v1726_v35, %v4367_v38  ;;  %v1862_v47 = vadd.f32 %v1861_v14, %v1799_v33  ;;  %3501 = vst [vmem:[#allocation3 + $0xb8] sm:$0xff] %v3165_v49   ;;  %v4493_v38 = vadd.f32 %v4198_v20, %v1480_v4  ;;  %v3185_v33 = vpack.c.bf16 %v1554_v30, %v1553_v26 }
 0x24d   : > { %v1863_v22 = vadd.f32 %v1862_v47, %v1800_v53  ;;  %v1728_v50 = vadd.f32 %v1727_v46, %v4378_v16  ;;  %v3170_v57 = vpack.c.bf16 %v4493_v38, %v4490_v51  ;;  %v1804_v16 = vmul.f32 %v4395_v42, %v4395_v42  ;;  %3505 = vst [vmem:[#allocation3 + $0xc8] sm:$0xff] %v3185_v33  }
 0x24f   : > { %v1729_v61 = vadd.f32 %v1728_v50, %v4381_v40  ;;  %v1864_v62 = vadd.f32 %v1863_v22, %v1801_v48  ;;  %3502 = vst [vmem:[#allocation3 + $0x10] sm:$0xff] %v3170_v57   ;;  %v1483_v40 = vld [vmem:[#allocation2 + $0x158] sm:$0xff] }
 0x250   : > { %v1551_v10 = vadd.f32 %v4198_v20, %v1483_v40  ;;  %v1811_v20 = vmul.f32 %v4448_v11, %v4448_v11 }
 0x251   : > { %v1865_v37 = vadd.f32 %v1864_v62, %v1802_v3  ;;  %v1730_v0 = vadd.f32 %v1729_v61, %v4392_v28 }
 0x252   : > { %v3180_v25 = vpack.c.bf16 %v1552_v18, %v1551_v10 }
 0x253   : > { %v1731_v6 = vadd.f32 %v1730_v0, %v4395_v42  ;;  %v1866_v7 = vadd.f32 %v1865_v37, %v1803_v63  ;;  %v1820_v0 = vmul.f32 %v4505_v5, %v4505_v5 }
 0x254   : > { %3504 = vst [vmem:[#allocation3 + $0x40] sm:$0xff] %v3180_v25  }
 0x255   : > { %v1867_v28 = vadd.f32 %v1866_v7, %v1804_v16  ;;  %v1732_v59 = vadd.f32 %v1731_v6, %v4406_v43  ;;  %v1821_v6 = vmul.f32 %v1551_v10, %v1551_v10 }
 0x257   : > { %v1733_v42 = vadd.f32 %v1732_v59, %v4409_v55  ;;  %v1868_v21 = vadd.f32 %v1867_v28, %v1805_v8 }
 0x259   : > { %v1869_v12 = vadd.f32 %v1868_v21, %v1806_v29  ;;  %v1734_v43 = vadd.f32 %v1733_v42, %v4420_v52 }
 0x25b   : > { %v1735_v31 = vadd.f32 %v1734_v43, %v4423_v58  ;;  %v1870_v55 = vadd.f32 %v1869_v12, %v1807_v24 }
 0x25d   : > { %v1871_v34 = vadd.f32 %v1870_v55, %v1808_v44  ;;  %v1736_v53 = vadd.f32 %v1735_v31, %v4434_v2  ;;  %v1813_v2 = vmul.f32 %v4462_v27, %v4462_v27 }
 0x25f   : > { %v1737_v52 = vadd.f32 %v1736_v53, %v4437_v60  ;;  %v1872_v14 = vadd.f32 %v1871_v34, %v1809_v32  ;;  %v1814_v60 = vmul.f32 %v4465_v15, %v4465_v15  ;;  %v1760_v32 = vld [vmem:[#allocation5] sm:$0x1] }
 0x261   : > { %v1873_v35 = vadd.f32 %v1872_v14, %v1810_v54  ;;  %v1738_v58 = vadd.f32 %v1737_v52, %v4448_v11  ;;  %v1815_v11 = vmul.f32 %v4476_v36, %v4476_v36 }
 0x263   : > { %v1739_v46 = vadd.f32 %v1738_v58, %v4451_v13  ;;  %v1874_v47 = vadd.f32 %v1873_v35, %v1811_v20  ;;  %v1816_v13 = vmul.f32 %v4479_v23, %v4479_v23 }
 0x265   : > { %v1875_v48 = vadd.f32 %v1874_v47, %v1812_v45  ;;  %v1740_v49 = vadd.f32 %v1739_v46, %v4462_v27  ;;  %v1817_v27 = vmul.f32 %v4490_v51, %v4490_v51 }
 0x267   : > { %v1741_v3 = vadd.f32 %v1740_v49, %v4465_v15  ;;  %v1876_v4 = vadd.f32 %v1875_v48, %v1813_v2  ;;  %v1818_v15 = vmul.f32 %v4493_v38, %v4493_v38 }
 0x269   : > { %v1877_v22 = vadd.f32 %v1876_v4, %v1814_v60  ;;  %v1742_v50 = vadd.f32 %v1741_v3, %v4476_v36 }
 0x26b   : > { %v1743_v56 = vadd.f32 %v1742_v50, %v4479_v23  ;;  %v1878_v61 = vadd.f32 %v1877_v22, %v1815_v11 }
 0x26d   : > { %v1879_v62 = vadd.f32 %v1878_v61, %v1816_v13  ;;  %v1744_v63 = vadd.f32 %v1743_v56, %v4490_v51 }
 0x26f   : > { %v1745_v57 = vadd.f32 %v1744_v63, %v4493_v38  ;;  %v1880_v16 = vadd.f32 %v1879_v62, %v1817_v27  ;;  %v1824_v38 = vmul.f32 %v1554_v30, %v1554_v30 }
 0x271   : > { %v1881_v36 = vadd.f32 %v1880_v16, %v1818_v15  ;;  %v1746_v37 = vadd.f32 %v1745_v57, %v1549_v1 }
 0x273   : > { %v1747_v23 = vadd.f32 %v1746_v37, %v4505_v5  ;;  %v1882_v40 = vadd.f32 %v1881_v36, %v1819_v17 }
 0x275   : > { %v1883_v7 = vadd.f32 %v1882_v40, %v1820_v0  ;;  %v1748_v8 = vadd.f32 %v1747_v23, %v1551_v10  ;;  %v1688_v10 = vld [vmem:[#allocation4] sm:$0x1] }
 0x277   : > { %v1749_v51 = vadd.f32 %v1748_v8, %v1552_v18  ;;  %v1884_v29 = vadd.f32 %v1883_v7, %v1821_v6 }
 0x279   : > { %v1885_v28 = vadd.f32 %v1884_v29, %v1822_v9  ;;  %v1750_v59 = vadd.f32 %v1749_v51, %v1553_v26 }
 0x27b   : > { %v1751_v19 = vadd.f32 %v1750_v59, %v1554_v30  ;;  %v1886_v42 = vadd.f32 %v1885_v28, %v1823_v39 }
 0x27d   : > { %v1752_v21 = vrot.slane %v1751_v19, 4  ;;  %v1887_v1 = vadd.f32 %v1886_v42, %v1824_v38 }
 0x27f   : > { %v1753_v24 = vadd.f32 %v1752_v21, %v1751_v19  ;;  %v1888_v25 = vrot.slane %v1887_v1, 4 }
 0x281   : > { %v1754_v44 = vrot.slane %v1753_v24, 2  ;;  %v1889_v41 = vadd.f32 %v1888_v25, %v1887_v1 }
 0x283   : > { %v1755_v5 = vadd.f32 %v1754_v44, %v1753_v24  ;;  %v1890_v12 = vrot.slane %v1889_v41, 2 }
 0x285   : > { %v1756_v43 = vrot.slane %v1755_v5, 1  ;;  %v1891_v31 = vadd.f32 %v1890_v12, %v1889_v41 }
 0x287   : > { %v1757_v55 = vadd.f32 %v1756_v43, %v1755_v5  ;;  %v1892_v18 = vrot.slane %v1891_v31, 1 }
 0x289   : > { %v1758_v33 = vadd.f32 %v1757_v55, %v1688_v10  ;;  %v1893_v34 = vadd.f32 %v1892_v18, %v1891_v31 }
 0x28b   : > { %1759 = vst [vmem:[#allocation4] sm:$0x1] %v1758_v33  ;;  %v1894_v26 = vadd.f32 %v1893_v34, %v1760_v32 }
 0x28d   : > { %1895 = vst [vmem:[#allocation5] sm:$0x1] %v1894_v26 }
 0x28e PF: > { %p1896_p6 = scmp.eq.s32.totalorder %s3629_s18, 1 }
 0x28f   : > { %v1910_v49 = vld [vmem:[%s4809_s3] sm:$0x1] (%p1896_p6) }
 0x290   : > { %1902 = sbr.rel (!%p1896_p6) target bundleno = 694 (0x2b6), region = 60  ;;  %v1924_v11 = vld [vmem:[%s4810_s4] sm:$0x1] (%p1896_p6) }
 0x292   : > { %v1903_v30 = vld [vmem:[#allocation4] sm:$0x1] (%p1896_p6) }
 0x293   : > { %v1904_v54 = vmul.f32 (%p1896_p6), 0.001953125, %v1903_v30 }
 0x294   : > { %v1905_v53 = vld [vmem:[#allocation5] sm:$0x1] (%p1896_p6) }
 0x295   : > { %v1906_v52 = vmul.f32 0.001953125, %v1905_v53  ;;  %v1907_v14 = vmul.f32 %v1904_v54, %v1904_v54 }
 0x297   : > { %v1908_v20 = vsub.f32 %v1906_v52, %v1907_v14 }
 0x299   : > { %v1909_v35 = vmax.f32 %v1908_v20, 0.0 }
 0x29b   : > { %v1911_v58 = vadd.f32 1e-05, %v1909_v35 }
 0x29d   : > { %3611 = vrsqrt.f32 %v1911_v58  ;;  %vm1918_vm0 = vweird.f32 %v1911_v58 }
 0x2a3   : > { %v3612_v45 = vpop.eup %3611 }
 0x2a4   : > { %v1913_v46 = vmul.f32 %v3612_v45, %v1911_v58  ;;  %vm1919_vm1 = vweird.f32 %v3612_v45 }
 0x2a5   : > { %vm1920_vm2 = vmor %vm1918_vm0, %vm1919_vm1 }
 0x2a6   : > { %v1914_v47 = vmul.f32 %v3612_v45, %v1913_v46 }
 0x2a8   : > { %v1915_v2 = vmul.f32 0.5, %v1914_v47 }
 0x2aa   : > { %v1916_v48 = vsub.f32 1.5, %v1915_v2 }
 0x2ac   : > { %v1917_v60 = vmul.f32 %v3612_v45, %v1916_v48 }
 0x2ae   : > { %v1921_v3 = vsel %vm1920_vm2, %v3612_v45, %v1917_v60 }
 0x2af   : > { %v1922_v4 = vmul.f32 %v1921_v3, %v1910_v49 }
 0x2b1   : > { %1923 = vst [vmem:[#allocation6] sm:$0x1] %v1922_v4  ;;  %v1925_v22 = vmul.f32 %v1922_v4, %v1904_v54 }
 0x2b3   : > { %v1926_v50 = vsub.f32 %v1924_v11, %v1925_v22 }
 0x2b5   : > { %1927 = vst [vmem:[#allocation7] sm:$0x1] %v1926_v50 }
 0x2b6 PF: > { %1931 = sbr.rel (!%p1896_p6) target bundleno = 806 (0x326), region = 64  ;;  %v3188_v13 = vld [vmem:[#allocation3 + $0x68] sm:$0xff] (%p1896_p6)   ;;  %v3506_v63 = vld [vmem:[#allocation3 + $0x50] sm:$0xff] (%p1896_p6)   ;;  %v3508_v17 = vld [vmem:[#allocation3 + $0x60] sm:$0xff] (%p1896_p6)  }
 0x2b7   : > { %v3189_v61 = vunpack.c.l.bf16 (%p1896_p6), %v3188_v13  ;;  %v3190_v27 = vunpack.c.h.bf16 (%p1896_p6), %v3188_v13  ;;  %v3193_v15 = vunpack.c.l.bf16 (%p1896_p6), %v3506_v63  ;;  %v3194_v57 = vunpack.c.h.bf16 (%p1896_p6), %v3506_v63  ;;  %v3507_v16 = vld [vmem:[#allocation3 + $0x70] sm:$0xff] (%p1896_p6)   ;;  %v3510_v18 = vld [vmem:[#allocation3 + $0xd8] sm:$0xff] (%p1896_p6)   ;;  %v3511_v20 = vld [vmem:[#allocation3 + $0xe0] sm:$0xff] (%p1896_p6)  }
 0x2b8   : > { %v4569_v56 = vld [vmem:[#allocation6] ss:$0 sm:$0xff] (%p1896_p6)  ;;  %v3197_v0 = vunpack.c.l.bf16 (%p1896_p6), %v3507_v16  ;;  %v3198_v23 = vunpack.c.h.bf16 (%p1896_p6), %v3507_v16  ;;  %v3201_v7 = vunpack.c.l.bf16 (%p1896_p6), %v3508_v17  ;;  %v3202_v8 = vunpack.c.h.bf16 (%p1896_p6), %v3508_v17  ;;  %v3509_v55 = vld [vmem:[#allocation3 + $0xd0] sm:$0xff] (%p1896_p6)  }
 0x2b9   : > { %v2069_v36 = vmul.f32 (%p1896_p6), %v4569_v56, %v3189_v61  ;;  %v2070_v37 = vmul.f32 (%p1896_p6), %v4569_v56, %v3190_v27  ;;  %v2071_v40 = vmul.f32 (%p1896_p6), %v4569_v56, %v3193_v15  ;;  %v2072_v6 = vmul.f32 (%p1896_p6), %v4569_v56, %v3194_v57  ;;  %v3512_v49 = vld [vmem:[#allocation3 + $0x30] sm:$0xff] (%p1896_p6)  }
 0x2ba   : > { %v2073_v29 = vmul.f32 (%p1896_p6), %v4569_v56, %v3197_v0  ;;  %v2074_v39 = vmul.f32 (%p1896_p6), %v4569_v56, %v3198_v23  ;;  %v2075_v38 = vmul.f32 (%p1896_p6), %v4569_v56, %v3201_v7  ;;  %v2076_v19 = vmul.f32 (%p1896_p6), %v4569_v56, %v3202_v8 }
 0x2bb   : > { %v3205_v54 = vunpack.c.l.bf16 %v3509_v55  ;;  %v3206_v52 = vunpack.c.h.bf16 %v3509_v55  ;;  %v3209_v14 = vunpack.c.l.bf16 %v3510_v18  ;;  %v3210_v48 = vunpack.c.h.bf16 %v3510_v18 }
 0x2bc   : > { %v4571_v62 = vld [vmem:[#allocation7] ss:$0 sm:$0xff]  ;;  %v3213_v4 = vunpack.c.l.bf16 %v3511_v20  ;;  %v3214_v11 = vunpack.c.h.bf16 %v3511_v20  ;;  %v3217_v57 = vunpack.c.l.bf16 %v3512_v49 }
 0x2bd   : > { %v2137_v9 = vadd.f32 %v4571_v62, %v2069_v36  ;;  %v2138_v51 = vadd.f32 %v4571_v62, %v2070_v37  ;;  %v2139_v28 = vadd.f32 %v4571_v62, %v2071_v40  ;;  %v2140_v59 = vadd.f32 %v4571_v62, %v2072_v6 }
 0x2be   : > { %v2141_v41 = vadd.f32 %v4571_v62, %v2073_v29  ;;  %v2142_v5 = vadd.f32 %v4571_v62, %v2074_v39  ;;  %v2143_v10 = vadd.f32 %v4571_v62, %v2075_v38  ;;  %v2144_v26 = vadd.f32 %v4571_v62, %v2076_v19  ;;  %v3514_v29 = vld [vmem:[#allocation3 + $0x8] sm:$0xff]  }
 0x2bf   : > { %vm2201_vm3 = vcmp.gt.f32.partialorder %v2137_v9, 0.0  ;;  %vm2202_vm4 = vcmp.gt.f32.partialorder %v2138_v51, 0.0  ;;  %v2265_v42 = vmul.f32 0.2, %v2137_v9  ;;  %v2266_v21 = vmul.f32 0.2, %v2138_v51 }
 0x2c0   : > { %vm2203_vm5 = vcmp.gt.f32.partialorder %v2139_v28, 0.0  ;;  %vm2204_vm6 = vcmp.gt.f32.partialorder %v2140_v59, 0.0  ;;  %v2267_v1 = vmul.f32 0.2, %v2139_v28  ;;  %v2268_v24 = vmul.f32 0.2, %v2140_v59 }
 0x2c1   : > { %v2329_v25 = vsel %vm2201_vm3, %v2137_v9, %v2265_v42  ;;  %v2330_v44 = vsel %vm2202_vm4, %v2138_v51, %v2266_v21  ;;  %vm2205_vm7 = vcmp.gt.f32.partialorder %v2141_v41, 0.0  ;;  %vm2206_vm8 = vcmp.gt.f32.partialorder %v2142_v5, 0.0  ;;  %v3513_v51 = vld [vmem:[#allocation3 + $0x48] sm:$0xff]  }
 0x2c2   : > { %v3318_v12 = vpack.c.bf16 %v2330_v44, %v2329_v25  ;;  %v2331_v43 = vsel %vm2203_vm5, %v2139_v28, %v2267_v1  ;;  %v2332_v31 = vsel %vm2204_vm6, %v2140_v59, %v2268_v24  ;;  %v2269_v33 = vmul.f32 0.2, %v2141_v41  ;;  %v3515_v1 = vld [vmem:[#allocation3 + $0xf0] sm:$0xff]  }
 0x2c3   : > { %v3323_v32 = vpack.c.bf16 %v2332_v31, %v2331_v43  ;;  %v2270_v34 = vmul.f32 0.2, %v2142_v5  ;;  %vm2207_vm9 = vcmp.gt.f32.partialorder %v2143_v10, 0.0  ;;  %v2271_v30 = vmul.f32 0.2, %v2143_v10 }
 0x2c4   : > { %3319 = vst [vmem:[%s4811_s5] sm:$0xff] %v3318_v12   ;;  %v2333_v53 = vsel %vm2205_vm7, %v2141_v41, %v2269_v33  ;;  %vm2208_vm10 = vcmp.gt.f32.partialorder %v2144_v26, 0.0  ;;  %v2272_v58 = vmul.f32 0.2, %v2144_v26  ;;  %v2077_v47 = vmul.f32 %v4569_v56, %v3205_v54 }
 0x2c5   : > { %3537 = vst [vmem:[%s4811_s5 + $0x8] sm:$0xff] %v3323_v32   ;;  %v2334_v35 = vsel %vm2206_vm8, %v2142_v5, %v2270_v34  ;;  %v2335_v45 = vsel %vm2207_vm9, %v2143_v10, %v2271_v30  ;;  %v2078_v2 = vmul.f32 %v4569_v56, %v3206_v52  ;;  %v2079_v3 = vmul.f32 %v4569_v56, %v3209_v14 }
 0x2c6   : > { %v3328_v46 = vpack.c.bf16 %v2334_v35, %v2333_v53  ;;  %v2336_v60 = vsel %vm2208_vm10, %v2144_v26, %v2272_v58  ;;  %v2145_v50 = vadd.f32 %v4571_v62, %v2077_v47  ;;  %v2080_v61 = vmul.f32 %v4569_v56, %v3210_v48  ;;  %v3517_v48 = vld [vmem:[#allocation3 + $0x78] sm:$0xff]  }
 0x2c7   : > { %v3333_v22 = vpack.c.bf16 %v2336_v60, %v2335_v45  ;;  %v2146_v13 = vadd.f32 %v4571_v62, %v2078_v2  ;;  %v2147_v27 = vadd.f32 %v4571_v62, %v2079_v3  ;;  %v2081_v63 = vmul.f32 %v4569_v56, %v3213_v4  ;;  %v3516_v2 = vld [vmem:[#allocation3 + $0x88] sm:$0xff]  }
 0x2c8   : > { %3538 = vst [vmem:[%s4811_s5 + $0x10] sm:$0xff] %v3328_v46   ;;  %v2082_v15 = vmul.f32 %v4569_v56, %v3214_v11  ;;  %vm2209_vm11 = vcmp.gt.f32.partialorder %v2145_v50, 0.0  ;;  %v2273_v16 = vmul.f32 0.2, %v2145_v50  ;;  %v2148_v17 = vadd.f32 %v4571_v62, %v2080_v61  ;;  %v3518_v61 = vld [vmem:[#allocation3 + $0x20] sm:$0xff]  }
 0x2c9   : > { %3539 = vst [vmem:[%s4811_s5 + $0x18] sm:$0xff] %v3333_v22   ;;  %vm2210_vm12 = vcmp.gt.f32.partialorder %v2146_v13, 0.0  ;;  %v2274_v36 = vmul.f32 0.2, %v2146_v13  ;;  %vm2211_vm13 = vcmp.gt.f32.partialorder %v2147_v27, 0.0  ;;  %v2149_v0 = vadd.f32 %v4571_v62, %v2081_v63 }
 0x2ca   : > { %v2275_v37 = vmul.f32 0.2, %v2147_v27  ;;  %v2337_v23 = vsel %vm2209_vm11, %v2145_v50, %v2273_v16  ;;  %vm2212_vm14 = vcmp.gt.f32.partialorder %v2148_v17, 0.0  ;;  %v2276_v40 = vmul.f32 0.2, %v2148_v17 }
 0x2cb   : > { %v2150_v6 = vadd.f32 %v4571_v62, %v2082_v15  ;;  %v2338_v7 = vsel %vm2210_vm12, %v2146_v13, %v2274_v36  ;;  %vm2213_vm15 = vcmp.gt.f32.partialorder %v2149_v0, 0.0  ;;  %v2277_v9 = vmul.f32 0.2, %v2149_v0 }
 0x2cc   : > { %v2339_v8 = vsel %vm2211_vm13, %v2147_v27, %v2275_v37  ;;  %v3338_v39 = vpack.c.bf16 %v2338_v7, %v2337_v23  ;;  %v2340_v28 = vsel %vm2212_vm14, %v2148_v17, %v2276_v40  ;;  %v3218_v42 = vunpack.c.h.bf16 %v3512_v49 }
 0x2cd   : > { %vm2214_vm0 = vcmp.gt.f32.partialorder %v2150_v6, 0.0  ;;  %v2278_v59 = vmul.f32 0.2, %v2150_v6  ;;  %v3343_v38 = vpack.c.bf16 %v2340_v28, %v2339_v8  ;;  %v2341_v19 = vsel %vm2213_vm15, %v2149_v0, %v2277_v9 }
 0x2ce   : > { %v2083_v21 = vmul.f32 %v4569_v56, %v3217_v57  ;;  %3540 = vst [vmem:[%s4811_s5 + $0x20] sm:$0xff] %v3338_v39   ;;  %v3221_v25 = vunpack.c.l.bf16 %v3513_v51  ;;  %v3222_v44 = vunpack.c.h.bf16 %v3513_v51  ;;  %v3225_v41 = vunpack.c.l.bf16 %v3514_v29 }
 0x2cf   : > { %v2342_v24 = vsel %vm2214_vm0, %v2150_v6, %v2278_v59  ;;  %3541 = vst [vmem:[%s4811_s5 + $0x28] sm:$0xff] %v3343_v38   ;;  %v2084_v12 = vmul.f32 %v4569_v56, %v3218_v42  ;;  %v3226_v31 = vunpack.c.h.bf16 %v3514_v29  ;;  %v3229_v32 = vunpack.c.l.bf16 %v3515_v1 }
 0x2d0   : > { %v3348_v5 = vpack.c.bf16 %v2342_v24, %v2341_v19  ;;  %v2151_v43 = vadd.f32 %v4571_v62, %v2083_v21  ;;  %v2085_v10 = vmul.f32 %v4569_v56, %v3221_v25  ;;  %v2086_v55 = vmul.f32 %v4569_v56, %v3222_v44 }
 0x2d1   : > { %v2087_v18 = vmul.f32 %v4569_v56, %v3225_v41  ;;  %v2152_v33 = vadd.f32 %v4571_v62, %v2084_v12  ;;  %v2088_v26 = vmul.f32 %v4569_v56, %v3226_v31  ;;  %v3230_v52 = vunpack.c.h.bf16 %v3515_v1  ;;  %v3519_v1 = vld [vmem:[#allocation3] sm:$0xff]  }
 0x2d2   : > { %3542 = vst [vmem:[%s4811_s5 + $0x30] sm:$0xff] %v3348_v5   ;;  %vm2215_vm1 = vcmp.gt.f32.partialorder %v2151_v43, 0.0  ;;  %v2279_v34 = vmul.f32 0.2, %v2151_v43  ;;  %v2153_v30 = vadd.f32 %v4571_v62, %v2085_v10  ;;  %v2154_v53 = vadd.f32 %v4571_v62, %v2086_v55 }
 0x2d3   : > { %v2155_v54 = vadd.f32 %v4571_v62, %v2087_v18  ;;  %vm2216_vm2 = vcmp.gt.f32.partialorder %v2152_v33, 0.0  ;;  %v2280_v14 = vmul.f32 0.2, %v2152_v33  ;;  %v2156_v35 = vadd.f32 %v4571_v62, %v2088_v26  ;;  %v3520_v18 = vld [vmem:[#allocation3 + $0x18] sm:$0xff]  }
 0x2d4   : > { %v2343_v20 = vsel %vm2215_vm1, %v2151_v43, %v2279_v34  ;;  %vm2217_vm3 = vcmp.gt.f32.partialorder %v2153_v30, 0.0  ;;  %vm2218_vm4 = vcmp.gt.f32.partialorder %v2154_v53, 0.0  ;;  %v2281_v58 = vmul.f32 0.2, %v2153_v30 }
 0x2d5   : > { %v2282_v45 = vmul.f32 0.2, %v2154_v53  ;;  %v2344_v46 = vsel %vm2216_vm2, %v2152_v33, %v2280_v14  ;;  %vm2219_vm5 = vcmp.gt.f32.partialorder %v2155_v54, 0.0  ;;  %vm2220_vm6 = vcmp.gt.f32.partialorder %v2156_v35, 0.0 }
 0x2d6   : > { %v2283_v47 = vmul.f32 0.2, %v2155_v54  ;;  %v3353_v49 = vpack.c.bf16 %v2344_v46, %v2343_v20  ;;  %v2345_v60 = vsel %vm2217_vm3, %v2153_v30, %v2281_v58  ;;  %v2284_v4 = vmul.f32 0.2, %v2156_v35  ;;  %v3521_v30 = vld [vmem:[#allocation3 + $0x98] sm:$0xff]  }
 0x2d7   : > { %v2346_v3 = vsel %vm2218_vm4, %v2154_v53, %v2282_v45  ;;  %v2089_v50 = vmul.f32 %v4569_v56, %v3229_v32  ;;  %v2090_v13 = vmul.f32 %v4569_v56, %v3230_v52  ;;  %v3233_v63 = vunpack.c.l.bf16 %v3516_v2 }
 0x2d8   : > { %v3358_v11 = vpack.c.bf16 %v2346_v3, %v2345_v60  ;;  %v2347_v22 = vsel %vm2219_vm5, %v2155_v54, %v2283_v47  ;;  %3543 = vst [vmem:[%s4811_s5 + $0x38] sm:$0xff] %v3353_v49   ;;  %v2348_v27 = vsel %vm2220_vm6, %v2156_v35, %v2284_v4  ;;  %v3234_v15 = vunpack.c.h.bf16 %v3516_v2  ;;  %v3522_v3 = vld [vmem:[#allocation3 + $0xa0] sm:$0xff]  }
 0x2d9   : > { %v3237_v57 = vunpack.c.l.bf16 %v3517_v48  ;;  %v3363_v16 = vpack.c.bf16 %v2348_v27, %v2347_v22  ;;  %v2157_v17 = vadd.f32 %v4571_v62, %v2089_v50  ;;  %v2158_v36 = vadd.f32 %v4571_v62, %v2090_v13 }
 0x2da   : > { %3544 = vst [vmem:[%s4811_s5 + $0x40] sm:$0xff] %v3358_v11   ;;  %v3238_v37 = vunpack.c.h.bf16 %v3517_v48  ;;  %v2091_v0 = vmul.f32 %v4569_v56, %v3233_v63  ;;  %v2092_v23 = vmul.f32 %v4569_v56, %v3234_v15  ;;  %v3241_v6 = vunpack.c.l.bf16 %v3518_v61 }
 0x2db   : > { %v2093_v40 = vmul.f32 %v4569_v56, %v3237_v57  ;;  %3545 = vst [vmem:[%s4811_s5 + $0x48] sm:$0xff] %v3363_v16   ;;  %vm2221_vm7 = vcmp.gt.f32.partialorder %v2157_v17, 0.0  ;;  %vm2222_vm8 = vcmp.gt.f32.partialorder %v2158_v36, 0.0  ;;  %v2285_v7 = vmul.f32 0.2, %v2157_v17 }
 0x2dc   : > { %v2094_v8 = vmul.f32 %v4569_v56, %v3238_v37  ;;  %v2286_v9 = vmul.f32 0.2, %v2158_v36  ;;  %v2159_v51 = vadd.f32 %v4571_v62, %v2091_v0  ;;  %v2160_v29 = vadd.f32 %v4571_v62, %v2092_v23 }
 0x2dd   : > { %v2161_v39 = vadd.f32 %v4571_v62, %v2093_v40  ;;  %v2349_v28 = vsel %vm2221_vm7, %v2157_v17, %v2285_v7  ;;  %v3242_v38 = vunpack.c.h.bf16 %v3518_v61  ;;  %v2095_v19 = vmul.f32 %v4569_v56, %v3241_v6  ;;  %v3523_v40 = vld [vmem:[#allocation3 + $0xf8] sm:$0xff]  }
 0x2de   : > { %v2162_v59 = vadd.f32 %v4571_v62, %v2094_v8  ;;  %v2350_v42 = vsel %vm2222_vm8, %v2158_v36, %v2286_v9  ;;  %vm2223_vm9 = vcmp.gt.f32.partialorder %v2159_v51, 0.0  ;;  %vm2224_vm10 = vcmp.gt.f32.partialorder %v2160_v29, 0.0  ;;  %v3524_v9 = vld [vmem:[#allocation3 + $0x58] sm:$0xff]  }
 0x2df   : > { %v2287_v21 = vmul.f32 0.2, %v2159_v51  ;;  %v3368_v24 = vpack.c.bf16 %v2350_v42, %v2349_v28  ;;  %v2288_v25 = vmul.f32 0.2, %v2160_v29  ;;  %vm2225_vm11 = vcmp.gt.f32.partialorder %v2161_v39, 0.0 }
 0x2e0   : > { %vm2226_vm12 = vcmp.gt.f32.partialorder %v2162_v59, 0.0  ;;  %v2289_v41 = vmul.f32 0.2, %v2161_v39  ;;  %v2290_v5 = vmul.f32 0.2, %v2162_v59  ;;  %v2096_v12 = vmul.f32 %v4569_v56, %v3242_v38 }
 0x2e1   : > { %v2351_v44 = vsel %vm2223_vm9, %v2159_v51, %v2287_v21  ;;  %3546 = vst [vmem:[%s4811_s5 + $0x50] sm:$0xff] %v3368_v24   ;;  %v2352_v43 = vsel %vm2224_vm10, %v2160_v29, %v2288_v25  ;;  %v2163_v31 = vadd.f32 %v4571_v62, %v2095_v19  ;;  %v3245_v10 = vunpack.c.l.bf16 %v3519_v1 }
 0x2e2   : > { %v3246_v55 = vunpack.c.h.bf16 %v3519_v1  ;;  %v3373_v32 = vpack.c.bf16 %v2352_v43, %v2351_v44  ;;  %v2353_v33 = vsel %vm2225_vm11, %v2161_v39, %v2289_v41  ;;  %v2354_v34 = vsel %vm2226_vm12, %v2162_v59, %v2290_v5 }
 0x2e3   : > { %v2164_v26 = vadd.f32 %v4571_v62, %v2096_v12  ;;  %v3378_v53 = vpack.c.bf16 %v2354_v34, %v2353_v33  ;;  %vm2227_vm13 = vcmp.gt.f32.partialorder %v2163_v31, 0.0  ;;  %v2291_v54 = vmul.f32 0.2, %v2163_v31  ;;  %v3525_v12 = vld [vmem:[#allocation3 + $0xc0] sm:$0xff]  }
 0x2e4   : > { %v2097_v52 = vmul.f32 %v4569_v56, %v3245_v10  ;;  %3547 = vst [vmem:[%s4811_s5 + $0x58] sm:$0xff] %v3373_v32   ;;  %v2098_v20 = vmul.f32 %v4569_v56, %v3246_v55  ;;  %v3249_v35 = vunpack.c.l.bf16 %v3520_v18  ;;  %v3250_v46 = vunpack.c.h.bf16 %v3520_v18 }
 0x2e5   : > { %vm2228_vm14 = vcmp.gt.f32.partialorder %v2164_v26, 0.0  ;;  %v2292_v14 = vmul.f32 0.2, %v2164_v26  ;;  %3548 = vst [vmem:[%s4811_s5 + $0x60] sm:$0xff] %v3378_v53   ;;  %v2355_v58 = vsel %vm2227_vm13, %v2163_v31, %v2291_v54  ;;  %v3253_v47 = vunpack.c.l.bf16 %v3521_v30 }
 0x2e6   : > { %v2165_v45 = vadd.f32 %v4571_v62, %v2097_v52  ;;  %v2166_v48 = vadd.f32 %v4571_v62, %v2098_v20  ;;  %v2099_v49 = vmul.f32 %v4569_v56, %v3249_v35  ;;  %v3254_v60 = vunpack.c.h.bf16 %v3521_v30 }
 0x2e7   : > { %v2356_v2 = vsel %vm2228_vm14, %v2164_v26, %v2292_v14  ;;  %v2100_v22 = vmul.f32 %v4569_v56, %v3250_v46  ;;  %v2101_v61 = vmul.f32 %v4569_v56, %v3253_v47  ;;  %v3257_v57 = vunpack.c.l.bf16 %v3522_v3  ;;  %v3526_v14 = vld [vmem:[#allocation3 + $0x38] sm:$0xff]  }
 0x2e8   : > { %v3383_v4 = vpack.c.bf16 %v2356_v2, %v2355_v58  ;;  %vm2229_vm15 = vcmp.gt.f32.partialorder %v2165_v45, 0.0  ;;  %v2293_v11 = vmul.f32 0.2, %v2165_v45  ;;  %vm2230_vm0 = vcmp.gt.f32.partialorder %v2166_v48, 0.0 }
 0x2e9   : > { %v2294_v50 = vmul.f32 0.2, %v2166_v48  ;;  %v2167_v13 = vadd.f32 %v4571_v62, %v2099_v49  ;;  %v2168_v63 = vadd.f32 %v4571_v62, %v2100_v22  ;;  %v2102_v15 = vmul.f32 %v4569_v56, %v3254_v60  ;;  %v3527_v60 = vld [vmem:[#allocation3 + $0x28] sm:$0xff]  }
 0x2ea   : > { %3549 = vst [vmem:[%s4811_s5 + $0x68] sm:$0xff] %v3383_v4   ;;  %v2357_v27 = vsel %vm2229_vm15, %v2165_v45, %v2293_v11  ;;  %v2169_v36 = vadd.f32 %v4571_v62, %v2101_v61  ;;  %v3258_v8 = vunpack.c.h.bf16 %v3522_v3  ;;  %v2103_v39 = vmul.f32 %v4569_v56, %v3257_v57  ;;  %v3528_v3 = vld [vmem:[#allocation3 + $0xa8] sm:$0xff]  }
 0x2eb   : > { %v2358_v16 = vsel %vm2230_vm0, %v2166_v48, %v2294_v50  ;;  %vm2231_vm1 = vcmp.gt.f32.partialorder %v2167_v13, 0.0  ;;  %v2295_v17 = vmul.f32 0.2, %v2167_v13  ;;  %vm2232_vm2 = vcmp.gt.f32.partialorder %v2168_v63, 0.0 }
 0x2ec   : > { %v3388_v37 = vpack.c.bf16 %v2358_v16, %v2357_v27  ;;  %v2296_v0 = vmul.f32 0.2, %v2168_v63  ;;  %v2170_v23 = vadd.f32 %v4571_v62, %v2102_v15  ;;  %vm2233_vm3 = vcmp.gt.f32.partialorder %v2169_v36, 0.0 }
 0x2ed   : > { %v2359_v6 = vsel %vm2231_vm1, %v2167_v13, %v2295_v17  ;;  %v2297_v7 = vmul.f32 0.2, %v2169_v36  ;;  %v2104_v38 = vmul.f32 %v4569_v56, %v3258_v8  ;;  %v3261_v19 = vunpack.c.l.bf16 %v3523_v40 }
 0x2ee   : > { %3550 = vst [vmem:[%s4811_s5 + $0x70] sm:$0xff] %v3388_v37   ;;  %v2360_v51 = vsel %vm2232_vm2, %v2168_v63, %v2296_v0  ;;  %vm2234_vm4 = vcmp.gt.f32.partialorder %v2170_v23, 0.0  ;;  %v2298_v29 = vmul.f32 0.2, %v2170_v23  ;;  %v2171_v21 = vadd.f32 %v4571_v62, %v2103_v39 }
 0x2ef   : > { %v3393_v28 = vpack.c.bf16 %v2360_v51, %v2359_v6  ;;  %v2361_v59 = vsel %vm2233_vm3, %v2169_v36, %v2297_v7  ;;  %v3262_v1 = vunpack.c.h.bf16 %v3523_v40  ;;  %v3265_v24 = vunpack.c.l.bf16 %v3524_v9 }
 0x2f0   : > { %v2362_v42 = vsel %vm2234_vm4, %v2170_v23, %v2298_v29  ;;  %v2172_v44 = vadd.f32 %v4571_v62, %v2104_v38  ;;  %v2105_v41 = vmul.f32 %v4569_v56, %v3261_v19  ;;  %v3266_v5 = vunpack.c.h.bf16 %v3524_v9 }
 0x2f1   : > { %3551 = vst [vmem:[%s4811_s5 + $0x78] sm:$0xff] %v3393_v28   ;;  %v3398_v25 = vpack.c.bf16 %v2362_v42, %v2361_v59  ;;  %vm2235_vm5 = vcmp.gt.f32.partialorder %v2171_v21, 0.0  ;;  %v2299_v43 = vmul.f32 0.2, %v2171_v21  ;;  %v2106_v31 = vmul.f32 %v4569_v56, %v3262_v1  ;;  %v3529_v42 = vld [vmem:[#allocation3 + $0xe8] sm:$0xff]  }
 0x2f2   : > { %v2107_v10 = vmul.f32 %v4569_v56, %v3265_v24  ;;  %vm2236_vm6 = vcmp.gt.f32.partialorder %v2172_v44, 0.0  ;;  %v2300_v55 = vmul.f32 0.2, %v2172_v44  ;;  %v2173_v18 = vadd.f32 %v4571_v62, %v2105_v41 }
 0x2f3   : > { %3552 = vst [vmem:[%s4811_s5 + $0x80] sm:$0xff] %v3398_v25   ;;  %v2108_v32 = vmul.f32 %v4569_v56, %v3266_v5  ;;  %v2363_v33 = vsel %vm2235_vm5, %v2171_v21, %v2299_v43  ;;  %v2174_v34 = vadd.f32 %v4571_v62, %v2106_v31  ;;  %v3269_v30 = vunpack.c.l.bf16 %v3525_v12  ;;  %v3530_v25 = vld [vmem:[#allocation3 + $0xb0] sm:$0xff]  }
 0x2f4   : > { %v2175_v26 = vadd.f32 %v4571_v62, %v2107_v10  ;;  %v2364_v53 = vsel %vm2236_vm6, %v2172_v44, %v2300_v55  ;;  %vm2237_vm7 = vcmp.gt.f32.partialorder %v2173_v18, 0.0  ;;  %v2301_v54 = vmul.f32 0.2, %v2173_v18 }
 0x2f5   : > { %v2176_v52 = vadd.f32 %v4571_v62, %v2108_v32  ;;  %v3403_v20 = vpack.c.bf16 %v2364_v53, %v2363_v33  ;;  %vm2238_vm8 = vcmp.gt.f32.partialorder %v2174_v34, 0.0  ;;  %v2302_v35 = vmul.f32 0.2, %v2174_v34 }
 0x2f6   : > { %vm2239_vm9 = vcmp.gt.f32.partialorder %v2175_v26, 0.0  ;;  %v2365_v58 = vsel %vm2237_vm7, %v2173_v18, %v2301_v54  ;;  %v2303_v45 = vmul.f32 0.2, %v2175_v26  ;;  %v3270_v2 = vunpack.c.h.bf16 %v3525_v12 }
 0x2f7   : > { %vm2240_vm10 = vcmp.gt.f32.partialorder %v2176_v52, 0.0  ;;  %v2304_v46 = vmul.f32 0.2, %v2176_v52  ;;  %3553 = vst [vmem:[%s4811_s5 + $0x88] sm:$0xff] %v3403_v20   ;;  %v2366_v47 = vsel %vm2238_vm8, %v2174_v34, %v2302_v35  ;;  %v2109_v48 = vmul.f32 %v4569_v56, %v3269_v30  ;;  %v3531_v34 = vld [vmem:[#allocation3 + $0x90] sm:$0xff]  }
 0x2f8   : > { %v3273_v49 = vunpack.c.l.bf16 %v3526_v14  ;;  %v3408_v4 = vpack.c.bf16 %v2366_v47, %v2365_v58  ;;  %v2367_v11 = vsel %vm2239_vm9, %v2175_v26, %v2303_v45  ;;  %v3274_v50 = vunpack.c.h.bf16 %v3526_v14 }
 0x2f9   : > { %v2368_v22 = vsel %vm2240_vm10, %v2176_v52, %v2304_v46  ;;  %v2110_v61 = vmul.f32 %v4569_v56, %v3270_v2  ;;  %v2177_v27 = vadd.f32 %v4571_v62, %v2109_v48  ;;  %v3277_v57 = vunpack.c.l.bf16 %v3527_v60 }
 0x2fa   : > { %v3413_v13 = vpack.c.bf16 %v2368_v22, %v2367_v11  ;;  %v2111_v63 = vmul.f32 %v4569_v56, %v3273_v49  ;;  %3554 = vst [vmem:[%s4811_s5 + $0x90] sm:$0xff] %v3408_v4   ;;  %v2112_v15 = vmul.f32 %v4569_v56, %v3274_v50  ;;  %v3278_v16 = vunpack.c.h.bf16 %v3527_v60 }
 0x2fb   : > { %v3281_v17 = vunpack.c.l.bf16 %v3528_v3  ;;  %v2178_v36 = vadd.f32 %v4571_v62, %v2110_v61  ;;  %vm2241_vm11 = vcmp.gt.f32.partialorder %v2177_v27, 0.0  ;;  %v2305_v37 = vmul.f32 0.2, %v2177_v27  ;;  %v3532_v61 = vld [vmem:[#allocation3 + $0xb8] sm:$0xff]  }
 0x2fc   : > { %3555 = vst [vmem:[%s4811_s5 + $0x98] sm:$0xff] %v3413_v13   ;;  %v2179_v0 = vadd.f32 %v4571_v62, %v2111_v63  ;;  %v2180_v23 = vadd.f32 %v4571_v62, %v2112_v15  ;;  %v2113_v40 = vmul.f32 %v4569_v56, %v3277_v57  ;;  %v2114_v6 = vmul.f32 %v4569_v56, %v3278_v16  ;;  %v3533_v16 = vld [vmem:[#allocation3 + $0x10] sm:$0xff]  }
 0x2fd   : > { %v3282_v7 = vunpack.c.h.bf16 %v3528_v3  ;;  %vm2242_vm12 = vcmp.gt.f32.partialorder %v2178_v36, 0.0  ;;  %v2306_v8 = vmul.f32 0.2, %v2178_v36  ;;  %v2369_v9 = vsel %vm2241_vm11, %v2177_v27, %v2305_v37 }
 0x2fe   : > { %vm2243_vm13 = vcmp.gt.f32.partialorder %v2179_v0, 0.0  ;;  %vm2244_vm14 = vcmp.gt.f32.partialorder %v2180_v23, 0.0  ;;  %v2307_v51 = vmul.f32 0.2, %v2179_v0  ;;  %v2308_v29 = vmul.f32 0.2, %v2180_v23 }
 0x2ff   : > { %v2181_v39 = vadd.f32 %v4571_v62, %v2113_v40  ;;  %v2370_v28 = vsel %vm2242_vm12, %v2178_v36, %v2306_v8  ;;  %v2182_v59 = vadd.f32 %v4571_v62, %v2114_v6  ;;  %v2115_v38 = vmul.f32 %v4569_v56, %v3281_v17 }
 0x300   : > { %v2116_v19 = vmul.f32 %v4569_v56, %v3282_v7  ;;  %v3418_v21 = vpack.c.bf16 %v2370_v28, %v2369_v9  ;;  %v2371_v1 = vsel %vm2243_vm13, %v2179_v0, %v2307_v51  ;;  %v2372_v24 = vsel %vm2244_vm14, %v2180_v23, %v2308_v29  ;;  %v3534_v0 = vld [vmem:[#allocation3 + $0x80] sm:$0xff]  }
 0x301   : > { %vm2245_vm15 = vcmp.gt.f32.partialorder %v2181_v39, 0.0  ;;  %v3423_v44 = vpack.c.bf16 %v2372_v24, %v2371_v1  ;;  %vm2246_vm0 = vcmp.gt.f32.partialorder %v2182_v59, 0.0  ;;  %v2309_v41 = vmul.f32 0.2, %v2181_v39  ;;  %v3535_v29 = vld [vmem:[#allocation3 + $0x40] sm:$0xff]  }
 0x302   : > { %v2310_v5 = vmul.f32 0.2, %v2182_v59  ;;  %3556 = vst [vmem:[%s4811_s5 + $0xa0] sm:$0xff] %v3418_v21   ;;  %v2183_v12 = vadd.f32 %v4571_v62, %v2115_v38  ;;  %v2184_v43 = vadd.f32 %v4571_v62, %v2116_v19  ;;  %v3285_v31 = vunpack.c.l.bf16 %v3529_v42 }
 0x303   : > { %v3286_v10 = vunpack.c.h.bf16 %v3529_v42  ;;  %3557 = vst [vmem:[%s4811_s5 + $0xa8] sm:$0xff] %v3423_v44   ;;  %v2373_v55 = vsel %vm2245_vm15, %v2181_v39, %v2309_v41  ;;  %v3289_v32 = vunpack.c.l.bf16 %v3530_v25  ;;  %v3290_v33 = vunpack.c.h.bf16 %v3530_v25 }
 0x304   : > { %v2374_v18 = vsel %vm2246_vm0, %v2182_v59, %v2310_v5  ;;  %vm2247_vm1 = vcmp.gt.f32.partialorder %v2183_v12, 0.0  ;;  %vm2248_vm2 = vcmp.gt.f32.partialorder %v2184_v43, 0.0  ;;  %v2311_v30 = vmul.f32 0.2, %v2183_v12 }
 0x305   : > { %v3428_v26 = vpack.c.bf16 %v2374_v18, %v2373_v55  ;;  %v2312_v53 = vmul.f32 0.2, %v2184_v43  ;;  %v2117_v54 = vmul.f32 %v4569_v56, %v3285_v31  ;;  %v2118_v52 = vmul.f32 %v4569_v56, %v3286_v10 }
 0x306   : > { %v2119_v14 = vmul.f32 %v4569_v56, %v3289_v32  ;;  %v2375_v20 = vsel %vm2247_vm1, %v2183_v12, %v2311_v30  ;;  %v2120_v35 = vmul.f32 %v4569_v56, %v3290_v33  ;;  %v3293_v58 = vunpack.c.l.bf16 %v3531_v34 }
 0x307   : > { %3558 = vst [vmem:[%s4811_s5 + $0xb0] sm:$0xff] %v3428_v26   ;;  %v3294_v45 = vunpack.c.h.bf16 %v3531_v34  ;;  %v2376_v46 = vsel %vm2248_vm2, %v2184_v43, %v2312_v53  ;;  %v2185_v47 = vadd.f32 %v4571_v62, %v2117_v54  ;;  %v2186_v2 = vadd.f32 %v4571_v62, %v2118_v52 }
 0x308   : > { %v2187_v48 = vadd.f32 %v4571_v62, %v2119_v14  ;;  %v3433_v49 = vpack.c.bf16 %v2376_v46, %v2375_v20  ;;  %v2188_v60 = vadd.f32 %v4571_v62, %v2120_v35  ;;  %v2121_v3 = vmul.f32 %v4569_v56, %v3293_v58  ;;  %v3536_v14 = vld [vmem:[#allocation3 + $0xc8] sm:$0xff]  }
 0x309   : > { %v2122_v4 = vmul.f32 %v4569_v56, %v3294_v45  ;;  %vm2249_vm3 = vcmp.gt.f32.partialorder %v2185_v47, 0.0  ;;  %vm2250_vm4 = vcmp.gt.f32.partialorder %v2186_v2, 0.0  ;;  %v2313_v11 = vmul.f32 0.2, %v2185_v47 }
 0x30a   : > { %v2314_v22 = vmul.f32 0.2, %v2186_v2  ;;  %3559 = vst [vmem:[%s4811_s5 + $0xb8] sm:$0xff] %v3433_v49   ;;  %vm2251_vm5 = vcmp.gt.f32.partialorder %v2187_v48, 0.0  ;;  %vm2252_vm6 = vcmp.gt.f32.partialorder %v2188_v60, 0.0  ;;  %v2189_v13 = vadd.f32 %v4571_v62, %v2121_v3 }
 0x30b   : > { %v2315_v50 = vmul.f32 0.2, %v2187_v48  ;;  %v2377_v27 = vsel %vm2249_vm3, %v2185_v47, %v2313_v11  ;;  %v2316_v15 = vmul.f32 0.2, %v2188_v60  ;;  %v2190_v57 = vadd.f32 %v4571_v62, %v2122_v4 }
 0x30c   : > { %v2378_v63 = vsel %vm2250_vm4, %v2186_v2, %v2314_v22  ;;  %vm2253_vm7 = vcmp.gt.f32.partialorder %v2189_v13, 0.0  ;;  %v2317_v37 = vmul.f32 0.2, %v2189_v13  ;;  %v3297_v6 = vunpack.c.l.bf16 %v3532_v61 }
 0x30d   : > { %v3438_v17 = vpack.c.bf16 %v2378_v63, %v2377_v27  ;;  %v2379_v36 = vsel %vm2251_vm5, %v2187_v48, %v2315_v50  ;;  %v2380_v23 = vsel %vm2252_vm6, %v2188_v60, %v2316_v15  ;;  %vm2254_vm8 = vcmp.gt.f32.partialorder %v2190_v57, 0.0 }
 0x30e   : > { %v2318_v40 = vmul.f32 0.2, %v2190_v57  ;;  %v3443_v7 = vpack.c.bf16 %v2380_v23, %v2379_v36  ;;  %v2381_v8 = vsel %vm2253_vm7, %v2189_v13, %v2317_v37  ;;  %v3298_v9 = vunpack.c.h.bf16 %v3532_v61 }
 0x30f   : > { %3560 = vst [vmem:[%s4811_s5 + $0xc0] sm:$0xff] %v3438_v17   ;;  %v3301_v51 = vunpack.c.l.bf16 %v3533_v16  ;;  %v2123_v28 = vmul.f32 %v4569_v56, %v3297_v6  ;;  %v3302_v59 = vunpack.c.h.bf16 %v3533_v16  ;;  %v3305_v38 = vunpack.c.l.bf16 %v3534_v0 }
 0x310   : > { %v2382_v39 = vsel %vm2254_vm8, %v2190_v57, %v2318_v40  ;;  %3561 = vst [vmem:[%s4811_s5 + $0xc8] sm:$0xff] %v3443_v7   ;;  %v2124_v42 = vmul.f32 %v4569_v56, %v3298_v9  ;;  %v3306_v1 = vunpack.c.h.bf16 %v3534_v0  ;;  %v3309_v41 = vunpack.c.l.bf16 %v3535_v29 }
 0x311   : > { %v3448_v19 = vpack.c.bf16 %v2382_v39, %v2381_v8  ;;  %v2125_v21 = vmul.f32 %v4569_v56, %v3301_v51  ;;  %v2191_v24 = vadd.f32 %v4571_v62, %v2123_v28  ;;  %v2126_v25 = vmul.f32 %v4569_v56, %v3302_v59 }
 0x312   : > { %v2127_v44 = vmul.f32 %v4569_v56, %v3305_v38  ;;  %v2192_v5 = vadd.f32 %v4571_v62, %v2124_v42  ;;  %v2128_v43 = vmul.f32 %v4569_v56, %v3306_v1  ;;  %v3310_v31 = vunpack.c.h.bf16 %v3535_v29 }
 0x313   : > { %3562 = vst [vmem:[%s4811_s5 + $0xd0] sm:$0xff] %v3448_v19   ;;  %v2193_v12 = vadd.f32 %v4571_v62, %v2125_v21  ;;  %vm2255_vm9 = vcmp.gt.f32.partialorder %v2191_v24, 0.0  ;;  %v2319_v10 = vmul.f32 0.2, %v2191_v24  ;;  %v2194_v55 = vadd.f32 %v4571_v62, %v2126_v25 }
 0x314   : > { %v2195_v18 = vadd.f32 %v4571_v62, %v2127_v44  ;;  %vm2256_vm10 = vcmp.gt.f32.partialorder %v2192_v5, 0.0  ;;  %v2320_v32 = vmul.f32 0.2, %v2192_v5  ;;  %v2196_v30 = vadd.f32 %v4571_v62, %v2128_v43 }
 0x315   : > { %vm2257_vm11 = vcmp.gt.f32.partialorder %v2193_v12, 0.0  ;;  %v2321_v33 = vmul.f32 0.2, %v2193_v12  ;;  %v2383_v34 = vsel %vm2255_vm9, %v2191_v24, %v2319_v10  ;;  %vm2258_vm12 = vcmp.gt.f32.partialorder %v2194_v55, 0.0 }
 0x316   : > { %v2322_v26 = vmul.f32 0.2, %v2194_v55  ;;  %v2384_v53 = vsel %vm2256_vm10, %v2192_v5, %v2320_v32  ;;  %vm2259_vm13 = vcmp.gt.f32.partialorder %v2195_v18, 0.0  ;;  %v2323_v52 = vmul.f32 0.2, %v2195_v18 }
 0x317   : > { %v2385_v54 = vsel %vm2257_vm11, %v2193_v12, %v2321_v33  ;;  %v3453_v20 = vpack.c.bf16 %v2384_v53, %v2383_v34  ;;  %vm2260_vm14 = vcmp.gt.f32.partialorder %v2196_v30, 0.0  ;;  %v2324_v58 = vmul.f32 0.2, %v2196_v30 }
 0x318   : > { %v2386_v35 = vsel %vm2258_vm12, %v2194_v55, %v2322_v26  ;;  %v2387_v46 = vsel %vm2259_vm13, %v2195_v18, %v2323_v52  ;;  %v2129_v47 = vmul.f32 %v4569_v56, %v3309_v41  ;;  %v2130_v2 = vmul.f32 %v4569_v56, %v3310_v31 }
 0x319   : > { %v3458_v45 = vpack.c.bf16 %v2386_v35, %v2385_v54  ;;  %3563 = vst [vmem:[%s4811_s5 + $0xd8] sm:$0xff] %v3453_v20   ;;  %v2388_v48 = vsel %vm2260_vm14, %v2196_v30, %v2324_v58  ;;  %v3313_v49 = vunpack.c.l.bf16 %v3536_v14  ;;  %v3314_v60 = vunpack.c.h.bf16 %v3536_v14 }
 0x31a   : > { %v3463_v3 = vpack.c.bf16 %v2388_v48, %v2387_v46  ;;  %v2197_v4 = vadd.f32 %v4571_v62, %v2129_v47  ;;  %v2198_v11 = vadd.f32 %v4571_v62, %v2130_v2 }
 0x31b   : > { %3564 = vst [vmem:[%s4811_s5 + $0xe0] sm:$0xff] %v3458_v45   ;;  %v2131_v22 = vmul.f32 %v4569_v56, %v3313_v49  ;;  %v2132_v50 = vmul.f32 %v4569_v56, %v3314_v60 }
 0x31c   : > { %3565 = vst [vmem:[%s4811_s5 + $0xe8] sm:$0xff] %v3463_v3   ;;  %vm2261_vm15 = vcmp.gt.f32.partialorder %v2197_v4, 0.0  ;;  %vm2262_vm0 = vcmp.gt.f32.partialorder %v2198_v11, 0.0  ;;  %v2325_v13 = vmul.f32 0.2, %v2197_v4 }
 0x31d   : > { %v2326_v61 = vmul.f32 0.2, %v2198_v11  ;;  %v2199_v27 = vadd.f32 %v4571_v62, %v2131_v22  ;;  %v2200_v63 = vadd.f32 %v4571_v62, %v2132_v50 }
 0x31e   : > { %v2389_v15 = vsel %vm2261_vm15, %v2197_v4, %v2325_v13 }
 0x31f   : > { %v2390_v57 = vsel %vm2262_vm0, %v2198_v11, %v2326_v61  ;;  %vm2263_vm1 = vcmp.gt.f32.partialorder %v2199_v27, 0.0  ;;  %vm2264_vm2 = vcmp.gt.f32.partialorder %v2200_v63, 0.0  ;;  %v2327_v16 = vmul.f32 0.2, %v2199_v27 }
 0x320   : > { %v3468_v17 = vpack.c.bf16 %v2390_v57, %v2389_v15  ;;  %v2328_v36 = vmul.f32 0.2, %v2200_v63 }
 0x321   : > { %v2391_v56 = vsel %vm2263_vm1, %v2199_v27, %v2327_v16 }
 0x322   : > { %3566 = vst [vmem:[%s4811_s5 + $0xf0] sm:$0xff] %v3468_v17   ;;  %v2392_v37 = vsel %vm2264_vm2, %v2200_v63, %v2328_v36 }
 0x323   : > { %v3473_v0 = vpack.c.bf16 %v2392_v37, %v2391_v56 }
 0x325   : > { %3567 = vst [vmem:[%s4811_s5 + $0xf8] sm:$0xff] %v3473_v0  }
 0x326 PF: > { %s15_s20 = sadd.s32 1, %s3637_s20   ;;  %s4812_s18 = smov %s3633_s19 }
 0x327   : > { %p12_p7 = scmp.ge.s32.totalorder %s15_s20, 4   ;;  %s4813_s19 = smov %s4815_s21 }
 0x329   :  { %14 = sbr.rel (!%p12_p7) target bundleno = 2 (0x2), region = 97 }

// kernel: discriminator_forward.6
= control target key start
LH: loop header
LB: loop body
LE: loop exit
PB: predicated region body
PF: predicated region fallthrough
CT: control target
= control target key end

     0   :  { %s2001_s18 = smov 0   ;;  %s2003_s19 = smov 0   ;;  %s2400_s0 = inlined_call_operand.vmem [shape: bf16[128,512], index: 0, kind: input, shape index: {}]   ;;  %s2401_s1 = inlined_call_operand.vmem [shape: bf16[512,128], index: 1, kind: input, shape index: {}]   ;;  %s2402_s2 = inlined_call_operand.vmem [shape: f32[1,128], index: 2, kind: input, shape index: {}]   ;;  %s2403_s3 = inlined_call_operand.vmem [shape: f32[1,128], index: 3, kind: input, shape index: {}]   ;;  %s2404_s4 = inlined_call_operand.vmem [shape: f32[1,128], index: 4, kind: input, shape index: {}]   ;;  %s2405_s5 = inlined_call_operand.vmem [shape: bf16[128,128], index: 5, kind: output, shape index: {}]  }
   0x1   :  { %s2005_s20 = smov 0  }
   0x2 LB: > { %s34_s21 = sadd.s32 1, %s1963_s19  ;;  %p1443_p0 = scmp.ge.s32.totalorder %s1967_s20, 1  ;;  %s1967_s20 = sphi %s2005_s20, %s15_s20   ;;  %s1963_s19 = sphi %s2003_s19, %s2407_s19   ;;  %s1959_s18 = sphi %s2001_s18, %s2406_s18  }
   0x3   : > { %p36_p1 = scmp.ge.s32.totalorder %s34_s21, 2  ;;  %p229_p2 = scmp.lt.s32.totalorder %s1967_s20, 3 }
   0x5   : > { %s2409_s21 = smov (%p36_p1, %s34_s21), 0  ;;  %p230_p3 = pnand %p1443_p0, %p229_p2 }
   0x6   : > { %p292_p4 = scmp.eq.s32.totalorder (!%p230_p3), %s1959_s18, 0 }
   0x7   : > { %233 = sbr.rel (%p230_p3) target bundleno = 461 (0x1cd), region = 40 }
   0xc   : > { %300 = sbr.rel (!%p292_p4) target bundleno = 17 (0x11), region = 44  ;;  %v1969_v0 = vmov (%p292_p4), 0.0  }
   0xd   : > { %301 = vst [vmem:[#allocation4] sm:$0x1] (%p292_p4), %v1969_v0 }
   0xe   : > { %302 = vst [vmem:[#allocation5] sm:$0x1] (%p292_p4), %v1969_v0 }
  0x11 PF: > { %306 = sbr.rel (!%p292_p4) target bundleno = 34 (0x22), region = 48  ;;  %v1970_v1 = vmov (%p292_p4), 0.0  }
  0x12   : > { %307 = vst [vmem:[#allocation2 + $0x30] sm:$0xff] (%p292_p4), %v1970_v1 }
  0x13   : > { %308 = vst [vmem:[#allocation2] sm:$0xff] (%p292_p4), %v1970_v1 }
  0x14   : > { %309 = vst [vmem:[#allocation2 + $0x58] sm:$0xff] (%p292_p4), %v1970_v1 }
  0x15   : > { %310 = vst [vmem:[#allocation2 + $0x18] sm:$0xff] (%p292_p4), %v1970_v1 }
  0x16   : > { %311 = vst [vmem:[#allocation2 + $0x50] sm:$0xff] %v1970_v1 }
  0x17   : > { %312 = vst [vmem:[#allocation2 + $0x68] sm:$0xff] %v1970_v1 }
  0x18   : > { %313 = vst [vmem:[#allocation2 + $0x8] sm:$0xff] %v1970_v1 }
  0x19   : > { %314 = vst [vmem:[#allocation2 + $0x48] sm:$0xff] %v1970_v1 }
  0x1a   : > { %315 = vst [vmem:[#allocation2 + $0x40] sm:$0xff] %v1970_v1 }
  0x1b   : > { %316 = vst [vmem:[#allocation2 + $0x20] sm:$0xff] %v1970_v1 }
  0x1c   : > { %317 = vst [vmem:[#allocation2 + $0x10] sm:$0xff] %v1970_v1 }
  0x1d   : > { %318 = vst [vmem:[#allocation2 + $0x38] sm:$0xff] %v1970_v1 }
  0x1e   : > { %319 = vst [vmem:[#allocation2 + $0x60] sm:$0xff] %v1970_v1 }
  0x1f   : > { %320 = vst [vmem:[#allocation2 + $0x70] sm:$0xff] %v1970_v1 }
  0x20   : > { %321 = vst [vmem:[#allocation2 + $0x78] sm:$0xff] %v1970_v1 }
  0x21   : > { %322 = vst [vmem:[#allocation2 + $0x28] sm:$0xff] %v1970_v1 }
  0x22 PF: > { %p1447_p5 = scmp.ne.s32.totalorder %s1959_s18, 0 }
  0x24   : > { %325 = sbr.rel (%p1447_p5) target bundleno = 334 (0x14e), region = 52 }
  0x29   : > { %v1721_v2 = vld [vmem:[%s2401_s1 + $0x38] sm:$0xff]  ;;  %v1720_v6 = vld [vmem:[%s2401_s1 + $0x30] sm:$0xff]  ;;  %v1719_v10 = vld [vmem:[%s2401_s1 + $0x28] sm:$0xff] }
  0x2a   : > { %v1729_v3 = vld [vmem:[%s2401_s1 + $0x78] sm:$0xff]  ;;  %795 = vmatpush.bf16.msra.mxu0 %v1721_v2  ;;  %v1728_v7 = vld [vmem:[%s2401_s1 + $0x70] sm:$0xff]  ;;  %v1727_v11 = vld [vmem:[%s2401_s1 + $0x68] sm:$0xff] }
  0x2b   : > { %v1737_v4 = vld [vmem:[%s2401_s1 + $0xb8] sm:$0xff]  ;;  %844 = vmatpush.bf16.msra.mxu1 %v1729_v3  ;;  %v1736_v8 = vld [vmem:[%s2401_s1 + $0xb0] sm:$0xff]  ;;  %v1735_v12 = vld [vmem:[%s2401_s1 + $0xa8] sm:$0xff] }
  0x2c   : > { %v1745_v5 = vld [vmem:[%s2401_s1 + $0xf8] sm:$0xff]  ;;  %893 = vmatpush.bf16.msra.mxu2 %v1737_v4  ;;  %v1744_v9 = vld [vmem:[%s2401_s1 + $0xf0] sm:$0xff]  ;;  %v1743_v13 = vld [vmem:[%s2401_s1 + $0xe8] sm:$0xff] }
  0x2d   : > { %942 = vmatpush.bf16.msra.mxu3 %v1745_v5  ;;  %v1718_v14 = vld [vmem:[%s2401_s1 + $0x20] sm:$0xff]  ;;  %v1717_v18 = vld [vmem:[%s2401_s1 + $0x18] sm:$0xff]  ;;  %v1716_v22 = vld [vmem:[%s2401_s1 + $0x10] sm:$0xff] }
  0x2e   : > { %796 = vmatpush.bf16.msra.mxu0 %v1720_v6  ;;  %v1726_v15 = vld [vmem:[%s2401_s1 + $0x60] sm:$0xff]  ;;  %v1725_v19 = vld [vmem:[%s2401_s1 + $0x58] sm:$0xff]  ;;  %v1724_v23 = vld [vmem:[%s2401_s1 + $0x50] sm:$0xff] }
  0x2f   : > { %845 = vmatpush.bf16.msra.mxu1 %v1728_v7  ;;  %v1734_v16 = vld [vmem:[%s2401_s1 + $0xa0] sm:$0xff]  ;;  %v1733_v20 = vld [vmem:[%s2401_s1 + $0x98] sm:$0xff]  ;;  %v1732_v24 = vld [vmem:[%s2401_s1 + $0x90] sm:$0xff] }
  0x30   : > { %894 = vmatpush.bf16.msra.mxu2 %v1736_v8  ;;  %v1742_v17 = vld [vmem:[%s2401_s1 + $0xe0] sm:$0xff]  ;;  %v1741_v21 = vld [vmem:[%s2401_s1 + $0xd8] sm:$0xff]  ;;  %v1740_v25 = vld [vmem:[%s2401_s1 + $0xd0] sm:$0xff] }
  0x31   : > { %943 = vmatpush.bf16.msra.mxu3 %v1744_v9  ;;  %v1715_v26 = vld [vmem:[%s2401_s1 + $0x8] sm:$0xff]  ;;  %v1714_v30 = vld [vmem:[%s2401_s1] sm:$0xff]  ;;  %v1748_v35 = vld [vmem:[%s2400_s0 + $0xc] sm:$0xf0] }
  0x32   : > { %797 = vmatpush.bf16.msra.mxu0 %v1719_v10  ;;  %v1723_v27 = vld [vmem:[%s2401_s1 + $0x48] sm:$0xff]  ;;  %v1722_v31 = vld [vmem:[%s2401_s1 + $0x40] sm:$0xff]  ;;  %v1452_v37 = vld [vmem:[%s2400_s0 + $0x10] sm:$0xf0] }
  0x33   : > { %846 = vmatpush.bf16.msra.mxu1 %v1727_v11  ;;  %v1731_v28 = vld [vmem:[%s2401_s1 + $0x88] sm:$0xff]  ;;  %v1730_v32 = vld [vmem:[%s2401_s1 + $0x80] sm:$0xff]  ;;  %v1749_v39 = vld [vmem:[%s2400_s0 + $0x14] sm:$0xf0] }
  0x34   : > { %895 = vmatpush.bf16.msra.mxu2 %v1735_v12  ;;  %v1739_v29 = vld [vmem:[%s2401_s1 + $0xc8] sm:$0xff]  ;;  %v1738_v33 = vld [vmem:[%s2401_s1 + $0xc0] sm:$0xff]  ;;  %v1460_v41 = vld [vmem:[%s2400_s0 + $0x18] sm:$0xf0] }
  0x35   : > { %944 = vmatpush.bf16.msra.mxu3 %v1743_v13  ;;  %v1450_v34 = vld [vmem:[%s2400_s0] sm:$0xf]  ;;  %v1746_v36 = vld [vmem:[%s2400_s0 + $0x4] sm:$0xf]  ;;  %v1458_v38 = vld [vmem:[%s2400_s0 + $0x8] sm:$0xf] }
  0x36   : > { %798 = vmatpush.bf16.msra.mxu0 %v1718_v14  ;;  %v1747_v40 = vld [vmem:[%s2400_s0 + $0xc] sm:$0xf]  ;;  %v1451_v42 = vor.u32 %v1748_v35, %v1450_v34  ;;  %v1455_v43 = vor.u32 %v1746_v36, %v1452_v37  ;;  %v1459_v44 = vor.u32 %v1749_v39, %v1458_v38  ;;  %v1466_v46 = vld [vmem:[%s2400_s0 + $0x20] sm:$0xf]  ;;  %v1752_v47 = vld [vmem:[%s2400_s0 + $0x2c] sm:$0xf0] }
  0x37   : > { %847 = vmatpush.bf16.msra.mxu1 %v1726_v15  ;;  %v1463_v45 = vor.u32 %v1747_v40, %v1460_v41  ;;  %v1750_v48 = vld [vmem:[%s2400_s0 + $0x24] sm:$0xf]  ;;  %v1468_v49 = vld [vmem:[%s2400_s0 + $0x30] sm:$0xf0]  ;;  %v1474_v50 = vld [vmem:[%s2400_s0 + $0x28] sm:$0xf]  ;;  %v1467_v54 = vor.u32 %v1752_v47, %v1466_v46 }
  0x38   : > { %896 = vmatpush.bf16.msra.mxu2 %v1734_v16  ;;  %v1753_v51 = vld [vmem:[%s2400_s0 + $0x34] sm:$0xf0]  ;;  %v1751_v52 = vld [vmem:[%s2400_s0 + $0x2c] sm:$0xf]  ;;  %v1476_v53 = vld [vmem:[%s2400_s0 + $0x38] sm:$0xf0]  ;;  %v1471_v55 = vor.u32 %v1750_v48, %v1468_v49 }
  0x39   : > { %945 = vmatpush.bf16.msra.mxu3 %v1742_v17  ;;  %v1475_v56 = vor.u32 %v1753_v51, %v1474_v50  ;;  %v1479_v57 = vor.u32 %v1751_v52, %v1476_v53  ;;  %v1482_v58 = vld [vmem:[%s2400_s0 + $0x40] sm:$0xf]  ;;  %v1756_v59 = vld [vmem:[%s2400_s0 + $0x4c] sm:$0xf0]  ;;  %v1754_v60 = vld [vmem:[%s2400_s0 + $0x44] sm:$0xf] }
  0x3a   : > { %799 = vmatpush.bf16.msra.mxu0 %v1717_v18  ;;  %v1484_v61 = vld [vmem:[%s2400_s0 + $0x50] sm:$0xf0]  ;;  %v1490_v62 = vld [vmem:[%s2400_s0 + $0x48] sm:$0xf]  ;;  %v1757_v63 = vld [vmem:[%s2400_s0 + $0x54] sm:$0xf0]  ;;  %v1483_v2 = vor.u32 %v1756_v59, %v1482_v58 }
  0x3b   : > { %848 = vmatpush.bf16.msra.mxu1 %v1725_v19  ;;  %v1755_v0 = vld [vmem:[%s2400_s0 + $0x4c] sm:$0xf]  ;;  %v1492_v1 = vld [vmem:[%s2400_s0 + $0x58] sm:$0xf0]  ;;  %v1487_v3 = vor.u32 %v1754_v60, %v1484_v61  ;;  %v1491_v4 = vor.u32 %v1757_v63, %v1490_v62  ;;  %v1498_v6 = vld [vmem:[%s2400_s0 + $0x60] sm:$0xf] }
  0x3c   : > { %897 = vmatpush.bf16.msra.mxu2 %v1733_v20  ;;  %v1495_v5 = vor.u32 %v1755_v0, %v1492_v1  ;;  %v1760_v7 = vld [vmem:[%s2400_s0 + $0x6c] sm:$0xf0]  ;;  %v1758_v8 = vld [vmem:[%s2400_s0 + $0x64] sm:$0xf]  ;;  %v1500_v9 = vld [vmem:[%s2400_s0 + $0x70] sm:$0xf0] }
  0x3d   : > { %946 = vmatpush.bf16.msra.mxu3 %v1741_v21  ;;  %v1506_v10 = vld [vmem:[%s2400_s0 + $0x68] sm:$0xf]  ;;  %v1761_v11 = vld [vmem:[%s2400_s0 + $0x74] sm:$0xf0]  ;;  %v1759_v12 = vld [vmem:[%s2400_s0 + $0x6c] sm:$0xf]  ;;  %v1499_v14 = vor.u32 %v1760_v7, %v1498_v6  ;;  %v1503_v15 = vor.u32 %v1758_v8, %v1500_v9 }
  0x3e   : > { %800 = vmatpush.bf16.msra.mxu0 %v1716_v22  ;;  %v1508_v13 = vld [vmem:[%s2400_s0 + $0x78] sm:$0xf0]  ;;  %v1507_v16 = vor.u32 %v1761_v11, %v1506_v10  ;;  %v1514_v18 = vld [vmem:[%s2400_s0 + $0x80] sm:$0xf]  ;;  %v1764_v19 = vld [vmem:[%s2400_s0 + $0x8c] sm:$0xf0] }
  0x3f   : > { %849 = vmatpush.bf16.msra.mxu1 %v1724_v23  ;;  %v1511_v17 = vor.u32 %v1759_v12, %v1508_v13  ;;  %v1762_v20 = vld [vmem:[%s2400_s0 + $0x84] sm:$0xf]  ;;  %v1516_v21 = vld [vmem:[%s2400_s0 + $0x90] sm:$0xf0]  ;;  %v1522_v22 = vld [vmem:[%s2400_s0 + $0x88] sm:$0xf] }
  0x40   : > { %898 = vmatpush.bf16.msra.mxu2 %v1732_v24  ;;  %v1765_v23 = vld [vmem:[%s2400_s0 + $0x94] sm:$0xf0]  ;;  %v1763_v24 = vld [vmem:[%s2400_s0 + $0x8c] sm:$0xf]  ;;  %v1538_v34 = vld [vmem:[%s2400_s0 + $0xa8] sm:$0xf] }
  0x41   : > { %947 = vmatpush.bf16.msra.mxu3 %v1740_v25  ;;  %v1524_v25 = vld [vmem:[%s2400_s0 + $0x98] sm:$0xf0]  ;;  %v1769_v35 = vld [vmem:[%s2400_s0 + $0xb4] sm:$0xf0]  ;;  %v1767_v36 = vld [vmem:[%s2400_s0 + $0xac] sm:$0xf] }
  0x42   : > { %801 = vmatpush.bf16.msra.mxu0 %v1715_v26  ;;  %v1515_v26 = vor.u32 %v1764_v19, %v1514_v18  ;;  %v1540_v37 = vld [vmem:[%s2400_s0 + $0xb8] sm:$0xf0]  ;;  %v1539_v40 = vor.u32 %v1769_v35, %v1538_v34  ;;  %v1554_v46 = vld [vmem:[%s2400_s0 + $0xc8] sm:$0xf]  ;;  %v1773_v47 = vld [vmem:[%s2400_s0 + $0xd4] sm:$0xf0] }
  0x43   : > { %850 = vmatpush.bf16.msra.mxu1 %v1723_v27  ;;  %v1519_v27 = vor.u32 %v1762_v20, %v1516_v21  ;;  %v1543_v41 = vor.u32 %v1767_v36, %v1540_v37  ;;  %v1771_v48 = vld [vmem:[%s2400_s0 + $0xcc] sm:$0xf]  ;;  %v1556_v49 = vld [vmem:[%s2400_s0 + $0xd8] sm:$0xf0]  ;;  %v1555_v52 = vor.u32 %v1773_v47, %v1554_v46  ;;  %v1570_v58 = vld [vmem:[%s2400_s0 + $0xe8] sm:$0xf] }
  0x44   : > { %899 = vmatpush.bf16.msra.mxu2 %v1731_v28  ;;  %v1523_v28 = vor.u32 %v1765_v23, %v1522_v22  ;;  %v1559_v53 = vor.u32 %v1771_v48, %v1556_v49  ;;  %v1777_v59 = vld [vmem:[%s2400_s0 + $0xf4] sm:$0xf0]  ;;  %v1775_v60 = vld [vmem:[%s2400_s0 + $0xec] sm:$0xf]  ;;  %v1572_v61 = vld [vmem:[%s2400_s0 + $0xf8] sm:$0xf0] }
  0x45   : > { %948 = vmatpush.bf16.msra.mxu3 %v1739_v29  ;;  %v1527_v29 = vor.u32 %v1763_v24, %v1524_v25  ;;  %v1571_v0 = vor.u32 %v1777_v59, %v1570_v58  ;;  %v1575_v1 = vor.u32 %v1775_v60, %v1572_v61  ;;  %v395_v10 = vld [vmem:[#allocation2 + $0x30] sm:$0xff]  ;;  %v396_v19 = vld [vmem:[#allocation2] sm:$0xff]  ;;  %v398_v37 = vld [vmem:[#allocation2 + $0x18] sm:$0xff] }
  0x46   : > { %802 = vmatpush.bf16.msra.mxu0 %v1714_v30  ;;  %v1530_v30 = vld [vmem:[%s2400_s0 + $0xa0] sm:$0xf]  ;;  %v399_v46 = vld [vmem:[#allocation2 + $0x50] sm:$0xff] }
  0x47   : > { %851 = vmatpush.bf16.msra.mxu1 %v1722_v31  ;;  %v1768_v31 = vld [vmem:[%s2400_s0 + $0xac] sm:$0xf0] }
  0x48   : > { %900 = vmatpush.bf16.msra.mxu2 %v1730_v32  ;;  %v1766_v32 = vld [vmem:[%s2400_s0 + $0xa4] sm:$0xf]  ;;  %v1531_v38 = vor.u32 %v1768_v31, %v1530_v30 }
  0x49   : > { %949 = vmatpush.bf16.msra.mxu3 %v1738_v33  ;;  %803 = vmatmul.bf16.vlgmr.msra.gmra.mxu0 %v1451_v42  ;;  %v1532_v33 = vld [vmem:[%s2400_s0 + $0xb0] sm:$0xf0]  ;;  %v1546_v42 = vld [vmem:[%s2400_s0 + $0xc0] sm:$0xf] }
  0x4a   : > { %852 = vmatmul.bf16.vlgmr.msra.gmra.mxu1 %v1455_v43  ;;  %v1535_v39 = vor.u32 %v1766_v32, %v1532_v33  ;;  %v1772_v43 = vld [vmem:[%s2400_s0 + $0xcc] sm:$0xf0] }
  0x4b   : > { %901 = vmatmul.bf16.vlgmr.msra.gmra.mxu2 %v1459_v44  ;;  %v1770_v44 = vld [vmem:[%s2400_s0 + $0xc4] sm:$0xf]  ;;  %v1547_v50 = vor.u32 %v1772_v43, %v1546_v42 }
  0x4c   : > { %950 = vmatmul.bf16.vlgmr.msra.gmra.mxu3 %v1463_v45  ;;  %v1548_v45 = vld [vmem:[%s2400_s0 + $0xd0] sm:$0xf0] }
  0x4d   : > { %v1551_v51 = vor.u32 %v1770_v44, %v1548_v45 }
  0x59   : > { %808 = vmatmul.bf16.gmra.mxu0 %v1467_v54  ;;  %v1562_v54 = vld [vmem:[%s2400_s0 + $0xe0] sm:$0xf] }
  0x5a   : > { %857 = vmatmul.bf16.gmra.mxu1 %v1471_v55  ;;  %v1776_v55 = vld [vmem:[%s2400_s0 + $0xec] sm:$0xf0] }
  0x5b   : > { %906 = vmatmul.bf16.gmra.mxu2 %v1475_v56  ;;  %v1774_v56 = vld [vmem:[%s2400_s0 + $0xe4] sm:$0xf]  ;;  %v1563_v62 = vor.u32 %v1776_v55, %v1562_v54  ;;  %v400_v55 = vld [vmem:[#allocation2 + $0x68] sm:$0xff] }
  0x5c   : > { %955 = vmatmul.bf16.gmra.mxu3 %v1479_v57  ;;  %v1564_v57 = vld [vmem:[%s2400_s0 + $0xf0] sm:$0xf0] }
  0x5d   : > { %v1567_v63 = vor.u32 %v1774_v56, %v1564_v57 }
  0x69   : > { %813 = vmatmul.bf16.gmra.mxu0 %v1483_v2 }
  0x6a   : > { %862 = vmatmul.bf16.gmra.mxu1 %v1487_v3 }
  0x6b   : > { %911 = vmatmul.bf16.gmra.mxu2 %v1491_v4 }
  0x6c   : > { %960 = vmatmul.bf16.gmra.mxu3 %v1495_v5 }
  0x79   : > { %818 = vmatmul.bf16.gmra.mxu0 %v1499_v14 }
  0x7a   : > { %867 = vmatmul.bf16.gmra.mxu1 %v1503_v15 }
  0x7b   : > { %916 = vmatmul.bf16.gmra.mxu2 %v1507_v16 }
  0x7c   : > { %965 = vmatmul.bf16.gmra.mxu3 %v1511_v17 }
  0x89   : > { %823 = vmatmul.bf16.gmra.mxu0 %v1515_v26 }
  0x8a   : > { %872 = vmatmul.bf16.gmra.mxu1 %v1519_v27 }
  0x8b   : > { %921 = vmatmul.bf16.gmra.mxu2 %v1523_v28  ;;  %v397_v28 = vld [vmem:[#allocation2 + $0x58] sm:$0xff] }
  0x8c   : > { %970 = vmatmul.bf16.gmra.mxu3 %v1527_v29 }
  0x99   : > { %828 = vmatmul.bf16.gmra.mxu0 %v1531_v38 }
  0x9a   : > { %877 = vmatmul.bf16.gmra.mxu1 %v1535_v39 }
  0x9b   : > { %926 = vmatmul.bf16.gmra.mxu2 %v1539_v40 }
  0x9c   : > { %975 = vmatmul.bf16.gmra.mxu3 %v1543_v41 }
  0xa9   : > { %833 = vmatmul.bf16.gmra.mxu0 %v1547_v50 }
  0xaa   : > { %882 = vmatmul.bf16.gmra.mxu1 %v1551_v51 }
  0xab   : > { %931 = vmatmul.bf16.gmra.mxu2 %v1555_v52 }
  0xac   : > { %980 = vmatmul.bf16.gmra.mxu3 %v1559_v53 }
  0xb9   : > { %838 = vmatmul.bf16.gmra.mxu0 %v1563_v62 }
  0xba   : > { %887 = vmatmul.bf16.gmra.mxu1 %v1567_v63 }
  0xbb   : > { %936 = vmatmul.bf16.gmra.mxu2 %v1571_v0  ;;  %v401_v0 = vld [vmem:[#allocation2 + $0x8] sm:$0xff] }
  0xbc   : > { %985 = vmatmul.bf16.gmra.mxu3 %v1575_v1 }
  0xc6   : > { %v804_v2 = vpop.f32.mrf.mxu0 }
  0xc7   : > { %v853_v3 = vpop.f32.mrf.mxu1 }
  0xc8   : > { %v854_v4 = vadd.f32 %v853_v3, %v804_v2 }
  0xce   : > { %v902_v5 = vpop.f32.mrf.mxu2  ;;  %v806_v8 = vpop.f32.mrf.mxu0 }
  0xcf   : > { %v951_v6 = vpop.f32.mrf.mxu3  ;;  %v903_v7 = vadd.f32 %v902_v5, %v854_v4  ;;  %v855_v9 = vpop.f32.mrf.mxu1 }
  0xd0   : > { %v856_v13 = vadd.f32 %v855_v9, %v806_v8  ;;  %v402_v9 = vld [vmem:[#allocation2 + $0x48] sm:$0xff] }
  0xd1   : > { %v952_v11 = vadd.f32 %v951_v6, %v903_v7 }
  0xd3   : > { %v991_v12 = vadd.f32 %v952_v11, %v395_v10 }
  0xd5   : > { %1007 = vst [vmem:[#allocation2 + $0x30] sm:$0xff] %v991_v12 }
  0xd6   : > { %v904_v14 = vpop.f32.mrf.mxu2  ;;  %v809_v17 = vpop.f32.mrf.mxu0 }
  0xd7   : > { %v953_v15 = vpop.f32.mrf.mxu3  ;;  %v905_v16 = vadd.f32 %v904_v14, %v856_v13  ;;  %v858_v18 = vpop.f32.mrf.mxu1 }
  0xd8   : > { %v859_v22 = vadd.f32 %v858_v18, %v809_v17  ;;  %v403_v18 = vld [vmem:[#allocation2 + $0x40] sm:$0xff] }
  0xd9   : > { %v954_v20 = vadd.f32 %v953_v15, %v905_v16 }
  0xdb   : > { %v992_v21 = vadd.f32 %v954_v20, %v396_v19 }
  0xdd   : > { %1008 = vst [vmem:[#allocation2] sm:$0xff] %v992_v21 }
  0xde   : > { %v907_v23 = vpop.f32.mrf.mxu2  ;;  %v811_v26 = vpop.f32.mrf.mxu0 }
  0xdf   : > { %v956_v24 = vpop.f32.mrf.mxu3  ;;  %v908_v25 = vadd.f32 %v907_v23, %v859_v22  ;;  %v860_v27 = vpop.f32.mrf.mxu1 }
  0xe0   : > { %v861_v31 = vadd.f32 %v860_v27, %v811_v26  ;;  %v404_v27 = vld [vmem:[#allocation2 + $0x20] sm:$0xff] }
  0xe1   : > { %v957_v29 = vadd.f32 %v956_v24, %v908_v25 }
  0xe3   : > { %v993_v30 = vadd.f32 %v957_v29, %v397_v28 }
  0xe5   : > { %1009 = vst [vmem:[#allocation2 + $0x58] sm:$0xff] %v993_v30 }
  0xe6   : > { %v909_v32 = vpop.f32.mrf.mxu2  ;;  %v814_v35 = vpop.f32.mrf.mxu0 }
  0xe7   : > { %v958_v33 = vpop.f32.mrf.mxu3  ;;  %v910_v34 = vadd.f32 %v909_v32, %v861_v31  ;;  %v863_v36 = vpop.f32.mrf.mxu1 }
  0xe8   : > { %v864_v40 = vadd.f32 %v863_v36, %v814_v35  ;;  %v405_v36 = vld [vmem:[#allocation2 + $0x10] sm:$0xff] }
  0xe9   : > { %v959_v38 = vadd.f32 %v958_v33, %v910_v34 }
  0xeb   : > { %v994_v39 = vadd.f32 %v959_v38, %v398_v37 }
  0xed   : > { %1010 = vst [vmem:[#allocation2 + $0x18] sm:$0xff] %v994_v39 }
  0xee   : > { %v912_v41 = vpop.f32.mrf.mxu2  ;;  %v816_v44 = vpop.f32.mrf.mxu0 }
  0xef   : > { %v961_v42 = vpop.f32.mrf.mxu3  ;;  %v913_v43 = vadd.f32 %v912_v41, %v864_v40  ;;  %v865_v45 = vpop.f32.mrf.mxu1 }
  0xf0   : > { %v866_v49 = vadd.f32 %v865_v45, %v816_v44  ;;  %v406_v45 = vld [vmem:[#allocation2 + $0x38] sm:$0xff] }
  0xf1   : > { %v962_v47 = vadd.f32 %v961_v42, %v913_v43 }
  0xf3   : > { %v995_v48 = vadd.f32 %v962_v47, %v399_v46 }
  0xf5   : > { %1011 = vst [vmem:[#allocation2 + $0x50] sm:$0xff] %v995_v48 }
  0xf6   : > { %v914_v50 = vpop.f32.mrf.mxu2  ;;  %v819_v53 = vpop.f32.mrf.mxu0 }
  0xf7   : > { %v963_v51 = vpop.f32.mrf.mxu3  ;;  %v915_v52 = vadd.f32 %v914_v50, %v866_v49  ;;  %v868_v54 = vpop.f32.mrf.mxu1 }
  0xf8   : > { %v869_v58 = vadd.f32 %v868_v54, %v819_v53  ;;  %v407_v54 = vld [vmem:[#allocation2 + $0x60] sm:$0xff] }
  0xf9   : > { %v964_v56 = vadd.f32 %v963_v51, %v915_v52 }
  0xfb   : > { %v996_v57 = vadd.f32 %v964_v56, %v400_v55 }
  0xfd   : > { %1012 = vst [vmem:[#allocation2 + $0x68] sm:$0xff] %v996_v57 }
  0xfe   : > { %v917_v59 = vpop.f32.mrf.mxu2  ;;  %v821_v62 = vpop.f32.mrf.mxu0 }
  0xff   : > { %v966_v60 = vpop.f32.mrf.mxu3  ;;  %v918_v61 = vadd.f32 %v917_v59, %v869_v58  ;;  %v870_v63 = vpop.f32.mrf.mxu1 }
 0x100   : > { %v871_v3 = vadd.f32 %v870_v63, %v821_v62 }
 0x101   : > { %v967_v1 = vadd.f32 %v966_v60, %v918_v61  ;;  %v408_v61 = vld [vmem:[#allocation2 + $0x70] sm:$0xff] }
 0x103   : > { %v997_v2 = vadd.f32 %v967_v1, %v401_v0 }
 0x105   : > { %1013 = vst [vmem:[#allocation2 + $0x8] sm:$0xff] %v997_v2 }
 0x106   : > { %v919_v4 = vpop.f32.mrf.mxu2  ;;  %v824_v7 = vpop.f32.mrf.mxu0 }
 0x107   : > { %v968_v5 = vpop.f32.mrf.mxu3  ;;  %v920_v6 = vadd.f32 %v919_v4, %v871_v3  ;;  %v873_v8 = vpop.f32.mrf.mxu1 }
 0x108   : > { %v874_v12 = vadd.f32 %v873_v8, %v824_v7 }
 0x109   : > { %v969_v10 = vadd.f32 %v968_v5, %v920_v6  ;;  %v409_v6 = vld [vmem:[#allocation2 + $0x78] sm:$0xff] }
 0x10b   : > { %v998_v11 = vadd.f32 %v969_v10, %v402_v9 }
 0x10d   : > { %1014 = vst [vmem:[#allocation2 + $0x48] sm:$0xff] %v998_v11 }
 0x10e   : > { %v922_v13 = vpop.f32.mrf.mxu2  ;;  %v826_v16 = vpop.f32.mrf.mxu0 }
 0x10f   : > { %v971_v14 = vpop.f32.mrf.mxu3  ;;  %v923_v15 = vadd.f32 %v922_v13, %v874_v12  ;;  %v875_v17 = vpop.f32.mrf.mxu1 }
 0x110   : > { %v876_v21 = vadd.f32 %v875_v17, %v826_v16 }
 0x111   : > { %v972_v19 = vadd.f32 %v971_v14, %v923_v15  ;;  %v410_v14 = vld [vmem:[#allocation2 + $0x28] sm:$0xff] }
 0x113   : > { %v999_v20 = vadd.f32 %v972_v19, %v403_v18 }
 0x115   : > { %1015 = vst [vmem:[#allocation2 + $0x40] sm:$0xff] %v999_v20 }
 0x116   : > { %v924_v22 = vpop.f32.mrf.mxu2  ;;  %v829_v25 = vpop.f32.mrf.mxu0 }
 0x117   : > { %v973_v23 = vpop.f32.mrf.mxu3  ;;  %v925_v24 = vadd.f32 %v924_v22, %v876_v21  ;;  %v878_v26 = vpop.f32.mrf.mxu1 }
 0x118   : > { %v879_v30 = vadd.f32 %v878_v26, %v829_v25 }
 0x119   : > { %v974_v28 = vadd.f32 %v973_v23, %v925_v24 }
 0x11b   : > { %v1000_v29 = vadd.f32 %v974_v28, %v404_v27 }
 0x11d   : > { %1016 = vst [vmem:[#allocation2 + $0x20] sm:$0xff] %v1000_v29 }
 0x11e   : > { %v927_v31 = vpop.f32.mrf.mxu2  ;;  %v831_v34 = vpop.f32.mrf.mxu0 }
 0x11f   : > { %v976_v32 = vpop.f32.mrf.mxu3  ;;  %v928_v33 = vadd.f32 %v927_v31, %v879_v30  ;;  %v880_v35 = vpop.f32.mrf.mxu1 }
 0x120   : > { %v881_v39 = vadd.f32 %v880_v35, %v831_v34 }
 0x121   : > { %v977_v37 = vadd.f32 %v976_v32, %v928_v33 }
 0x123   : > { %v1001_v38 = vadd.f32 %v977_v37, %v405_v36 }
 0x125   : > { %1017 = vst [vmem:[#allocation2 + $0x10] sm:$0xff] %v1001_v38 }
 0x126   : > { %v929_v40 = vpop.f32.mrf.mxu2  ;;  %v834_v43 = vpop.f32.mrf.mxu0 }
 0x127   : > { %v978_v41 = vpop.f32.mrf.mxu3  ;;  %v930_v42 = vadd.f32 %v929_v40, %v881_v39  ;;  %v883_v44 = vpop.f32.mrf.mxu1 }
 0x128   : > { %v884_v48 = vadd.f32 %v883_v44, %v834_v43 }
 0x129   : > { %v979_v46 = vadd.f32 %v978_v41, %v930_v42 }
 0x12b   : > { %v1002_v47 = vadd.f32 %v979_v46, %v406_v45 }
 0x12d   : > { %1018 = vst [vmem:[#allocation2 + $0x38] sm:$0xff] %v1002_v47 }
 0x12e   : > { %v932_v49 = vpop.f32.mrf.mxu2  ;;  %v836_v52 = vpop.f32.mrf.mxu0 }
 0x12f   : > { %v981_v50 = vpop.f32.mrf.mxu3  ;;  %v933_v51 = vadd.f32 %v932_v49, %v884_v48  ;;  %v885_v53 = vpop.f32.mrf.mxu1 }
 0x130   : > { %v886_v57 = vadd.f32 %v885_v53, %v836_v52 }
 0x131   : > { %v982_v55 = vadd.f32 %v981_v50, %v933_v51 }
 0x133   : > { %v1003_v56 = vadd.f32 %v982_v55, %v407_v54 }
 0x135   : > { %1019 = vst [vmem:[#allocation2 + $0x60] sm:$0xff] %v1003_v56 }
 0x136   : > { %v934_v58 = vpop.f32.mrf.mxu2  ;;  %v839_v62 = vpop.f32.mrf.mxu0 }
 0x137   : > { %v983_v59 = vpop.f32.mrf.mxu3  ;;  %v935_v60 = vadd.f32 %v934_v58, %v886_v57  ;;  %v888_v63 = vpop.f32.mrf.mxu1 }
 0x138   : > { %v889_v2 = vadd.f32 %v888_v63, %v839_v62 }
 0x139   : > { %v984_v0 = vadd.f32 %v983_v59, %v935_v60 }
 0x13b   : > { %v1004_v1 = vadd.f32 %v984_v0, %v408_v61 }
 0x13d   : > { %1020 = vst [vmem:[#allocation2 + $0x70] sm:$0xff] %v1004_v1 }
 0x13e   : > { %v937_v3 = vpop.f32.mrf.mxu2  ;;  %v841_v8 = vpop.f32.mrf.mxu0 }
 0x13f   : > { %v986_v4 = vpop.f32.mrf.mxu3  ;;  %v938_v5 = vadd.f32 %v937_v3, %v889_v2  ;;  %v890_v9 = vpop.f32.mrf.mxu1 }
 0x140   : > { %v891_v11 = vadd.f32 %v890_v9, %v841_v8 }
 0x141   : > { %v987_v7 = vadd.f32 %v986_v4, %v938_v5 }
 0x143   : > { %v1005_v10 = vadd.f32 %v987_v7, %v409_v6 }
 0x145   : > { %1021 = vst [vmem:[#allocation2 + $0x78] sm:$0xff] %v1005_v10 }
 0x146   : > { %v939_v12 = vpop.f32.mrf.mxu2 }
 0x147   : > { %v940_v13 = vadd.f32 %v939_v12, %v891_v11  ;;  %v988_v15 = vpop.f32.mrf.mxu3 }
 0x149   : > { %v989_v16 = vadd.f32 %v988_v15, %v940_v13 }
 0x14b   : > { %v1006_v17 = vadd.f32 %v989_v16, %v410_v14 }
 0x14d   : > { %1022 = vst [vmem:[#allocation2 + $0x28] sm:$0xff] %v1006_v17 }
 0x14e PF: > { %1024 = sbr.rel (!%p292_p4) target bundleno = 386 (0x182), region = 56  ;;  %v1025_v18 = vld [vmem:[#allocation2 + $0x30] sm:$0xff] (%p292_p4)  ;;  %v1026_v19 = vld [vmem:[#allocation2] sm:$0xff] (%p292_p4)  ;;  %v1027_v21 = vld [vmem:[#allocation2 + $0x58] sm:$0xff] (%p292_p4) }
 0x14f   : > { %v1940_v20 = vld [vmem:[%s2402_s2] ss:$0 sm:$0xff] (%p292_p4)  ;;  %v1028_v22 = vld [vmem:[#allocation2 + $0x18] sm:$0xff] (%p292_p4)  ;;  %v1029_v23 = vld [vmem:[#allocation2 + $0x50] sm:$0xff] (%p292_p4) }
 0x150   : > { %v1030_v24 = vld [vmem:[#allocation2 + $0x68] sm:$0xff] (%p292_p4)  ;;  %v1045_v26 = vadd.f32 (%p292_p4), %v1940_v20, %v1025_v18  ;;  %v1046_v27 = vadd.f32 (%p292_p4), %v1940_v20, %v1026_v19  ;;  %v1047_v28 = vadd.f32 (%p292_p4), %v1940_v20, %v1027_v21  ;;  %v1048_v29 = vadd.f32 (%p292_p4), %v1940_v20, %v1028_v22  ;;  %v1033_v42 = vld [vmem:[#allocation2 + $0x40] sm:$0xff] (%p292_p4)  ;;  %v1035_v44 = vld [vmem:[#allocation2 + $0x10] sm:$0xff] (%p292_p4) }
 0x151   : > { %v1031_v25 = vld [vmem:[#allocation2 + $0x8] sm:$0xff] (%p292_p4)  ;;  %v1049_v31 = vadd.f32 (%p292_p4), %v1940_v20, %v1029_v23  ;;  %v1050_v32 = vadd.f32 (%p292_p4), %v1940_v20, %v1030_v24  ;;  %v1034_v43 = vld [vmem:[#allocation2 + $0x20] sm:$0xff] (%p292_p4)  ;;  %v1036_v48 = vld [vmem:[#allocation2 + $0x38] sm:$0xff] (%p292_p4)  ;;  %v1053_v55 = vadd.f32 (%p292_p4), %v1940_v20, %v1033_v42  ;;  %v1055_v57 = vadd.f32 (%p292_p4), %v1940_v20, %v1035_v44 }
 0x152   : > { %v1032_v30 = vld [vmem:[#allocation2 + $0x48] sm:$0xff] (%p292_p4)  ;;  %v1051_v33 = vadd.f32 (%p292_p4), %v1940_v20, %v1031_v25  ;;  %v1784_v34 = vpack.c.bf16 (%p292_p4), %v1046_v27, %v1045_v26  ;;  %v1099_v35 = vadd.f32 (%p292_p4), %v1046_v27, %v1045_v26  ;;  %v1123_v36 = vmul.f32 (%p292_p4), %v1045_v26, %v1045_v26  ;;  %v1037_v49 = vld [vmem:[#allocation2 + $0x60] sm:$0xff] (%p292_p4)  ;;  %v1038_v50 = vld [vmem:[#allocation2 + $0x70] sm:$0xff] (%p292_p4) }
 0x153   : > { %v1124_v37 = vmul.f32 %v1046_v27, %v1046_v27  ;;  %v1789_v38 = vpack.c.bf16 %v1048_v29, %v1047_v28  ;;  %v1125_v39 = vmul.f32 %v1047_v28, %v1047_v28  ;;  %v1794_v40 = vpack.c.bf16 %v1050_v32, %v1049_v31  ;;  %v1039_v1 = vld [vmem:[#allocation2 + $0x78] sm:$0xff] }
 0x154   : > { %v1052_v41 = vadd.f32 %v1940_v20, %v1032_v30  ;;  %1785 = vst [vmem:[#allocation3 + $0x28] sm:$0xff] %v1784_v34   ;;  %v1100_v46 = vadd.f32 %v1099_v35, %v1047_v28  ;;  %v1126_v47 = vmul.f32 %v1048_v29, %v1048_v29  ;;  %v1127_v51 = vmul.f32 %v1049_v31, %v1049_v31  ;;  %v1040_v2 = vld [vmem:[#allocation2 + $0x28] sm:$0xff] }
 0x155   : > { %v1139_v45 = vadd.f32 %v1124_v37, %v1123_v36  ;;  %1893 = vst [vmem:[#allocation3] sm:$0xff] %v1789_v38   ;;  %v1054_v56 = vadd.f32 %v1940_v20, %v1034_v43  ;;  %v1056_v58 = vadd.f32 %v1940_v20, %v1036_v48  ;;  %v1057_v59 = vadd.f32 %v1940_v20, %v1037_v49 }
 0x156   : > { %v1799_v52 = vpack.c.bf16 %v1052_v41, %v1051_v33  ;;  %v1101_v53 = vadd.f32 %v1100_v46, %v1048_v29  ;;  %1894 = vst [vmem:[#allocation3 + $0x10] sm:$0xff] %v1794_v40   ;;  %v1058_v60 = vadd.f32 %v1940_v20, %v1038_v50  ;;  %v1128_v63 = vmul.f32 %v1050_v32, %v1050_v32  ;;  %v1098_v50 = vld [vmem:[#allocation4] sm:$0x1] }
 0x157   : > { %v1140_v54 = vadd.f32 %v1139_v45, %v1125_v39  ;;  %v1804_v0 = vpack.c.bf16 %v1054_v56, %v1053_v55  ;;  %v1809_v3 = vpack.c.bf16 %v1056_v58, %v1055_v57  ;;  %v1129_v7 = vmul.f32 %v1051_v33, %v1051_v33 }
 0x158   : > { %1895 = vst [vmem:[#allocation3 + $0x20] sm:$0xff] %v1799_v52   ;;  %v1102_v62 = vadd.f32 %v1101_v53, %v1049_v31  ;;  %v1814_v4 = vpack.c.bf16 %v1058_v60, %v1057_v59  ;;  %v1059_v8 = vadd.f32 %v1940_v20, %v1039_v1  ;;  %v1060_v9 = vadd.f32 %v1940_v20, %v1040_v2  ;;  %v1122_v53 = vld [vmem:[#allocation5] sm:$0x1] }
 0x159   : > { %v1141_v61 = vadd.f32 %v1140_v54, %v1126_v47  ;;  %1896 = vst [vmem:[#allocation3 + $0x18] sm:$0xff] %v1804_v0   ;;  %v1130_v12 = vmul.f32 %v1052_v41, %v1052_v41  ;;  %v1131_v16 = vmul.f32 %v1053_v55, %v1053_v55  ;;  %v1132_v19 = vmul.f32 %v1054_v56, %v1054_v56 }
 0x15a   : > { %v1103_v5 = vadd.f32 %v1102_v62, %v1050_v32  ;;  %1897 = vst [vmem:[#allocation3 + $0x8] sm:$0xff] %v1809_v3   ;;  %v1819_v13 = vpack.c.bf16 %v1060_v9, %v1059_v8  ;;  %v1133_v23 = vmul.f32 %v1055_v57, %v1055_v57  ;;  %v1134_v26 = vmul.f32 %v1056_v58, %v1056_v58 }
 0x15b   : > { %v1142_v6 = vadd.f32 %v1141_v61, %v1127_v51  ;;  %1898 = vst [vmem:[#allocation3 + $0x38] sm:$0xff] %v1814_v4   ;;  %v1135_v28 = vmul.f32 %v1057_v59, %v1057_v59  ;;  %v1136_v31 = vmul.f32 %v1058_v60, %v1058_v60  ;;  %v1137_v34 = vmul.f32 %v1059_v8, %v1059_v8 }
 0x15c   : > { %v1104_v11 = vadd.f32 %v1103_v5, %v1051_v33  ;;  %1899 = vst [vmem:[#allocation3 + $0x30] sm:$0xff] %v1819_v13   ;;  %v1138_v37 = vmul.f32 %v1060_v9, %v1060_v9 }
 0x15d   : > { %v1143_v10 = vadd.f32 %v1142_v6, %v1128_v63 }
 0x15e   : > { %v1105_v14 = vadd.f32 %v1104_v11, %v1052_v41 }
 0x15f   : > { %v1144_v15 = vadd.f32 %v1143_v10, %v1129_v7 }
 0x160   : > { %v1106_v18 = vadd.f32 %v1105_v14, %v1053_v55 }
 0x161   : > { %v1145_v17 = vadd.f32 %v1144_v15, %v1130_v12 }
 0x162   : > { %v1107_v21 = vadd.f32 %v1106_v18, %v1054_v56 }
 0x163   : > { %v1146_v22 = vadd.f32 %v1145_v17, %v1131_v16 }
 0x164   : > { %v1108_v25 = vadd.f32 %v1107_v21, %v1055_v57 }
 0x165   : > { %v1147_v24 = vadd.f32 %v1146_v22, %v1132_v19 }
 0x166   : > { %v1109_v27 = vadd.f32 %v1108_v25, %v1056_v58 }
 0x167   : > { %v1148_v20 = vadd.f32 %v1147_v24, %v1133_v23 }
 0x168   : > { %v1110_v30 = vadd.f32 %v1109_v27, %v1057_v59 }
 0x169   : > { %v1149_v29 = vadd.f32 %v1148_v20, %v1134_v26 }
 0x16a   : > { %v1111_v32 = vadd.f32 %v1110_v30, %v1058_v60 }
 0x16b   : > { %v1150_v33 = vadd.f32 %v1149_v29, %v1135_v28 }
 0x16c   : > { %v1112_v36 = vadd.f32 %v1111_v32, %v1059_v8 }
 0x16d   : > { %v1151_v35 = vadd.f32 %v1150_v33, %v1136_v31 }
 0x16e   : > { %v1113_v38 = vadd.f32 %v1112_v36, %v1060_v9 }
 0x16f   : > { %v1152_v39 = vadd.f32 %v1151_v35, %v1137_v34 }
 0x170   : > { %v1114_v40 = vrot.slane %v1113_v38, 4 }
 0x171   : > { %v1153_v41 = vadd.f32 %v1152_v39, %v1138_v37 }
 0x172   : > { %v1115_v42 = vadd.f32 %v1114_v40, %v1113_v38 }
 0x173   : > { %v1154_v43 = vrot.slane %v1153_v41, 4 }
 0x174   : > { %v1116_v44 = vrot.slane %v1115_v42, 2 }
 0x175   : > { %v1155_v45 = vadd.f32 %v1154_v43, %v1153_v41 }
 0x176   : > { %v1117_v46 = vadd.f32 %v1116_v44, %v1115_v42 }
 0x177   : > { %v1156_v47 = vrot.slane %v1155_v45, 2 }
 0x178   : > { %v1118_v48 = vrot.slane %v1117_v46, 1 }
 0x179   : > { %v1157_v49 = vadd.f32 %v1156_v47, %v1155_v45 }
 0x17a   : > { %v1119_v51 = vadd.f32 %v1118_v48, %v1117_v46 }
 0x17b   : > { %v1158_v52 = vrot.slane %v1157_v49, 1 }
 0x17c   : > { %v1120_v54 = vadd.f32 %v1119_v51, %v1098_v50 }
 0x17d   : > { %v1159_v55 = vadd.f32 %v1158_v52, %v1157_v49 }
 0x17e   : > { %1121 = vst [vmem:[#allocation4] sm:$0x1] %v1120_v54 }
 0x17f   : > { %v1160_v56 = vadd.f32 %v1159_v55, %v1122_v53 }
 0x181   : > { %1161 = vst [vmem:[#allocation5] sm:$0x1] %v1160_v56 }
 0x182 PF: > { %p1162_p6 = scmp.eq.s32.totalorder %s1959_s18, 1 }
 0x183   : > { %v1176_v6 = vld [vmem:[%s2403_s3] sm:$0x1] (%p1162_p6) }
 0x184   : > { %1168 = sbr.rel (!%p1162_p6) target bundleno = 426 (0x1aa), region = 60  ;;  %v1190_v10 = vld [vmem:[%s2404_s4] sm:$0x1] (%p1162_p6) }
 0x185   : > { %v1169_v57 = vld [vmem:[#allocation4] sm:$0x1] (%p1162_p6) }
 0x186   : > { %v1170_v59 = vmul.f32 (%p1162_p6), 0.0078125, %v1169_v57 }
 0x188   : > { %v1171_v58 = vld [vmem:[#allocation5] sm:$0x1] (%p1162_p6)  ;;  %v1173_v61 = vmul.f32 (%p1162_p6), %v1170_v59, %v1170_v59 }
 0x189   : > { %v1172_v60 = vmul.f32 0.0078125, %v1171_v58 }
 0x18b   : > { %v1174_v62 = vsub.f32 %v1172_v60, %v1173_v61 }
 0x18d   : > { %v1175_v63 = vmax.f32 %v1174_v62, 0.0 }
 0x18f   : > { %v1177_v0 = vadd.f32 1e-05, %v1175_v63 }
 0x191   : > { %1941 = vrsqrt.f32 %v1177_v0  ;;  %vm1184_vm0 = vweird.f32 %v1177_v0 }
 0x197   : > { %v1942_v1 = vpop.eup %1941 }
 0x198   : > { %v1179_v2 = vmul.f32 %v1942_v1, %v1177_v0  ;;  %vm1185_vm1 = vweird.f32 %v1942_v1 }
 0x199   : > { %vm1186_vm2 = vmor %vm1184_vm0, %vm1185_vm1 }
 0x19a   : > { %v1180_v3 = vmul.f32 %v1942_v1, %v1179_v2 }
 0x19c   : > { %v1181_v4 = vmul.f32 0.5, %v1180_v3 }
 0x19e   : > { %v1182_v5 = vsub.f32 1.5, %v1181_v4 }
 0x1a0   : > { %v1183_v7 = vmul.f32 %v1942_v1, %v1182_v5 }
 0x1a2   : > { %v1187_v8 = vsel %vm1186_vm2, %v1942_v1, %v1183_v7 }
 0x1a3   : > { %v1188_v9 = vmul.f32 %v1187_v8, %v1176_v6 }
 0x1a5   : > { %1189 = vst [vmem:[#allocation6] sm:$0x1] %v1188_v9  ;;  %v1191_v11 = vmul.f32 %v1188_v9, %v1170_v59 }
 0x1a7   : > { %v1192_v12 = vsub.f32 %v1190_v10, %v1191_v11 }
 0x1a9   : > { %1193 = vst [vmem:[#allocation7] sm:$0x1] %v1192_v12 }
 0x1aa PF: > { %1197 = sbr.rel (!%p1162_p6) target bundleno = 461 (0x1cd), region = 64  ;;  %v1822_v13 = vld [vmem:[#allocation3 + $0x28] sm:$0xff] (%p1162_p6)   ;;  %v1900_v18 = vld [vmem:[#allocation3] sm:$0xff] (%p1162_p6)   ;;  %v1901_v22 = vld [vmem:[#allocation3 + $0x10] sm:$0xff] (%p1162_p6)  }
 0x1ab   : > { %v1823_v15 = vunpack.c.l.bf16 (%p1162_p6), %v1822_v13  ;;  %v1824_v16 = vunpack.c.h.bf16 (%p1162_p6), %v1822_v13  ;;  %v1827_v19 = vunpack.c.l.bf16 (%p1162_p6), %v1900_v18  ;;  %v1828_v21 = vunpack.c.h.bf16 (%p1162_p6), %v1900_v18  ;;  %v1902_v23 = vld [vmem:[#allocation3 + $0x20] sm:$0xff] (%p1162_p6)   ;;  %v1903_v51 = vld [vmem:[#allocation3 + $0x18] sm:$0xff] (%p1162_p6)   ;;  %v1904_v52 = vld [vmem:[#allocation3 + $0x8] sm:$0xff] (%p1162_p6)  }
 0x1ac   : > { %v2331_v14 = vld [vmem:[#allocation6] ss:$0 sm:$0xff] (%p1162_p6)  ;;  %v1831_v26 = vunpack.c.l.bf16 (%p1162_p6), %v1901_v22  ;;  %v1832_v27 = vunpack.c.h.bf16 (%p1162_p6), %v1901_v22  ;;  %v1835_v29 = vunpack.c.l.bf16 (%p1162_p6), %v1902_v23  ;;  %v1836_v30 = vunpack.c.h.bf16 (%p1162_p6), %v1902_v23  ;;  %v1905_v62 = vld [vmem:[#allocation3 + $0x38] sm:$0xff] (%p1162_p6)   ;;  %v1906_v6 = vld [vmem:[#allocation3 + $0x30] sm:$0xff] (%p1162_p6)  }
 0x1ad   : > { %v1239_v24 = vmul.f32 (%p1162_p6), %v2331_v14, %v1823_v15  ;;  %v1240_v25 = vmul.f32 (%p1162_p6), %v2331_v14, %v1824_v16  ;;  %v1241_v20 = vmul.f32 (%p1162_p6), %v2331_v14, %v1827_v19  ;;  %v1242_v28 = vmul.f32 (%p1162_p6), %v2331_v14, %v1828_v21 }
 0x1ae   : > { %v1243_v33 = vmul.f32 (%p1162_p6), %v2331_v14, %v1831_v26  ;;  %v1244_v34 = vmul.f32 (%p1162_p6), %v2331_v14, %v1832_v27  ;;  %v1245_v37 = vmul.f32 (%p1162_p6), %v2331_v14, %v1835_v29  ;;  %v1246_v38 = vmul.f32 (%p1162_p6), %v2331_v14, %v1836_v30 }
 0x1af   : > { %v1839_v59 = vunpack.c.l.bf16 %v1903_v51  ;;  %v1840_v60 = vunpack.c.h.bf16 %v1903_v51  ;;  %v1843_v61 = vunpack.c.l.bf16 %v1904_v52  ;;  %v1844_v5 = vunpack.c.h.bf16 %v1904_v52 }
 0x1b0   : > { %v2333_v17 = vld [vmem:[#allocation7] ss:$0 sm:$0xff]  ;;  %v1847_v9 = vunpack.c.l.bf16 %v1905_v62  ;;  %v1848_v10 = vunpack.c.h.bf16 %v1905_v62  ;;  %v1851_v21 = vunpack.c.l.bf16 %v1906_v6 }
 0x1b1   : > { %v1259_v31 = vadd.f32 %v2333_v17, %v1239_v24  ;;  %v1260_v32 = vadd.f32 %v2333_v17, %v1240_v25  ;;  %v1261_v35 = vadd.f32 %v2333_v17, %v1241_v20  ;;  %v1262_v36 = vadd.f32 %v2333_v17, %v1242_v28 }
 0x1b2   : > { %v1263_v45 = vadd.f32 %v2333_v17, %v1243_v33  ;;  %v1264_v46 = vadd.f32 %v2333_v17, %v1244_v34  ;;  %v1265_v50 = vadd.f32 %v2333_v17, %v1245_v37  ;;  %v1266_v56 = vadd.f32 %v2333_v17, %v1246_v38 }
 0x1b3   : > { %vm1275_vm3 = vcmp.gt.f32.partialorder %v1259_v31, 0.0  ;;  %vm1276_vm4 = vcmp.gt.f32.partialorder %v1260_v32, 0.0  ;;  %v1291_v39 = vmul.f32 0.2, %v1259_v31  ;;  %v1292_v40 = vmul.f32 0.2, %v1260_v32 }
 0x1b4   : > { %vm1277_vm5 = vcmp.gt.f32.partialorder %v1261_v35, 0.0  ;;  %vm1278_vm6 = vcmp.gt.f32.partialorder %v1262_v36, 0.0  ;;  %v1293_v41 = vmul.f32 0.2, %v1261_v35  ;;  %v1294_v42 = vmul.f32 0.2, %v1262_v36 }
 0x1b5   : > { %v1307_v43 = vsel %vm1275_vm3, %v1259_v31, %v1291_v39  ;;  %v1308_v44 = vsel %vm1276_vm4, %v1260_v32, %v1292_v40  ;;  %vm1279_vm7 = vcmp.gt.f32.partialorder %v1263_v45, 0.0  ;;  %vm1280_vm8 = vcmp.gt.f32.partialorder %v1264_v46, 0.0 }
 0x1b6   : > { %v1856_v47 = vpack.c.bf16 %v1308_v44, %v1307_v43  ;;  %v1309_v48 = vsel %vm1277_vm5, %v1261_v35, %v1293_v41  ;;  %v1310_v49 = vsel %vm1278_vm6, %v1262_v36, %v1294_v42  ;;  %v1295_v54 = vmul.f32 0.2, %v1263_v45 }
 0x1b7   : > { %v1861_v53 = vpack.c.bf16 %v1310_v49, %v1309_v48  ;;  %v1296_v55 = vmul.f32 0.2, %v1264_v46  ;;  %vm1281_vm9 = vcmp.gt.f32.partialorder %v1265_v50, 0.0  ;;  %v1297_v57 = vmul.f32 0.2, %v1265_v50 }
 0x1b8   : > { %1857 = vst [vmem:[%s2405_s5] sm:$0xff] %v1856_v47   ;;  %v1311_v58 = vsel %vm1279_vm7, %v1263_v45, %v1295_v54  ;;  %vm1282_vm10 = vcmp.gt.f32.partialorder %v1266_v56, 0.0  ;;  %v1298_v0 = vmul.f32 0.2, %v1266_v56  ;;  %v1247_v3 = vmul.f32 %v2331_v14, %v1839_v59 }
 0x1b9   : > { %1907 = vst [vmem:[%s2405_s5 + $0x8] sm:$0xff] %v1861_v53   ;;  %v1312_v63 = vsel %vm1280_vm8, %v1264_v46, %v1296_v55  ;;  %v1313_v1 = vsel %vm1281_vm9, %v1265_v50, %v1297_v57  ;;  %v1248_v4 = vmul.f32 %v2331_v14, %v1840_v60  ;;  %v1249_v8 = vmul.f32 %v2331_v14, %v1843_v61 }
 0x1ba   : > { %v1866_v2 = vpack.c.bf16 %v1312_v63, %v1311_v58  ;;  %v1314_v7 = vsel %vm1282_vm10, %v1266_v56, %v1298_v0  ;;  %v1267_v12 = vadd.f32 %v2333_v17, %v1247_v3  ;;  %v1250_v15 = vmul.f32 %v2331_v14, %v1844_v5 }
 0x1bb   : > { %v1871_v11 = vpack.c.bf16 %v1314_v7, %v1313_v1  ;;  %v1268_v13 = vadd.f32 %v2333_v17, %v1248_v4  ;;  %v1269_v16 = vadd.f32 %v2333_v17, %v1249_v8  ;;  %v1251_v18 = vmul.f32 %v2331_v14, %v1847_v9 }
 0x1bc   : > { %1908 = vst [vmem:[%s2405_s5 + $0x10] sm:$0xff] %v1866_v2   ;;  %v1252_v19 = vmul.f32 %v2331_v14, %v1848_v10  ;;  %vm1283_vm11 = vcmp.gt.f32.partialorder %v1267_v12, 0.0  ;;  %v1299_v22 = vmul.f32 0.2, %v1267_v12  ;;  %v1270_v23 = vadd.f32 %v2333_v17, %v1250_v15 }
 0x1bd   : > { %1909 = vst [vmem:[%s2405_s5 + $0x18] sm:$0xff] %v1871_v11   ;;  %vm1284_vm12 = vcmp.gt.f32.partialorder %v1268_v13, 0.0  ;;  %v1300_v24 = vmul.f32 0.2, %v1268_v13  ;;  %vm1285_vm13 = vcmp.gt.f32.partialorder %v1269_v16, 0.0  ;;  %v1271_v26 = vadd.f32 %v2333_v17, %v1251_v18 }
 0x1be   : > { %v1301_v25 = vmul.f32 0.2, %v1269_v16  ;;  %v1315_v27 = vsel %vm1283_vm11, %v1267_v12, %v1299_v22  ;;  %vm1286_vm14 = vcmp.gt.f32.partialorder %v1270_v23, 0.0  ;;  %v1302_v20 = vmul.f32 0.2, %v1270_v23 }
 0x1bf   : > { %v1272_v28 = vadd.f32 %v2333_v17, %v1252_v19  ;;  %v1316_v29 = vsel %vm1284_vm12, %v1268_v13, %v1300_v24  ;;  %vm1287_vm15 = vcmp.gt.f32.partialorder %v1271_v26, 0.0  ;;  %v1303_v31 = vmul.f32 0.2, %v1271_v26 }
 0x1c0   : > { %v1317_v30 = vsel %vm1285_vm13, %v1269_v16, %v1301_v25  ;;  %v1876_v32 = vpack.c.bf16 %v1316_v29, %v1315_v27  ;;  %v1318_v33 = vsel %vm1286_vm14, %v1270_v23, %v1302_v20  ;;  %v1852_v37 = vunpack.c.h.bf16 %v1906_v6 }
 0x1c1   : > { %vm1288_vm0 = vcmp.gt.f32.partialorder %v1272_v28, 0.0  ;;  %v1304_v34 = vmul.f32 0.2, %v1272_v28  ;;  %v1881_v35 = vpack.c.bf16 %v1318_v33, %v1317_v30  ;;  %v1319_v36 = vsel %vm1287_vm15, %v1271_v26, %v1303_v31 }
 0x1c2   : > { %v1253_v38 = vmul.f32 %v2331_v14, %v1851_v21  ;;  %1910 = vst [vmem:[%s2405_s5 + $0x20] sm:$0xff] %v1876_v32   ;;  %v1254_v41 = vmul.f32 %v2331_v14, %v1852_v37 }
 0x1c3   : > { %v1320_v39 = vsel %vm1288_vm0, %v1272_v28, %v1304_v34  ;;  %1911 = vst [vmem:[%s2405_s5 + $0x28] sm:$0xff] %v1881_v35  }
 0x1c4   : > { %v1886_v40 = vpack.c.bf16 %v1320_v39, %v1319_v36  ;;  %v1273_v42 = vadd.f32 %v2333_v17, %v1253_v38  ;;  %v1274_v43 = vadd.f32 %v2333_v17, %v1254_v41 }
 0x1c6   : > { %1912 = vst [vmem:[%s2405_s5 + $0x30] sm:$0xff] %v1886_v40   ;;  %vm1289_vm1 = vcmp.gt.f32.partialorder %v1273_v42, 0.0  ;;  %v1305_v44 = vmul.f32 0.2, %v1273_v42  ;;  %vm1290_vm2 = vcmp.gt.f32.partialorder %v1274_v43, 0.0 }
 0x1c7   : > { %v1306_v45 = vmul.f32 0.2, %v1274_v43 }
 0x1c8   : > { %v1321_v46 = vsel %vm1289_vm1, %v1273_v42, %v1305_v44 }
 0x1c9   : > { %v1322_v47 = vsel %vm1290_vm2, %v1274_v43, %v1306_v45 }
 0x1ca   : > { %v1891_v48 = vpack.c.bf16 %v1322_v47, %v1321_v46 }
 0x1cc   : > { %1913 = vst [vmem:[%s2405_s5 + $0x38] sm:$0xff] %v1891_v48  }
 0x1cd PF: > { %s15_s20 = sadd.s32 1, %s1967_s20   ;;  %s2406_s18 = smov %s1963_s19 }
 0x1ce   : > { %p12_p7 = scmp.ge.s32.totalorder %s15_s20, 4   ;;  %s2407_s19 = smov %s2409_s21 }
 0x1d0   :  { %14 = sbr.rel (!%p12_p7) target bundleno = 2 (0x2), region = 97 }

// kernel: discriminator_forward.7
= control target key start
LH: loop header
LB: loop body
LE: loop exit
PB: predicated region body
PF: predicated region fallthrough
CT: control target
= control target key end

     0   :  { %s2482_s0 = inlined_call_operand.vmem [shape: bf16[32,1024], index: 0, kind: input, shape index: {}]   ;;  %s2483_s1 = inlined_call_operand.vmem [shape: bf16[1024,128], index: 1, kind: input, shape index: {}]   ;;  %s2484_s2 = inlined_call_operand.vmem [shape: f32[1,128], index: 2, kind: input, shape index: {}]   ;;  %s2485_s3 = inlined_call_operand.vmem [shape: f32[1,128], index: 3, kind: input, shape index: {}]   ;;  %s2486_s4 = inlined_call_operand.vmem [shape: f32[1,128], index: 4, kind: input, shape index: {}]   ;;  %s2487_s5 = inlined_call_operand.vmem [shape: f32[16,128], index: 5, kind: input, shape index: {}]   ;;  %s2488_s6 = inlined_call_operand.<no memory space> [shape: f32[1,1], index: 6, kind: input, shape index: {}]   ;;  %s2489_s7 = inlined_call_operand.hbm [shape: bf16[32,128], index: 7, kind: output, shape index: {0}]   ;;  %s2490_s8 = inlined_call_operand.vmem [shape: f32[2,1], index: 8, kind: output, shape index: {1}]  }
   0x1   :  { %v14_v0 = vstv %s2488_s6 }
   0x2   :  { %15 = vst [vmem:[#allocation8] sm:$0x1] %v14_v0 }
   0x3   :  { %16 = vsyncpa [#allocation10], 0 }
   0x4   :  { %18 = vsyncpa [#allocation10 + $0x1], 0  ;;  %s2124_s29 = smov 0   ;;  %s2126_s30 = smov 0  }
   0x5   :  { %s2128_s9 = smov 0  }
   0x6 LB: > { %s1509_s6 = sadd.s32 4294967295, %s2069_s9   ;;  %s1510_s10 = sadd.s32 4294967294, %s2069_s9   ;;  %s2069_s9 = sphi %s2128_s9, %s24_s9   ;;  %s2065_s30 = sphi %s2126_s30, %s2492_s30   ;;  %s2061_s29 = sphi %s2124_s29, %s2491_s29  }
   0x7   : > { %s43_s11 = sadd.s32 1, %s2065_s30  ;;  %p1514_p0 = scmp.ge.s32.totalorder %s2069_s9, 1 }
   0x8   : > { %p45_p1 = scmp.ge.s32.totalorder %s43_s11, 2  ;;  %p314_p2 = scmp.lt.s32.totalorder %s2069_s9, 3 }
   0xa   : > { %s2494_s11 = smov (%p45_p1, %s43_s11), 0  ;;  %p315_p3 = pnand %p1514_p0, %p314_p2 }
   0xb   : > { %p387_p4 = scmp.eq.s32.totalorder (!%p315_p3), %s2061_s29, 0 }
   0xc   : > { %318 = sbr.rel (%p315_p3) target bundleno = 618 (0x26a), region = 48 }
  0x11   : > { %395 = sbr.rel (!%p387_p4) target bundleno = 22 (0x16), region = 52  ;;  %v2071_v1 = vmov (%p387_p4), 0.0  }
  0x12   : > { %396 = vst [vmem:[#allocation4] sm:$0x1] (%p387_p4), %v2071_v1 }
  0x13   : > { %397 = vst [vmem:[#allocation5] sm:$0x1] (%p387_p4), %v2071_v1 }
  0x16 PF: > { %401 = sbr.rel (!%p387_p4) target bundleno = 27 (0x1b), region = 56  ;;  %v2072_v2 = vmov (%p387_p4), 0.0  }
  0x17   : > { %402 = vst [vmem:[#allocation2 + $0x10] sm:$0xff] (%p387_p4), %v2072_v2 }
  0x18   : > { %403 = vst [vmem:[#allocation2] sm:$0xff] (%p387_p4), %v2072_v2 }
  0x19   : > { %404 = vst [vmem:[#allocation2 + $0x18] sm:$0xff] (%p387_p4), %v2072_v2 }
  0x1a   : > { %405 = vst [vmem:[#allocation2 + $0x8] sm:$0xff] (%p387_p4), %v2072_v2 }
  0x1b PF: > { %p1518_p5 = scmp.ne.s32.totalorder %s2061_s29, 0 }
  0x1d   : > { %408 = sbr.rel (%p1518_p5) target bundleno = 263 (0x107), region = 60 }
  0x22   : > { %v1858_v3 = vld [vmem:[%s2483_s1 + $0x38] sm:$0xff]  ;;  %v1857_v7 = vld [vmem:[%s2483_s1 + $0x30] sm:$0xff]  ;;  %v1856_v11 = vld [vmem:[%s2483_s1 + $0x28] sm:$0xff] }
  0x23   : > { %v1866_v4 = vld [vmem:[%s2483_s1 + $0x78] sm:$0xff]  ;;  %1026 = vmatpush.bf16.msra.mxu0 %v1858_v3  ;;  %v1865_v8 = vld [vmem:[%s2483_s1 + $0x70] sm:$0xff]  ;;  %v1864_v12 = vld [vmem:[%s2483_s1 + $0x68] sm:$0xff] }
  0x24   : > { %v1874_v5 = vld [vmem:[%s2483_s1 + $0xb8] sm:$0xff]  ;;  %1045 = vmatpush.bf16.msra.mxu1 %v1866_v4  ;;  %v1873_v9 = vld [vmem:[%s2483_s1 + $0xb0] sm:$0xff]  ;;  %v1872_v13 = vld [vmem:[%s2483_s1 + $0xa8] sm:$0xff] }
  0x25   : > { %v1882_v6 = vld [vmem:[%s2483_s1 + $0xf8] sm:$0xff]  ;;  %1064 = vmatpush.bf16.msra.mxu2 %v1874_v5  ;;  %v1881_v10 = vld [vmem:[%s2483_s1 + $0xf0] sm:$0xff]  ;;  %v1880_v14 = vld [vmem:[%s2483_s1 + $0xe8] sm:$0xff] }
  0x26   : > { %1083 = vmatpush.bf16.msra.mxu3 %v1882_v6  ;;  %v1855_v15 = vld [vmem:[%s2483_s1 + $0x20] sm:$0xff]  ;;  %v1854_v19 = vld [vmem:[%s2483_s1 + $0x18] sm:$0xff]  ;;  %v1853_v23 = vld [vmem:[%s2483_s1 + $0x10] sm:$0xff] }
  0x27   : > { %1027 = vmatpush.bf16.msra.mxu0 %v1857_v7  ;;  %v1863_v16 = vld [vmem:[%s2483_s1 + $0x60] sm:$0xff]  ;;  %v1862_v20 = vld [vmem:[%s2483_s1 + $0x58] sm:$0xff]  ;;  %v1861_v24 = vld [vmem:[%s2483_s1 + $0x50] sm:$0xff] }
  0x28   : > { %1046 = vmatpush.bf16.msra.mxu1 %v1865_v8  ;;  %v1871_v17 = vld [vmem:[%s2483_s1 + $0xa0] sm:$0xff]  ;;  %v1870_v21 = vld [vmem:[%s2483_s1 + $0x98] sm:$0xff]  ;;  %v1869_v25 = vld [vmem:[%s2483_s1 + $0x90] sm:$0xff] }
  0x29   : > { %1065 = vmatpush.bf16.msra.mxu2 %v1873_v9  ;;  %v1879_v18 = vld [vmem:[%s2483_s1 + $0xe0] sm:$0xff]  ;;  %v1878_v22 = vld [vmem:[%s2483_s1 + $0xd8] sm:$0xff]  ;;  %v1877_v26 = vld [vmem:[%s2483_s1 + $0xd0] sm:$0xff] }
  0x2a   : > { %1084 = vmatpush.bf16.msra.mxu3 %v1881_v10  ;;  %v1852_v27 = vld [vmem:[%s2483_s1 + $0x8] sm:$0xff]  ;;  %v1851_v31 = vld [vmem:[%s2483_s1] sm:$0xff]  ;;  %v1906_v43 = vld [vmem:[%s2483_s1 + $0x1b8] sm:$0xff] }
  0x2b   : > { %1028 = vmatpush.bf16.msra.mxu0 %v1856_v11  ;;  %v1860_v28 = vld [vmem:[%s2483_s1 + $0x48] sm:$0xff]  ;;  %v1859_v32 = vld [vmem:[%s2483_s1 + $0x40] sm:$0xff]  ;;  %v1890_v44 = vld [vmem:[%s2483_s1 + $0x138] sm:$0xff] }
  0x2c   : > { %1047 = vmatpush.bf16.msra.mxu1 %v1864_v12  ;;  %v1868_v29 = vld [vmem:[%s2483_s1 + $0x88] sm:$0xff]  ;;  %v1867_v33 = vld [vmem:[%s2483_s1 + $0x80] sm:$0xff]  ;;  %v1898_v49 = vld [vmem:[%s2483_s1 + $0x178] sm:$0xff] }
  0x2d   : > { %1066 = vmatpush.bf16.msra.mxu2 %v1872_v13  ;;  %v1876_v30 = vld [vmem:[%s2483_s1 + $0xc8] sm:$0xff]  ;;  %v1875_v34 = vld [vmem:[%s2483_s1 + $0xc0] sm:$0xff]  ;;  %v1914_v50 = vld [vmem:[%s2483_s1 + $0x1f8] sm:$0xff] }
  0x2e   : > { %1085 = vmatpush.bf16.msra.mxu3 %v1880_v14  ;;  %v1521_v35 = vld [vmem:[%s2482_s0] sm:$0xf]  ;;  %v1915_v37 = vld [vmem:[%s2482_s0 + $0x4] sm:$0xf]  ;;  %v1529_v39 = vld [vmem:[%s2482_s0 + $0x8] sm:$0xf] }
  0x2f   : > { %1029 = vmatpush.bf16.msra.mxu0 %v1855_v15  ;;  %v1919_v36 = vld [vmem:[%s2482_s0 + $0x1c] sm:$0xf0]  ;;  %v1523_v38 = vld [vmem:[%s2482_s0 + $0x20] sm:$0xf0]  ;;  %v1920_v40 = vld [vmem:[%s2482_s0 + $0x24] sm:$0xf0] }
  0x30   : > { %1048 = vmatpush.bf16.msra.mxu1 %v1863_v16  ;;  %v1916_v41 = vld [vmem:[%s2482_s0 + $0xc] sm:$0xf]  ;;  %v1522_v45 = vor.u32 %v1919_v36, %v1521_v35  ;;  %v1526_v46 = vor.u32 %v1915_v37, %v1523_v38  ;;  %v1530_v47 = vor.u32 %v1920_v40, %v1529_v39  ;;  %v1905_v51 = vld [vmem:[%s2483_s1 + $0x1b0] sm:$0xff]  ;;  %v1903_v59 = vld [vmem:[%s2483_s1 + $0x1a0] sm:$0xff] }
  0x31   : > { %1067 = vmatpush.bf16.msra.mxu2 %v1871_v17  ;;  %v1531_v42 = vld [vmem:[%s2482_s0 + $0x28] sm:$0xf0]  ;;  %v1889_v52 = vld [vmem:[%s2483_s1 + $0x130] sm:$0xff]  ;;  %v1887_v60 = vld [vmem:[%s2483_s1 + $0x120] sm:$0xff] }
  0x32   : > { %1086 = vmatpush.bf16.msra.mxu3 %v1879_v18  ;;  %v1534_v48 = vor.u32 %v1916_v41, %v1531_v42  ;;  %v1897_v53 = vld [vmem:[%s2483_s1 + $0x170] sm:$0xff]  ;;  %v1904_v55 = vld [vmem:[%s2483_s1 + $0x1a8] sm:$0xff]  ;;  %v1895_v61 = vld [vmem:[%s2483_s1 + $0x160] sm:$0xff] }
  0x33   : > { %1030 = vmatpush.bf16.msra.mxu0 %v1854_v19  ;;  %v1913_v54 = vld [vmem:[%s2483_s1 + $0x1f0] sm:$0xff]  ;;  %v1888_v56 = vld [vmem:[%s2483_s1 + $0x128] sm:$0xff]  ;;  %v1911_v62 = vld [vmem:[%s2483_s1 + $0x1e0] sm:$0xff] }
  0x34   : > { %1049 = vmatpush.bf16.msra.mxu1 %v1862_v20  ;;  %v1896_v57 = vld [vmem:[%s2483_s1 + $0x168] sm:$0xff]  ;;  %v1553_v63 = vld [vmem:[%s2482_s0 + $0x40] sm:$0xf]  ;;  %v1923_v1 = vld [vmem:[%s2482_s0 + $0x44] sm:$0xf] }
  0x35   : > { %1068 = vmatpush.bf16.msra.mxu2 %v1870_v21  ;;  %v1912_v58 = vld [vmem:[%s2483_s1 + $0x1e8] sm:$0xff]  ;;  %v1927_v0 = vld [vmem:[%s2482_s0 + $0x5c] sm:$0xf0]  ;;  %v1555_v2 = vld [vmem:[%s2482_s0 + $0x60] sm:$0xf0] }
  0x36   : > { %1087 = vmatpush.bf16.msra.mxu3 %v1878_v22  ;;  %v1561_v3 = vld [vmem:[%s2482_s0 + $0x48] sm:$0xf]  ;;  %v1924_v5 = vld [vmem:[%s2482_s0 + $0x4c] sm:$0xf]  ;;  %v1902_v7 = vld [vmem:[%s2483_s1 + $0x198] sm:$0xff]  ;;  %v1554_v9 = vor.u32 %v1927_v0, %v1553_v63  ;;  %v1558_v10 = vor.u32 %v1923_v1, %v1555_v2 }
  0x37   : > { %1031 = vmatpush.bf16.msra.mxu0 %v1853_v23  ;;  %v1928_v4 = vld [vmem:[%s2482_s0 + $0x64] sm:$0xf0]  ;;  %v1563_v6 = vld [vmem:[%s2482_s0 + $0x68] sm:$0xf0]  ;;  %v1886_v8 = vld [vmem:[%s2483_s1 + $0x118] sm:$0xff] }
  0x38   : > { %1050 = vmatpush.bf16.msra.mxu1 %v1861_v24  ;;  %v1562_v11 = vor.u32 %v1928_v4, %v1561_v3  ;;  %v1566_v12 = vor.u32 %v1924_v5, %v1563_v6  ;;  %v1894_v13 = vld [vmem:[%s2483_s1 + $0x158] sm:$0xff]  ;;  %v1901_v15 = vld [vmem:[%s2483_s1 + $0x190] sm:$0xff]  ;;  %v1900_v19 = vld [vmem:[%s2483_s1 + $0x188] sm:$0xff] }
  0x39   : > { %1069 = vmatpush.bf16.msra.mxu2 %v1869_v25  ;;  %v1910_v14 = vld [vmem:[%s2483_s1 + $0x1d8] sm:$0xff]  ;;  %v1885_v16 = vld [vmem:[%s2483_s1 + $0x110] sm:$0xff]  ;;  %v1884_v20 = vld [vmem:[%s2483_s1 + $0x108] sm:$0xff] }
  0x3a   : > { %1088 = vmatpush.bf16.msra.mxu3 %v1877_v26  ;;  %v1893_v17 = vld [vmem:[%s2483_s1 + $0x150] sm:$0xff]  ;;  %v1892_v21 = vld [vmem:[%s2483_s1 + $0x148] sm:$0xff]  ;;  %v1899_v23 = vld [vmem:[%s2483_s1 + $0x180] sm:$0xff] }
  0x3b   : > { %1032 = vmatpush.bf16.msra.mxu0 %v1852_v27  ;;  %v1909_v18 = vld [vmem:[%s2483_s1 + $0x1d0] sm:$0xff]  ;;  %v1908_v22 = vld [vmem:[%s2483_s1 + $0x1c8] sm:$0xff]  ;;  %v1883_v24 = vld [vmem:[%s2483_s1 + $0x100] sm:$0xff] }
  0x3c   : > { %1051 = vmatpush.bf16.msra.mxu1 %v1860_v28  ;;  %v1891_v25 = vld [vmem:[%s2483_s1 + $0x140] sm:$0xff]  ;;  %v1537_v27 = vld [vmem:[%s2482_s0 + $0x10] sm:$0xf]  ;;  %v1925_v41 = vld [vmem:[%s2482_s0 + $0x54] sm:$0xf] }
  0x3d   : > { %1070 = vmatpush.bf16.msra.mxu2 %v1868_v29  ;;  %v1907_v26 = vld [vmem:[%s2483_s1 + $0x1c0] sm:$0xff]  ;;  %v1921_v28 = vld [vmem:[%s2482_s0 + $0x2c] sm:$0xf0]  ;;  %v1917_v29 = vld [vmem:[%s2482_s0 + $0x14] sm:$0xf] }
  0x3e   : > { %1089 = vmatpush.bf16.msra.mxu3 %v1876_v30  ;;  %v1539_v30 = vld [vmem:[%s2482_s0 + $0x30] sm:$0xf0]  ;;  %v1538_v35 = vor.u32 %v1921_v28, %v1537_v27  ;;  %v1569_v39 = vld [vmem:[%s2482_s0 + $0x50] sm:$0xf] }
  0x3f   : > { %1033 = vmatpush.bf16.msra.mxu0 %v1851_v31  ;;  %v1545_v31 = vld [vmem:[%s2482_s0 + $0x18] sm:$0xf]  ;;  %v1542_v36 = vor.u32 %v1917_v29, %v1539_v30  ;;  %v1929_v40 = vld [vmem:[%s2482_s0 + $0x6c] sm:$0xf0]  ;;  %v1571_v42 = vld [vmem:[%s2482_s0 + $0x70] sm:$0xf0] }
  0x40   : > { %1052 = vmatpush.bf16.msra.mxu1 %v1859_v32  ;;  %v1922_v32 = vld [vmem:[%s2482_s0 + $0x34] sm:$0xf0]  ;;  %v543_v30 = vld [vmem:[#allocation2] sm:$0xff] }
  0x41   : > { %1071 = vmatpush.bf16.msra.mxu2 %v1867_v33  ;;  %v1918_v33 = vld [vmem:[%s2482_s0 + $0x1c] sm:$0xf]  ;;  %v1546_v37 = vor.u32 %v1922_v32, %v1545_v31 }
  0x42   : > { %1090 = vmatpush.bf16.msra.mxu3 %v1875_v34  ;;  %1034 = vmatmul.bf16.vlgmr.msra.gmra.mxu0 %v1522_v45  ;;  %v1547_v34 = vld [vmem:[%s2482_s0 + $0x38] sm:$0xf0] }
  0x43   : > { %1102 = vmatpush.bf16.msrb.mxu0 %v1890_v44  ;;  %1053 = vmatmul.bf16.vlgmr.msra.gmra.mxu1 %v1526_v46  ;;  %v1550_v38 = vor.u32 %v1918_v33, %v1547_v34  ;;  %v1930_v44 = vld [vmem:[%s2482_s0 + $0x74] sm:$0xf0]  ;;  %v1926_v45 = vld [vmem:[%s2482_s0 + $0x5c] sm:$0xf] }
  0x44   : > { %1072 = vmatmul.bf16.vlgmr.msra.gmra.mxu2 %v1530_v47  ;;  %1121 = vmatpush.bf16.msrb.mxu1 %v1898_v49  ;;  %v1579_v46 = vld [vmem:[%s2482_s0 + $0x78] sm:$0xf0]  ;;  %v1570_v47 = vor.u32 %v1929_v40, %v1569_v39 }
  0x45   : > { %1140 = vmatpush.bf16.msrb.mxu2 %v1906_v43  ;;  %1091 = vmatmul.bf16.vlgmr.msra.gmra.mxu3 %v1534_v48  ;;  %v1577_v43 = vld [vmem:[%s2482_s0 + $0x58] sm:$0xf]  ;;  %v1574_v48 = vor.u32 %v1925_v41, %v1571_v42 }
  0x46   : > { %1159 = vmatpush.bf16.msrb.mxu3 %v1914_v50  ;;  %v1578_v49 = vor.u32 %v1930_v44, %v1577_v43  ;;  %v1582_v50 = vor.u32 %v1926_v45, %v1579_v46  ;;  %v544_v43 = vld [vmem:[#allocation2 + $0x18] sm:$0xff] }
  0x47   : > { %1103 = vmatpush.bf16.msrb.mxu0 %v1889_v52 }
  0x48   : > { %1122 = vmatpush.bf16.msrb.mxu1 %v1897_v53 }
  0x49   : > { %1141 = vmatpush.bf16.msrb.mxu2 %v1905_v51 }
  0x4a   : > { %1160 = vmatpush.bf16.msrb.mxu3 %v1913_v54 }
  0x4b   : > { %1104 = vmatpush.bf16.msrb.mxu0 %v1888_v56 }
  0x4c   : > { %1123 = vmatpush.bf16.msrb.mxu1 %v1896_v57 }
  0x4d   : > { %1142 = vmatpush.bf16.msrb.mxu2 %v1904_v55 }
  0x4e   : > { %1161 = vmatpush.bf16.msrb.mxu3 %v1912_v58 }
  0x4f   : > { %1105 = vmatpush.bf16.msrb.mxu0 %v1887_v60 }
  0x50   : > { %1124 = vmatpush.bf16.msrb.mxu1 %v1895_v61 }
  0x51   : > { %1143 = vmatpush.bf16.msrb.mxu2 %v1903_v59 }
  0x52   : > { %1162 = vmatpush.bf16.msrb.mxu3 %v1911_v62  ;;  %1039 = vmatmul.bf16.gmra.mxu0 %v1554_v9 }
  0x53   : > { %1106 = vmatpush.bf16.msrb.mxu0 %v1886_v8  ;;  %1058 = vmatmul.bf16.gmra.mxu1 %v1558_v10 }
  0x54   : > { %1077 = vmatmul.bf16.gmra.mxu2 %v1562_v11  ;;  %1125 = vmatpush.bf16.msrb.mxu1 %v1894_v13 }
  0x55   : > { %1144 = vmatpush.bf16.msrb.mxu2 %v1902_v7  ;;  %1096 = vmatmul.bf16.gmra.mxu3 %v1566_v12 }
  0x56   : > { %1163 = vmatpush.bf16.msrb.mxu3 %v1910_v14 }
  0x57   : > { %1107 = vmatpush.bf16.msrb.mxu0 %v1885_v16 }
  0x58   : > { %1126 = vmatpush.bf16.msrb.mxu1 %v1893_v17  ;;  %v542_v17 = vld [vmem:[#allocation2 + $0x10] sm:$0xff] }
  0x59   : > { %1145 = vmatpush.bf16.msrb.mxu2 %v1901_v15 }
  0x5a   : > { %1164 = vmatpush.bf16.msrb.mxu3 %v1909_v18 }
  0x5b   : > { %1108 = vmatpush.bf16.msrb.mxu0 %v1884_v20 }
  0x5c   : > { %1127 = vmatpush.bf16.msrb.mxu1 %v1892_v21 }
  0x5d   : > { %1146 = vmatpush.bf16.msrb.mxu2 %v1900_v19 }
  0x5e   : > { %1165 = vmatpush.bf16.msrb.mxu3 %v1908_v22 }
  0x5f   : > { %1109 = vmatpush.bf16.msrb.mxu0 %v1883_v24 }
  0x60   : > { %1128 = vmatpush.bf16.msrb.mxu1 %v1891_v25 }
  0x61   : > { %1147 = vmatpush.bf16.msrb.mxu2 %v1899_v23 }
  0x62   : > { %1166 = vmatpush.bf16.msrb.mxu3 %v1907_v26  ;;  %1110 = vmatmul.bf16.vlgmr.msrb.gmra.mxu0 %v1538_v35 }
  0x63   : > { %1129 = vmatmul.bf16.vlgmr.msrb.gmra.mxu1 %v1542_v36 }
  0x64   : > { %1148 = vmatmul.bf16.vlgmr.msrb.gmra.mxu2 %v1546_v37 }
  0x65   : > { %1167 = vmatmul.bf16.vlgmr.msrb.gmra.mxu3 %v1550_v38 }
  0x72   : > { %1115 = vmatmul.bf16.gmra.mxu0 %v1570_v47 }
  0x73   : > { %1134 = vmatmul.bf16.gmra.mxu1 %v1574_v48 }
  0x74   : > { %1153 = vmatmul.bf16.gmra.mxu2 %v1578_v49 }
  0x75   : > { %1172 = vmatmul.bf16.gmra.mxu3 %v1582_v50 }
  0xbf   : > { %v1035_v51 = vpop.f32.mrf.mxu0 }
  0xc0   : > { %v1054_v52 = vpop.f32.mrf.mxu1 }
  0xc1   : > { %v1055_v1 = vadd.f32 %v1054_v52, %v1035_v51  ;;  %v545_v51 = vld [vmem:[#allocation2 + $0x8] sm:$0xff] }
  0xc7   : > { %v1073_v53 = vpop.f32.mrf.mxu2  ;;  %v1037_v55 = vpop.f32.mrf.mxu0 }
  0xc8   : > { %v1092_v54 = vpop.f32.mrf.mxu3  ;;  %v1056_v56 = vpop.f32.mrf.mxu1  ;;  %v1074_v2 = vadd.f32 %v1073_v53, %v1055_v1 }
  0xc9   : > { %v1057_v8 = vadd.f32 %v1056_v56, %v1037_v55 }
  0xca   : > { %v1093_v5 = vadd.f32 %v1092_v54, %v1074_v2 }
  0xcf   : > { %v1075_v57 = vpop.f32.mrf.mxu2  ;;  %v1040_v59 = vpop.f32.mrf.mxu0 }
  0xd0   : > { %v1094_v58 = vpop.f32.mrf.mxu3  ;;  %v1059_v60 = vpop.f32.mrf.mxu1  ;;  %v1076_v10 = vadd.f32 %v1075_v57, %v1057_v8 }
  0xd1   : > { %v1060_v19 = vadd.f32 %v1059_v60, %v1040_v59 }
  0xd2   : > { %v1095_v13 = vadd.f32 %v1094_v58, %v1076_v10 }
  0xd7   : > { %v1078_v61 = vpop.f32.mrf.mxu2  ;;  %v1042_v63 = vpop.f32.mrf.mxu0 }
  0xd8   : > { %v1097_v62 = vpop.f32.mrf.mxu3  ;;  %v1061_v0 = vpop.f32.mrf.mxu1  ;;  %v1079_v22 = vadd.f32 %v1078_v61, %v1060_v19 }
  0xd9   : > { %v1062_v31 = vadd.f32 %v1061_v0, %v1042_v63 }
  0xda   : > { %v1098_v26 = vadd.f32 %v1097_v62, %v1079_v22 }
  0xdf   : > { %v1080_v3 = vpop.f32.mrf.mxu2  ;;  %v1111_v6 = vpop.f32.mrf.mxu0 }
  0xe0   : > { %v1099_v4 = vpop.f32.mrf.mxu3  ;;  %v1130_v7 = vpop.f32.mrf.mxu1  ;;  %v1112_v9 = vadd.f32 %v1111_v6, %v1093_v5  ;;  %v1081_v35 = vadd.f32 %v1080_v3, %v1062_v31 }
  0xe2   : > { %v1131_v11 = vadd.f32 %v1130_v7, %v1112_v9  ;;  %v1100_v39 = vadd.f32 %v1099_v4, %v1081_v35 }
  0xe7   : > { %v1149_v12 = vpop.f32.mrf.mxu2  ;;  %v1113_v16 = vpop.f32.mrf.mxu0 }
  0xe8   : > { %v1150_v14 = vadd.f32 %v1149_v12, %v1131_v11  ;;  %v1168_v15 = vpop.f32.mrf.mxu3  ;;  %v1132_v18 = vpop.f32.mrf.mxu1  ;;  %v1114_v21 = vadd.f32 %v1113_v16, %v1095_v13 }
  0xea   : > { %v1169_v20 = vadd.f32 %v1168_v15, %v1150_v14  ;;  %v1133_v24 = vadd.f32 %v1132_v18, %v1114_v21 }
  0xec   : > { %v1178_v23 = vadd.f32 %v1169_v20, %v542_v17 }
  0xee   : > { %1182 = vst [vmem:[#allocation2 + $0x10] sm:$0xff] %v1178_v23 }
  0xef   : > { %v1151_v25 = vpop.f32.mrf.mxu2  ;;  %v1116_v29 = vpop.f32.mrf.mxu0 }
  0xf0   : > { %v1152_v27 = vadd.f32 %v1151_v25, %v1133_v24  ;;  %v1170_v28 = vpop.f32.mrf.mxu3  ;;  %v1117_v33 = vadd.f32 %v1116_v29, %v1098_v26  ;;  %v1135_v34 = vpop.f32.mrf.mxu1 }
  0xf2   : > { %v1171_v32 = vadd.f32 %v1170_v28, %v1152_v27  ;;  %v1136_v37 = vadd.f32 %v1135_v34, %v1117_v33 }
  0xf4   : > { %v1179_v36 = vadd.f32 %v1171_v32, %v543_v30 }
  0xf6   : > { %1183 = vst [vmem:[#allocation2] sm:$0xff] %v1179_v36 }
  0xf7   : > { %v1154_v38 = vpop.f32.mrf.mxu2  ;;  %v1118_v42 = vpop.f32.mrf.mxu0 }
  0xf8   : > { %v1155_v40 = vadd.f32 %v1154_v38, %v1136_v37  ;;  %v1173_v41 = vpop.f32.mrf.mxu3  ;;  %v1119_v45 = vadd.f32 %v1118_v42, %v1100_v39  ;;  %v1137_v47 = vpop.f32.mrf.mxu1 }
  0xfa   : > { %v1174_v44 = vadd.f32 %v1173_v41, %v1155_v40  ;;  %v1138_v48 = vadd.f32 %v1137_v47, %v1119_v45 }
  0xfc   : > { %v1180_v46 = vadd.f32 %v1174_v44, %v544_v43 }
  0xfe   : > { %1184 = vst [vmem:[#allocation2 + $0x18] sm:$0xff] %v1180_v46 }
  0xff   : > { %v1156_v49 = vpop.f32.mrf.mxu2 }
 0x100   : > { %v1157_v50 = vadd.f32 %v1156_v49, %v1138_v48  ;;  %v1175_v52 = vpop.f32.mrf.mxu3 }
 0x102   : > { %v1176_v53 = vadd.f32 %v1175_v52, %v1157_v50 }
 0x104   : > { %v1181_v54 = vadd.f32 %v1176_v53, %v545_v51 }
 0x106   : > { %1185 = vst [vmem:[#allocation2 + $0x8] sm:$0xff] %v1181_v54 }
 0x107 PF: > { %1187 = sbr.rel (!%p387_p4) target bundleno = 291 (0x123), region = 64  ;;  %v1188_v55 = vld [vmem:[#allocation2 + $0x10] sm:$0xff] (%p387_p4)  ;;  %v1189_v56 = vld [vmem:[#allocation2] sm:$0xff] (%p387_p4)  ;;  %v1190_v58 = vld [vmem:[#allocation2 + $0x18] sm:$0xff] (%p387_p4) }
 0x108   : > { %v2005_v57 = vld [vmem:[%s2484_s2] ss:$0 sm:$0xff] (%p387_p4)  ;;  %v1213_v21 = vld [vmem:[#allocation4] sm:$0x1] (%p387_p4)  ;;  %v1225_v24 = vld [vmem:[#allocation5] sm:$0x1] (%p387_p4) }
 0x109   : > { %v1196_v60 = vadd.f32 (%p387_p4), %v2005_v57, %v1188_v55  ;;  %v1197_v61 = vadd.f32 (%p387_p4), %v2005_v57, %v1189_v56  ;;  %v1198_v62 = vadd.f32 (%p387_p4), %v2005_v57, %v1190_v58 }
 0x10b   : > { %v1937_v0 = vpack.c.bf16 (%p387_p4), %v1197_v61, %v1196_v60  ;;  %v1214_v1 = vadd.f32 (%p387_p4), %v1197_v61, %v1196_v60  ;;  %v1226_v2 = vmul.f32 (%p387_p4), %v1196_v60, %v1196_v60  ;;  %v1227_v3 = vmul.f32 (%p387_p4), %v1197_v61, %v1197_v61 }
 0x10c   : > { %v1228_v5 = vmul.f32 %v1198_v62, %v1198_v62 }
 0x10d   : > { %v1191_v59 = vld [vmem:[#allocation2 + $0x8] sm:$0xff]  ;;  %1938 = vst [vmem:[#allocation3] sm:$0xff] %v1937_v0   ;;  %v1230_v6 = vadd.f32 %v1227_v3, %v1226_v2  ;;  %v1215_v7 = vadd.f32 %v1214_v1, %v1198_v62 }
 0x10e   : > { %v1199_v63 = vadd.f32 %v2005_v57, %v1191_v59 }
 0x10f   : > { %v1231_v10 = vadd.f32 %v1230_v6, %v1228_v5 }
 0x110   : > { %v1942_v4 = vpack.c.bf16 %v1199_v63, %v1198_v62  ;;  %v1229_v8 = vmul.f32 %v1199_v63, %v1199_v63  ;;  %v1216_v9 = vadd.f32 %v1215_v7, %v1199_v63 }
 0x112   : > { %1962 = vst [vmem:[#allocation3 + $0x8] sm:$0xff] %v1942_v4   ;;  %v1217_v11 = vrot.slane %v1216_v9, 4  ;;  %v1232_v12 = vadd.f32 %v1231_v10, %v1229_v8 }
 0x114   : > { %v1218_v13 = vadd.f32 %v1217_v11, %v1216_v9  ;;  %v1233_v14 = vrot.slane %v1232_v12, 4 }
 0x116   : > { %v1219_v15 = vrot.slane %v1218_v13, 2  ;;  %v1234_v16 = vadd.f32 %v1233_v14, %v1232_v12 }
 0x118   : > { %v1220_v17 = vadd.f32 %v1219_v15, %v1218_v13  ;;  %v1235_v18 = vrot.slane %v1234_v16, 2 }
 0x11a   : > { %v1221_v19 = vrot.slane %v1220_v17, 1  ;;  %v1236_v20 = vadd.f32 %v1235_v18, %v1234_v16 }
 0x11c   : > { %v1222_v22 = vadd.f32 %v1221_v19, %v1220_v17  ;;  %v1237_v23 = vrot.slane %v1236_v20, 1 }
 0x11e   : > { %v1223_v25 = vadd.f32 %v1222_v22, %v1213_v21  ;;  %v1238_v26 = vadd.f32 %v1237_v23, %v1236_v20 }
 0x120   : > { %1224 = vst [vmem:[#allocation4] sm:$0x1] %v1223_v25  ;;  %v1239_v27 = vadd.f32 %v1238_v26, %v1225_v24 }
 0x122   : > { %1240 = vst [vmem:[#allocation5] sm:$0x1] %v1239_v27 }
 0x123 PF: > { %p1241_p6 = scmp.eq.s32.totalorder %s2061_s29, 1 }
 0x124   : > { %v1255_v41 = vld [vmem:[%s2485_s3] sm:$0x1] (%p1241_p6) }
 0x125   : > { %1247 = sbr.rel (!%p1241_p6) target bundleno = 331 (0x14b), region = 68  ;;  %v1269_v45 = vld [vmem:[%s2486_s4] sm:$0x1] (%p1241_p6) }
 0x127   : > { %v1248_v28 = vld [vmem:[#allocation4] sm:$0x1] (%p1241_p6) }
 0x128   : > { %v1249_v30 = vmul.f32 (%p1241_p6), 0.03125, %v1248_v28 }
 0x129   : > { %v1250_v29 = vld [vmem:[#allocation5] sm:$0x1] (%p1241_p6) }
 0x12a   : > { %v1251_v31 = vmul.f32 0.03125, %v1250_v29  ;;  %v1252_v32 = vmul.f32 %v1249_v30, %v1249_v30 }
 0x12c   : > { %v1253_v33 = vsub.f32 %v1251_v31, %v1252_v32 }
 0x12e   : > { %v1254_v34 = vmax.f32 %v1253_v33, 0.0 }
 0x130   : > { %v1256_v35 = vadd.f32 1e-05, %v1254_v34 }
 0x132   : > { %2006 = vrsqrt.f32 %v1256_v35  ;;  %vm1263_vm0 = vweird.f32 %v1256_v35 }
 0x138   : > { %v2007_v36 = vpop.eup %2006 }
 0x139   : > { %v1258_v37 = vmul.f32 %v2007_v36, %v1256_v35  ;;  %vm1264_vm1 = vweird.f32 %v2007_v36 }
 0x13a   : > { %vm1265_vm2 = vmor %vm1263_vm0, %vm1264_vm1 }
 0x13b   : > { %v1259_v38 = vmul.f32 %v2007_v36, %v1258_v37 }
 0x13d   : > { %v1260_v39 = vmul.f32 0.5, %v1259_v38 }
 0x13f   : > { %v1261_v40 = vsub.f32 1.5, %v1260_v39 }
 0x141   : > { %v1262_v42 = vmul.f32 %v2007_v36, %v1261_v40 }
 0x143   : > { %v1266_v43 = vsel %vm1265_vm2, %v2007_v36, %v1262_v42 }
 0x144   : > { %v1267_v44 = vmul.f32 %v1266_v43, %v1255_v41 }
 0x146   : > { %1268 = vst [vmem:[#allocation6] sm:$0x1] %v1267_v44  ;;  %v1270_v46 = vmul.f32 %v1267_v44, %v1249_v30 }
 0x148   : > { %v1271_v47 = vsub.f32 %v1269_v45, %v1270_v46 }
 0x14a   : > { %1272 = vst [vmem:[#allocation7] sm:$0x1] %v1271_v47 }
 0x14b PF: > { %1276 = sbr.rel (!%p1241_p6) target bundleno = 614 (0x266), region = 72  ;;  %v1963_v48 = vld [vmem:[#allocation3 + $0x8] sm:$0xff] (%p1241_p6)   ;;  %v1945_v53 = vld [vmem:[#allocation3] sm:$0xff] (%p1241_p6)   ;;  %v1344_v16 = vlaneseq (%p1241_p6)  ;;  %vm1349_vm7 = vcmask (%p1241_p6), 130112   ;;  %vm1354_vm8 = vcmask (%p1241_p6), 1041409   ;;  %vm1357_vm9 = vcmask (%p1241_p6), 123904  }
 0x14c   : > { %v1950_v50 = vunpack.c.l.bf16 (%p1241_p6), %v1963_v48  ;;  %v1951_v51 = vunpack.c.h.bf16 (%p1241_p6), %v1963_v48  ;;  %v1946_v56 = vunpack.c.l.bf16 (%p1241_p6), %v1945_v53  ;;  %v1947_v57 = vunpack.c.h.bf16 (%p1241_p6), %v1945_v53  ;;  %v1326_v62 = vld [vmem:[%s2487_s5] sm:$0xff] (%p1241_p6)  ;;  %v1327_v11 = vld [vmem:[%s2487_s5 + $0x8] sm:$0xff] (%p1241_p6)  ;;  %v2010_v31 = vld [vmem:[#allocation8] ss:$0 sm:$0xff] (%p1241_p6) }
 0x14d   : > { %v2008_v49 = vld [vmem:[#allocation6] ss:$0 sm:$0xff] (%p1241_p6)  ;;  %v1345_v18 = vand.u32 (%p1241_p6), 127, %v1344_v16  ;;  %vm1371_vm10 = vcmask (%p1241_p6), 1024  }
 0x14e   : > { %v1296_v54 = vmul.f32 (%p1241_p6), %v2008_v49, %v1950_v50  ;;  %v1297_v55 = vmul.f32 (%p1241_p6), %v2008_v49, %v1951_v51  ;;  %v1294_v60 = vmul.f32 (%p1241_p6), %v2008_v49, %v1946_v56  ;;  %v1295_v61 = vmul.f32 (%p1241_p6), %v2008_v49, %v1947_v57 }
 0x14f   : > { %v1347_v20 = vadd.s32 (%p1241_p6), 4294967288, %v1345_v18 }
 0x151   : > { %v2009_v52 = vld [vmem:[#allocation7] ss:$0 sm:$0xff] }
 0x152   : > { %v1304_v58 = vadd.f32 %v2009_v52, %v1296_v54  ;;  %v1305_v59 = vadd.f32 %v2009_v52, %v1297_v55  ;;  %v1302_v1 = vadd.f32 %v2009_v52, %v1294_v60  ;;  %v1303_v2 = vadd.f32 %v2009_v52, %v1295_v61 }
 0x154   : > { %vm1308_vm3 = vcmp.gt.f32.partialorder %v1304_v58, 0.0  ;;  %vm1309_vm4 = vcmp.gt.f32.partialorder %v1305_v59, 0.0  ;;  %v1312_v63 = vmul.f32 0.2, %v1304_v58  ;;  %v1313_v0 = vmul.f32 0.2, %v1305_v59 }
 0x155   : > { %vm1306_vm5 = vcmp.gt.f32.partialorder %v1302_v1, 0.0  ;;  %vm1307_vm6 = vcmp.gt.f32.partialorder %v1303_v2, 0.0  ;;  %v1310_v7 = vmul.f32 0.2, %v1302_v1  ;;  %v1311_v8 = vmul.f32 0.2, %v1303_v2 }
 0x156   : > { %v1316_v3 = vsel %vm1308_vm3, %v1304_v58, %v1312_v63  ;;  %v1317_v4 = vsel %vm1309_vm4, %v1305_v59, %v1313_v0 }
 0x157   : > { %v1330_v5 = vmul.f32 %v1326_v62, %v1316_v3  ;;  %v1960_v6 = vpack.c.bf16 %v1317_v4, %v1316_v3  ;;  %v1314_v9 = vsel %vm1306_vm5, %v1302_v1, %v1310_v7  ;;  %v1315_v10 = vsel %vm1307_vm6, %v1303_v2, %v1311_v8 }
 0x158   : > { %v1328_v12 = vmul.f32 %v1326_v62, %v1314_v9  ;;  %v1955_v13 = vpack.c.bf16 %v1315_v10, %v1314_v9  ;;  %v1331_v14 = vmul.f32 %v1327_v11, %v1317_v4  ;;  %v1329_v15 = vmul.f32 %v1327_v11, %v1315_v10 }
 0x159   : > { %1336 = vadd.xlane.f32.xlu1 %v1330_v5  ;;  %1964 = vst [vmem:[#allocation9 + $0x8] sm:$0xff] %v1960_v6  }
 0x15a   : > { %1332 = vadd.xlane.f32.xlu0 %v1328_v12  ;;  %1956 = vst [vmem:[#allocation9] sm:$0xff] %v1955_v13  }
 0x161   : > { %1338 = vadd.xlane.f32.xlu1 %v1331_v14 }
 0x162   : > { %1334 = vadd.xlane.f32.xlu0 %v1329_v15 }
 0x1cc   : > { %v1337_v17 = vpop.xlane.xlu1 %1336 }
 0x1cd   : > { %v1333_v19 = vpop.xlane.xlu0 %1332  ;;  %v1351_v23 = vperm.slane %v1337_v17, %v1345_v18 }
 0x1ce   : > { %v1346_v25 = vperm.slane %v1333_v19, %v1345_v18 }
 0x1d4   : > { %v1339_v21 = vpop.xlane.xlu1 %1338 }
 0x1d5   : > { %v1352_v22 = vperm.slane %v1339_v21, %v1347_v20  ;;  %v1335_v24 = vpop.xlane.xlu0 %1334 }
 0x1d6   : > { %v1348_v26 = vperm.slane %v1335_v24, %v1347_v20 }
 0x1d7   : > { %v1353_v27 = vsel %vm1349_vm7, %v1352_v22, %v1351_v23 }
 0x1d8   : > { %v1350_v28 = vsel %vm1349_vm7, %v1348_v26, %v1346_v25 }
 0x1d9   : > { %v1355_v29 = vsel %vm1354_vm8, %v1353_v27, %v1350_v28 }
 0x1da   : > { %v1358_v30 = vsel %vm1357_vm9, %v1355_v29, 0.0 }
 0x1db   : > { %1359 = vadd.xlane.f32.xlu2 %v1358_v30 }
 0x24e   : > { %v1360_v32 = vpop.xlane.xlu2 %1359 }
 0x24f   : > { %v1365_v33 = vadd.f32 %v2010_v31, %v1360_v32 }
 0x251   : > { %v1366_v34 = vsub.f32 0.0, %v1365_v33 }
 0x253   : > { %v1367_v35 = vmul.f32 1.442695, %v1366_v34 }
 0x255   : > { %2011 = vpow2.f32 %v1367_v35 }
 0x25b   : > { %v2012_v36 = vpop.eup %2011 }
 0x25c   : > { %v1369_v37 = vadd.f32 1.0, %v2012_v36 }
 0x25e   : > { %2013 = vrcp.f32 %v1369_v37 }
 0x264   : > { %v2014_v38 = vpop.eup %2013 }
 0x265   : > { %1372 = vst.msk [vmem:[%s2490_s8] sm:$0x3] %vm1371_vm10, %v2014_v38 }
 0x266 PF: > { %p1973_p7 = scmp.eq.s32.totalorder %s1509_s6, 1  ;;  %s1394_s13 = sshll.u32 %s2489_s7, 4  ;;  %s1395_s13 = int_to_ptr.hbm [resolvable:$true] %s1394_s13 }
 0x267   : > { %s2073_s14 = smov [#allocation9]   ;;  %s2074_s16 = smov 64  }
 0x268   : > { %s1392_s15 = sshll.u32 %s2073_s14, 4  ;;  %s2075_s17 = smov 4   ;;  %s1393_s15 = int_to_ptr.vmem [resolvable:$true] %s1392_s15 }
 0x269   : > { %1966 = dma.vmem_to_hbm [thread:$0]  (%p1973_p7), %s1393_s15, 256, %s1395_s13, [#allocation10], %s2074_s16, %s2074_s16, %s2075_s17  }
 0x26a PF: > { %p1974_p8 = scmp.ge.s32.totalorder %s2069_s9, 2  ;;  %p1975_p9 = scmp.eq.s32.totalorder %s1510_s10, 1 }
 0x26c   : > { %p1970_p10 = pnand %p1975_p9, %p1974_p8 }
 0x26e   : > { %p1971_p11 = pneg %p1970_p10 }
 0x270   : > { %2056 = dma.done.wait (%p1971_p11), [#allocation10], 256  }
 0x271   : > { %2058 = vsyncadd (%p1971_p11), [#allocation10], 4294967040  ;;  %s24_s9 = sadd.s32 1, %s2069_s9   ;;  %s2491_s29 = smov %s2065_s30 }
 0x272   : > { %p21_p12 = scmp.ge.s32.totalorder %s24_s9, 4   ;;  %s2492_s30 = smov %s2494_s11 }
 0x274   :  { %23 = sbr.rel (!%p21_p12) target bundleno = 6 (0x6), region = 122 }
 0x279   :  { %1428 = vsyncpa [#allocation10], 1 }
 0x27a   :  { %1430 = vsyncpa [#allocation10 + $0x1], 1 }

</bundles_post_ra>
